<compile_context>
chip_gen: v7x
topology: tpu7x:2x2x1
jax: 0.10.0
libtpu: 0.0.40
codegen_flags: <defaults>
</compile_context>

<pallas_src>
import jax
import jax.numpy as jnp
from jax.experimental import pallas as pl
from jax.experimental.pallas import tpu as pltpu

HP = 128  # lane-padded hidden size (real nhid <= HP, zero padded)


def _netE_text_kernel(ids_ref, len_ref, emb_ref,
                      wih1_ref, whh1_ref, b1_ref,
                      wih2_ref, whh2_ref, b2_ref,
                      wfc_ref, bfc_ref,
                      out_ref,
                      xw_ref, hturn_ref):
    bf16 = jnp.bfloat16
    f32 = jnp.float32
    V = emb_ref.shape[0]
    T, rows, four_hp = xw_ref.shape          # rows = D * turns
    Hp = four_hp // 4
    D = out_ref.shape[1]
    turns = rows // D
    BT = ids_ref.shape[1]                    # T * rows tokens, time-major

    ids_flat = ids_ref[0]                    # (BT, 1) int32, row = t*rows + u*D + d
    lens = len_ref[0]                        # (rows, 1) int32, row = u*D + d

    # ---- embedding lookup + tanh + input projection, hoisted out of the loop ----
    onehot = (ids_flat == jax.lax.broadcasted_iota(jnp.int32, (BT, V), 1)).astype(bf16)
    x_all = jnp.tanh(jnp.dot(onehot, emb_ref[...],
                             preferred_element_type=f32))                 # (BT, E)
    xw_all = (jnp.dot(x_all.astype(bf16), wih1_ref[...],
                      preferred_element_type=f32) + b1_ref[...])          # (BT, 4Hp)
    xw_ref[...] = xw_all.reshape(T, rows, four_hp)

    # gates ordered (i, f, o, g): one contiguous sigmoid slab + one tanh slab
    def lstm_math(gates, c):
        ifo = jax.nn.sigmoid(gates[:, :3 * Hp])
        g = jnp.tanh(gates[:, 3 * Hp:])
        i = ifo[:, 0 * Hp:1 * Hp]
        f = ifo[:, 1 * Hp:2 * Hp]
        o = ifo[:, 2 * Hp:3 * Hp]
        c_new = f * c + i * g
        return o * jnp.tanh(c_new), c_new

    # ---- word LSTM over all D*turns utterances of this block, length-masked ----
    w_hh1 = whh1_ref[...]

    def word_step(t, carry):
        h, c = carry
        gates = xw_ref[t] + jnp.dot(h.astype(bf16), w_hh1,
                                    preferred_element_type=f32)           # (rows, 4Hp)
        h_new, c_new = lstm_math(gates, c)
        valid = t < lens                                                  # (rows, 1)
        return jnp.where(valid, h_new, h), jnp.where(valid, c_new, c)

    h0 = jnp.zeros((rows, Hp), f32)
    c0 = jnp.zeros((rows, Hp), f32)
    h_last, _ = jax.lax.fori_loop(0, T, word_step, (h0, c0),
                                  unroll=True if T <= 16 else 2)
    hturn_ref[...] = h_last          # row r = utterance (r // D) of dialog (r % D)

    # ---- speaker LSTM over turns, batched across the D dialogs of this block ----
    w_ih2 = wih2_ref[...]
    w_hh2 = whh2_ref[...]
    b2 = b2_ref[...]

    def turn_step(s, carry):
        hs, cs = carry
        start = s * D
        if D % 8 == 0:               # static Python branch: alignment hint only
            start = pl.multiple_of(start, 8)
        x_s = hturn_ref[pl.ds(start, D), :]                               # (D, Hp)
        gates = (jnp.dot(x_s.astype(bf16), w_ih2, preferred_element_type=f32)
                 + jnp.dot(hs.astype(bf16), w_hh2, preferred_element_type=f32)
                 + b2)
        return lstm_math(gates, cs)

    hs0 = jnp.zeros((D, Hp), f32)
    cs0 = jnp.zeros((D, Hp), f32)
    hs, _ = jax.lax.fori_loop(0, turns, turn_step, (hs0, cs0),
                              unroll=True if turns <= 16 else 2)

    # ---- out = sigmoid(fc(tanh(drop(hout)))) as one lane-dense (D, OUTP) slab ----
    logits = (jnp.dot(jnp.tanh(hs).astype(bf16), wfc_ref[...],
                      preferred_element_type=f32) + bfc_ref[...])
    out_ref[0] = jax.nn.sigmoid(logits)


def _vmem_limit_bytes():
    """Per-generation scoped-VMEM limit (v7x has half the VMEM of v5e/v6e)."""
    try:
        cap = int(pltpu.get_tpu_info().vmem_capacity_bytes)
    except Exception:
        cap = 64 * 1024 * 1024  # conservative: v7x per-TC VMEM
    return int(min(cap * 3 // 4, 100 * 1024 * 1024))


def netE_text_forward(ids, lengths, params, org_batch_size, dialogs_per_block=None):
    B_total, T = ids.shape
    turns = B_total // org_batch_size
    V, E = params["emb"].shape
    H = params["w_hh1"].shape[0]
    out_features = params["w_fc"].shape[1]
    Hp = HP
    OUTP = ((out_features + 127) // 128) * 128
    bf16 = jnp.bfloat16

    # -------- choose how many dialogs each grid step batches --------
    if dialogs_per_block is None:
        rows_target = pl.cdiv(128, turns)                  # >=128 recurrent rows
        keep_two_steps = max(1, org_batch_size // 2)       # 2 TCs on v7x
        d = max(1, min(rows_target, keep_two_steps, org_batch_size))
        xw_bytes_per_dialog = T * turns * 4 * Hp * 4       # f32 xw scratch
        d = max(1, min(d, (16 * 1024 * 1024) // max(1, xw_bytes_per_dialog)))
        dialogs_per_block = d
    D = dialogs_per_block
    n_blocks = pl.cdiv(org_batch_size, D)
    org_pad = n_blocks * D
    rows = D * turns

    # -------- weights: reorder gates (i,f,g,o)->(i,f,o,g), zero-pad to Hp lanes --------
    def pad_gate_cols(w):
        parts = [w[:, k * H:(k + 1) * H] for k in (0, 1, 3, 2)]
        return jnp.concatenate([jnp.pad(p, ((0, 0), (0, Hp - H))) for p in parts],
                               axis=1)

    def pad_rows(w):
        return jnp.pad(w, ((0, Hp - w.shape[0]), (0, 0)))

    emb = params["emb"].astype(bf16)
    w_ih1 = pad_gate_cols(params["w_ih1"]).astype(bf16)                   # (E, 4Hp)
    w_hh1 = pad_gate_cols(pad_rows(params["w_hh1"])).astype(bf16)         # (Hp, 4Hp)
    b1 = pad_gate_cols(params["b1"])                                      # (1, 4Hp) f32
    w_ih2 = pad_gate_cols(pad_rows(params["w_ih2"])).astype(bf16)         # (Hp, 4Hp)
    w_hh2 = pad_gate_cols(pad_rows(params["w_hh2"])).astype(bf16)         # (Hp, 4Hp)
    b2 = pad_gate_cols(params["b2"])                                      # (1, 4Hp) f32
    w_fc = jnp.pad(params["w_fc"],
                   ((0, Hp - H), (0, OUTP - out_features))).astype(bf16)  # (Hp, OUTP)
    b_fc = jnp.pad(params["b_fc"], ((0, 0), (0, OUTP - out_features)))    # (1, OUTP)

    # -------- token / length layout: blocks of D dialogs, time-major rows --------
    ids_d = ids.astype(jnp.int32).reshape(org_batch_size, turns, T)
    len_d = lengths.astype(jnp.int32).reshape(org_batch_size, turns)
    if org_pad != org_batch_size:
        pad_n = org_pad - org_batch_size
        ids_d = jnp.pad(ids_d, ((0, pad_n), (0, 0), (0, 0)))
        len_d = jnp.pad(len_d, ((0, pad_n), (0, 0)), constant_values=1)
    # within a block: index = t*rows + u*D + d  (time-major, utterance, dialog-minor)
    ids3 = (ids_d.reshape(n_blocks, D, turns, T)
            .transpose(0, 3, 2, 1)
            .reshape(n_blocks, T * rows, 1))
    len3 = (len_d.reshape(n_blocks, D, turns)
            .transpose(0, 2, 1)
            .reshape(n_blocks, rows, 1))

    vmem_limit = _vmem_limit_bytes()

    def _make_call(single_buffer_weights):
        def wspec(shape):
            idx_map = lambda b, _n=len(shape): (0,) * _n
            if single_buffer_weights:
                # grid-invariant weights: DMA'd once, no need for double buffers
                return pl.BlockSpec(shape, idx_map, pipeline_mode=pl.Buffered(1))
            return pl.BlockSpec(shape, idx_map)

        grid_spec = pltpu.PrefetchScalarGridSpec(
            num_scalar_prefetch=0,
            grid=(n_blocks,),
            in_specs=[
                pl.BlockSpec((1, T * rows, 1), lambda b: (b, 0, 0)),   # ids
                pl.BlockSpec((1, rows, 1), lambda b: (b, 0, 0)),       # lengths
                wspec((V, E)),
                wspec((E, 4 * Hp)), wspec((Hp, 4 * Hp)), wspec((1, 4 * Hp)),
                wspec((Hp, 4 * Hp)), wspec((Hp, 4 * Hp)), wspec((1, 4 * Hp)),
                wspec((Hp, OUTP)), wspec((1, OUTP)),
            ],
            out_specs=pl.BlockSpec((1, D, OUTP), lambda b: (b, 0, 0)),
            scratch_shapes=[
                pltpu.VMEM((T, rows, 4 * Hp), jnp.float32),   # per-token projections
                pltpu.VMEM((rows, Hp), jnp.float32),          # per-(dialog,turn) h_last
            ],
        )
        return pl.pallas_call(
            _netE_text_kernel,
            out_shape=jax.ShapeDtypeStruct((n_blocks, D, OUTP), jnp.float32),
            grid_spec=grid_spec,
            compiler_params=pltpu.CompilerParams(
                dimension_semantics=("parallel",),
                vmem_limit_bytes=vmem_limit),
        )

    args = (ids3, len3, emb, w_ih1, w_hh1, b1, w_ih2, w_hh2, b2, w_fc, b_fc)
    try:
        out = _make_call(single_buffer_weights=True)(*args)
    except Exception:
        # pl.Buffered(1) not supported on this jax version -> default buffering.
        out = _make_call(single_buffer_weights=False)(*args)

    out = out.reshape(org_pad, OUTP)[:org_batch_size, :out_features]
    return out


def _reference_forward(ids, lengths, params, org_batch_size):
    """Pure-JAX reference using the same bf16-weight / f32-accumulate math."""
    bf16, f32 = jnp.bfloat16, jnp.float32
    B, T = ids.shape
    H = params["w_hh1"].shape[0]
    w_ih1 = params["w_ih1"].astype(bf16); w_hh1 = params["w_hh1"].astype(bf16)
    w_ih2 = params["w_ih2"].astype(bf16); w_hh2 = params["w_hh2"].astype(bf16)
    w_fc = params["w_fc"].astype(bf16)
    emb = jnp.tanh(params["emb"].astype(bf16)[ids].astype(f32))      # (B, T, E)

    def cell(x, h, c, w_ih, w_hh, b):
        gates = (jnp.dot(x.astype(bf16), w_ih, preferred_element_type=f32)
                 + jnp.dot(h.astype(bf16), w_hh, preferred_element_type=f32) + b)
        i = jax.nn.sigmoid(gates[:, 0 * H:1 * H])
        f = jax.nn.sigmoid(gates[:, 1 * H:2 * H])
        g = jnp.tanh(gates[:, 2 * H:3 * H])
        o = jax.nn.sigmoid(gates[:, 3 * H:4 * H])
        c_new = f * c + i * g
        return o * jnp.tanh(c_new), c_new

    h = jnp.zeros((B, H), f32); c = jnp.zeros((B, H), f32)
    for t in range(T):
        h_new, c_new = cell(emb[:, t, :], h, c, w_ih1, w_hh1, params["b1"])
        valid = (t < lengths)[:, None]
        h = jnp.where(valid, h_new, h)
        c = jnp.where(valid, c_new, c)
    turns = B // org_batch_size
    h_d = h.reshape(org_batch_size, turns, H)
    hs = jnp.zeros((org_batch_size, H), f32); cs = jnp.zeros((org_batch_size, H), f32)
    for s in range(turns):
        hs, cs = cell(h_d[:, s, :], hs, cs, w_ih2, w_hh2, params["b2"])
    return jax.nn.sigmoid(
        jnp.dot(jnp.tanh(hs).astype(bf16), w_fc, preferred_element_type=f32)
        + params["b_fc"])


def init_params(key, embedding_tokens, embedding_features, nhid, out_features):
    """Deterministic uniform(-0.05, 0.05) init, matching init_params() in the module."""
    def u(k, shape):
        return jax.random.uniform(k, shape, jnp.float32, -0.05, 0.05)
    ks = jax.random.split(key, 12)
    return {
        "emb":   u(ks[0], (embedding_tokens, embedding_features)),
        # word LSTM (weights stored transposed: (in_dim, 4H)); bias = b_ih + b_hh
        "w_ih1": u(ks[1], (embedding_features, 4 * nhid)),
        "w_hh1": u(ks[2], (nhid, 4 * nhid)),
        "b1":    u(ks[3], (1, 4 * nhid)) + u(ks[4], (1, 4 * nhid)),
        # speaker LSTM
        "w_ih2": u(ks[5], (nhid, 4 * nhid)),
        "w_hh2": u(ks[6], (nhid, 4 * nhid)),
        "b2":    u(ks[7], (1, 4 * nhid)) + u(ks[8], (1, 4 * nhid)),
        # fc
        "w_fc":  u(ks[9], (nhid, out_features)),
        "b_fc":  u(ks[10], (1, out_features)),
    }


if __name__ == "__main__":
    embedding_tokens = 64
    embedding_features = 16
    nhid = 32
    out_features = 8
    org_batch_size = 4
    turns = 4
    B_total = org_batch_size * turns       # 16 utterances (dialog-major)
    T = 8                                   # max tokens per utterance

    key = jax.random.PRNGKey(0)
    k_param, k_ids, k_len = jax.random.split(key, 3)
    params = init_params(k_param, embedding_tokens, embedding_features, nhid, out_features)

    ids = jax.random.randint(k_ids, (B_total, T), 0, embedding_tokens, dtype=jnp.int32)
    lengths = jax.random.randint(k_len, (B_total,), 1, T + 1, dtype=jnp.int32)

    out = netE_text_forward(ids, lengths, params, org_batch_size)
    out = jax.block_until_ready(out)

    ref = _reference_forward(ids, lengths, params, org_batch_size)
    assert out.shape == (org_batch_size, out_features)
    assert jnp.allclose(out, ref, rtol=5e-3, atol=5e-3), "mismatch vs JAX reference"

    print("KERNEL_OK")
</pallas_src>

<mosaic_0001>
module attributes {stable_mosaic.version = 11 : i64} {
  func.func @_netE_text_kernel(%arg0: i32, %arg1: memref<1x64x1xi32, #tpu.memory_space<vmem>>, %arg2: memref<1x8x1xi32, #tpu.memory_space<vmem>>, %arg3: memref<64x16xbf16, #tpu.memory_space<vmem>>, %arg4: memref<16x512xbf16, #tpu.memory_space<vmem>>, %arg5: memref<128x512xbf16, #tpu.memory_space<vmem>>, %arg6: memref<1x512xf32, #tpu.memory_space<vmem>>, %arg7: memref<128x512xbf16, #tpu.memory_space<vmem>>, %arg8: memref<128x512xbf16, #tpu.memory_space<vmem>>, %arg9: memref<1x512xf32, #tpu.memory_space<vmem>>, %arg10: memref<128x128xbf16, #tpu.memory_space<vmem>>, %arg11: memref<1x128xf32, #tpu.memory_space<vmem>>, %arg12: memref<1x2x128xf32, #tpu.memory_space<vmem>>, %arg13: memref<8x8x512xf32, #tpu.memory_space<vmem>>, %arg14: memref<8x128xf32, #tpu.memory_space<vmem>>) attributes {dimension_semantics = [#tpu.dimension_semantics<parallel>], iteration_bounds = array<i64: 2>, scalar_prefetch = 0 : i64, scratch_operands = 2 : i64, tpu.core_type = #tpu.core_type<tc>, window_params = [{transform_indices = @transform_0, window_bounds = array<i64: 1, 64, 1>}, {transform_indices = @transform_1, window_bounds = array<i64: 1, 8, 1>}, {pipeline_mode = #tpu.pipeline_mode<synchronous>, transform_indices = @transform_2, window_bounds = array<i64: 64, 16>}, {pipeline_mode = #tpu.pipeline_mode<synchronous>, transform_indices = @transform_3, window_bounds = array<i64: 16, 512>}, {pipeline_mode = #tpu.pipeline_mode<synchronous>, transform_indices = @transform_4, window_bounds = array<i64: 128, 512>}, {pipeline_mode = #tpu.pipeline_mode<synchronous>, transform_indices = @transform_5, window_bounds = array<i64: 1, 512>}, {pipeline_mode = #tpu.pipeline_mode<synchronous>, transform_indices = @transform_6, window_bounds = array<i64: 128, 512>}, {pipeline_mode = #tpu.pipeline_mode<synchronous>, transform_indices = @transform_7, window_bounds = array<i64: 128, 512>}, {pipeline_mode = #tpu.pipeline_mode<synchronous>, transform_indices = @transform_8, window_bounds = array<i64: 1, 512>}, {pipeline_mode = #tpu.pipeline_mode<synchronous>, transform_indices = @transform_9, window_bounds = array<i64: 128, 128>}, {pipeline_mode = #tpu.pipeline_mode<synchronous>, transform_indices = @transform_10, window_bounds = array<i64: 1, 128>}, {transform_indices = @transform_11, window_bounds = array<i64: 1, 2, 128>}]} {
    %c0 = arith.constant 0 : index
    %c0_0 = arith.constant 0 : index
    %c0_1 = arith.constant 0 : index
    %0 = vector.load %arg1[%c0, %c0_0, %c0_1] : memref<1x64x1xi32, #tpu.memory_space<vmem>>, vector<1x64x1xi32>
    %1 = vector.shape_cast %0 : vector<1x64x1xi32> to vector<64x1xi32>
    %c0_2 = arith.constant 0 : index
    %c0_3 = arith.constant 0 : index
    %c0_4 = arith.constant 0 : index
    %2 = vector.load %arg2[%c0_2, %c0_3, %c0_4] : memref<1x8x1xi32, #tpu.memory_space<vmem>>, vector<1x8x1xi32>
    %3 = vector.shape_cast %2 : vector<1x8x1xi32> to vector<8x1xi32>
    %4 = tpu.iota {dimensions = array<i32: 1>} : vector<64x64xi32>
    %5 = vector.broadcast %1 : vector<64x1xi32> to vector<64x64xi32>
    %6 = arith.cmpi eq, %5, %4 : vector<64x64xi32>
    %7 = arith.extui %6 : vector<64x64xi1> to vector<64x64xi32>
    %8 = arith.sitofp %7 : vector<64x64xi32> to vector<64x64xf32>
    %9 = arith.truncf %8 : vector<64x64xf32> to vector<64x64xbf16>
    %c0_5 = arith.constant 0 : index
    %c0_6 = arith.constant 0 : index
    %10 = vector.load %arg3[%c0_5, %c0_6] : memref<64x16xbf16, #tpu.memory_space<vmem>>, vector<64x16xbf16>
    %cst = arith.constant dense<0.000000e+00> : vector<64x16xf32>
    %11 = tpu.matmul %9, %10, %cst {dimension_numbers = #tpu.dot_dimension_numbers<[1], [0], [0], [1], [0, 0, 1, 1], [], []>} : vector<64x64xbf16>, vector<64x16xbf16>, vector<64x16xf32> -> vector<64x16xf32>
    %12 = math.tanh %11 : vector<64x16xf32>
    %13 = arith.truncf %12 : vector<64x16xf32> to vector<64x16xbf16>
    %c0_7 = arith.constant 0 : index
    %c0_8 = arith.constant 0 : index
    %14 = vector.load %arg4[%c0_7, %c0_8] : memref<16x512xbf16, #tpu.memory_space<vmem>>, vector<16x512xbf16>
    %cst_9 = arith.constant dense<0.000000e+00> : vector<64x512xf32>
    %15 = tpu.matmul %13, %14, %cst_9 {dimension_numbers = #tpu.dot_dimension_numbers<[1], [0], [0], [1], [0, 0, 1, 1], [], []>} : vector<64x16xbf16>, vector<16x512xbf16>, vector<64x512xf32> -> vector<64x512xf32>
    %c0_10 = arith.constant 0 : index
    %c0_11 = arith.constant 0 : index
    %16 = vector.load %arg6[%c0_10, %c0_11] : memref<1x512xf32, #tpu.memory_space<vmem>>, vector<1x512xf32>
    %17 = vector.broadcast %16 : vector<1x512xf32> to vector<64x512xf32>
    %18 = arith.addf %15, %17 : vector<64x512xf32>
    %19 = vector.shape_cast %18 : vector<64x512xf32> to vector<8x8x512xf32>
    %c0_12 = arith.constant 0 : index
    %c0_13 = arith.constant 0 : index
    %c0_14 = arith.constant 0 : index
    %20 = vector.load %arg13[%c0_12, %c0_13, %c0_14] : memref<8x8x512xf32, #tpu.memory_space<vmem>>, vector<8x8x512xf32>
    tpu.vector_store %arg13[%c0_12, %c0_13, %c0_14], %19 {strides = array<i32>} : memref<8x8x512xf32, #tpu.memory_space<vmem>>, vector<8x8x512xf32>,
    %c0_15 = arith.constant 0 : index
    %c0_16 = arith.constant 0 : index
    %21 = vector.load %arg5[%c0_15, %c0_16] : memref<128x512xbf16, #tpu.memory_space<vmem>>, vector<128x512xbf16>
    %cst_17 = arith.constant 0.000000e+00 : f32
    %22 = vector.broadcast %cst_17 : f32 to vector<8x128xf32>
    %cst_18 = arith.constant 0.000000e+00 : f32
    %23 = vector.broadcast %cst_18 : f32 to vector<8x128xf32>
    %c0_i32 = arith.constant 0 : i32
    %24 = arith.index_cast %c0_i32 : i32 to index
    %c0_19 = arith.constant 0 : index
    %c0_20 = arith.constant 0 : index
    %25 = vector.load %arg13[%24, %c0_19, %c0_20] : memref<8x8x512xf32, #tpu.memory_space<vmem>>, vector<1x8x512xf32>
    %26 = vector.shape_cast %25 : vector<1x8x512xf32> to vector<8x512xf32>
    %27 = arith.truncf %22 : vector<8x128xf32> to vector<8x128xbf16>
    %cst_21 = arith.constant dense<0.000000e+00> : vector<8x512xf32>
    %28 = tpu.matmul %27, %21, %cst_21 {dimension_numbers = #tpu.dot_dimension_numbers<[1], [0], [0], [1], [0, 0, 1, 1], [], []>} : vector<8x128xbf16>, vector<128x512xbf16>, vector<8x512xf32> -> vector<8x512xf32>
    %29 = arith.addf %26, %28 : vector<8x512xf32>
    %30 = vector.extract_strided_slice %29 {offsets = [0, 0], sizes = [8, 384], strides = [1, 1]} : vector<8x512xf32> to vector<8x384xf32>
    %31 = arith.negf %30 : vector<8x384xf32>
    %32 = math.exp %31 : vector<8x384xf32>
    %cst_22 = arith.constant 1.000000e+00 : f32
    %33 = vector.broadcast %cst_22 : f32 to vector<8x384xf32>
    %34 = arith.addf %33, %32 : vector<8x384xf32>
    %35 = arith.divf %33, %34 : vector<8x384xf32>
    %36 = vector.extract_strided_slice %29 {offsets = [0, 384], sizes = [8, 128], strides = [1, 1]} : vector<8x512xf32> to vector<8x128xf32>
    %37 = math.tanh %36 : vector<8x128xf32>
    %38 = vector.extract_strided_slice %35 {offsets = [0, 0], sizes = [8, 128], strides = [1, 1]} : vector<8x384xf32> to vector<8x128xf32>
    %39 = vector.extract_strided_slice %35 {offsets = [0, 128], sizes = [8, 128], strides = [1, 1]} : vector<8x384xf32> to vector<8x128xf32>
    %40 = vector.extract_strided_slice %35 {offsets = [0, 256], sizes = [8, 128], strides = [1, 1]} : vector<8x384xf32> to vector<8x128xf32>
    %41 = arith.mulf %39, %23 : vector<8x128xf32>
    %42 = arith.mulf %38, %37 : vector<8x128xf32>
    %43 = arith.addf %41, %42 : vector<8x128xf32>
    %44 = math.tanh %43 : vector<8x128xf32>
    %45 = arith.mulf %40, %44 : vector<8x128xf32>
    %46 = vector.broadcast %c0_i32 : i32 to vector<8x1xi32>
    %47 = arith.cmpi slt, %46, %3 : vector<8x1xi32>
    %48 = vector.shape_cast %47 : vector<8x1xi1> to vector<8x1xi1>
    %49 = vector.broadcast %48 : vector<8x1xi1> to vector<8x128xi1>
    %50 = arith.select %49, %45, %22 : vector<8x128xi1>, vector<8x128xf32>
    %51 = vector.shape_cast %47 : vector<8x1xi1> to vector<8x1xi1>
    %52 = vector.broadcast %51 : vector<8x1xi1> to vector<8x128xi1>
    %53 = arith.select %52, %43, %23 : vector<8x128xi1>, vector<8x128xf32>
    %c1_i32 = arith.constant 1 : i32
    %54 = arith.index_cast %c1_i32 : i32 to index
    %c0_23 = arith.constant 0 : index
    %c0_24 = arith.constant 0 : index
    %55 = vector.load %arg13[%54, %c0_23, %c0_24] : memref<8x8x512xf32, #tpu.memory_space<vmem>>, vector<1x8x512xf32>
    %56 = vector.shape_cast %55 : vector<1x8x512xf32> to vector<8x512xf32>
    %57 = arith.truncf %50 : vector<8x128xf32> to vector<8x128xbf16>
    %cst_25 = arith.constant dense<0.000000e+00> : vector<8x512xf32>
    %58 = tpu.matmul %57, %21, %cst_25 {dimension_numbers = #tpu.dot_dimension_numbers<[1], [0], [0], [1], [0, 0, 1, 1], [], []>} : vector<8x128xbf16>, vector<128x512xbf16>, vector<8x512xf32> -> vector<8x512xf32>
    %59 = arith.addf %56, %58 : vector<8x512xf32>
    %60 = vector.extract_strided_slice %59 {offsets = [0, 0], sizes = [8, 384], strides = [1, 1]} : vector<8x512xf32> to vector<8x384xf32>
    %61 = arith.negf %60 : vector<8x384xf32>
    %62 = math.exp %61 : vector<8x384xf32>
    %cst_26 = arith.constant 1.000000e+00 : f32
    %63 = vector.broadcast %cst_26 : f32 to vector<8x384xf32>
    %64 = arith.addf %63, %62 : vector<8x384xf32>
    %65 = arith.divf %63, %64 : vector<8x384xf32>
    %66 = vector.extract_strided_slice %59 {offsets = [0, 384], sizes = [8, 128], strides = [1, 1]} : vector<8x512xf32> to vector<8x128xf32>
    %67 = math.tanh %66 : vector<8x128xf32>
    %68 = vector.extract_strided_slice %65 {offsets = [0, 0], sizes = [8, 128], strides = [1, 1]} : vector<8x384xf32> to vector<8x128xf32>
    %69 = vector.extract_strided_slice %65 {offsets = [0, 128], sizes = [8, 128], strides = [1, 1]} : vector<8x384xf32> to vector<8x128xf32>
    %70 = vector.extract_strided_slice %65 {offsets = [0, 256], sizes = [8, 128], strides = [1, 1]} : vector<8x384xf32> to vector<8x128xf32>
    %71 = arith.mulf %69, %53 : vector<8x128xf32>
    %72 = arith.mulf %68, %67 : vector<8x128xf32>
    %73 = arith.addf %71, %72 : vector<8x128xf32>
    %74 = math.tanh %73 : vector<8x128xf32>
    %75 = arith.mulf %70, %74 : vector<8x128xf32>
    %76 = vector.broadcast %c1_i32 : i32 to vector<8x1xi32>
    %77 = arith.cmpi slt, %76, %3 : vector<8x1xi32>
    %78 = vector.shape_cast %77 : vector<8x1xi1> to vector<8x1xi1>
    %79 = vector.broadcast %78 : vector<8x1xi1> to vector<8x128xi1>
    %80 = arith.select %79, %75, %50 : vector<8x128xi1>, vector<8x128xf32>
    %81 = vector.shape_cast %77 : vector<8x1xi1> to vector<8x1xi1>
    %82 = vector.broadcast %81 : vector<8x1xi1> to vector<8x128xi1>
    %83 = arith.select %82, %73, %53 : vector<8x128xi1>, vector<8x128xf32>
    %c2_i32 = arith.constant 2 : i32
    %84 = arith.index_cast %c2_i32 : i32 to index
    %c0_27 = arith.constant 0 : index
    %c0_28 = arith.constant 0 : index
    %85 = vector.load %arg13[%84, %c0_27, %c0_28] : memref<8x8x512xf32, #tpu.memory_space<vmem>>, vector<1x8x512xf32>
    %86 = vector.shape_cast %85 : vector<1x8x512xf32> to vector<8x512xf32>
    %87 = arith.truncf %80 : vector<8x128xf32> to vector<8x128xbf16>
    %cst_29 = arith.constant dense<0.000000e+00> : vector<8x512xf32>
    %88 = tpu.matmul %87, %21, %cst_29 {dimension_numbers = #tpu.dot_dimension_numbers<[1], [0], [0], [1], [0, 0, 1, 1], [], []>} : vector<8x128xbf16>, vector<128x512xbf16>, vector<8x512xf32> -> vector<8x512xf32>
    %89 = arith.addf %86, %88 : vector<8x512xf32>
    %90 = vector.extract_strided_slice %89 {offsets = [0, 0], sizes = [8, 384], strides = [1, 1]} : vector<8x512xf32> to vector<8x384xf32>
    %91 = arith.negf %90 : vector<8x384xf32>
    %92 = math.exp %91 : vector<8x384xf32>
    %cst_30 = arith.constant 1.000000e+00 : f32
    %93 = vector.broadcast %cst_30 : f32 to vector<8x384xf32>
    %94 = arith.addf %93, %92 : vector<8x384xf32>
    %95 = arith.divf %93, %94 : vector<8x384xf32>
    %96 = vector.extract_strided_slice %89 {offsets = [0, 384], sizes = [8, 128], strides = [1, 1]} : vector<8x512xf32> to vector<8x128xf32>
    %97 = math.tanh %96 : vector<8x128xf32>
    %98 = vector.extract_strided_slice %95 {offsets = [0, 0], sizes = [8, 128], strides = [1, 1]} : vector<8x384xf32> to vector<8x128xf32>
    %99 = vector.extract_strided_slice %95 {offsets = [0, 128], sizes = [8, 128], strides = [1, 1]} : vector<8x384xf32> to vector<8x128xf32>
    %100 = vector.extract_strided_slice %95 {offsets = [0, 256], sizes = [8, 128], strides = [1, 1]} : vector<8x384xf32> to vector<8x128xf32>
    %101 = arith.mulf %99, %83 : vector<8x128xf32>
    %102 = arith.mulf %98, %97 : vector<8x128xf32>
    %103 = arith.addf %101, %102 : vector<8x128xf32>
    %104 = math.tanh %103 : vector<8x128xf32>
    %105 = arith.mulf %100, %104 : vector<8x128xf32>
    %106 = vector.broadcast %c2_i32 : i32 to vector<8x1xi32>
    %107 = arith.cmpi slt, %106, %3 : vector<8x1xi32>
    %108 = vector.shape_cast %107 : vector<8x1xi1> to vector<8x1xi1>
    %109 = vector.broadcast %108 : vector<8x1xi1> to vector<8x128xi1>
    %110 = arith.select %109, %105, %80 : vector<8x128xi1>, vector<8x128xf32>
    %111 = vector.shape_cast %107 : vector<8x1xi1> to vector<8x1xi1>
    %112 = vector.broadcast %111 : vector<8x1xi1> to vector<8x128xi1>
    %113 = arith.select %112, %103, %83 : vector<8x128xi1>, vector<8x128xf32>
    %c3_i32 = arith.constant 3 : i32
    %114 = arith.index_cast %c3_i32 : i32 to index
    %c0_31 = arith.constant 0 : index
    %c0_32 = arith.constant 0 : index
    %115 = vector.load %arg13[%114, %c0_31, %c0_32] : memref<8x8x512xf32, #tpu.memory_space<vmem>>, vector<1x8x512xf32>
    %116 = vector.shape_cast %115 : vector<1x8x512xf32> to vector<8x512xf32>
    %117 = arith.truncf %110 : vector<8x128xf32> to vector<8x128xbf16>
    %cst_33 = arith.constant dense<0.000000e+00> : vector<8x512xf32>
    %118 = tpu.matmul %117, %21, %cst_33 {dimension_numbers = #tpu.dot_dimension_numbers<[1], [0], [0], [1], [0, 0, 1, 1], [], []>} : vector<8x128xbf16>, vector<128x512xbf16>, vector<8x512xf32> -> vector<8x512xf32>
    %119 = arith.addf %116, %118 : vector<8x512xf32>
    %120 = vector.extract_strided_slice %119 {offsets = [0, 0], sizes = [8, 384], strides = [1, 1]} : vector<8x512xf32> to vector<8x384xf32>
    %121 = arith.negf %120 : vector<8x384xf32>
    %122 = math.exp %121 : vector<8x384xf32>
    %cst_34 = arith.constant 1.000000e+00 : f32
    %123 = vector.broadcast %cst_34 : f32 to vector<8x384xf32>
    %124 = arith.addf %123, %122 : vector<8x384xf32>
    %125 = arith.divf %123, %124 : vector<8x384xf32>
    %126 = vector.extract_strided_slice %119 {offsets = [0, 384], sizes = [8, 128], strides = [1, 1]} : vector<8x512xf32> to vector<8x128xf32>
    %127 = math.tanh %126 : vector<8x128xf32>
    %128 = vector.extract_strided_slice %125 {offsets = [0, 0], sizes = [8, 128], strides = [1, 1]} : vector<8x384xf32> to vector<8x128xf32>
    %129 = vector.extract_strided_slice %125 {offsets = [0, 128], sizes = [8, 128], strides = [1, 1]} : vector<8x384xf32> to vector<8x128xf32>
    %130 = vector.extract_strided_slice %125 {offsets = [0, 256], sizes = [8, 128], strides = [1, 1]} : vector<8x384xf32> to vector<8x128xf32>
    %131 = arith.mulf %129, %113 : vector<8x128xf32>
    %132 = arith.mulf %128, %127 : vector<8x128xf32>
    %133 = arith.addf %131, %132 : vector<8x128xf32>
    %134 = math.tanh %133 : vector<8x128xf32>
    %135 = arith.mulf %130, %134 : vector<8x128xf32>
    %136 = vector.broadcast %c3_i32 : i32 to vector<8x1xi32>
    %137 = arith.cmpi slt, %136, %3 : vector<8x1xi32>
    %138 = vector.shape_cast %137 : vector<8x1xi1> to vector<8x1xi1>
    %139 = vector.broadcast %138 : vector<8x1xi1> to vector<8x128xi1>
    %140 = arith.select %139, %135, %110 : vector<8x128xi1>, vector<8x128xf32>
    %141 = vector.shape_cast %137 : vector<8x1xi1> to vector<8x1xi1>
    %142 = vector.broadcast %141 : vector<8x1xi1> to vector<8x128xi1>
    %143 = arith.select %142, %133, %113 : vector<8x128xi1>, vector<8x128xf32>
    %c4_i32 = arith.constant 4 : i32
    %144 = arith.index_cast %c4_i32 : i32 to index
    %c0_35 = arith.constant 0 : index
    %c0_36 = arith.constant 0 : index
    %145 = vector.load %arg13[%144, %c0_35, %c0_36] : memref<8x8x512xf32, #tpu.memory_space<vmem>>, vector<1x8x512xf32>
    %146 = vector.shape_cast %145 : vector<1x8x512xf32> to vector<8x512xf32>
    %147 = arith.truncf %140 : vector<8x128xf32> to vector<8x128xbf16>
    %cst_37 = arith.constant dense<0.000000e+00> : vector<8x512xf32>
    %148 = tpu.matmul %147, %21, %cst_37 {dimension_numbers = #tpu.dot_dimension_numbers<[1], [0], [0], [1], [0, 0, 1, 1], [], []>} : vector<8x128xbf16>, vector<128x512xbf16>, vector<8x512xf32> -> vector<8x512xf32>
    %149 = arith.addf %146, %148 : vector<8x512xf32>
    %150 = vector.extract_strided_slice %149 {offsets = [0, 0], sizes = [8, 384], strides = [1, 1]} : vector<8x512xf32> to vector<8x384xf32>
    %151 = arith.negf %150 : vector<8x384xf32>
    %152 = math.exp %151 : vector<8x384xf32>
    %cst_38 = arith.constant 1.000000e+00 : f32
    %153 = vector.broadcast %cst_38 : f32 to vector<8x384xf32>
    %154 = arith.addf %153, %152 : vector<8x384xf32>
    %155 = arith.divf %153, %154 : vector<8x384xf32>
    %156 = vector.extract_strided_slice %149 {offsets = [0, 384], sizes = [8, 128], strides = [1, 1]} : vector<8x512xf32> to vector<8x128xf32>
    %157 = math.tanh %156 : vector<8x128xf32>
    %158 = vector.extract_strided_slice %155 {offsets = [0, 0], sizes = [8, 128], strides = [1, 1]} : vector<8x384xf32> to vector<8x128xf32>
    %159 = vector.extract_strided_slice %155 {offsets = [0, 128], sizes = [8, 128], strides = [1, 1]} : vector<8x384xf32> to vector<8x128xf32>
    %160 = vector.extract_strided_slice %155 {offsets = [0, 256], sizes = [8, 128], strides = [1, 1]} : vector<8x384xf32> to vector<8x128xf32>
    %161 = arith.mulf %159, %143 : vector<8x128xf32>
    %162 = arith.mulf %158, %157 : vector<8x128xf32>
    %163 = arith.addf %161, %162 : vector<8x128xf32>
    %164 = math.tanh %163 : vector<8x128xf32>
    %165 = arith.mulf %160, %164 : vector<8x128xf32>
    %166 = vector.broadcast %c4_i32 : i32 to vector<8x1xi32>
    %167 = arith.cmpi slt, %166, %3 : vector<8x1xi32>
    %168 = vector.shape_cast %167 : vector<8x1xi1> to vector<8x1xi1>
    %169 = vector.broadcast %168 : vector<8x1xi1> to vector<8x128xi1>
    %170 = arith.select %169, %165, %140 : vector<8x128xi1>, vector<8x128xf32>
    %171 = vector.shape_cast %167 : vector<8x1xi1> to vector<8x1xi1>
    %172 = vector.broadcast %171 : vector<8x1xi1> to vector<8x128xi1>
    %173 = arith.select %172, %163, %143 : vector<8x128xi1>, vector<8x128xf32>
    %c5_i32 = arith.constant 5 : i32
    %174 = arith.index_cast %c5_i32 : i32 to index
    %c0_39 = arith.constant 0 : index
    %c0_40 = arith.constant 0 : index
    %175 = vector.load %arg13[%174, %c0_39, %c0_40] : memref<8x8x512xf32, #tpu.memory_space<vmem>>, vector<1x8x512xf32>
    %176 = vector.shape_cast %175 : vector<1x8x512xf32> to vector<8x512xf32>
    %177 = arith.truncf %170 : vector<8x128xf32> to vector<8x128xbf16>
    %cst_41 = arith.constant dense<0.000000e+00> : vector<8x512xf32>
    %178 = tpu.matmul %177, %21, %cst_41 {dimension_numbers = #tpu.dot_dimension_numbers<[1], [0], [0], [1], [0, 0, 1, 1], [], []>} : vector<8x128xbf16>, vector<128x512xbf16>, vector<8x512xf32> -> vector<8x512xf32>
    %179 = arith.addf %176, %178 : vector<8x512xf32>
    %180 = vector.extract_strided_slice %179 {offsets = [0, 0], sizes = [8, 384], strides = [1, 1]} : vector<8x512xf32> to vector<8x384xf32>
    %181 = arith.negf %180 : vector<8x384xf32>
    %182 = math.exp %181 : vector<8x384xf32>
    %cst_42 = arith.constant 1.000000e+00 : f32
    %183 = vector.broadcast %cst_42 : f32 to vector<8x384xf32>
    %184 = arith.addf %183, %182 : vector<8x384xf32>
    %185 = arith.divf %183, %184 : vector<8x384xf32>
    %186 = vector.extract_strided_slice %179 {offsets = [0, 384], sizes = [8, 128], strides = [1, 1]} : vector<8x512xf32> to vector<8x128xf32>
    %187 = math.tanh %186 : vector<8x128xf32>
    %188 = vector.extract_strided_slice %185 {offsets = [0, 0], sizes = [8, 128], strides = [1, 1]} : vector<8x384xf32> to vector<8x128xf32>
    %189 = vector.extract_strided_slice %185 {offsets = [0, 128], sizes = [8, 128], strides = [1, 1]} : vector<8x384xf32> to vector<8x128xf32>
    %190 = vector.extract_strided_slice %185 {offsets = [0, 256], sizes = [8, 128], strides = [1, 1]} : vector<8x384xf32> to vector<8x128xf32>
    %191 = arith.mulf %189, %173 : vector<8x128xf32>
    %192 = arith.mulf %188, %187 : vector<8x128xf32>
    %193 = arith.addf %191, %192 : vector<8x128xf32>
    %194 = math.tanh %193 : vector<8x128xf32>
    %195 = arith.mulf %190, %194 : vector<8x128xf32>
    %196 = vector.broadcast %c5_i32 : i32 to vector<8x1xi32>
    %197 = arith.cmpi slt, %196, %3 : vector<8x1xi32>
    %198 = vector.shape_cast %197 : vector<8x1xi1> to vector<8x1xi1>
    %199 = vector.broadcast %198 : vector<8x1xi1> to vector<8x128xi1>
    %200 = arith.select %199, %195, %170 : vector<8x128xi1>, vector<8x128xf32>
    %201 = vector.shape_cast %197 : vector<8x1xi1> to vector<8x1xi1>
    %202 = vector.broadcast %201 : vector<8x1xi1> to vector<8x128xi1>
    %203 = arith.select %202, %193, %173 : vector<8x128xi1>, vector<8x128xf32>
    %c6_i32 = arith.constant 6 : i32
    %204 = arith.index_cast %c6_i32 : i32 to index
    %c0_43 = arith.constant 0 : index
    %c0_44 = arith.constant 0 : index
    %205 = vector.load %arg13[%204, %c0_43, %c0_44] : memref<8x8x512xf32, #tpu.memory_space<vmem>>, vector<1x8x512xf32>
    %206 = vector.shape_cast %205 : vector<1x8x512xf32> to vector<8x512xf32>
    %207 = arith.truncf %200 : vector<8x128xf32> to vector<8x128xbf16>
    %cst_45 = arith.constant dense<0.000000e+00> : vector<8x512xf32>
    %208 = tpu.matmul %207, %21, %cst_45 {dimension_numbers = #tpu.dot_dimension_numbers<[1], [0], [0], [1], [0, 0, 1, 1], [], []>} : vector<8x128xbf16>, vector<128x512xbf16>, vector<8x512xf32> -> vector<8x512xf32>
    %209 = arith.addf %206, %208 : vector<8x512xf32>
    %210 = vector.extract_strided_slice %209 {offsets = [0, 0], sizes = [8, 384], strides = [1, 1]} : vector<8x512xf32> to vector<8x384xf32>
    %211 = arith.negf %210 : vector<8x384xf32>
    %212 = math.exp %211 : vector<8x384xf32>
    %cst_46 = arith.constant 1.000000e+00 : f32
    %213 = vector.broadcast %cst_46 : f32 to vector<8x384xf32>
    %214 = arith.addf %213, %212 : vector<8x384xf32>
    %215 = arith.divf %213, %214 : vector<8x384xf32>
    %216 = vector.extract_strided_slice %209 {offsets = [0, 384], sizes = [8, 128], strides = [1, 1]} : vector<8x512xf32> to vector<8x128xf32>
    %217 = math.tanh %216 : vector<8x128xf32>
    %218 = vector.extract_strided_slice %215 {offsets = [0, 0], sizes = [8, 128], strides = [1, 1]} : vector<8x384xf32> to vector<8x128xf32>
    %219 = vector.extract_strided_slice %215 {offsets = [0, 128], sizes = [8, 128], strides = [1, 1]} : vector<8x384xf32> to vector<8x128xf32>
    %220 = vector.extract_strided_slice %215 {offsets = [0, 256], sizes = [8, 128], strides = [1, 1]} : vector<8x384xf32> to vector<8x128xf32>
    %221 = arith.mulf %219, %203 : vector<8x128xf32>
    %222 = arith.mulf %218, %217 : vector<8x128xf32>
    %223 = arith.addf %221, %222 : vector<8x128xf32>
    %224 = math.tanh %223 : vector<8x128xf32>
    %225 = arith.mulf %220, %224 : vector<8x128xf32>
    %226 = vector.broadcast %c6_i32 : i32 to vector<8x1xi32>
    %227 = arith.cmpi slt, %226, %3 : vector<8x1xi32>
    %228 = vector.shape_cast %227 : vector<8x1xi1> to vector<8x1xi1>
    %229 = vector.broadcast %228 : vector<8x1xi1> to vector<8x128xi1>
    %230 = arith.select %229, %225, %200 : vector<8x128xi1>, vector<8x128xf32>
    %231 = vector.shape_cast %227 : vector<8x1xi1> to vector<8x1xi1>
    %232 = vector.broadcast %231 : vector<8x1xi1> to vector<8x128xi1>
    %233 = arith.select %232, %223, %203 : vector<8x128xi1>, vector<8x128xf32>
    %c7_i32 = arith.constant 7 : i32
    %234 = arith.index_cast %c7_i32 : i32 to index
    %c0_47 = arith.constant 0 : index
    %c0_48 = arith.constant 0 : index
    %235 = vector.load %arg13[%234, %c0_47, %c0_48] : memref<8x8x512xf32, #tpu.memory_space<vmem>>, vector<1x8x512xf32>
    %236 = vector.shape_cast %235 : vector<1x8x512xf32> to vector<8x512xf32>
    %237 = arith.truncf %230 : vector<8x128xf32> to vector<8x128xbf16>
    %cst_49 = arith.constant dense<0.000000e+00> : vector<8x512xf32>
    %238 = tpu.matmul %237, %21, %cst_49 {dimension_numbers = #tpu.dot_dimension_numbers<[1], [0], [0], [1], [0, 0, 1, 1], [], []>} : vector<8x128xbf16>, vector<128x512xbf16>, vector<8x512xf32> -> vector<8x512xf32>
    %239 = arith.addf %236, %238 : vector<8x512xf32>
    %240 = vector.extract_strided_slice %239 {offsets = [0, 0], sizes = [8, 384], strides = [1, 1]} : vector<8x512xf32> to vector<8x384xf32>
    %241 = arith.negf %240 : vector<8x384xf32>
    %242 = math.exp %241 : vector<8x384xf32>
    %cst_50 = arith.constant 1.000000e+00 : f32
    %243 = vector.broadcast %cst_50 : f32 to vector<8x384xf32>
    %244 = arith.addf %243, %242 : vector<8x384xf32>
    %245 = arith.divf %243, %244 : vector<8x384xf32>
    %246 = vector.extract_strided_slice %239 {offsets = [0, 384], sizes = [8, 128], strides = [1, 1]} : vector<8x512xf32> to vector<8x128xf32>
    %247 = math.tanh %246 : vector<8x128xf32>
    %248 = vector.extract_strided_slice %245 {offsets = [0, 0], sizes = [8, 128], strides = [1, 1]} : vector<8x384xf32> to vector<8x128xf32>
    %249 = vector.extract_strided_slice %245 {offsets = [0, 128], sizes = [8, 128], strides = [1, 1]} : vector<8x384xf32> to vector<8x128xf32>
    %250 = vector.extract_strided_slice %245 {offsets = [0, 256], sizes = [8, 128], strides = [1, 1]} : vector<8x384xf32> to vector<8x128xf32>
    %251 = arith.mulf %249, %233 : vector<8x128xf32>
    %252 = arith.mulf %248, %247 : vector<8x128xf32>
    %253 = arith.addf %251, %252 : vector<8x128xf32>
    %254 = math.tanh %253 : vector<8x128xf32>
    %255 = arith.mulf %250, %254 : vector<8x128xf32>
    %256 = vector.broadcast %c7_i32 : i32 to vector<8x1xi32>
    %257 = arith.cmpi slt, %256, %3 : vector<8x1xi32>
    %258 = vector.shape_cast %257 : vector<8x1xi1> to vector<8x1xi1>
    %259 = vector.broadcast %258 : vector<8x1xi1> to vector<8x128xi1>
    %260 = arith.select %259, %255, %230 : vector<8x128xi1>, vector<8x128xf32>
    %261 = vector.shape_cast %257 : vector<8x1xi1> to vector<8x1xi1>
    %262 = vector.broadcast %261 : vector<8x1xi1> to vector<8x128xi1>
    %263 = arith.select %262, %253, %233 : vector<8x128xi1>, vector<8x128xf32>
    %c8_i32 = arith.constant 8 : i32
    %c0_51 = arith.constant 0 : index
    %c0_52 = arith.constant 0 : index
    %264 = vector.load %arg14[%c0_51, %c0_52] : memref<8x128xf32, #tpu.memory_space<vmem>>, vector<8x128xf32>
    tpu.vector_store %arg14[%c0_51, %c0_52], %260 {strides = array<i32>} : memref<8x128xf32, #tpu.memory_space<vmem>>, vector<8x128xf32>,
    %c0_53 = arith.constant 0 : index
    %c0_54 = arith.constant 0 : index
    %265 = vector.load %arg7[%c0_53, %c0_54] : memref<128x512xbf16, #tpu.memory_space<vmem>>, vector<128x512xbf16>
    %c0_55 = arith.constant 0 : index
    %c0_56 = arith.constant 0 : index
    %266 = vector.load %arg8[%c0_55, %c0_56] : memref<128x512xbf16, #tpu.memory_space<vmem>>, vector<128x512xbf16>
    %c0_57 = arith.constant 0 : index
    %c0_58 = arith.constant 0 : index
    %267 = vector.load %arg9[%c0_57, %c0_58] : memref<1x512xf32, #tpu.memory_space<vmem>>, vector<1x512xf32>
    %cst_59 = arith.constant 0.000000e+00 : f32
    %268 = vector.broadcast %cst_59 : f32 to vector<2x128xf32>
    %cst_60 = arith.constant 0.000000e+00 : f32
    %269 = vector.broadcast %cst_60 : f32 to vector<2x128xf32>
    %c0_i32_61 = arith.constant 0 : i32
    %c2_i32_62 = arith.constant 2 : i32
    %270 = arith.muli %c0_i32_61, %c2_i32_62 : i32
    %271 = arith.index_cast %270 : i32 to index
    %c0_63 = arith.constant 0 : index
    %272 = vector.load %arg14[%271, %c0_63] : memref<8x128xf32, #tpu.memory_space<vmem>>, vector<2x128xf32>
    %273 = arith.truncf %272 : vector<2x128xf32> to vector<2x128xbf16>
    %cst_64 = arith.constant dense<0.000000e+00> : vector<2x512xf32>
    %274 = tpu.matmul %273, %265, %cst_64 {dimension_numbers = #tpu.dot_dimension_numbers<[1], [0], [0], [1], [0, 0, 1, 1], [], []>} : vector<2x128xbf16>, vector<128x512xbf16>, vector<2x512xf32> -> vector<2x512xf32>
    %275 = arith.truncf %268 : vector<2x128xf32> to vector<2x128xbf16>
    %cst_65 = arith.constant dense<0.000000e+00> : vector<2x512xf32>
    %276 = tpu.matmul %275, %266, %cst_65 {dimension_numbers = #tpu.dot_dimension_numbers<[1], [0], [0], [1], [0, 0, 1, 1], [], []>} : vector<2x128xbf16>, vector<128x512xbf16>, vector<2x512xf32> -> vector<2x512xf32>
    %277 = arith.addf %274, %276 : vector<2x512xf32>
    %278 = vector.broadcast %267 : vector<1x512xf32> to vector<2x512xf32>
    %279 = arith.addf %277, %278 : vector<2x512xf32>
    %280 = vector.extract_strided_slice %279 {offsets = [0, 0], sizes = [2, 384], strides = [1, 1]} : vector<2x512xf32> to vector<2x384xf32>
    %281 = arith.negf %280 : vector<2x384xf32>
    %282 = math.exp %281 : vector<2x384xf32>
    %cst_66 = arith.constant 1.000000e+00 : f32
    %283 = vector.broadcast %cst_66 : f32 to vector<2x384xf32>
    %284 = arith.addf %283, %282 : vector<2x384xf32>
    %285 = arith.divf %283, %284 : vector<2x384xf32>
    %286 = vector.extract_strided_slice %279 {offsets = [0, 384], sizes = [2, 128], strides = [1, 1]} : vector<2x512xf32> to vector<2x128xf32>
    %287 = math.tanh %286 : vector<2x128xf32>
    %288 = vector.extract_strided_slice %285 {offsets = [0, 0], sizes = [2, 128], strides = [1, 1]} : vector<2x384xf32> to vector<2x128xf32>
    %289 = vector.extract_strided_slice %285 {offsets = [0, 128], sizes = [2, 128], strides = [1, 1]} : vector<2x384xf32> to vector<2x128xf32>
    %290 = vector.extract_strided_slice %285 {offsets = [0, 256], sizes = [2, 128], strides = [1, 1]} : vector<2x384xf32> to vector<2x128xf32>
    %291 = arith.mulf %289, %269 : vector<2x128xf32>
    %292 = arith.mulf %288, %287 : vector<2x128xf32>
    %293 = arith.addf %291, %292 : vector<2x128xf32>
    %294 = math.tanh %293 : vector<2x128xf32>
    %295 = arith.mulf %290, %294 : vector<2x128xf32>
    %c1_i32_67 = arith.constant 1 : i32
    %c2_i32_68 = arith.constant 2 : i32
    %296 = arith.muli %c1_i32_67, %c2_i32_68 : i32
    %297 = arith.index_cast %296 : i32 to index
    %c0_69 = arith.constant 0 : index
    %298 = vector.load %arg14[%297, %c0_69] : memref<8x128xf32, #tpu.memory_space<vmem>>, vector<2x128xf32>
    %299 = arith.truncf %298 : vector<2x128xf32> to vector<2x128xbf16>
    %cst_70 = arith.constant dense<0.000000e+00> : vector<2x512xf32>
    %300 = tpu.matmul %299, %265, %cst_70 {dimension_numbers = #tpu.dot_dimension_numbers<[1], [0], [0], [1], [0, 0, 1, 1], [], []>} : vector<2x128xbf16>, vector<128x512xbf16>, vector<2x512xf32> -> vector<2x512xf32>
    %301 = arith.truncf %295 : vector<2x128xf32> to vector<2x128xbf16>
    %cst_71 = arith.constant dense<0.000000e+00> : vector<2x512xf32>
    %302 = tpu.matmul %301, %266, %cst_71 {dimension_numbers = #tpu.dot_dimension_numbers<[1], [0], [0], [1], [0, 0, 1, 1], [], []>} : vector<2x128xbf16>, vector<128x512xbf16>, vector<2x512xf32> -> vector<2x512xf32>
    %303 = arith.addf %300, %302 : vector<2x512xf32>
    %304 = vector.broadcast %267 : vector<1x512xf32> to vector<2x512xf32>
    %305 = arith.addf %303, %304 : vector<2x512xf32>
    %306 = vector.extract_strided_slice %305 {offsets = [0, 0], sizes = [2, 384], strides = [1, 1]} : vector<2x512xf32> to vector<2x384xf32>
    %307 = arith.negf %306 : vector<2x384xf32>
    %308 = math.exp %307 : vector<2x384xf32>
    %cst_72 = arith.constant 1.000000e+00 : f32
    %309 = vector.broadcast %cst_72 : f32 to vector<2x384xf32>
    %310 = arith.addf %309, %308 : vector<2x384xf32>
    %311 = arith.divf %309, %310 : vector<2x384xf32>
    %312 = vector.extract_strided_slice %305 {offsets = [0, 384], sizes = [2, 128], strides = [1, 1]} : vector<2x512xf32> to vector<2x128xf32>
    %313 = math.tanh %312 : vector<2x128xf32>
    %314 = vector.extract_strided_slice %311 {offsets = [0, 0], sizes = [2, 128], strides = [1, 1]} : vector<2x384xf32> to vector<2x128xf32>
    %315 = vector.extract_strided_slice %311 {offsets = [0, 128], sizes = [2, 128], strides = [1, 1]} : vector<2x384xf32> to vector<2x128xf32>
    %316 = vector.extract_strided_slice %311 {offsets = [0, 256], sizes = [2, 128], strides = [1, 1]} : vector<2x384xf32> to vector<2x128xf32>
    %317 = arith.mulf %315, %293 : vector<2x128xf32>
    %318 = arith.mulf %314, %313 : vector<2x128xf32>
    %319 = arith.addf %317, %318 : vector<2x128xf32>
    %320 = math.tanh %319 : vector<2x128xf32>
    %321 = arith.mulf %316, %320 : vector<2x128xf32>
    %c2_i32_73 = arith.constant 2 : i32
    %c2_i32_74 = arith.constant 2 : i32
    %322 = arith.muli %c2_i32_73, %c2_i32_74 : i32
    %323 = arith.index_cast %322 : i32 to index
    %c0_75 = arith.constant 0 : index
    %324 = vector.load %arg14[%323, %c0_75] : memref<8x128xf32, #tpu.memory_space<vmem>>, vector<2x128xf32>
    %325 = arith.truncf %324 : vector<2x128xf32> to vector<2x128xbf16>
    %cst_76 = arith.constant dense<0.000000e+00> : vector<2x512xf32>
    %326 = tpu.matmul %325, %265, %cst_76 {dimension_numbers = #tpu.dot_dimension_numbers<[1], [0], [0], [1], [0, 0, 1, 1], [], []>} : vector<2x128xbf16>, vector<128x512xbf16>, vector<2x512xf32> -> vector<2x512xf32>
    %327 = arith.truncf %321 : vector<2x128xf32> to vector<2x128xbf16>
    %cst_77 = arith.constant dense<0.000000e+00> : vector<2x512xf32>
    %328 = tpu.matmul %327, %266, %cst_77 {dimension_numbers = #tpu.dot_dimension_numbers<[1], [0], [0], [1], [0, 0, 1, 1], [], []>} : vector<2x128xbf16>, vector<128x512xbf16>, vector<2x512xf32> -> vector<2x512xf32>
    %329 = arith.addf %326, %328 : vector<2x512xf32>
    %330 = vector.broadcast %267 : vector<1x512xf32> to vector<2x512xf32>
    %331 = arith.addf %329, %330 : vector<2x512xf32>
    %332 = vector.extract_strided_slice %331 {offsets = [0, 0], sizes = [2, 384], strides = [1, 1]} : vector<2x512xf32> to vector<2x384xf32>
    %333 = arith.negf %332 : vector<2x384xf32>
    %334 = math.exp %333 : vector<2x384xf32>
    %cst_78 = arith.constant 1.000000e+00 : f32
    %335 = vector.broadcast %cst_78 : f32 to vector<2x384xf32>
    %336 = arith.addf %335, %334 : vector<2x384xf32>
    %337 = arith.divf %335, %336 : vector<2x384xf32>
    %338 = vector.extract_strided_slice %331 {offsets = [0, 384], sizes = [2, 128], strides = [1, 1]} : vector<2x512xf32> to vector<2x128xf32>
    %339 = math.tanh %338 : vector<2x128xf32>
    %340 = vector.extract_strided_slice %337 {offsets = [0, 0], sizes = [2, 128], strides = [1, 1]} : vector<2x384xf32> to vector<2x128xf32>
    %341 = vector.extract_strided_slice %337 {offsets = [0, 128], sizes = [2, 128], strides = [1, 1]} : vector<2x384xf32> to vector<2x128xf32>
    %342 = vector.extract_strided_slice %337 {offsets = [0, 256], sizes = [2, 128], strides = [1, 1]} : vector<2x384xf32> to vector<2x128xf32>
    %343 = arith.mulf %341, %319 : vector<2x128xf32>
    %344 = arith.mulf %340, %339 : vector<2x128xf32>
    %345 = arith.addf %343, %344 : vector<2x128xf32>
    %346 = math.tanh %345 : vector<2x128xf32>
    %347 = arith.mulf %342, %346 : vector<2x128xf32>
    %c3_i32_79 = arith.constant 3 : i32
    %c2_i32_80 = arith.constant 2 : i32
    %348 = arith.muli %c3_i32_79, %c2_i32_80 : i32
    %349 = arith.index_cast %348 : i32 to index
    %c0_81 = arith.constant 0 : index
    %350 = vector.load %arg14[%349, %c0_81] : memref<8x128xf32, #tpu.memory_space<vmem>>, vector<2x128xf32>
    %351 = arith.truncf %350 : vector<2x128xf32> to vector<2x128xbf16>
    %cst_82 = arith.constant dense<0.000000e+00> : vector<2x512xf32>
    %352 = tpu.matmul %351, %265, %cst_82 {dimension_numbers = #tpu.dot_dimension_numbers<[1], [0], [0], [1], [0, 0, 1, 1], [], []>} : vector<2x128xbf16>, vector<128x512xbf16>, vector<2x512xf32> -> vector<2x512xf32>
    %353 = arith.truncf %347 : vector<2x128xf32> to vector<2x128xbf16>
    %cst_83 = arith.constant dense<0.000000e+00> : vector<2x512xf32>
    %354 = tpu.matmul %353, %266, %cst_83 {dimension_numbers = #tpu.dot_dimension_numbers<[1], [0], [0], [1], [0, 0, 1, 1], [], []>} : vector<2x128xbf16>, vector<128x512xbf16>, vector<2x512xf32> -> vector<2x512xf32>
    %355 = arith.addf %352, %354 : vector<2x512xf32>
    %356 = vector.broadcast %267 : vector<1x512xf32> to vector<2x512xf32>
    %357 = arith.addf %355, %356 : vector<2x512xf32>
    %358 = vector.extract_strided_slice %357 {offsets = [0, 0], sizes = [2, 384], strides = [1, 1]} : vector<2x512xf32> to vector<2x384xf32>
    %359 = arith.negf %358 : vector<2x384xf32>
    %360 = math.exp %359 : vector<2x384xf32>
    %cst_84 = arith.constant 1.000000e+00 : f32
    %361 = vector.broadcast %cst_84 : f32 to vector<2x384xf32>
    %362 = arith.addf %361, %360 : vector<2x384xf32>
    %363 = arith.divf %361, %362 : vector<2x384xf32>
    %364 = vector.extract_strided_slice %357 {offsets = [0, 384], sizes = [2, 128], strides = [1, 1]} : vector<2x512xf32> to vector<2x128xf32>
    %365 = math.tanh %364 : vector<2x128xf32>
    %366 = vector.extract_strided_slice %363 {offsets = [0, 0], sizes = [2, 128], strides = [1, 1]} : vector<2x384xf32> to vector<2x128xf32>
    %367 = vector.extract_strided_slice %363 {offsets = [0, 128], sizes = [2, 128], strides = [1, 1]} : vector<2x384xf32> to vector<2x128xf32>
    %368 = vector.extract_strided_slice %363 {offsets = [0, 256], sizes = [2, 128], strides = [1, 1]} : vector<2x384xf32> to vector<2x128xf32>
    %369 = arith.mulf %367, %345 : vector<2x128xf32>
    %370 = arith.mulf %366, %365 : vector<2x128xf32>
    %371 = arith.addf %369, %370 : vector<2x128xf32>
    %372 = math.tanh %371 : vector<2x128xf32>
    %373 = arith.mulf %368, %372 : vector<2x128xf32>
    %c4_i32_85 = arith.constant 4 : i32
    %374 = math.tanh %373 : vector<2x128xf32>
    %375 = arith.truncf %374 : vector<2x128xf32> to vector<2x128xbf16>
    %c0_86 = arith.constant 0 : index
    %c0_87 = arith.constant 0 : index
    %376 = vector.load %arg10[%c0_86, %c0_87] : memref<128x128xbf16, #tpu.memory_space<vmem>>, vector<128x128xbf16>
    %cst_88 = arith.constant dense<0.000000e+00> : vector<2x128xf32>
    %377 = tpu.matmul %375, %376, %cst_88 {dimension_numbers = #tpu.dot_dimension_numbers<[1], [0], [0], [1], [0, 0, 1, 1], [], []>} : vector<2x128xbf16>, vector<128x128xbf16>, vector<2x128xf32> -> vector<2x128xf32>
    %c0_89 = arith.constant 0 : index
    %c0_90 = arith.constant 0 : index
    %378 = vector.load %arg11[%c0_89, %c0_90] : memref<1x128xf32, #tpu.memory_space<vmem>>, vector<1x128xf32>
    %379 = vector.broadcast %378 : vector<1x128xf32> to vector<2x128xf32>
    %380 = arith.addf %377, %379 : vector<2x128xf32>
    %381 = arith.negf %380 : vector<2x128xf32>
    %382 = math.exp %381 : vector<2x128xf32>
    %cst_91 = arith.constant 1.000000e+00 : f32
    %383 = vector.broadcast %cst_91 : f32 to vector<2x128xf32>
    %384 = arith.addf %383, %382 : vector<2x128xf32>
    %385 = arith.divf %383, %384 : vector<2x128xf32>
    %c0_92 = arith.constant 0 : index
    %c0_93 = arith.constant 0 : index
    %c0_94 = arith.constant 0 : index
    %386 = vector.load %arg12[%c0_92, %c0_93, %c0_94] : memref<1x2x128xf32, #tpu.memory_space<vmem>>, vector<1x2x128xf32>
    %387 = vector.shape_cast %386 : vector<1x2x128xf32> to vector<2x128xf32>
    %388 = vector.shape_cast %385 : vector<2x128xf32> to vector<1x2x128xf32>
    tpu.vector_store %arg12[%c0_92, %c0_93, %c0_94], %388 {strides = array<i32>} : memref<1x2x128xf32, #tpu.memory_space<vmem>>, vector<1x2x128xf32>,
    return
  }
  func.func @transform_0(%arg0: i32) -> (i32, i32, i32) {
    %c0_i32 = arith.constant 0 : i32
    %c0_i32_0 = arith.constant 0 : i32
    %c0_i32_1 = arith.constant 0 : i32
    return %arg0, %c0_i32, %c0_i32_0 : i32, i32, i32
  }
  func.func @transform_1(%arg0: i32) -> (i32, i32, i32) {
    %c0_i32 = arith.constant 0 : i32
    %c0_i32_0 = arith.constant 0 : i32
    %c0_i32_1 = arith.constant 0 : i32
    return %arg0, %c0_i32, %c0_i32_0 : i32, i32, i32
  }
  func.func @transform_2(%arg0: i32) -> (i32, i32) {
    %c0_i32 = arith.constant 0 : i32
    %c0_i32_0 = arith.constant 0 : i32
    %c0_i32_1 = arith.constant 0 : i32
    return %c0_i32, %c0_i32_0 : i32, i32
  }
  func.func @transform_3(%arg0: i32) -> (i32, i32) {
    %c0_i32 = arith.constant 0 : i32
    %c0_i32_0 = arith.constant 0 : i32
    %c0_i32_1 = arith.constant 0 : i32
    return %c0_i32, %c0_i32_0 : i32, i32
  }
  func.func @transform_4(%arg0: i32) -> (i32, i32) {
    %c0_i32 = arith.constant 0 : i32
    %c0_i32_0 = arith.constant 0 : i32
    %c0_i32_1 = arith.constant 0 : i32
    return %c0_i32, %c0_i32_0 : i32, i32
  }
  func.func @transform_5(%arg0: i32) -> (i32, i32) {
    %c0_i32 = arith.constant 0 : i32
    %c0_i32_0 = arith.constant 0 : i32
    %c0_i32_1 = arith.constant 0 : i32
    return %c0_i32, %c0_i32_0 : i32, i32
  }
  func.func @transform_6(%arg0: i32) -> (i32, i32) {
    %c0_i32 = arith.constant 0 : i32
    %c0_i32_0 = arith.constant 0 : i32
    %c0_i32_1 = arith.constant 0 : i32
    return %c0_i32, %c0_i32_0 : i32, i32
  }
  func.func @transform_7(%arg0: i32) -> (i32, i32) {
    %c0_i32 = arith.constant 0 : i32
    %c0_i32_0 = arith.constant 0 : i32
    %c0_i32_1 = arith.constant 0 : i32
    return %c0_i32, %c0_i32_0 : i32, i32
  }
  func.func @transform_8(%arg0: i32) -> (i32, i32) {
    %c0_i32 = arith.constant 0 : i32
    %c0_i32_0 = arith.constant 0 : i32
    %c0_i32_1 = arith.constant 0 : i32
    return %c0_i32, %c0_i32_0 : i32, i32
  }
  func.func @transform_9(%arg0: i32) -> (i32, i32) {
    %c0_i32 = arith.constant 0 : i32
    %c0_i32_0 = arith.constant 0 : i32
    %c0_i32_1 = arith.constant 0 : i32
    return %c0_i32, %c0_i32_0 : i32, i32
  }
  func.func @transform_10(%arg0: i32) -> (i32, i32) {
    %c0_i32 = arith.constant 0 : i32
    %c0_i32_0 = arith.constant 0 : i32
    %c0_i32_1 = arith.constant 0 : i32
    return %c0_i32, %c0_i32_0 : i32, i32
  }
  func.func @transform_11(%arg0: i32) -> (i32, i32, i32) {
    %c0_i32 = arith.constant 0 : i32
    %c0_i32_0 = arith.constant 0 : i32
    %c0_i32_1 = arith.constant 0 : i32
    return %arg0, %c0_i32, %c0_i32_0 : i32, i32, i32
  }
}

module attributes {stable_mosaic.version = 11 : i64} {
  func.func @_netE_text_kernel(%arg0: i32, %arg1: memref<1x64x1xi32, #tpu.memory_space<vmem>>, %arg2: memref<1x8x1xi32, #tpu.memory_space<vmem>>, %arg3: memref<64x16xbf16, #tpu.memory_space<vmem>>, %arg4: memref<16x512xbf16, #tpu.memory_space<vmem>>, %arg5: memref<128x512xbf16, #tpu.memory_space<vmem>>, %arg6: memref<1x512xf32, #tpu.memory_space<vmem>>, %arg7: memref<128x512xbf16, #tpu.memory_space<vmem>>, %arg8: memref<128x512xbf16, #tpu.memory_space<vmem>>, %arg9: memref<1x512xf32, #tpu.memory_space<vmem>>, %arg10: memref<128x128xbf16, #tpu.memory_space<vmem>>, %arg11: memref<1x128xf32, #tpu.memory_space<vmem>>, %arg12: memref<1x2x128xf32, #tpu.memory_space<vmem>>, %arg13: memref<8x8x512xf32, #tpu.memory_space<vmem>>, %arg14: memref<8x128xf32, #tpu.memory_space<vmem>>) attributes {dimension_semantics = [#tpu.dimension_semantics<parallel>], iteration_bounds = array<i64: 2>, scalar_prefetch = 0 : i64, scratch_operands = 2 : i64, tpu.core_type = #tpu.core_type<tc>, window_params = [{transform_indices = @transform_0, window_bounds = array<i64: 1, 64, 1>}, {transform_indices = @transform_1, window_bounds = array<i64: 1, 8, 1>}, {pipeline_mode = #tpu.pipeline_mode<synchronous>, transform_indices = @transform_2, window_bounds = array<i64: 64, 16>}, {pipeline_mode = #tpu.pipeline_mode<synchronous>, transform_indices = @transform_3, window_bounds = array<i64: 16, 512>}, {pipeline_mode = #tpu.pipeline_mode<synchronous>, transform_indices = @transform_4, window_bounds = array<i64: 128, 512>}, {pipeline_mode = #tpu.pipeline_mode<synchronous>, transform_indices = @transform_5, window_bounds = array<i64: 1, 512>}, {pipeline_mode = #tpu.pipeline_mode<synchronous>, transform_indices = @transform_6, window_bounds = array<i64: 128, 512>}, {pipeline_mode = #tpu.pipeline_mode<synchronous>, transform_indices = @transform_7, window_bounds = array<i64: 128, 512>}, {pipeline_mode = #tpu.pipeline_mode<synchronous>, transform_indices = @transform_8, window_bounds = array<i64: 1, 512>}, {pipeline_mode = #tpu.pipeline_mode<synchronous>, transform_indices = @transform_9, window_bounds = array<i64: 128, 128>}, {pipeline_mode = #tpu.pipeline_mode<synchronous>, transform_indices = @transform_10, window_bounds = array<i64: 1, 128>}, {transform_indices = @transform_11, window_bounds = array<i64: 1, 2, 128>}]} {
    %c0 = arith.constant 0 : index
    %c0_0 = arith.constant 0 : index
    %c0_1 = arith.constant 0 : index
    %0 = vector.load %arg1[%c0, %c0_0, %c0_1] : memref<1x64x1xi32, #tpu.memory_space<vmem>>, vector<1x64x1xi32>
    %1 = vector.shape_cast %0 : vector<1x64x1xi32> to vector<64x1xi32>
    %c0_2 = arith.constant 0 : index
    %c0_3 = arith.constant 0 : index
    %c0_4 = arith.constant 0 : index
    %2 = vector.load %arg2[%c0_2, %c0_3, %c0_4] : memref<1x8x1xi32, #tpu.memory_space<vmem>>, vector<1x8x1xi32>
    %3 = vector.shape_cast %2 : vector<1x8x1xi32> to vector<8x1xi32>
    %4 = tpu.iota {dimensions = array<i32: 1>} : vector<64x64xi32>
    %5 = vector.broadcast %1 : vector<64x1xi32> to vector<64x64xi32>
    %6 = arith.cmpi eq, %5, %4 : vector<64x64xi32>
    %7 = arith.extui %6 : vector<64x64xi1> to vector<64x64xi32>
    %8 = arith.sitofp %7 : vector<64x64xi32> to vector<64x64xf32>
    %9 = arith.truncf %8 : vector<64x64xf32> to vector<64x64xbf16>
    %c0_5 = arith.constant 0 : index
    %c0_6 = arith.constant 0 : index
    %10 = vector.load %arg3[%c0_5, %c0_6] : memref<64x16xbf16, #tpu.memory_space<vmem>>, vector<64x16xbf16>
    %cst = arith.constant dense<0.000000e+00> : vector<64x16xf32>
    %11 = tpu.matmul %9, %10, %cst {dimension_numbers = #tpu.dot_dimension_numbers<[1], [0], [0], [1], [0, 0, 1, 1], [], []>} : vector<64x64xbf16>, vector<64x16xbf16>, vector<64x16xf32> -> vector<64x16xf32>
    %12 = math.tanh %11 : vector<64x16xf32>
    %13 = arith.truncf %12 : vector<64x16xf32> to vector<64x16xbf16>
    %c0_7 = arith.constant 0 : index
    %c0_8 = arith.constant 0 : index
    %14 = vector.load %arg4[%c0_7, %c0_8] : memref<16x512xbf16, #tpu.memory_space<vmem>>, vector<16x512xbf16>
    %cst_9 = arith.constant dense<0.000000e+00> : vector<64x512xf32>
    %15 = tpu.matmul %13, %14, %cst_9 {dimension_numbers = #tpu.dot_dimension_numbers<[1], [0], [0], [1], [0, 0, 1, 1], [], []>} : vector<64x16xbf16>, vector<16x512xbf16>, vector<64x512xf32> -> vector<64x512xf32>
    %c0_10 = arith.constant 0 : index
    %c0_11 = arith.constant 0 : index
    %16 = vector.load %arg6[%c0_10, %c0_11] : memref<1x512xf32, #tpu.memory_space<vmem>>, vector<1x512xf32>
    %17 = vector.broadcast %16 : vector<1x512xf32> to vector<64x512xf32>
    %18 = arith.addf %15, %17 : vector<64x512xf32>
    %19 = vector.shape_cast %18 : vector<64x512xf32> to vector<8x8x512xf32>
    %c0_12 = arith.constant 0 : index
    %c0_13 = arith.constant 0 : index
    %c0_14 = arith.constant 0 : index
    %20 = vector.load %arg13[%c0_12, %c0_13, %c0_14] : memref<8x8x512xf32, #tpu.memory_space<vmem>>, vector<8x8x512xf32>
    tpu.vector_store %arg13[%c0_12, %c0_13, %c0_14], %19 {strides = array<i32>} : memref<8x8x512xf32, #tpu.memory_space<vmem>>, vector<8x8x512xf32>,
    %c0_15 = arith.constant 0 : index
    %c0_16 = arith.constant 0 : index
    %21 = vector.load %arg5[%c0_15, %c0_16] : memref<128x512xbf16, #tpu.memory_space<vmem>>, vector<128x512xbf16>
    %cst_17 = arith.constant 0.000000e+00 : f32
    %22 = vector.broadcast %cst_17 : f32 to vector<8x128xf32>
    %cst_18 = arith.constant 0.000000e+00 : f32
    %23 = vector.broadcast %cst_18 : f32 to vector<8x128xf32>
    %c0_i32 = arith.constant 0 : i32
    %24 = arith.index_cast %c0_i32 : i32 to index
    %c0_19 = arith.constant 0 : index
    %c0_20 = arith.constant 0 : index
    %25 = vector.load %arg13[%24, %c0_19, %c0_20] : memref<8x8x512xf32, #tpu.memory_space<vmem>>, vector<1x8x512xf32>
    %26 = vector.shape_cast %25 : vector<1x8x512xf32> to vector<8x512xf32>
    %27 = arith.truncf %22 : vector<8x128xf32> to vector<8x128xbf16>
    %cst_21 = arith.constant dense<0.000000e+00> : vector<8x512xf32>
    %28 = tpu.matmul %27, %21, %cst_21 {dimension_numbers = #tpu.dot_dimension_numbers<[1], [0], [0], [1], [0, 0, 1, 1], [], []>} : vector<8x128xbf16>, vector<128x512xbf16>, vector<8x512xf32> -> vector<8x512xf32>
    %29 = arith.addf %26, %28 : vector<8x512xf32>
    %30 = vector.extract_strided_slice %29 {offsets = [0, 0], sizes = [8, 384], strides = [1, 1]} : vector<8x512xf32> to vector<8x384xf32>
    %31 = arith.negf %30 : vector<8x384xf32>
    %32 = math.exp %31 : vector<8x384xf32>
    %cst_22 = arith.constant 1.000000e+00 : f32
    %33 = vector.broadcast %cst_22 : f32 to vector<8x384xf32>
    %34 = arith.addf %33, %32 : vector<8x384xf32>
    %35 = arith.divf %33, %34 : vector<8x384xf32>
    %36 = vector.extract_strided_slice %29 {offsets = [0, 384], sizes = [8, 128], strides = [1, 1]} : vector<8x512xf32> to vector<8x128xf32>
    %37 = math.tanh %36 : vector<8x128xf32>
    %38 = vector.extract_strided_slice %35 {offsets = [0, 0], sizes = [8, 128], strides = [1, 1]} : vector<8x384xf32> to vector<8x128xf32>
    %39 = vector.extract_strided_slice %35 {offsets = [0, 128], sizes = [8, 128], strides = [1, 1]} : vector<8x384xf32> to vector<8x128xf32>
    %40 = vector.extract_strided_slice %35 {offsets = [0, 256], sizes = [8, 128], strides = [1, 1]} : vector<8x384xf32> to vector<8x128xf32>
    %41 = arith.mulf %39, %23 : vector<8x128xf32>
    %42 = arith.mulf %38, %37 : vector<8x128xf32>
    %43 = arith.addf %41, %42 : vector<8x128xf32>
    %44 = math.tanh %43 : vector<8x128xf32>
    %45 = arith.mulf %40, %44 : vector<8x128xf32>
    %46 = vector.broadcast %c0_i32 : i32 to vector<8x1xi32>
    %47 = arith.cmpi slt, %46, %3 : vector<8x1xi32>
    %48 = vector.shape_cast %47 : vector<8x1xi1> to vector<8x1xi1>
    %49 = vector.broadcast %48 : vector<8x1xi1> to vector<8x128xi1>
    %50 = arith.select %49, %45, %22 : vector<8x128xi1>, vector<8x128xf32>
    %51 = vector.shape_cast %47 : vector<8x1xi1> to vector<8x1xi1>
    %52 = vector.broadcast %51 : vector<8x1xi1> to vector<8x128xi1>
    %53 = arith.select %52, %43, %23 : vector<8x128xi1>, vector<8x128xf32>
    %c1_i32 = arith.constant 1 : i32
    %54 = arith.index_cast %c1_i32 : i32 to index
    %c0_23 = arith.constant 0 : index
    %c0_24 = arith.constant 0 : index
    %55 = vector.load %arg13[%54, %c0_23, %c0_24] : memref<8x8x512xf32, #tpu.memory_space<vmem>>, vector<1x8x512xf32>
    %56 = vector.shape_cast %55 : vector<1x8x512xf32> to vector<8x512xf32>
    %57 = arith.truncf %50 : vector<8x128xf32> to vector<8x128xbf16>
    %cst_25 = arith.constant dense<0.000000e+00> : vector<8x512xf32>
    %58 = tpu.matmul %57, %21, %cst_25 {dimension_numbers = #tpu.dot_dimension_numbers<[1], [0], [0], [1], [0, 0, 1, 1], [], []>} : vector<8x128xbf16>, vector<128x512xbf16>, vector<8x512xf32> -> vector<8x512xf32>
    %59 = arith.addf %56, %58 : vector<8x512xf32>
    %60 = vector.extract_strided_slice %59 {offsets = [0, 0], sizes = [8, 384], strides = [1, 1]} : vector<8x512xf32> to vector<8x384xf32>
    %61 = arith.negf %60 : vector<8x384xf32>
    %62 = math.exp %61 : vector<8x384xf32>
    %cst_26 = arith.constant 1.000000e+00 : f32
    %63 = vector.broadcast %cst_26 : f32 to vector<8x384xf32>
    %64 = arith.addf %63, %62 : vector<8x384xf32>
    %65 = arith.divf %63, %64 : vector<8x384xf32>
    %66 = vector.extract_strided_slice %59 {offsets = [0, 384], sizes = [8, 128], strides = [1, 1]} : vector<8x512xf32> to vector<8x128xf32>
    %67 = math.tanh %66 : vector<8x128xf32>
    %68 = vector.extract_strided_slice %65 {offsets = [0, 0], sizes = [8, 128], strides = [1, 1]} : vector<8x384xf32> to vector<8x128xf32>
    %69 = vector.extract_strided_slice %65 {offsets = [0, 128], sizes = [8, 128], strides = [1, 1]} : vector<8x384xf32> to vector<8x128xf32>
    %70 = vector.extract_strided_slice %65 {offsets = [0, 256], sizes = [8, 128], strides = [1, 1]} : vector<8x384xf32> to vector<8x128xf32>
    %71 = arith.mulf %69, %53 : vector<8x128xf32>
    %72 = arith.mulf %68, %67 : vector<8x128xf32>
    %73 = arith.addf %71, %72 : vector<8x128xf32>
    %74 = math.tanh %73 : vector<8x128xf32>
    %75 = arith.mulf %70, %74 : vector<8x128xf32>
    %76 = vector.broadcast %c1_i32 : i32 to vector<8x1xi32>
    %77 = arith.cmpi slt, %76, %3 : vector<8x1xi32>
    %78 = vector.shape_cast %77 : vector<8x1xi1> to vector<8x1xi1>
    %79 = vector.broadcast %78 : vector<8x1xi1> to vector<8x128xi1>
    %80 = arith.select %79, %75, %50 : vector<8x128xi1>, vector<8x128xf32>
    %81 = vector.shape_cast %77 : vector<8x1xi1> to vector<8x1xi1>
    %82 = vector.broadcast %81 : vector<8x1xi1> to vector<8x128xi1>
    %83 = arith.select %82, %73, %53 : vector<8x128xi1>, vector<8x128xf32>
    %c2_i32 = arith.constant 2 : i32
    %84 = arith.index_cast %c2_i32 : i32 to index
    %c0_27 = arith.constant 0 : index
    %c0_28 = arith.constant 0 : index
    %85 = vector.load %arg13[%84, %c0_27, %c0_28] : memref<8x8x512xf32, #tpu.memory_space<vmem>>, vector<1x8x512xf32>
    %86 = vector.shape_cast %85 : vector<1x8x512xf32> to vector<8x512xf32>
    %87 = arith.truncf %80 : vector<8x128xf32> to vector<8x128xbf16>
    %cst_29 = arith.constant dense<0.000000e+00> : vector<8x512xf32>
    %88 = tpu.matmul %87, %21, %cst_29 {dimension_numbers = #tpu.dot_dimension_numbers<[1], [0], [0], [1], [0, 0, 1, 1], [], []>} : vector<8x128xbf16>, vector<128x512xbf16>, vector<8x512xf32> -> vector<8x512xf32>
    %89 = arith.addf %86, %88 : vector<8x512xf32>
    %90 = vector.extract_strided_slice %89 {offsets = [0, 0], sizes = [8, 384], strides = [1, 1]} : vector<8x512xf32> to vector<8x384xf32>
    %91 = arith.negf %90 : vector<8x384xf32>
    %92 = math.exp %91 : vector<8x384xf32>
    %cst_30 = arith.constant 1.000000e+00 : f32
    %93 = vector.broadcast %cst_30 : f32 to vector<8x384xf32>
    %94 = arith.addf %93, %92 : vector<8x384xf32>
    %95 = arith.divf %93, %94 : vector<8x384xf32>
    %96 = vector.extract_strided_slice %89 {offsets = [0, 384], sizes = [8, 128], strides = [1, 1]} : vector<8x512xf32> to vector<8x128xf32>
    %97 = math.tanh %96 : vector<8x128xf32>
    %98 = vector.extract_strided_slice %95 {offsets = [0, 0], sizes = [8, 128], strides = [1, 1]} : vector<8x384xf32> to vector<8x128xf32>
    %99 = vector.extract_strided_slice %95 {offsets = [0, 128], sizes = [8, 128], strides = [1, 1]} : vector<8x384xf32> to vector<8x128xf32>
    %100 = vector.extract_strided_slice %95 {offsets = [0, 256], sizes = [8, 128], strides = [1, 1]} : vector<8x384xf32> to vector<8x128xf32>
    %101 = arith.mulf %99, %83 : vector<8x128xf32>
    %102 = arith.mulf %98, %97 : vector<8x128xf32>
    %103 = arith.addf %101, %102 : vector<8x128xf32>
    %104 = math.tanh %103 : vector<8x128xf32>
    %105 = arith.mulf %100, %104 : vector<8x128xf32>
    %106 = vector.broadcast %c2_i32 : i32 to vector<8x1xi32>
    %107 = arith.cmpi slt, %106, %3 : vector<8x1xi32>
    %108 = vector.shape_cast %107 : vector<8x1xi1> to vector<8x1xi1>
    %109 = vector.broadcast %108 : vector<8x1xi1> to vector<8x128xi1>
    %110 = arith.select %109, %105, %80 : vector<8x128xi1>, vector<8x128xf32>
    %111 = vector.shape_cast %107 : vector<8x1xi1> to vector<8x1xi1>
    %112 = vector.broadcast %111 : vector<8x1xi1> to vector<8x128xi1>
    %113 = arith.select %112, %103, %83 : vector<8x128xi1>, vector<8x128xf32>
    %c3_i32 = arith.constant 3 : i32
    %114 = arith.index_cast %c3_i32 : i32 to index
    %c0_31 = arith.constant 0 : index
    %c0_32 = arith.constant 0 : index
    %115 = vector.load %arg13[%114, %c0_31, %c0_32] : memref<8x8x512xf32, #tpu.memory_space<vmem>>, vector<1x8x512xf32>
    %116 = vector.shape_cast %115 : vector<1x8x512xf32> to vector<8x512xf32>
    %117 = arith.truncf %110 : vector<8x128xf32> to vector<8x128xbf16>
    %cst_33 = arith.constant dense<0.000000e+00> : vector<8x512xf32>
    %118 = tpu.matmul %117, %21, %cst_33 {dimension_numbers = #tpu.dot_dimension_numbers<[1], [0], [0], [1], [0, 0, 1, 1], [], []>} : vector<8x128xbf16>, vector<128x512xbf16>, vector<8x512xf32> -> vector<8x512xf32>
    %119 = arith.addf %116, %118 : vector<8x512xf32>
    %120 = vector.extract_strided_slice %119 {offsets = [0, 0], sizes = [8, 384], strides = [1, 1]} : vector<8x512xf32> to vector<8x384xf32>
    %121 = arith.negf %120 : vector<8x384xf32>
    %122 = math.exp %121 : vector<8x384xf32>
    %cst_34 = arith.constant 1.000000e+00 : f32
    %123 = vector.broadcast %cst_34 : f32 to vector<8x384xf32>
    %124 = arith.addf %123, %122 : vector<8x384xf32>
    %125 = arith.divf %123, %124 : vector<8x384xf32>
    %126 = vector.extract_strided_slice %119 {offsets = [0, 384], sizes = [8, 128], strides = [1, 1]} : vector<8x512xf32> to vector<8x128xf32>
    %127 = math.tanh %126 : vector<8x128xf32>
    %128 = vector.extract_strided_slice %125 {offsets = [0, 0], sizes = [8, 128], strides = [1, 1]} : vector<8x384xf32> to vector<8x128xf32>
    %129 = vector.extract_strided_slice %125 {offsets = [0, 128], sizes = [8, 128], strides = [1, 1]} : vector<8x384xf32> to vector<8x128xf32>
    %130 = vector.extract_strided_slice %125 {offsets = [0, 256], sizes = [8, 128], strides = [1, 1]} : vector<8x384xf32> to vector<8x128xf32>
    %131 = arith.mulf %129, %113 : vector<8x128xf32>
    %132 = arith.mulf %128, %127 : vector<8x128xf32>
    %133 = arith.addf %131, %132 : vector<8x128xf32>
    %134 = math.tanh %133 : vector<8x128xf32>
    %135 = arith.mulf %130, %134 : vector<8x128xf32>
    %136 = vector.broadcast %c3_i32 : i32 to vector<8x1xi32>
    %137 = arith.cmpi slt, %136, %3 : vector<8x1xi32>
    %138 = vector.shape_cast %137 : vector<8x1xi1> to vector<8x1xi1>
    %139 = vector.broadcast %138 : vector<8x1xi1> to vector<8x128xi1>
    %140 = arith.select %139, %135, %110 : vector<8x128xi1>, vector<8x128xf32>
    %141 = vector.shape_cast %137 : vector<8x1xi1> to vector<8x1xi1>
    %142 = vector.broadcast %141 : vector<8x1xi1> to vector<8x128xi1>
    %143 = arith.select %142, %133, %113 : vector<8x128xi1>, vector<8x128xf32>
    %c4_i32 = arith.constant 4 : i32
    %144 = arith.index_cast %c4_i32 : i32 to index
    %c0_35 = arith.constant 0 : index
    %c0_36 = arith.constant 0 : index
    %145 = vector.load %arg13[%144, %c0_35, %c0_36] : memref<8x8x512xf32, #tpu.memory_space<vmem>>, vector<1x8x512xf32>
    %146 = vector.shape_cast %145 : vector<1x8x512xf32> to vector<8x512xf32>
    %147 = arith.truncf %140 : vector<8x128xf32> to vector<8x128xbf16>
    %cst_37 = arith.constant dense<0.000000e+00> : vector<8x512xf32>
    %148 = tpu.matmul %147, %21, %cst_37 {dimension_numbers = #tpu.dot_dimension_numbers<[1], [0], [0], [1], [0, 0, 1, 1], [], []>} : vector<8x128xbf16>, vector<128x512xbf16>, vector<8x512xf32> -> vector<8x512xf32>
    %149 = arith.addf %146, %148 : vector<8x512xf32>
    %150 = vector.extract_strided_slice %149 {offsets = [0, 0], sizes = [8, 384], strides = [1, 1]} : vector<8x512xf32> to vector<8x384xf32>
    %151 = arith.negf %150 : vector<8x384xf32>
    %152 = math.exp %151 : vector<8x384xf32>
    %cst_38 = arith.constant 1.000000e+00 : f32
    %153 = vector.broadcast %cst_38 : f32 to vector<8x384xf32>
    %154 = arith.addf %153, %152 : vector<8x384xf32>
    %155 = arith.divf %153, %154 : vector<8x384xf32>
    %156 = vector.extract_strided_slice %149 {offsets = [0, 384], sizes = [8, 128], strides = [1, 1]} : vector<8x512xf32> to vector<8x128xf32>
    %157 = math.tanh %156 : vector<8x128xf32>
    %158 = vector.extract_strided_slice %155 {offsets = [0, 0], sizes = [8, 128], strides = [1, 1]} : vector<8x384xf32> to vector<8x128xf32>
    %159 = vector.extract_strided_slice %155 {offsets = [0, 128], sizes = [8, 128], strides = [1, 1]} : vector<8x384xf32> to vector<8x128xf32>
    %160 = vector.extract_strided_slice %155 {offsets = [0, 256], sizes = [8, 128], strides = [1, 1]} : vector<8x384xf32> to vector<8x128xf32>
    %161 = arith.mulf %159, %143 : vector<8x128xf32>
    %162 = arith.mulf %158, %157 : vector<8x128xf32>
    %163 = arith.addf %161, %162 : vector<8x128xf32>
    %164 = math.tanh %163 : vector<8x128xf32>
    %165 = arith.mulf %160, %164 : vector<8x128xf32>
    %166 = vector.broadcast %c4_i32 : i32 to vector<8x1xi32>
    %167 = arith.cmpi slt, %166, %3 : vector<8x1xi32>
    %168 = vector.shape_cast %167 : vector<8x1xi1> to vector<8x1xi1>
    %169 = vector.broadcast %168 : vector<8x1xi1> to vector<8x128xi1>
    %170 = arith.select %169, %165, %140 : vector<8x128xi1>, vector<8x128xf32>
    %171 = vector.shape_cast %167 : vector<8x1xi1> to vector<8x1xi1>
    %172 = vector.broadcast %171 : vector<8x1xi1> to vector<8x128xi1>
    %173 = arith.select %172, %163, %143 : vector<8x128xi1>, vector<8x128xf32>
    %c5_i32 = arith.constant 5 : i32
    %174 = arith.index_cast %c5_i32 : i32 to index
    %c0_39 = arith.constant 0 : index
    %c0_40 = arith.constant 0 : index
    %175 = vector.load %arg13[%174, %c0_39, %c0_40] : memref<8x8x512xf32, #tpu.memory_space<vmem>>, vector<1x8x512xf32>
    %176 = vector.shape_cast %175 : vector<1x8x512xf32> to vector<8x512xf32>
    %177 = arith.truncf %170 : vector<8x128xf32> to vector<8x128xbf16>
    %cst_41 = arith.constant dense<0.000000e+00> : vector<8x512xf32>
    %178 = tpu.matmul %177, %21, %cst_41 {dimension_numbers = #tpu.dot_dimension_numbers<[1], [0], [0], [1], [0, 0, 1, 1], [], []>} : vector<8x128xbf16>, vector<128x512xbf16>, vector<8x512xf32> -> vector<8x512xf32>
    %179 = arith.addf %176, %178 : vector<8x512xf32>
    %180 = vector.extract_strided_slice %179 {offsets = [0, 0], sizes = [8, 384], strides = [1, 1]} : vector<8x512xf32> to vector<8x384xf32>
    %181 = arith.negf %180 : vector<8x384xf32>
    %182 = math.exp %181 : vector<8x384xf32>
    %cst_42 = arith.constant 1.000000e+00 : f32
    %183 = vector.broadcast %cst_42 : f32 to vector<8x384xf32>
    %184 = arith.addf %183, %182 : vector<8x384xf32>
    %185 = arith.divf %183, %184 : vector<8x384xf32>
    %186 = vector.extract_strided_slice %179 {offsets = [0, 384], sizes = [8, 128], strides = [1, 1]} : vector<8x512xf32> to vector<8x128xf32>
    %187 = math.tanh %186 : vector<8x128xf32>
    %188 = vector.extract_strided_slice %185 {offsets = [0, 0], sizes = [8, 128], strides = [1, 1]} : vector<8x384xf32> to vector<8x128xf32>
    %189 = vector.extract_strided_slice %185 {offsets = [0, 128], sizes = [8, 128], strides = [1, 1]} : vector<8x384xf32> to vector<8x128xf32>
    %190 = vector.extract_strided_slice %185 {offsets = [0, 256], sizes = [8, 128], strides = [1, 1]} : vector<8x384xf32> to vector<8x128xf32>
    %191 = arith.mulf %189, %173 : vector<8x128xf32>
    %192 = arith.mulf %188, %187 : vector<8x128xf32>
    %193 = arith.addf %191, %192 : vector<8x128xf32>
    %194 = math.tanh %193 : vector<8x128xf32>
    %195 = arith.mulf %190, %194 : vector<8x128xf32>
    %196 = vector.broadcast %c5_i32 : i32 to vector<8x1xi32>
    %197 = arith.cmpi slt, %196, %3 : vector<8x1xi32>
    %198 = vector.shape_cast %197 : vector<8x1xi1> to vector<8x1xi1>
    %199 = vector.broadcast %198 : vector<8x1xi1> to vector<8x128xi1>
    %200 = arith.select %199, %195, %170 : vector<8x128xi1>, vector<8x128xf32>
    %201 = vector.shape_cast %197 : vector<8x1xi1> to vector<8x1xi1>
    %202 = vector.broadcast %201 : vector<8x1xi1> to vector<8x128xi1>
    %203 = arith.select %202, %193, %173 : vector<8x128xi1>, vector<8x128xf32>
    %c6_i32 = arith.constant 6 : i32
    %204 = arith.index_cast %c6_i32 : i32 to index
    %c0_43 = arith.constant 0 : index
    %c0_44 = arith.constant 0 : index
    %205 = vector.load %arg13[%204, %c0_43, %c0_44] : memref<8x8x512xf32, #tpu.memory_space<vmem>>, vector<1x8x512xf32>
    %206 = vector.shape_cast %205 : vector<1x8x512xf32> to vector<8x512xf32>
    %207 = arith.truncf %200 : vector<8x128xf32> to vector<8x128xbf16>
    %cst_45 = arith.constant dense<0.000000e+00> : vector<8x512xf32>
    %208 = tpu.matmul %207, %21, %cst_45 {dimension_numbers = #tpu.dot_dimension_numbers<[1], [0], [0], [1], [0, 0, 1, 1], [], []>} : vector<8x128xbf16>, vector<128x512xbf16>, vector<8x512xf32> -> vector<8x512xf32>
    %209 = arith.addf %206, %208 : vector<8x512xf32>
    %210 = vector.extract_strided_slice %209 {offsets = [0, 0], sizes = [8, 384], strides = [1, 1]} : vector<8x512xf32> to vector<8x384xf32>
    %211 = arith.negf %210 : vector<8x384xf32>
    %212 = math.exp %211 : vector<8x384xf32>
    %cst_46 = arith.constant 1.000000e+00 : f32
    %213 = vector.broadcast %cst_46 : f32 to vector<8x384xf32>
    %214 = arith.addf %213, %212 : vector<8x384xf32>
    %215 = arith.divf %213, %214 : vector<8x384xf32>
    %216 = vector.extract_strided_slice %209 {offsets = [0, 384], sizes = [8, 128], strides = [1, 1]} : vector<8x512xf32> to vector<8x128xf32>
    %217 = math.tanh %216 : vector<8x128xf32>
    %218 = vector.extract_strided_slice %215 {offsets = [0, 0], sizes = [8, 128], strides = [1, 1]} : vector<8x384xf32> to vector<8x128xf32>
    %219 = vector.extract_strided_slice %215 {offsets = [0, 128], sizes = [8, 128], strides = [1, 1]} : vector<8x384xf32> to vector<8x128xf32>
    %220 = vector.extract_strided_slice %215 {offsets = [0, 256], sizes = [8, 128], strides = [1, 1]} : vector<8x384xf32> to vector<8x128xf32>
    %221 = arith.mulf %219, %203 : vector<8x128xf32>
    %222 = arith.mulf %218, %217 : vector<8x128xf32>
    %223 = arith.addf %221, %222 : vector<8x128xf32>
    %224 = math.tanh %223 : vector<8x128xf32>
    %225 = arith.mulf %220, %224 : vector<8x128xf32>
    %226 = vector.broadcast %c6_i32 : i32 to vector<8x1xi32>
    %227 = arith.cmpi slt, %226, %3 : vector<8x1xi32>
    %228 = vector.shape_cast %227 : vector<8x1xi1> to vector<8x1xi1>
    %229 = vector.broadcast %228 : vector<8x1xi1> to vector<8x128xi1>
    %230 = arith.select %229, %225, %200 : vector<8x128xi1>, vector<8x128xf32>
    %231 = vector.shape_cast %227 : vector<8x1xi1> to vector<8x1xi1>
    %232 = vector.broadcast %231 : vector<8x1xi1> to vector<8x128xi1>
    %233 = arith.select %232, %223, %203 : vector<8x128xi1>, vector<8x128xf32>
    %c7_i32 = arith.constant 7 : i32
    %234 = arith.index_cast %c7_i32 : i32 to index
    %c0_47 = arith.constant 0 : index
    %c0_48 = arith.constant 0 : index
    %235 = vector.load %arg13[%234, %c0_47, %c0_48] : memref<8x8x512xf32, #tpu.memory_space<vmem>>, vector<1x8x512xf32>
    %236 = vector.shape_cast %235 : vector<1x8x512xf32> to vector<8x512xf32>
    %237 = arith.truncf %230 : vector<8x128xf32> to vector<8x128xbf16>
    %cst_49 = arith.constant dense<0.000000e+00> : vector<8x512xf32>
    %238 = tpu.matmul %237, %21, %cst_49 {dimension_numbers = #tpu.dot_dimension_numbers<[1], [0], [0], [1], [0, 0, 1, 1], [], []>} : vector<8x128xbf16>, vector<128x512xbf16>, vector<8x512xf32> -> vector<8x512xf32>
    %239 = arith.addf %236, %238 : vector<8x512xf32>
    %240 = vector.extract_strided_slice %239 {offsets = [0, 0], sizes = [8, 384], strides = [1, 1]} : vector<8x512xf32> to vector<8x384xf32>
    %241 = arith.negf %240 : vector<8x384xf32>
    %242 = math.exp %241 : vector<8x384xf32>
    %cst_50 = arith.constant 1.000000e+00 : f32
    %243 = vector.broadcast %cst_50 : f32 to vector<8x384xf32>
    %244 = arith.addf %243, %242 : vector<8x384xf32>
    %245 = arith.divf %243, %244 : vector<8x384xf32>
    %246 = vector.extract_strided_slice %239 {offsets = [0, 384], sizes = [8, 128], strides = [1, 1]} : vector<8x512xf32> to vector<8x128xf32>
    %247 = math.tanh %246 : vector<8x128xf32>
    %248 = vector.extract_strided_slice %245 {offsets = [0, 0], sizes = [8, 128], strides = [1, 1]} : vector<8x384xf32> to vector<8x128xf32>
    %249 = vector.extract_strided_slice %245 {offsets = [0, 128], sizes = [8, 128], strides = [1, 1]} : vector<8x384xf32> to vector<8x128xf32>
    %250 = vector.extract_strided_slice %245 {offsets = [0, 256], sizes = [8, 128], strides = [1, 1]} : vector<8x384xf32> to vector<8x128xf32>
    %251 = arith.mulf %249, %233 : vector<8x128xf32>
    %252 = arith.mulf %248, %247 : vector<8x128xf32>
    %253 = arith.addf %251, %252 : vector<8x128xf32>
    %254 = math.tanh %253 : vector<8x128xf32>
    %255 = arith.mulf %250, %254 : vector<8x128xf32>
    %256 = vector.broadcast %c7_i32 : i32 to vector<8x1xi32>
    %257 = arith.cmpi slt, %256, %3 : vector<8x1xi32>
    %258 = vector.shape_cast %257 : vector<8x1xi1> to vector<8x1xi1>
    %259 = vector.broadcast %258 : vector<8x1xi1> to vector<8x128xi1>
    %260 = arith.select %259, %255, %230 : vector<8x128xi1>, vector<8x128xf32>
    %261 = vector.shape_cast %257 : vector<8x1xi1> to vector<8x1xi1>
    %262 = vector.broadcast %261 : vector<8x1xi1> to vector<8x128xi1>
    %263 = arith.select %262, %253, %233 : vector<8x128xi1>, vector<8x128xf32>
    %c8_i32 = arith.constant 8 : i32
    %c0_51 = arith.constant 0 : index
    %c0_52 = arith.constant 0 : index
    %264 = vector.load %arg14[%c0_51, %c0_52] : memref<8x128xf32, #tpu.memory_space<vmem>>, vector<8x128xf32>
    tpu.vector_store %arg14[%c0_51, %c0_52], %260 {strides = array<i32>} : memref<8x128xf32, #tpu.memory_space<vmem>>, vector<8x128xf32>,
    %c0_53 = arith.constant 0 : index
    %c0_54 = arith.constant 0 : index
    %265 = vector.load %arg7[%c0_53, %c0_54] : memref<128x512xbf16, #tpu.memory_space<vmem>>, vector<128x512xbf16>
    %c0_55 = arith.constant 0 : index
    %c0_56 = arith.constant 0 : index
    %266 = vector.load %arg8[%c0_55, %c0_56] : memref<128x512xbf16, #tpu.memory_space<vmem>>, vector<128x512xbf16>
    %c0_57 = arith.constant 0 : index
    %c0_58 = arith.constant 0 : index
    %267 = vector.load %arg9[%c0_57, %c0_58] : memref<1x512xf32, #tpu.memory_space<vmem>>, vector<1x512xf32>
    %cst_59 = arith.constant 0.000000e+00 : f32
    %268 = vector.broadcast %cst_59 : f32 to vector<2x128xf32>
    %cst_60 = arith.constant 0.000000e+00 : f32
    %269 = vector.broadcast %cst_60 : f32 to vector<2x128xf32>
    %c0_i32_61 = arith.constant 0 : i32
    %c2_i32_62 = arith.constant 2 : i32
    %270 = arith.muli %c0_i32_61, %c2_i32_62 : i32
    %271 = arith.index_cast %270 : i32 to index
    %c0_63 = arith.constant 0 : index
    %272 = vector.load %arg14[%271, %c0_63] : memref<8x128xf32, #tpu.memory_space<vmem>>, vector<2x128xf32>
    %273 = arith.truncf %272 : vector<2x128xf32> to vector<2x128xbf16>
    %cst_64 = arith.constant dense<0.000000e+00> : vector<2x512xf32>
    %274 = tpu.matmul %273, %265, %cst_64 {dimension_numbers = #tpu.dot_dimension_numbers<[1], [0], [0], [1], [0, 0, 1, 1], [], []>} : vector<2x128xbf16>, vector<128x512xbf16>, vector<2x512xf32> -> vector<2x512xf32>
    %275 = arith.truncf %268 : vector<2x128xf32> to vector<2x128xbf16>
    %cst_65 = arith.constant dense<0.000000e+00> : vector<2x512xf32>
    %276 = tpu.matmul %275, %266, %cst_65 {dimension_numbers = #tpu.dot_dimension_numbers<[1], [0], [0], [1], [0, 0, 1, 1], [], []>} : vector<2x128xbf16>, vector<128x512xbf16>, vector<2x512xf32> -> vector<2x512xf32>
    %277 = arith.addf %274, %276 : vector<2x512xf32>
    %278 = vector.broadcast %267 : vector<1x512xf32> to vector<2x512xf32>
    %279 = arith.addf %277, %278 : vector<2x512xf32>
    %280 = vector.extract_strided_slice %279 {offsets = [0, 0], sizes = [2, 384], strides = [1, 1]} : vector<2x512xf32> to vector<2x384xf32>
    %281 = arith.negf %280 : vector<2x384xf32>
    %282 = math.exp %281 : vector<2x384xf32>
    %cst_66 = arith.constant 1.000000e+00 : f32
    %283 = vector.broadcast %cst_66 : f32 to vector<2x384xf32>
    %284 = arith.addf %283, %282 : vector<2x384xf32>
    %285 = arith.divf %283, %284 : vector<2x384xf32>
    %286 = vector.extract_strided_slice %279 {offsets = [0, 384], sizes = [2, 128], strides = [1, 1]} : vector<2x512xf32> to vector<2x128xf32>
    %287 = math.tanh %286 : vector<2x128xf32>
    %288 = vector.extract_strided_slice %285 {offsets = [0, 0], sizes = [2, 128], strides = [1, 1]} : vector<2x384xf32> to vector<2x128xf32>
    %289 = vector.extract_strided_slice %285 {offsets = [0, 128], sizes = [2, 128], strides = [1, 1]} : vector<2x384xf32> to vector<2x128xf32>
    %290 = vector.extract_strided_slice %285 {offsets = [0, 256], sizes = [2, 128], strides = [1, 1]} : vector<2x384xf32> to vector<2x128xf32>
    %291 = arith.mulf %289, %269 : vector<2x128xf32>
    %292 = arith.mulf %288, %287 : vector<2x128xf32>
    %293 = arith.addf %291, %292 : vector<2x128xf32>
    %294 = math.tanh %293 : vector<2x128xf32>
    %295 = arith.mulf %290, %294 : vector<2x128xf32>
    %c1_i32_67 = arith.constant 1 : i32
    %c2_i32_68 = arith.constant 2 : i32
    %296 = arith.muli %c1_i32_67, %c2_i32_68 : i32
    %297 = arith.index_cast %296 : i32 to index
    %c0_69 = arith.constant 0 : index
    %298 = vector.load %arg14[%297, %c0_69] : memref<8x128xf32, #tpu.memory_space<vmem>>, vector<2x128xf32>
    %299 = arith.truncf %298 : vector<2x128xf32> to vector<2x128xbf16>
    %cst_70 = arith.constant dense<0.000000e+00> : vector<2x512xf32>
    %300 = tpu.matmul %299, %265, %cst_70 {dimension_numbers = #tpu.dot_dimension_numbers<[1], [0], [0], [1], [0, 0, 1, 1], [], []>} : vector<2x128xbf16>, vector<128x512xbf16>, vector<2x512xf32> -> vector<2x512xf32>
    %301 = arith.truncf %295 : vector<2x128xf32> to vector<2x128xbf16>
    %cst_71 = arith.constant dense<0.000000e+00> : vector<2x512xf32>
    %302 = tpu.matmul %301, %266, %cst_71 {dimension_numbers = #tpu.dot_dimension_numbers<[1], [0], [0], [1], [0, 0, 1, 1], [], []>} : vector<2x128xbf16>, vector<128x512xbf16>, vector<2x512xf32> -> vector<2x512xf32>
    %303 = arith.addf %300, %302 : vector<2x512xf32>
    %304 = vector.broadcast %267 : vector<1x512xf32> to vector<2x512xf32>
    %305 = arith.addf %303, %304 : vector<2x512xf32>
    %306 = vector.extract_strided_slice %305 {offsets = [0, 0], sizes = [2, 384], strides = [1, 1]} : vector<2x512xf32> to vector<2x384xf32>
    %307 = arith.negf %306 : vector<2x384xf32>
    %308 = math.exp %307 : vector<2x384xf32>
    %cst_72 = arith.constant 1.000000e+00 : f32
    %309 = vector.broadcast %cst_72 : f32 to vector<2x384xf32>
    %310 = arith.addf %309, %308 : vector<2x384xf32>
    %311 = arith.divf %309, %310 : vector<2x384xf32>
    %312 = vector.extract_strided_slice %305 {offsets = [0, 384], sizes = [2, 128], strides = [1, 1]} : vector<2x512xf32> to vector<2x128xf32>
    %313 = math.tanh %312 : vector<2x128xf32>
    %314 = vector.extract_strided_slice %311 {offsets = [0, 0], sizes = [2, 128], strides = [1, 1]} : vector<2x384xf32> to vector<2x128xf32>
    %315 = vector.extract_strided_slice %311 {offsets = [0, 128], sizes = [2, 128], strides = [1, 1]} : vector<2x384xf32> to vector<2x128xf32>
    %316 = vector.extract_strided_slice %311 {offsets = [0, 256], sizes = [2, 128], strides = [1, 1]} : vector<2x384xf32> to vector<2x128xf32>
    %317 = arith.mulf %315, %293 : vector<2x128xf32>
    %318 = arith.mulf %314, %313 : vector<2x128xf32>
    %319 = arith.addf %317, %318 : vector<2x128xf32>
    %320 = math.tanh %319 : vector<2x128xf32>
    %321 = arith.mulf %316, %320 : vector<2x128xf32>
    %c2_i32_73 = arith.constant 2 : i32
    %c2_i32_74 = arith.constant 2 : i32
    %322 = arith.muli %c2_i32_73, %c2_i32_74 : i32
    %323 = arith.index_cast %322 : i32 to index
    %c0_75 = arith.constant 0 : index
    %324 = vector.load %arg14[%323, %c0_75] : memref<8x128xf32, #tpu.memory_space<vmem>>, vector<2x128xf32>
    %325 = arith.truncf %324 : vector<2x128xf32> to vector<2x128xbf16>
    %cst_76 = arith.constant dense<0.000000e+00> : vector<2x512xf32>
    %326 = tpu.matmul %325, %265, %cst_76 {dimension_numbers = #tpu.dot_dimension_numbers<[1], [0], [0], [1], [0, 0, 1, 1], [], []>} : vector<2x128xbf16>, vector<128x512xbf16>, vector<2x512xf32> -> vector<2x512xf32>
    %327 = arith.truncf %321 : vector<2x128xf32> to vector<2x128xbf16>
    %cst_77 = arith.constant dense<0.000000e+00> : vector<2x512xf32>
    %328 = tpu.matmul %327, %266, %cst_77 {dimension_numbers = #tpu.dot_dimension_numbers<[1], [0], [0], [1], [0, 0, 1, 1], [], []>} : vector<2x128xbf16>, vector<128x512xbf16>, vector<2x512xf32> -> vector<2x512xf32>
    %329 = arith.addf %326, %328 : vector<2x512xf32>
    %330 = vector.broadcast %267 : vector<1x512xf32> to vector<2x512xf32>
    %331 = arith.addf %329, %330 : vector<2x512xf32>
    %332 = vector.extract_strided_slice %331 {offsets = [0, 0], sizes = [2, 384], strides = [1, 1]} : vector<2x512xf32> to vector<2x384xf32>
    %333 = arith.negf %332 : vector<2x384xf32>
    %334 = math.exp %333 : vector<2x384xf32>
    %cst_78 = arith.constant 1.000000e+00 : f32
    %335 = vector.broadcast %cst_78 : f32 to vector<2x384xf32>
    %336 = arith.addf %335, %334 : vector<2x384xf32>
    %337 = arith.divf %335, %336 : vector<2x384xf32>
    %338 = vector.extract_strided_slice %331 {offsets = [0, 384], sizes = [2, 128], strides = [1, 1]} : vector<2x512xf32> to vector<2x128xf32>
    %339 = math.tanh %338 : vector<2x128xf32>
    %340 = vector.extract_strided_slice %337 {offsets = [0, 0], sizes = [2, 128], strides = [1, 1]} : vector<2x384xf32> to vector<2x128xf32>
    %341 = vector.extract_strided_slice %337 {offsets = [0, 128], sizes = [2, 128], strides = [1, 1]} : vector<2x384xf32> to vector<2x128xf32>
    %342 = vector.extract_strided_slice %337 {offsets = [0, 256], sizes = [2, 128], strides = [1, 1]} : vector<2x384xf32> to vector<2x128xf32>
    %343 = arith.mulf %341, %319 : vector<2x128xf32>
    %344 = arith.mulf %340, %339 : vector<2x128xf32>
    %345 = arith.addf %343, %344 : vector<2x128xf32>
    %346 = math.tanh %345 : vector<2x128xf32>
    %347 = arith.mulf %342, %346 : vector<2x128xf32>
    %c3_i32_79 = arith.constant 3 : i32
    %c2_i32_80 = arith.constant 2 : i32
    %348 = arith.muli %c3_i32_79, %c2_i32_80 : i32
    %349 = arith.index_cast %348 : i32 to index
    %c0_81 = arith.constant 0 : index
    %350 = vector.load %arg14[%349, %c0_81] : memref<8x128xf32, #tpu.memory_space<vmem>>, vector<2x128xf32>
    %351 = arith.truncf %350 : vector<2x128xf32> to vector<2x128xbf16>
    %cst_82 = arith.constant dense<0.000000e+00> : vector<2x512xf32>
    %352 = tpu.matmul %351, %265, %cst_82 {dimension_numbers = #tpu.dot_dimension_numbers<[1], [0], [0], [1], [0, 0, 1, 1], [], []>} : vector<2x128xbf16>, vector<128x512xbf16>, vector<2x512xf32> -> vector<2x512xf32>
    %353 = arith.truncf %347 : vector<2x128xf32> to vector<2x128xbf16>
    %cst_83 = arith.constant dense<0.000000e+00> : vector<2x512xf32>
    %354 = tpu.matmul %353, %266, %cst_83 {dimension_numbers = #tpu.dot_dimension_numbers<[1], [0], [0], [1], [0, 0, 1, 1], [], []>} : vector<2x128xbf16>, vector<128x512xbf16>, vector<2x512xf32> -> vector<2x512xf32>
    %355 = arith.addf %352, %354 : vector<2x512xf32>
    %356 = vector.broadcast %267 : vector<1x512xf32> to vector<2x512xf32>
    %357 = arith.addf %355, %356 : vector<2x512xf32>
    %358 = vector.extract_strided_slice %357 {offsets = [0, 0], sizes = [2, 384], strides = [1, 1]} : vector<2x512xf32> to vector<2x384xf32>
    %359 = arith.negf %358 : vector<2x384xf32>
    %360 = math.exp %359 : vector<2x384xf32>
    %cst_84 = arith.constant 1.000000e+00 : f32
    %361 = vector.broadcast %cst_84 : f32 to vector<2x384xf32>
    %362 = arith.addf %361, %360 : vector<2x384xf32>
    %363 = arith.divf %361, %362 : vector<2x384xf32>
    %364 = vector.extract_strided_slice %357 {offsets = [0, 384], sizes = [2, 128], strides = [1, 1]} : vector<2x512xf32> to vector<2x128xf32>
    %365 = math.tanh %364 : vector<2x128xf32>
    %366 = vector.extract_strided_slice %363 {offsets = [0, 0], sizes = [2, 128], strides = [1, 1]} : vector<2x384xf32> to vector<2x128xf32>
    %367 = vector.extract_strided_slice %363 {offsets = [0, 128], sizes = [2, 128], strides = [1, 1]} : vector<2x384xf32> to vector<2x128xf32>
    %368 = vector.extract_strided_slice %363 {offsets = [0, 256], sizes = [2, 128], strides = [1, 1]} : vector<2x384xf32> to vector<2x128xf32>
    %369 = arith.mulf %367, %345 : vector<2x128xf32>
    %370 = arith.mulf %366, %365 : vector<2x128xf32>
    %371 = arith.addf %369, %370 : vector<2x128xf32>
    %372 = math.tanh %371 : vector<2x128xf32>
    %373 = arith.mulf %368, %372 : vector<2x128xf32>
    %c4_i32_85 = arith.constant 4 : i32
    %374 = math.tanh %373 : vector<2x128xf32>
    %375 = arith.truncf %374 : vector<2x128xf32> to vector<2x128xbf16>
    %c0_86 = arith.constant 0 : index
    %c0_87 = arith.constant 0 : index
    %376 = vector.load %arg10[%c0_86, %c0_87] : memref<128x128xbf16, #tpu.memory_space<vmem>>, vector<128x128xbf16>
    %cst_88 = arith.constant dense<0.000000e+00> : vector<2x128xf32>
    %377 = tpu.matmul %375, %376, %cst_88 {dimension_numbers = #tpu.dot_dimension_numbers<[1], [0], [0], [1], [0, 0, 1, 1], [], []>} : vector<2x128xbf16>, vector<128x128xbf16>, vector<2x128xf32> -> vector<2x128xf32>
    %c0_89 = arith.constant 0 : index
    %c0_90 = arith.constant 0 : index
    %378 = vector.load %arg11[%c0_89, %c0_90] : memref<1x128xf32, #tpu.memory_space<vmem>>, vector<1x128xf32>
    %379 = vector.broadcast %378 : vector<1x128xf32> to vector<2x128xf32>
    %380 = arith.addf %377, %379 : vector<2x128xf32>
    %381 = arith.negf %380 : vector<2x128xf32>
    %382 = math.exp %381 : vector<2x128xf32>
    %cst_91 = arith.constant 1.000000e+00 : f32
    %383 = vector.broadcast %cst_91 : f32 to vector<2x128xf32>
    %384 = arith.addf %383, %382 : vector<2x128xf32>
    %385 = arith.divf %383, %384 : vector<2x128xf32>
    %c0_92 = arith.constant 0 : index
    %c0_93 = arith.constant 0 : index
    %c0_94 = arith.constant 0 : index
    %386 = vector.load %arg12[%c0_92, %c0_93, %c0_94] : memref<1x2x128xf32, #tpu.memory_space<vmem>>, vector<1x2x128xf32>
    %387 = vector.shape_cast %386 : vector<1x2x128xf32> to vector<2x128xf32>
    %388 = vector.shape_cast %385 : vector<2x128xf32> to vector<1x2x128xf32>
    tpu.vector_store %arg12[%c0_92, %c0_93, %c0_94], %388 {strides = array<i32>} : memref<1x2x128xf32, #tpu.memory_space<vmem>>, vector<1x2x128xf32>,
    return
  }
  func.func @transform_0(%arg0: i32) -> (i32, i32, i32) {
    %c0_i32 = arith.constant 0 : i32
    %c0_i32_0 = arith.constant 0 : i32
    %c0_i32_1 = arith.constant 0 : i32
    return %arg0, %c0_i32, %c0_i32_0 : i32, i32, i32
  }
  func.func @transform_1(%arg0: i32) -> (i32, i32, i32) {
    %c0_i32 = arith.constant 0 : i32
    %c0_i32_0 = arith.constant 0 : i32
    %c0_i32_1 = arith.constant 0 : i32
    return %arg0, %c0_i32, %c0_i32_0 : i32, i32, i32
  }
  func.func @transform_2(%arg0: i32) -> (i32, i32) {
    %c0_i32 = arith.constant 0 : i32
    %c0_i32_0 = arith.constant 0 : i32
    %c0_i32_1 = arith.constant 0 : i32
    return %c0_i32, %c0_i32_0 : i32, i32
  }
  func.func @transform_3(%arg0: i32) -> (i32, i32) {
    %c0_i32 = arith.constant 0 : i32
    %c0_i32_0 = arith.constant 0 : i32
    %c0_i32_1 = arith.constant 0 : i32
    return %c0_i32, %c0_i32_0 : i32, i32
  }
  func.func @transform_4(%arg0: i32) -> (i32, i32) {
    %c0_i32 = arith.constant 0 : i32
    %c0_i32_0 = arith.constant 0 : i32
    %c0_i32_1 = arith.constant 0 : i32
    return %c0_i32, %c0_i32_0 : i32, i32
  }
  func.func @transform_5(%arg0: i32) -> (i32, i32) {
    %c0_i32 = arith.constant 0 : i32
    %c0_i32_0 = arith.constant 0 : i32
    %c0_i32_1 = arith.constant 0 : i32
    return %c0_i32, %c0_i32_0 : i32, i32
  }
  func.func @transform_6(%arg0: i32) -> (i32, i32) {
    %c0_i32 = arith.constant 0 : i32
    %c0_i32_0 = arith.constant 0 : i32
    %c0_i32_1 = arith.constant 0 : i32
    return %c0_i32, %c0_i32_0 : i32, i32
  }
  func.func @transform_7(%arg0: i32) -> (i32, i32) {
    %c0_i32 = arith.constant 0 : i32
    %c0_i32_0 = arith.constant 0 : i32
    %c0_i32_1 = arith.constant 0 : i32
    return %c0_i32, %c0_i32_0 : i32, i32
  }
  func.func @transform_8(%arg0: i32) -> (i32, i32) {
    %c0_i32 = arith.constant 0 : i32
    %c0_i32_0 = arith.constant 0 : i32
    %c0_i32_1 = arith.constant 0 : i32
    return %c0_i32, %c0_i32_0 : i32, i32
  }
  func.func @transform_9(%arg0: i32) -> (i32, i32) {
    %c0_i32 = arith.constant 0 : i32
    %c0_i32_0 = arith.constant 0 : i32
    %c0_i32_1 = arith.constant 0 : i32
    return %c0_i32, %c0_i32_0 : i32, i32
  }
  func.func @transform_10(%arg0: i32) -> (i32, i32) {
    %c0_i32 = arith.constant 0 : i32
    %c0_i32_0 = arith.constant 0 : i32
    %c0_i32_1 = arith.constant 0 : i32
    return %c0_i32, %c0_i32_0 : i32, i32
  }
  func.func @transform_11(%arg0: i32) -> (i32, i32, i32) {
    %c0_i32 = arith.constant 0 : i32
    %c0_i32_0 = arith.constant 0 : i32
    %c0_i32_1 = arith.constant 0 : i32
    return %arg0, %c0_i32, %c0_i32_0 : i32, i32, i32
  }
}

</mosaic_0001>

<bundles_post_ra>
// kernel: tpu_custom_call.1
= control target key start
LH: loop header
LB: loop body
LE: loop exit
PB: predicated region body
PF: predicated region fallthrough
CT: control target
= control target key end

     0   :  { %s5772_s0 = inlined_call_operand.vmem [shape: s32[2,64,1], index: 0, kind: input, shape index: {}]   ;;  %s5773_s1 = inlined_call_operand.vmem [shape: s32[2,8,1], index: 1, kind: input, shape index: {}]   ;;  %s5774_s2 = inlined_call_operand.vmem [shape: bf16[64,16], index: 2, kind: input, shape index: {}]   ;;  %s5775_s3 = inlined_call_operand.vmem [shape: bf16[16,512], index: 3, kind: input, shape index: {}]   ;;  %s5776_s4 = inlined_call_operand.hbm [shape: bf16[128,512], index: 4, kind: input, shape index: {}]   ;;  %s5777_s5 = inlined_call_operand.vmem [shape: f32[1,512], index: 5, kind: input, shape index: {}]   ;;  %s5778_s6 = inlined_call_operand.hbm [shape: bf16[128,512], index: 6, kind: input, shape index: {}]   ;;  %s5779_s7 = inlined_call_operand.hbm [shape: bf16[128,512], index: 7, kind: input, shape index: {}]   ;;  %s5780_s8 = inlined_call_operand.vmem [shape: f32[1,512], index: 8, kind: input, shape index: {}]   ;;  %s5781_s9 = inlined_call_operand.vmem [shape: bf16[128,128], index: 9, kind: input, shape index: {}]   ;;  %s5782_s10 = inlined_call_operand.vmem [shape: f32[1,128], index: 10, kind: input, shape index: {}]   ;;  %s5783_s11 = inlined_call_operand.hbm [shape: f32[2,2,128], index: 11, kind: output, shape index: {}]  }
   0x1   :  { %5878 = sst [smem:[#allocation72_spill]] %s5783_s11 }
   0x2   :  { %16 = vsyncpa [#allocation5], 0 }
   0x3   :  { %17 = vsyncpa [#allocation8], 0 }
   0x4   :  { %18 = vsyncpa [#allocation6], 0 }
   0x5   :  { %20 = vsyncpa [#allocation6 + $0x1], 0  ;;  %s4430_s17 = smov 0   ;;  %s4432_s18 = smov 0  }
   0x6   :  { %s4434_s19 = smov 0   ;;  %s4436_s20 = smov 0  }
   0x7 LB: > { %5879 = sst [smem:[#allocation14_spill]] %s4347_s17  ;;  %s4451_s21 = sadd.s32 4294967295, %s4359_s20   ;;  %s4359_s20 = sphi %s4436_s20, %s6055_s20   ;;  %s4355_s19 = sphi %s4434_s19, %s6057_s19   ;;  %s4351_s18 = sphi %s4432_s18, %s6059_s18   ;;  %s4347_s17 = sphi %s4430_s17, %s6058_s17  }
   0x8   : > { %5880 = sst [smem:[#allocation15_spill]] %s4355_s19  ;;  %s3472_s22 = sadd.s32 4294967294, %s4359_s20  }
   0x9   : > { %5881 = sst [smem:[#allocation16_spill]] %s4359_s20  ;;  %s4455_s23 = sadd.s32 1, %s4359_s20  }
   0xa   : > { %5882 = sst [smem:[#allocation17_spill]] %s4455_s23  ;;  %s274_s24 = sadd.s32 1, %s4355_s19 }
   0xb   : > { %s271_s25 = ssub.s32 %s4359_s20, %s4455_s23  ;;  %p284_p0 = scmp.ne.s32.totalorder %s4355_s19, %s4351_s18 }
   0xc   : > { %p272_p1 = scmp.eq.s32.totalorder %s271_s25, 0  ;;  %p285_p2 = scmp.eq.s32.totalorder %s4451_s21, 1 }
   0xd   : > { %p290_p3 = scmp.ne.s32.totalorder %s4351_s18, %s4347_s17  ;;  %p291_p4 = scmp.eq.s32.totalorder %s3472_s22, 1 }
   0xe   : > { %s4466_s26 = scalar_select %p272_p1, %s4355_s19, %s274_s24  }
   0xf   : > { %p4468_p5 = por %p285_p2, %p284_p0  ;;  %p4472_p6 = por %p291_p4, %p290_p3 }
  0x10   : > { %5883 = sst [smem:[#allocation18_spill]] %s4466_s26  ;;  %p3473_p7 = scmp.ge.s32.totalorder %s4359_s20, 1 }
  0x11   : > { %s5884_s27 = scalar_select %p4468_p5, 1, 0 }
  0x12   : > { %s5885_s28 = scalar_select %p4472_p6, 1, 0 }
  0x13   : > { %p298_p8 = scmp.lt.s32.totalorder %s4359_s20, 3  ;;  %p5787_p9 = scmp.eq.s32.totalorder %s4451_s21, 0 }
  0x14   : > { %5886 = sst [smem:[#allocation19_spill]] %s5885_s28  ;;  %s4361_s30 = smov [#allocation7]  }
  0x15   : > { %p4479_p10 = pnand %p3473_p7, %p298_p8  ;;  %s332_s12 = sshll.u32 %s4361_s30, 4  ;;  %s4485_s12 = int_to_ptr.vmem [resolvable:$true] %s332_s12 }
  0x16   : > { %s4362_s14 = smov [#allocation4]   ;;  %s4363_s16 = smov [#allocation9]  }
  0x17   : > { %s5887_s29 = scalar_select %p4479_p10, 1, 0 }
  0x18   : > { %p3734_p11 = pneg %p4479_p10  ;;  %s316_s15 = sshll.u32 %s4362_s14, 4  ;;  %s4493_s15 = int_to_ptr.vmem [resolvable:$true] %s316_s15 }
  0x19   : > { %s4495_s22 = sshll.u32 %s4363_s16, 4  ;;  %s4205_s26 = scalar_lea.hbm %s5778_s6, 4096  ;;  %s346_s22 = int_to_ptr.vmem [resolvable:$true] %s4495_s22 }
  0x1a   : > { %p4489_p12 = pnand %p5787_p9, %p3734_p11  ;;  %p4206_p13 = scmp.ne.s32.totalorder %s5778_s6, %s4205_s26 }
  0x1b   : > { %p4212_p3 = scmp.lt.u32.totalorder %s4205_s26, %s5778_s6 }
  0x1c   : > { %p4505_p0 = pneg %p4489_p12 }
  0x1e   : > { %p4208_p1 = pnand %p4505_p0, %p4206_p13 }
  0x20   : > { %p4209_p2 = pneg %p4208_p1 }
  0x22   : > { %p4214_p4 = pnand %p4212_p3, %p4209_p2 }
  0x24   : > { %4217 = shalt.err (!%p4214_p4)
}
  0x25   : > { %s4218_s19 = scalar_lea.vmem %s4485_s12, 4096  ;;  %p4226_p9 = scmp.lt.s32.totalorder %s4485_s12, %s4485_s12 }
  0x26   : > { %p4219_p7 = scmp.ne.s32.totalorder %s4485_s12, %s4218_s19  ;;  %p4227_p6 = scmp.lt.s32.totalorder %s4218_s19, %s4218_s19 }
  0x28   : > { %p4221_p8 = pnand %p4219_p7, %p4505_p0  ;;  %p4228_p13 = por %p4227_p6, %p4226_p9 }
  0x2a   : > { %p4222_p11 = pneg %p4221_p8 }
  0x2c   : > { %p4229_p1 = pnand %p4228_p13, %p4222_p11 }
  0x2e   : > { %4232 = shalt.err (!%p4229_p1)
}
  0x2f   : > { %s4364_s24 = smov 256   ;;  %s4365_s26 = smov 16  }
  0x30   : > { %3740 = dma.hbm_to_vmem [thread:$0]  (!%p4489_p12), %s5778_s6, 4096, %s4485_s12, [#allocation8], %s4364_s24, %s4364_s24, %s4365_s26  }
  0x31   : > { %s4233_s19 = scalar_lea.hbm %s5776_s4, 4096 }
  0x32   : > { %p4234_p6 = scmp.ne.s32.totalorder %s5776_s4, %s4233_s19  ;;  %p4240_p3 = scmp.lt.u32.totalorder %s4233_s19, %s5776_s4 }
  0x34   : > { %p4236_p9 = pnand %p4234_p6, %p4505_p0 }
  0x36   : > { %p4237_p2 = pneg %p4236_p9 }
  0x38   : > { %p4242_p4 = pnand %p4240_p3, %p4237_p2 }
  0x3a   : > { %4245 = shalt.err (!%p4242_p4)
}
  0x3b   : > { %s4246_s12 = scalar_lea.vmem %s4493_s15, 4096  ;;  %p4254_p13 = scmp.lt.s32.totalorder %s4493_s15, %s4493_s15 }
  0x3c   : > { %p4247_p7 = scmp.ne.s32.totalorder %s4493_s15, %s4246_s12  ;;  %p4255_p1 = scmp.lt.s32.totalorder %s4246_s12, %s4246_s12 }
  0x3e   : > { %p4249_p8 = pnand %p4247_p7, %p4505_p0  ;;  %p4256_p6 = por %p4255_p1, %p4254_p13 }
  0x40   : > { %p4250_p11 = pneg %p4249_p8 }
  0x42   : > { %p4257_p9 = pnand %p4256_p6, %p4250_p11 }
  0x44   : > { %4260 = shalt.err (!%p4257_p9)
}
  0x45   : > { %3737 = dma.hbm_to_vmem [thread:$0]  (!%p4489_p12), %s5776_s4, 4096, %s4493_s15, [#allocation5], %s4364_s24, %s4364_s24, %s4365_s26  }
  0x46   : > { %s4261_s25 = scalar_lea.hbm %s5779_s7, 4096 }
  0x47   : > { %p4262_p2 = scmp.ne.s32.totalorder %s5779_s7, %s4261_s25  ;;  %p4268_p7 = scmp.lt.u32.totalorder %s4261_s25, %s5779_s7 }
  0x49   : > { %p4264_p3 = pnand %p4262_p2, %p4505_p0 }
  0x4b   : > { %p4265_p4 = pneg %p4264_p3 }
  0x4d   : > { %p4270_p8 = pnand %p4268_p7, %p4265_p4 }
  0x4f   : > { %4273 = shalt.err (!%p4270_p8)
}
  0x50   : > { %s4274_s12 = scalar_lea.vmem %s346_s22, 4096  ;;  %p4282_p6 = scmp.lt.s32.totalorder %s346_s22, %s346_s22 }
  0x51   : > { %p4275_p11 = scmp.ne.s32.totalorder %s346_s22, %s4274_s12  ;;  %p4283_p9 = scmp.lt.s32.totalorder %s4274_s12, %s4274_s12 }
  0x53   : > { %p4277_p13 = pnand %p4275_p11, %p4505_p0  ;;  %p4284_p5 = por %p4283_p9, %p4282_p6 }
  0x55   : > { %p4278_p1 = pneg %p4277_p13 }
  0x57   : > { %p4285_p10 = pnand %p4284_p5, %p4278_p1 }
  0x59   : > { %4288 = shalt.err (!%p4285_p10)
}
  0x5a   : > { %3743 = dma.hbm_to_vmem [thread:$0]  (!%p4489_p12), %s5779_s7, 4096, %s346_s22, [#allocation8], %s4364_s24, %s4364_s24, %s4365_s26  }
  0x5b   : > { %p5890_p2 = scmp.ne.s32.totalorder %s5887_s29, 0 }
  0x5d   : > { %385 = sbr.rel (%p5890_p2) target bundleno = 4014 (0xfae), region = 64 }
  0x64   : > { %p5891_p0 = scmp.eq.s32.totalorder %s4451_s21, 0 }
  0x66   : > { %4334 = dma.done.wait (%p5891_p0), [#allocation5], 4096   ;;  %p5892_p3 = pmov %p5891_p0 }
  0x67   : > { %p5893_p5 = pmov %p5891_p0 }
  0x68   : > { %4336 = vsyncadd (%p5892_p3), [#allocation5], 4294963200 }
  0x69   : > { %4338 = dma.done.wait (%p5893_p5), [#allocation8], 8192   ;;  %p5894_p10 = pmov %p5891_p0 }
  0x6a   : > { %p437_p4 = scmp.lt.s32.totalorder %s4451_s21, 1  ;;  %v5800_v0 = vmov 0   ;;  %v3797_v6 = vld [vmem:[%s5774_s2] sm:$0xff]   ;;  %v3798_v8 = vld [vmem:[%s5774_s2 + $0x8] sm:$0xff]   ;;  %v3799_v12 = vld [vmem:[%s5774_s2 + $0x10] sm:$0xff]   ;;  %v456_v22 = vlaneseq  ;;  %vm542_vm12 = vcmask 523264  }
  0x6b   : > { %4340 = vsyncadd (%p5894_p10), [#allocation8], 4294959104  ;;  %3796 = vset.pattern.permute.xlu1 %v5800_v0  ;;  %3795 = vset.pattern.permute.xlu0 %v5800_v0  ;;  %v3800_v13 = vld [vmem:[%s5774_s2 + $0x18] sm:$0xff]   ;;  %v5794_v28 = vmov 0.0   ;;  %v3801_v45 = vld [vmem:[%s5775_s3 + $0x4] ss:$16 sps:$4 sm:$0xff]  }
  0x6c   : > { %s438_s23 = scalar_select %p437_p4, %s4451_s21, 1  ;;  %723 = vmatprep.mubr.bf16.mxu1 %v5800_v0  ;;  %3684 = vmatprep.subr.bf16.mxu0 %v3797_v6  ;;  %v457_v23 = vand.u32 127, %v456_v22  ;;  %v3806_v46 = vld [vmem:[%s5775_s3 + $0xc] ss:$16 sps:$4 sm:$0xff]   ;;  %v3803_v47 = vld [vmem:[%s5775_s3] ss:$16 sps:$4 sm:$0xff]  }
  0x6d   : > { %3685 = vmatpush3.bf16.msra.mxu0 %v3797_v6  ;;  %v3804_v48 = vld [vmem:[%s5775_s3 + $0x8] ss:$16 sps:$4 sm:$0xff]   ;;  %v4644_v49 = vld [vmem:[#allocation4 + $0x4] ss:$16 sps:$4 sm:$0xff]   ;;  %691 = vmatprep.subr.bf16.mxu1 %v3801_v45  ;;  %v4647_v50 = vld [vmem:[#allocation4 + $0xc] ss:$16 sps:$4 sm:$0xff]  }
  0x6e   : > { %s3666_s29 = sshll.u32 %s438_s23, 6  ;;  %s3485_s26 = sshll.u32 %s438_s23, 3  ;;  %3686 = vmatprep.subr.bf16.mxu0 %v3798_v8  ;;  %692 = vmatpush1.bf16.msra.mxu1 %v3803_v47  ;;  %v4650_v63 = vld [vmem:[#allocation4] ss:$16 sps:$4 sm:$0xff]  }
  0x6f   : > { %s441_s24 = scalar_lea.vmem %s5772_s0, %s3666_s29  ;;  %s445_s28 = scalar_lea.vmem %s5773_s1, %s3485_s26  ;;  %1065 = vmatprep.subr.bf16.mxu1 %v4644_v49  ;;  %v4662_v6 = vld [vmem:[#allocation4 + $0x20] ss:$16 sps:$4 sm:$0xff]  }
  0x70   : > { %v449_v1 = vld [vmem:[%s441_s24 + $0x10] sm:$0xff]  ;;  %v447_v2 = vld [vmem:[%s441_s24] sm:$0xff]  ;;  %v450_v3 = vld [vmem:[%s441_s24 + $0x18] sm:$0xff]  ;;  %s434_s19 = sand.u32 1, %s4351_s18   ;;  %s3663_s15 = sshll.u32 %s4451_s21, 5 }
  0x71   : > { %465 = vperm.xlu1 %3796, %v449_v1   ;;  %459 = vperm.xlu0 %3795, %v447_v2   ;;  %v448_v4 = vld [vmem:[%s441_s24 + $0x8] sm:$0xff]  ;;  %v451_v7 = vld [vmem:[%s441_s24 + $0x20] sm:$0xff]  ;;  %v454_v9 = vld [vmem:[%s441_s24 + $0x38] sm:$0xff]  ;;  %s3482_s12 = sshll.u32 %s434_s19, 1  ;;  %s6049_s22 = sld [smem:[#allocation72_spill]] }
  0x72   : > { %v452_v5 = vld [vmem:[%s441_s24 + $0x28] sm:$0xff]  ;;  %v453_v10 = vld [vmem:[%s441_s24 + $0x30] sm:$0xff]  ;;  %v455_v11 = vld [vmem:[%s445_s28] sm:$0xff]  ;;  %3687 = vmatpush3.bf16.msra.mxu0 %v3798_v8  ;;  %s436_s11 = scalar_lea.vmem [#allocation10], %s3482_s12  ;;  %s3357_s26 = scalar_lea.sflag [#allocation6], %s434_s19 }
  0x73   : > { %vm1299_vm0 = vcmp.gt.s32.totalorder %v455_v11, 1  ;;  %vm1175_vm1 = vcmp.gt.s32.totalorder %v455_v11, 0  ;;  %3688 = vmatprep.subr.bf16.mxu0 %v3799_v12  ;;  %vm1547_vm2 = vcmp.gt.s32.totalorder %v455_v11, 3  ;;  %vm1423_vm3 = vcmp.gt.s32.totalorder %v455_v11, 2  ;;  %v4652_v1 = vld [vmem:[#allocation4 + $0x8] ss:$16 sps:$4 sm:$0xff]  }
  0x74   : > { %v1300_v14 = vsel %vm1299_vm0, 1, %v5800_v0  ;;  %v1176_v15 = vsel %vm1175_vm1, 1, %v5800_v0  ;;  %v1548_v16 = vsel %vm1547_vm2, 1, %v5800_v0  ;;  %v1424_v17 = vsel %vm1423_vm3, 1, %v5800_v0  ;;  %s3370_s23 = sshll.u32 %s436_s11, 4  ;;  %p6050_p7 = scmp.ne.s32.totalorder %s5884_s27, 0  ;;  %s5732_s23 = int_to_ptr.vmem [resolvable:$true] %s3370_s23 }
  0x75   : > { %468 = vperm.xlu1 %3796, %v450_v3   ;;  %462 = vperm.xlu0 %3795, %v448_v4   ;;  %vm1795_vm4 = vcmp.gt.s32.totalorder %v455_v11, 5  ;;  %vm1671_vm5 = vcmp.gt.s32.totalorder %v455_v11, 4  ;;  %vm2043_vm6 = vcmp.gt.s32.totalorder %v455_v11, 7  ;;  %vm1919_vm7 = vcmp.gt.s32.totalorder %v455_v11, 6  ;;  %v4654_v4 = vld [vmem:[#allocation4 + $0x24] ss:$16 sps:$4 sm:$0xff]  }
  0x76   : > { %3689 = vmatpush3.bf16.msra.mxu0 %v3799_v12  ;;  %v1796_v18 = vsel %vm1795_vm4, 1, %v5800_v0  ;;  %v1672_v19 = vsel %vm1671_vm5, 1, %v5800_v0  ;;  %v2044_v20 = vsel %vm2043_vm6, 1, %v5800_v0  ;;  %v1920_v21 = vsel %vm1919_vm7, 1, %v5800_v0  ;;  %s4289_s17 = scalar_lea.vmem %s5732_s23, 32  ;;  %s4369_s21 = smov [#allocation10]  }
  0x77   : > { %3690 = vmatprep.subr.bf16.mxu0 %v3800_v13  ;;  %vm678_vm1 = vcmask 130048   ;;  %s5730_s24 = scalar_lea.hbm %s6049_s22, %s3663_s15  ;;  %p4290_p12 = scmp.ne.s32.totalorder %s5732_s23, %s4289_s17 }
  0x78   : > { %s4293_s20 = sshll.u32 %s4369_s21, 4  ;;  %s4294_s20 = int_to_ptr.vmem [resolvable:$false] %s4293_s20 }
  0x79   : > { %474 = vperm.xlu1 %3796, %v452_v5   ;;  %471 = vperm.xlu0 %3795, %v451_v7   ;;  %v4656_v5 = vld [vmem:[#allocation4 + $0x2c] ss:$16 sps:$4 sm:$0xff]   ;;  %v4664_v7 = vld [vmem:[#allocation4 + $0x28] ss:$16 sps:$4 sm:$0xff]   ;;  %p4291_p8 = pnand %p4290_p12, %p6050_p7  ;;  %s4295_s28 = scalar_lea.vmem %s4294_s20, 64 }
  0x7a   : > { %3691 = vmatpush3.bf16.msra.mxu0 %v3800_v13  ;;  %p4296_p13 = scmp.lt.s32.totalorder %s5732_s23, %s4294_s20  ;;  %p4297_p1 = scmp.lt.s32.totalorder %s4295_s28, %s4289_s17 }
  0x7b   : > { %764 = vmatprep.subr.bf16.mxu0 %v3806_v46  ;;  %p4292_p11 = pneg %p4291_p8 }
  0x7c   : > { %p4298_p6 = por %p4297_p1, %p4296_p13 }
  0x7d   : > { %480 = vperm.xlu1 %3796, %v454_v9   ;;  %477 = vperm.xlu0 %3795, %v453_v10   ;;  %v4668_v9 = vld [vmem:[#allocation4 + $0x44] ss:$16 sps:$4 sm:$0xff]   ;;  %v4670_v10 = vld [vmem:[#allocation4 + $0x4c] ss:$16 sps:$4 sm:$0xff]  }
  0x7e   : > { %p4299_p9 = pnand %p4298_p6, %p4292_p11 }
  0x81   : > { %1302 = vperm.xlu1 %3796, %v1300_v14   ;;  %1178 = vperm.xlu0 %3795, %v1176_v15   ;;  %v4676_v14 = vld [vmem:[#allocation4 + $0x40] ss:$16 sps:$4 sm:$0xff]   ;;  %v4678_v15 = vld [vmem:[#allocation4 + $0x48] ss:$16 sps:$4 sm:$0xff]  }
  0x85   : > { %1550 = vperm.xlu1 %3796, %v1548_v16   ;;  %1426 = vperm.xlu0 %3795, %v1424_v17   ;;  %v4682_v17 = vld [vmem:[#allocation4 + $0x64] ss:$16 sps:$4 sm:$0xff]  }
  0x89   : > { %1798 = vperm.xlu1 %3796, %v1796_v18   ;;  %1674 = vperm.xlu0 %3795, %v1672_v19   ;;  %v4684_v18 = vld [vmem:[#allocation4 + $0x6c] ss:$16 sps:$4 sm:$0xff]  }
  0x8d   : > { %2046 = vperm.xlu1 %3796, %v2044_v20   ;;  %1922 = vperm.xlu0 %3795, %v1920_v21   ;;  %v4690_v20 = vld [vmem:[#allocation4 + $0x60] ss:$16 sps:$4 sm:$0xff]   ;;  %v4692_v21 = vld [vmem:[#allocation4 + $0x68] ss:$16 sps:$4 sm:$0xff]  }
  0xf0   : > { %v466_v24 = vpop.permute.xlu1 %465  ;;  %v460_v25 = vpop.permute.xlu0 %459 }
  0xf1   : > { %vm484_vm8 = vcmp.eq.s32.totalorder %v466_v24, %v457_v23  ;;  %vm482_vm9 = vcmp.eq.s32.totalorder %v460_v25, %v457_v23  ;;  %v4698_v24 = vld [vmem:[#allocation4 + $0x8c] ss:$16 sps:$4 sm:$0xff]   ;;  %v4704_v25 = vld [vmem:[#allocation4 + $0x80] ss:$16 sps:$4 sm:$0xff]  }
  0xf2   : > { %v3488_v29 = vsel %vm484_vm8, 1.0, %v5794_v28  ;;  %v3486_v30 = vsel %vm482_vm9, 1.0, %v5794_v28 }
  0xf4   : > { %v469_v26 = vpop.permute.xlu1 %468  ;;  %v463_v27 = vpop.permute.xlu0 %462 }
  0xf5   : > { %vm485_vm10 = vcmp.eq.s32.totalorder %v469_v26, %v457_v23  ;;  %vm483_vm11 = vcmp.eq.s32.totalorder %v463_v27, %v457_v23  ;;  %v4706_v26 = vld [vmem:[#allocation4 + $0x88] ss:$16 sps:$4 sm:$0xff]   ;;  %v4710_v27 = vld [vmem:[#allocation4 + $0xa4] ss:$16 sps:$4 sm:$0xff]  }
  0xf6   : > { %v3489_v31 = vsel %vm485_vm10, 1.0, %v5794_v28  ;;  %v3487_v32 = vsel %vm483_vm11, 1.0, %v5794_v28  ;;  %vm4368_vm11 = vmmov 0  }
  0xf7   : > { %v507_v33 = vpack.c.bf16 %v3489_v31, %v3488_v29  ;;  %v506_v34 = vpack.c.bf16 %v3487_v32, %v3486_v30  ;;  %v4712_v29 = vld [vmem:[#allocation4 + $0xac] ss:$16 sps:$4 sm:$0xff]   ;;  %v4718_v30 = vld [vmem:[#allocation4 + $0xa0] ss:$16 sps:$4 sm:$0xff]   ;;  %v4720_v31 = vld [vmem:[#allocation4 + $0xa8] ss:$16 sps:$4 sm:$0xff]  }
  0xf8   : > { %v475_v35 = vpop.permute.xlu1 %474  ;;  %v472_v36 = vpop.permute.xlu0 %471  ;;  %v4724_v32 = vld [vmem:[#allocation4 + $0xc4] ss:$16 sps:$4 sm:$0xff]  }
  0xf9   : > { %vm487_vm13 = vcmp.eq.s32.totalorder %v475_v35, %v457_v23  ;;  %vm486_vm14 = vcmp.eq.s32.totalorder %v472_v36, %v457_v23  ;;  %3692 = vmatprep.mubr.msk.bf16.mxu0 %vm542_vm12, %v506_v34  ;;  %v4732_v34 = vld [vmem:[#allocation4 + $0xc0] ss:$16 sps:$4 sm:$0xff]   ;;  %v4734_v35 = vld [vmem:[#allocation4 + $0xc8] ss:$16 sps:$4 sm:$0xff]   ;;  %v4738_v36 = vld [vmem:[#allocation4 + $0xe4] ss:$16 sps:$4 sm:$0xff]  }
  0xfa   : > { %v3491_v37 = vsel %vm487_vm13, 1.0, %v5794_v28  ;;  %v3490_v38 = vsel %vm486_vm14, 1.0, %v5794_v28  ;;  %3693 = vmatmul.mubr.msk.bf16.vlgmr.msra.gmra.mrb[0].mxu0 %vm542_vm12, %v507_v33  ;;  %v4726_v33 = vld [vmem:[#allocation4 + $0xcc] ss:$16 sps:$4 sm:$0xff]  }
  0xfb   : > { %v508_v39 = vpack.c.bf16 %v3491_v37, %v3490_v38  ;;  %765 = vmatpush1.bf16.msra.mxu0 %v3804_v48  ;;  %v4740_v37 = vld [vmem:[#allocation4 + $0xec] ss:$16 sps:$4 sm:$0xff]   ;;  %v4746_v38 = vld [vmem:[#allocation4 + $0xe0] ss:$16 sps:$4 sm:$0xff]  }
  0xfc   : > { %v481_v40 = vpop.permute.xlu1 %480  ;;  %v478_v41 = vpop.permute.xlu0 %477  ;;  %1106 = vmatprep.subr.bf16.mxu0 %v4647_v50 }
  0xfd   : > { %vm489_vm15 = vcmp.eq.s32.totalorder %v481_v40, %v457_v23  ;;  %vm488_vm0 = vcmp.eq.s32.totalorder %v478_v41, %v457_v23  ;;  %3696 = vmatprep.mubr.msk.bf16.mxu0 %vm542_vm12, %v508_v39  ;;  %v4696_v23 = vld [vmem:[#allocation4 + $0x84] ss:$16 sps:$4 sm:$0xff]   ;;  %v4748_v39 = vld [vmem:[#allocation4 + $0xe8] ss:$16 sps:$4 sm:$0xff]   ;;  %v4795_v40 = vshrl.u32 %v456_v22, 7 }
  0xfe   : > { %v3493_v42 = vsel %vm489_vm15, 1.0, %v5794_v28  ;;  %v3492_v43 = vsel %vm488_vm0, 1.0, %v5794_v28 }
  0xff   : > { %v509_v44 = vpack.c.bf16 %v3493_v42, %v3492_v43  ;;  %5895 = vst [vmem:[#allocation20_spill] sm:$0xff] %v4795_v40  ;;  %v5799_v41 = vsub.s32 0, %v4795_v40  ;;  %v5797_v42 = vsub.s32 2, %v4795_v40  ;;  %v636_v43 = vld [vmem:[%s5777_s5] sm:$0xf]  ;;  %v5796_v45 = vsub.s32 3, %v4795_v40 }
 0x101   : > { %v641_v22 = vrot.slane %v636_v43, %v5799_v41  ;;  %v649_v48 = vrot.slane %v636_v43, %v5797_v42 }
 0x102   : > { %3697 = vmatmul.mubr.msk.bf16.gmra.mrb[4].mxu0 %vm542_vm12, %v509_v44  ;;  %v5798_v44 = vsub.s32 1, %v4795_v40 }
 0x103   : > { %796 = vmatprep.mubr.bf16.mxu0 %v5800_v0 }
 0x1cd   : > { %v3694_v51 = vpop.f32.mrb[0].mxu0 }
 0x1ce   : > { %3959 = vtanh.f32 %v3694_v51  ;;  %v589_v52 = vpop.f32.mrb[1].mxu0 }
 0x1cf   : > { %3961 = vtanh.f32 %v589_v52  ;;  %v3695_v53 = vpop.f32.mrb[2].mxu0 }
 0x1d0   : > { %3963 = vtanh.f32 %v3695_v53  ;;  %v592_v54 = vpop.f32.mrb[3].mxu0  ;;  %v645_v53 = vrot.slane %v636_v43, %v5798_v44 }
 0x1d1   : > { %3965 = vtanh.f32 %v592_v54  ;;  %v653_v54 = vrot.slane %v636_v43, %v5796_v45 }
 0x1d5   : > { %v3698_v55 = vpop.f32.mrb[4].mxu0 }
 0x1d6   : > { %3967 = vtanh.f32 %v3698_v55  ;;  %v605_v56 = vpop.f32.mrb[5].mxu0 }
 0x1d7   : > { %3969 = vtanh.f32 %v605_v56  ;;  %v3699_v57 = vpop.f32.mrb[6].mxu0 }
 0x1d8   : > { %v3960_v58 = vpop.eup %3959  ;;  %3971 = vtanh.f32 %v3699_v57  ;;  %v608_v59 = vpop.f32.mrb[7].mxu0 }
 0x1d9   : > { %v3962_v60 = vpop.eup %3961  ;;  %3973 = vtanh.f32 %v608_v59 }
 0x1da   : > { %v3964_v61 = vpop.eup %3963 }
 0x1db   : > { %v3966_v62 = vpop.eup %3965  ;;  %v629_v2 = vpack.c.bf16 %v3964_v61, %v3960_v58 }
 0x1dc   : > { %v628_v3 = vpack.c.bf16 %v3966_v62, %v3962_v60 }
 0x1de   : > { %3506 = vmatmul.mubr.msk.bf16.vlgmr.msra.gmra.mrb[0].mxu1 %vm678_vm1, %v628_v3  ;;  %3510 = vmatmul.mubr.msk.bf16.vlgmr.msra.gmra.mrb[8].mxu0 %vm678_vm1, %v628_v3 }
 0x1df   : > { %1066 = vmatpush1.bf16.msra.mxu1 %v4650_v63  ;;  %1107 = vmatpush1.bf16.msra.mxu0 %v4652_v1 }
 0x1e0   : > { %v3968_v8 = vpop.eup %3967  ;;  %1067 = vmatprep.subr.bf16.mxu1 %v4654_v4  ;;  %1108 = vmatprep.subr.bf16.mxu0 %v4656_v5 }
 0x1e1   : > { %v3970_v11 = vpop.eup %3969  ;;  %733 = vmatprep.mubr.bf16.mxu1 %v5800_v0  ;;  %806 = vmatprep.mubr.bf16.mxu0 %v5800_v0 }
 0x1e2   : > { %v3972_v12 = vpop.eup %3971 }
 0x1e3   : > { %v3974_v13 = vpop.eup %3973  ;;  %1068 = vmatpush1.bf16.msra.mxu1 %v4662_v6  ;;  %1109 = vmatpush1.bf16.msra.mxu0 %v4664_v7  ;;  %v631_v16 = vpack.c.bf16 %v3972_v12, %v3968_v8 }
 0x1e4   : > { %1069 = vmatprep.subr.bf16.mxu1 %v4668_v9  ;;  %1110 = vmatprep.subr.bf16.mxu0 %v4670_v10  ;;  %v630_v19 = vpack.c.bf16 %v3974_v13, %v3970_v11 }
 0x1e6   : > { %3507 = vmatmul.mubr.msk.bf16.gmra.mrb[4].mxu1 %vm678_vm1, %v629_v2  ;;  %3511 = vmatmul.mubr.msk.bf16.gmra.mrb[12].mxu0 %vm678_vm1, %v629_v2 }
 0x1e7   : > { %1070 = vmatpush1.bf16.msra.mxu1 %v4676_v14  ;;  %1111 = vmatpush1.bf16.msra.mxu0 %v4678_v15 }
 0x1e8   : > { %1071 = vmatprep.subr.bf16.mxu1 %v4682_v17  ;;  %1112 = vmatprep.subr.bf16.mxu0 %v4684_v18 }
 0x1e9   : > { %743 = vmatprep.mubr.bf16.mxu1 %v5800_v0  ;;  %816 = vmatprep.mubr.bf16.mxu0 %v5800_v0 }
 0x1eb   : > { %1072 = vmatpush1.bf16.msra.mxu1 %v4690_v20  ;;  %1113 = vmatpush1.bf16.msra.mxu0 %v4692_v21 }
 0x1ec   : > { %1073 = vmatprep.subr.bf16.mxu1 %v4696_v23  ;;  %1114 = vmatprep.subr.bf16.mxu0 %v4698_v24 }
 0x1ee   : > { %3508 = vmatmul.mubr.msk.bf16.gmra.mrb[8].mxu1 %vm678_vm1, %v630_v19  ;;  %3512 = vmatmul.mubr.msk.bf16.gmra.mrb[16].mxu0 %vm678_vm1, %v630_v19 }
 0x1ef   : > { %1074 = vmatpush1.bf16.msra.mxu1 %v4704_v25  ;;  %1115 = vmatpush1.bf16.msra.mxu0 %v4706_v26 }
 0x1f0   : > { %1075 = vmatprep.subr.bf16.mxu1 %v4710_v27  ;;  %1116 = vmatprep.subr.bf16.mxu0 %v4712_v29 }
 0x1f1   : > { %753 = vmatprep.mubr.bf16.mxu1 %v5800_v0  ;;  %826 = vmatprep.mubr.bf16.mxu0 %v5800_v0 }
 0x1f3   : > { %1076 = vmatpush1.bf16.msra.mxu1 %v4718_v30  ;;  %1117 = vmatpush1.bf16.msra.mxu0 %v4720_v31 }
 0x1f4   : > { %1077 = vmatprep.subr.bf16.mxu1 %v4724_v32  ;;  %1118 = vmatprep.subr.bf16.mxu0 %v4726_v33 }
 0x1f6   : > { %3509 = vmatmul.mubr.msk.bf16.gmra.mrb[12].mxu1 %vm678_vm1, %v631_v16  ;;  %3513 = vmatmul.mubr.msk.bf16.gmra.mrb[20].mxu0 %vm678_vm1, %v631_v16 }
 0x1f7   : > { %1078 = vmatpush1.bf16.msra.mxu1 %v4732_v34  ;;  %1119 = vmatpush1.bf16.msra.mxu0 %v4734_v35 }
 0x1f8   : > { %1079 = vmatprep.subr.bf16.mxu1 %v4738_v36  ;;  %1120 = vmatprep.subr.bf16.mxu0 %v4740_v37 }
 0x1f9   : > { %1097 = vmatprep.mubr.bf16.mxu1 %v5800_v0  ;;  %1138 = vmatprep.mubr.bf16.mxu0 %v5800_v0 }
 0x1fb   : > { %1080 = vmatpush1.bf16.msra.mxu1 %v4746_v38  ;;  %1121 = vmatpush1.bf16.msra.mxu0 %v4748_v39 }
 0x1fc   : > { %1189 = vmatprep.subr.bf16.mxu1 %v4644_v49  ;;  %1230 = vmatprep.subr.bf16.mxu0 %v4647_v50 }
 0x1fe   : > { %1098 = vmatmul.mubr.bf16.vlgmr.msra.gmra.mrb[16].mxu1 %v5800_v0  ;;  %1139 = vmatmul.mubr.bf16.vlgmr.msra.gmra.mrb[24].mxu0 %v5800_v0 }
 0x1ff   : > { %1190 = vmatpush1.bf16.msra.mxu1 %v4650_v63  ;;  %1231 = vmatpush1.bf16.msra.mxu0 %v4652_v1 }
 0x200   : > { %1191 = vmatprep.subr.bf16.mxu1 %v4654_v4  ;;  %1232 = vmatprep.subr.bf16.mxu0 %v4656_v5 }
 0x201   : > { %1221 = vmatprep.mubr.bf16.mxu1 %v5800_v0  ;;  %1262 = vmatprep.mubr.bf16.mxu0 %v5800_v0 }
 0x203   : > { %1192 = vmatpush1.bf16.msra.mxu1 %v4662_v6  ;;  %1233 = vmatpush1.bf16.msra.mxu0 %v4664_v7 }
 0x204   : > { %1193 = vmatprep.subr.bf16.mxu1 %v4668_v9  ;;  %1234 = vmatprep.subr.bf16.mxu0 %v4670_v10 }
 0x207   : > { %1194 = vmatpush1.bf16.msra.mxu1 %v4676_v14  ;;  %1235 = vmatpush1.bf16.msra.mxu0 %v4678_v15 }
 0x208   : > { %1195 = vmatprep.subr.bf16.mxu1 %v4682_v17  ;;  %1236 = vmatprep.subr.bf16.mxu0 %v4684_v18 }
 0x20b   : > { %1196 = vmatpush1.bf16.msra.mxu1 %v4690_v20  ;;  %1237 = vmatpush1.bf16.msra.mxu0 %v4692_v21 }
 0x20c   : > { %1197 = vmatprep.subr.bf16.mxu1 %v4696_v23  ;;  %1238 = vmatprep.subr.bf16.mxu0 %v4698_v24 }
 0x20f   : > { %1198 = vmatpush1.bf16.msra.mxu1 %v4704_v25  ;;  %1239 = vmatpush1.bf16.msra.mxu0 %v4706_v26 }
 0x210   : > { %1199 = vmatprep.subr.bf16.mxu1 %v4710_v27  ;;  %1240 = vmatprep.subr.bf16.mxu0 %v4712_v29 }
 0x213   : > { %1200 = vmatpush1.bf16.msra.mxu1 %v4718_v30  ;;  %1241 = vmatpush1.bf16.msra.mxu0 %v4720_v31 }
 0x214   : > { %1201 = vmatprep.subr.bf16.mxu1 %v4724_v32  ;;  %1242 = vmatprep.subr.bf16.mxu0 %v4726_v33 }
 0x217   : > { %1202 = vmatpush1.bf16.msra.mxu1 %v4732_v34  ;;  %1243 = vmatpush1.bf16.msra.mxu0 %v4734_v35 }
 0x218   : > { %1203 = vmatprep.subr.bf16.mxu1 %v4738_v36  ;;  %1244 = vmatprep.subr.bf16.mxu0 %v4740_v37 }
 0x21b   : > { %1204 = vmatpush1.bf16.msra.mxu1 %v4746_v38  ;;  %1245 = vmatpush1.bf16.msra.mxu0 %v4748_v39 }
 0x21c   : > { %1313 = vmatprep.subr.bf16.mxu1 %v4644_v49  ;;  %1354 = vmatprep.subr.bf16.mxu0 %v4647_v50 }
 0x2b1   : > { %v4804_v46 = vpop.f32.mrb[0].mxu1  ;;  %v4806_v47 = vpop.f32.mrb[8].mxu0 }
 0x2b2   : > { %v727_v51 = vpop.f32.mrb[1].mxu1  ;;  %v800_v52 = vpop.f32.mrb[9].mxu0 }
 0x2b3   : > { %v729_v55 = vpop.f32.mrb[2].mxu1  ;;  %v802_v56 = vpop.f32.mrb[10].mxu0 }
 0x2b4   : > { %v4816_v57 = vadd.f32 %v729_v55, %v641_v22  ;;  %v4818_v58 = vadd.f32 %v802_v56, %v649_v48  ;;  %v731_v59 = vpop.f32.mrb[3].mxu1  ;;  %v804_v60 = vpop.f32.mrb[11].mxu0 }
 0x2b5   : > { %v4820_v61 = vadd.f32 %v731_v59, %v645_v53  ;;  %v4822_v62 = vadd.f32 %v804_v60, %v653_v54 }
 0x2b9   : > { %v735_v2 = vpop.f32.mrb[4].mxu1  ;;  %v808_v3 = vpop.f32.mrb[12].mxu0 }
 0x2ba   : > { %v4824_v8 = vadd.f32 %v735_v2, %v641_v22  ;;  %v4826_v11 = vadd.f32 %v808_v3, %v649_v48  ;;  %v737_v12 = vpop.f32.mrb[5].mxu1  ;;  %v810_v13 = vpop.f32.mrb[13].mxu0 }
 0x2bb   : > { %v4828_v16 = vadd.f32 %v737_v12, %v645_v53  ;;  %v4830_v19 = vadd.f32 %v810_v13, %v653_v54  ;;  %v739_v43 = vpop.f32.mrb[6].mxu1  ;;  %v812_v55 = vpop.f32.mrb[14].mxu0 }
 0x2bc   : > { %v4832_v56 = vadd.f32 %v739_v43, %v641_v22  ;;  %v4834_v59 = vadd.f32 %v812_v55, %v649_v48  ;;  %v741_v60 = vpop.f32.mrb[7].mxu1  ;;  %v814_v28 = vpop.f32.mrb[15].mxu0 }
 0x2bd   : > { %5896 = vst [vmem:[#allocation21_spill] sm:$0xff] %v4828_v16  ;;  %5897 = vst [vmem:[#allocation22_spill] sm:$0xff] %v4830_v19  ;;  %v4836_v45 = vadd.f32 %v741_v60, %v645_v53  ;;  %v4838_v2 = vadd.f32 %v814_v28, %v653_v54 }
 0x2be   : > { %5898 = vst [vmem:[#allocation23_spill] sm:$0xff] %v4832_v56  ;;  %5899 = vst [vmem:[#allocation24_spill] sm:$0xff] %v4834_v59 }
 0x2bf   : > { %5900 = vst [vmem:[#allocation25_spill] sm:$0xff] %v4836_v45  ;;  %5901 = vst [vmem:[#allocation26_spill] sm:$0xff] %v4838_v2 }
 0x2c1   : > { %v745_v3 = vpop.f32.mrb[8].mxu1  ;;  %v818_v42 = vpop.f32.mrb[16].mxu0 }
 0x2c2   : > { %v4840_v44 = vadd.f32 %v745_v3, %v641_v22  ;;  %v4842_v12 = vadd.f32 %v818_v42, %v649_v48  ;;  %v747_v13 = vpop.f32.mrb[9].mxu1  ;;  %v820_v41 = vpop.f32.mrb[17].mxu0 }
 0x2c3   : > { %v4844_v0 = vadd.f32 %v747_v13, %v645_v53  ;;  %v4846_v43 = vadd.f32 %v820_v41, %v653_v54  ;;  %v749_v55 = vpop.f32.mrb[10].mxu1  ;;  %v822_v40 = vpop.f32.mrb[18].mxu0 }
 0x2c4   : > { %5902 = vst [vmem:[#allocation27_spill] sm:$0xff] %v4840_v44  ;;  %5903 = vst [vmem:[#allocation28_spill] sm:$0xff] %v4842_v12  ;;  %v4848_v59 = vadd.f32 %v749_v55, %v641_v22  ;;  %v4850_v60 = vadd.f32 %v822_v40, %v649_v48  ;;  %v751_v28 = vpop.f32.mrb[11].mxu1  ;;  %v824_v2 = vpop.f32.mrb[19].mxu0 }
 0x2c5   : > { %5904 = vst [vmem:[#allocation29_spill] sm:$0xff] %v4844_v0  ;;  %5905 = vst [vmem:[#allocation30_spill] sm:$0xff] %v4846_v43  ;;  %v4852_v45 = vadd.f32 %v751_v28, %v645_v53  ;;  %v4854_v3 = vadd.f32 %v824_v2, %v653_v54 }
 0x2c6   : > { %5906 = vst [vmem:[#allocation31_spill] sm:$0xff] %v4848_v59  ;;  %5907 = vst [vmem:[#allocation32_spill] sm:$0xff] %v4850_v60 }
 0x2c7   : > { %5908 = vst [vmem:[#allocation33_spill] sm:$0xff] %v4852_v45  ;;  %5909 = vst [vmem:[#allocation34_spill] sm:$0xff] %v4854_v3 }
 0x2c9   : > { %v755_v42 = vpop.f32.mrb[12].mxu1  ;;  %v828_v12 = vpop.f32.mrb[20].mxu0 }
 0x2ca   : > { %v4856_v44 = vadd.f32 %v755_v42, %v641_v22  ;;  %v4858_v13 = vadd.f32 %v828_v12, %v649_v48  ;;  %v757_v41 = vpop.f32.mrb[13].mxu1  ;;  %v830_v43 = vpop.f32.mrb[21].mxu0  ;;  %v726_v12 = vadd.f32 %v4804_v46, %v641_v22 }
 0x2cb   : > { %v4860_v0 = vadd.f32 %v757_v41, %v645_v53  ;;  %v4862_v55 = vadd.f32 %v830_v43, %v653_v54  ;;  %v759_v40 = vpop.f32.mrb[14].mxu1  ;;  %v832_v60 = vpop.f32.mrb[22].mxu0  ;;  %v728_v41 = vadd.f32 %v727_v51, %v645_v53 }
 0x2cc   : > { %5910 = vst [vmem:[#allocation35_spill] sm:$0xff] %v4856_v44  ;;  %5911 = vst [vmem:[#allocation36_spill] sm:$0xff] %v4858_v13  ;;  %v4864_v59 = vadd.f32 %v759_v40, %v641_v22  ;;  %v4866_v28 = vadd.f32 %v832_v60, %v649_v48  ;;  %v761_v2 = vpop.f32.mrb[15].mxu1  ;;  %v834_v3 = vpop.f32.mrb[23].mxu0  ;;  %v799_v13 = vadd.f32 %v4806_v47, %v649_v48 }
 0x2cd   : > { %5912 = vst [vmem:[#allocation37_spill] sm:$0xff] %v4860_v0  ;;  %5913 = vst [vmem:[#allocation38_spill] sm:$0xff] %v4862_v55  ;;  %v4868_v45 = vadd.f32 %v761_v2, %v645_v53  ;;  %v4870_v42 = vadd.f32 %v834_v3, %v653_v54  ;;  %v801_v0 = vadd.f32 %v800_v52, %v653_v54 }
 0x2ce   : > { %5914 = vst [vmem:[#allocation39_spill] sm:$0xff] %v4864_v59  ;;  %5915 = vst [vmem:[#allocation40_spill] sm:$0xff] %v4866_v28 }
 0x2cf   : > { %5916 = vst [vmem:[#allocation41_spill] sm:$0xff] %v4868_v45  ;;  %5917 = vst [vmem:[#allocation42_spill] sm:$0xff] %v4870_v42 }
 0x2d1   : > { %v1099_v43 = vpop.f32.mrb[16].mxu1  ;;  %v1140_v55 = vpop.f32.mrb[24].mxu0 }
 0x2d2   : > { %v1147_v44 = vadd.f32 %v1099_v43, %v726_v12  ;;  %v1149_v56 = vadd.f32 %v1140_v55, %v799_v13  ;;  %v1101_v40 = vpop.f32.mrb[17].mxu1  ;;  %v1142_v59 = vpop.f32.mrb[25].mxu0 }
 0x2d3   : > { %v1148_v60 = vadd.f32 %v1101_v40, %v728_v41  ;;  %v1150_v28 = vadd.f32 %v1142_v59, %v801_v0  ;;  %v1103_v19 = vpop.f32.mrb[18].mxu1  ;;  %v1144_v16 = vpop.f32.mrb[26].mxu0 }
 0x2d4   : > { %v3546_v2 = vmul.f32 -1.442695, %v1147_v44  ;;  %v1104_v45 = vpop.f32.mrb[19].mxu1  ;;  %v1145_v3 = vpop.f32.mrb[27].mxu0  ;;  %v3548_v46 = vmul.f32 -1.442695, %v1149_v56 }
 0x2d5   : > { %v3547_v42 = vmul.f32 -1.442695, %v1148_v60  ;;  %v4877_v56 = vpop.permute.xlu0 %1178 }
 0x2d6   : > { %3975 = vpow2.f32 %v3546_v2  ;;  %vm1180_vm2 = vcmp.eq.s32.totalorder %v4877_v56, 1 }
 0x2d7   : > { %3977 = vpow2.f32 %v3547_v42  ;;  %vm3549_vm3 = vmpackc.low %vm1180_vm2, %vm1180_vm2  ;;  %v5918_v42 = vmov 0  }
 0x2d8   : > { %3979 = vtanh.f32 %v1150_v28 }
 0x2d9   : > { %3981 = vpow2.f32 %v3548_v46 }
 0x2e0   : > { %v3976_v47 = vpop.eup %3975 }
 0x2e1   : > { %v1160_v22 = vadd.f32 1.0, %v3976_v47  ;;  %v3978_v48 = vpop.eup %3977 }
 0x2e2   : > { %v1161_v51 = vadd.f32 1.0, %v3978_v48  ;;  %v3980_v52 = vpop.eup %3979 }
 0x2e3   : > { %3983 = vrcp.f32 %v1160_v22  ;;  %v3982_v53 = vpop.eup %3981 }
 0x2e4   : > { %3985 = vrcp.f32 %v1161_v51  ;;  %v1162_v44 = vadd.f32 1.0, %v3982_v53 }
 0x2e6   : > { %3987 = vrcp.f32 %v1162_v44 }
 0x2ed   : > { %v3984_v0 = vpop.eup %3983 }
 0x2ee   : > { %v1171_v54 = vmul.f32 %v3984_v0, %v3980_v52  ;;  %v3986_v16 = vpop.eup %3985 }
 0x2ef   : > { %v1170_v45 = vmul.f32 0.0, %v3986_v16 }
 0x2f0   : > { %v3988_v59 = vpop.eup %3987 }
 0x2f1   : > { %v4874_v19 = vadd.f32 %v1171_v54, %v1170_v45 }
 0x2f3   : > { %3989 = vtanh.f32 %v4874_v19 }
 0x2fd   : > { %v3990_v13 = vpop.eup %3989 }
 0x2fe   : > { %v4880_v55 = vmul.f32 %v3990_v13, %v3988_v59  ;;  %v1182_v13 = vsel %vm1180_vm2, %v4874_v19, 0.0 }
 0x300   : > { %v3550_v28 = vpack.c.bf16 %v4880_v55, %v4880_v55 }
 0x302   : > { %3551 = vmatmul.mubr.msk.bf16.vlgmr.msra.gmra.mrb[20].mxu1 %vm3549_vm3, %v3550_v28  ;;  %3554 = vmatmul.mubr.msk.bf16.vlgmr.msra.gmra.mrb[28].mxu0 %vm3549_vm3, %v3550_v28 }
 0x303   : > { %1314 = vmatpush1.bf16.msra.mxu1 %v4650_v63  ;;  %1355 = vmatpush1.bf16.msra.mxu0 %v4652_v1 }
 0x304   : > { %1315 = vmatprep.subr.bf16.mxu1 %v4654_v4  ;;  %1356 = vmatprep.subr.bf16.mxu0 %v4656_v5 }
 0x305   : > { %1345 = vmatprep.mubr.bf16.mxu1 %v5918_v42  ;;  %1386 = vmatprep.mubr.bf16.mxu0 %v5918_v42 }
 0x307   : > { %1316 = vmatpush1.bf16.msra.mxu1 %v4662_v6  ;;  %1357 = vmatpush1.bf16.msra.mxu0 %v4664_v7 }
 0x308   : > { %1317 = vmatprep.subr.bf16.mxu1 %v4668_v9  ;;  %1358 = vmatprep.subr.bf16.mxu0 %v4670_v10 }
 0x30b   : > { %1318 = vmatpush1.bf16.msra.mxu1 %v4676_v14  ;;  %1359 = vmatpush1.bf16.msra.mxu0 %v4678_v15 }
 0x30c   : > { %1319 = vmatprep.subr.bf16.mxu1 %v4682_v17  ;;  %1360 = vmatprep.subr.bf16.mxu0 %v4684_v18 }
 0x30f   : > { %1320 = vmatpush1.bf16.msra.mxu1 %v4690_v20  ;;  %1361 = vmatpush1.bf16.msra.mxu0 %v4692_v21 }
 0x310   : > { %1321 = vmatprep.subr.bf16.mxu1 %v4696_v23  ;;  %1362 = vmatprep.subr.bf16.mxu0 %v4698_v24 }
 0x313   : > { %1322 = vmatpush1.bf16.msra.mxu1 %v4704_v25  ;;  %1363 = vmatpush1.bf16.msra.mxu0 %v4706_v26 }
 0x314   : > { %1323 = vmatprep.subr.bf16.mxu1 %v4710_v27  ;;  %1364 = vmatprep.subr.bf16.mxu0 %v4712_v29 }
 0x317   : > { %1324 = vmatpush1.bf16.msra.mxu1 %v4718_v30  ;;  %1365 = vmatpush1.bf16.msra.mxu0 %v4720_v31 }
 0x318   : > { %1325 = vmatprep.subr.bf16.mxu1 %v4724_v32  ;;  %1366 = vmatprep.subr.bf16.mxu0 %v4726_v33 }
 0x31b   : > { %1326 = vmatpush1.bf16.msra.mxu1 %v4732_v34  ;;  %1367 = vmatpush1.bf16.msra.mxu0 %v4734_v35 }
 0x31c   : > { %1327 = vmatprep.subr.bf16.mxu1 %v4738_v36  ;;  %1368 = vmatprep.subr.bf16.mxu0 %v4740_v37 }
 0x31f   : > { %1328 = vmatpush1.bf16.msra.mxu1 %v4746_v38  ;;  %1369 = vmatpush1.bf16.msra.mxu0 %v4748_v39 }
 0x320   : > { %1437 = vmatprep.subr.bf16.mxu1 %v4644_v49  ;;  %1478 = vmatprep.subr.bf16.mxu0 %v4647_v50 }
 0x3d5   : > { %v1223_v12 = vpop.f32.mrb[20].mxu1  ;;  %v1264_v41 = vpop.f32.mrb[28].mxu0 }
 0x3d6   : > { %v1271_v43 = vadd.f32 %v1223_v12, %v4816_v57  ;;  %v1273_v40 = vadd.f32 %v1264_v41, %v4818_v58  ;;  %v1225_v60 = vpop.f32.mrb[21].mxu1  ;;  %v1266_v2 = vpop.f32.mrb[29].mxu0 }
 0x3d7   : > { %v1272_v3 = vadd.f32 %v1225_v60, %v4820_v61  ;;  %v1274_v46 = vadd.f32 %v1266_v2, %v4822_v62  ;;  %v1227_v47 = vpop.f32.mrb[22].mxu1  ;;  %v1268_v22 = vpop.f32.mrb[30].mxu0 }
 0x3d8   : > { %v3555_v48 = vmul.f32 -1.442695, %v1271_v43  ;;  %v1228_v51 = vpop.f32.mrb[23].mxu1  ;;  %v1269_v52 = vpop.f32.mrb[31].mxu0  ;;  %v3557_v0 = vmul.f32 -1.442695, %v1273_v40 }
 0x3d9   : > { %v3556_v53 = vmul.f32 -1.442695, %v1272_v3  ;;  %v1303_v12 = vpop.permute.xlu1 %1302 }
 0x3da   : > { %3991 = vpow2.f32 %v3555_v48  ;;  %vm1304_vm4 = vcmp.eq.s32.totalorder %v1303_v12, 1 }
 0x3db   : > { %3993 = vpow2.f32 %v3556_v53  ;;  %v5919_v53 = vld [vmem:[#allocation21_spill] sm:$0xff] }
 0x3dc   : > { %3995 = vtanh.f32 %v1274_v46  ;;  %v1181_v46 = vsel %vm1180_vm2, %v4880_v55, 0.0 }
 0x3dd   : > { %3997 = vpow2.f32 %v3557_v0 }
 0x3e4   : > { %v3992_v54 = vpop.eup %3991 }
 0x3e5   : > { %v1284_v16 = vadd.f32 1.0, %v3992_v54  ;;  %v3994_v57 = vpop.eup %3993  ;;  %v5920_v54 = vld [vmem:[#allocation22_spill] sm:$0xff] }
 0x3e6   : > { %v1285_v58 = vadd.f32 1.0, %v3994_v57  ;;  %v3996_v61 = vpop.eup %3995 }
 0x3e7   : > { %3999 = vrcp.f32 %v1284_v16  ;;  %v3998_v44 = vpop.eup %3997 }
 0x3e8   : > { %4001 = vrcp.f32 %v1285_v58  ;;  %v1286_v28 = vadd.f32 1.0, %v3998_v44 }
 0x3ea   : > { %4003 = vrcp.f32 %v1286_v28 }
 0x3f1   : > { %v4000_v62 = vpop.eup %3999 }
 0x3f2   : > { %v1295_v45 = vmul.f32 %v4000_v62, %v3996_v61  ;;  %v4002_v59 = vpop.eup %4001 }
 0x3f3   : > { %v1294_v41 = vmul.f32 %v4002_v59, %v1182_v13 }
 0x3f4   : > { %v4004_v60 = vpop.eup %4003 }
 0x3f5   : > { %v1296_v43 = vadd.f32 %v1295_v45, %v1294_v41 }
 0x3f7   : > { %4005 = vtanh.f32 %v1296_v43  ;;  %v4928_v40 = vsel %vm1304_vm4, %v1296_v43, %v1182_v13 }
 0x401   : > { %v4006_v2 = vpop.eup %4005 }
 0x402   : > { %v1298_v3 = vmul.f32 %v4006_v2, %v4004_v60 }
 0x404   : > { %v4933_v47 = vsel %vm1304_vm4, %v1298_v3, %v1181_v46  ;;  %v1427_v46 = vpop.permute.xlu0 %1426 }
 0x405   : > { %v1312_v19 = vpack.c.bf16 %v4933_v47, %v4933_v47  ;;  %vm1428_vm5 = vcmp.eq.s32.totalorder %v1427_v46, 1 }
 0x407   : > { %1346 = vmatmul.mubr.bf16.vlgmr.msra.gmra.mrb[24].mxu1 %v1312_v19  ;;  %1387 = vmatmul.mubr.bf16.vlgmr.msra.gmra.mrb[32].mxu0 %v1312_v19 }
 0x408   : > { %1438 = vmatpush1.bf16.msra.mxu1 %v4650_v63  ;;  %1479 = vmatpush1.bf16.msra.mxu0 %v4652_v1 }
 0x409   : > { %1439 = vmatprep.subr.bf16.mxu1 %v4654_v4  ;;  %1480 = vmatprep.subr.bf16.mxu0 %v4656_v5 }
 0x40a   : > { %1469 = vmatprep.mubr.bf16.mxu1 %v5918_v42  ;;  %1510 = vmatprep.mubr.bf16.mxu0 %v5918_v42 }
 0x40c   : > { %1440 = vmatpush1.bf16.msra.mxu1 %v4662_v6  ;;  %1481 = vmatpush1.bf16.msra.mxu0 %v4664_v7 }
 0x40d   : > { %1441 = vmatprep.subr.bf16.mxu1 %v4668_v9  ;;  %1482 = vmatprep.subr.bf16.mxu0 %v4670_v10 }
 0x410   : > { %1442 = vmatpush1.bf16.msra.mxu1 %v4676_v14  ;;  %1483 = vmatpush1.bf16.msra.mxu0 %v4678_v15 }
 0x411   : > { %1443 = vmatprep.subr.bf16.mxu1 %v4682_v17  ;;  %1484 = vmatprep.subr.bf16.mxu0 %v4684_v18 }
 0x414   : > { %1444 = vmatpush1.bf16.msra.mxu1 %v4690_v20  ;;  %1485 = vmatpush1.bf16.msra.mxu0 %v4692_v21 }
 0x415   : > { %1445 = vmatprep.subr.bf16.mxu1 %v4696_v23  ;;  %1486 = vmatprep.subr.bf16.mxu0 %v4698_v24 }
 0x418   : > { %1446 = vmatpush1.bf16.msra.mxu1 %v4704_v25  ;;  %1487 = vmatpush1.bf16.msra.mxu0 %v4706_v26 }
 0x419   : > { %1447 = vmatprep.subr.bf16.mxu1 %v4710_v27  ;;  %1488 = vmatprep.subr.bf16.mxu0 %v4712_v29 }
 0x41c   : > { %1448 = vmatpush1.bf16.msra.mxu1 %v4718_v30  ;;  %1489 = vmatpush1.bf16.msra.mxu0 %v4720_v31 }
 0x41d   : > { %1449 = vmatprep.subr.bf16.mxu1 %v4724_v32  ;;  %1490 = vmatprep.subr.bf16.mxu0 %v4726_v33 }
 0x420   : > { %1450 = vmatpush1.bf16.msra.mxu1 %v4732_v34  ;;  %1491 = vmatpush1.bf16.msra.mxu0 %v4734_v35 }
 0x421   : > { %1451 = vmatprep.subr.bf16.mxu1 %v4738_v36  ;;  %1492 = vmatprep.subr.bf16.mxu0 %v4740_v37 }
 0x424   : > { %1452 = vmatpush1.bf16.msra.mxu1 %v4746_v38  ;;  %1493 = vmatpush1.bf16.msra.mxu0 %v4748_v39 }
 0x425   : > { %1561 = vmatprep.subr.bf16.mxu1 %v4644_v49  ;;  %1602 = vmatprep.subr.bf16.mxu0 %v4647_v50 }
 0x4da   : > { %v1347_v56 = vpop.f32.mrb[24].mxu1  ;;  %v1388_v55 = vpop.f32.mrb[32].mxu0 }
 0x4db   : > { %v1395_v22 = vadd.f32 %v1347_v56, %v4824_v8  ;;  %v1397_v48 = vadd.f32 %v1388_v55, %v4826_v11  ;;  %v1349_v51 = vpop.f32.mrb[25].mxu1  ;;  %v1390_v52 = vpop.f32.mrb[33].mxu0 }
 0x4dc   : > { %v1396_v0 = vadd.f32 %v1349_v51, %v5919_v53  ;;  %v1398_v16 = vadd.f32 %v1390_v52, %v5920_v54  ;;  %v1351_v57 = vpop.f32.mrb[26].mxu1  ;;  %v1392_v58 = vpop.f32.mrb[34].mxu0 }
 0x4dd   : > { %v3558_v61 = vmul.f32 -1.442695, %v1395_v22  ;;  %v1352_v44 = vpop.f32.mrb[27].mxu1  ;;  %v1393_v62 = vpop.f32.mrb[35].mxu0  ;;  %v3560_v59 = vmul.f32 -1.442695, %v1397_v48 }
 0x4de   : > { %v3559_v45 = vmul.f32 -1.442695, %v1396_v0  ;;  %v5921_v0 = vld [vmem:[#allocation23_spill] sm:$0xff]  ;;  %v5923_v44 = vld [vmem:[#allocation25_spill] sm:$0xff] }
 0x4df   : > { %4007 = vpow2.f32 %v3558_v61 }
 0x4e0   : > { %4009 = vpow2.f32 %v3559_v45  ;;  %v5924_v45 = vld [vmem:[#allocation26_spill] sm:$0xff] }
 0x4e1   : > { %4011 = vtanh.f32 %v1398_v16  ;;  %v5922_v16 = vld [vmem:[#allocation24_spill] sm:$0xff] }
 0x4e2   : > { %4013 = vpow2.f32 %v3560_v59 }
 0x4e9   : > { %v4008_v13 = vpop.eup %4007 }
 0x4ea   : > { %v1408_v28 = vadd.f32 1.0, %v4008_v13  ;;  %v4010_v8 = vpop.eup %4009 }
 0x4eb   : > { %v1409_v11 = vadd.f32 1.0, %v4010_v8  ;;  %v4012_v12 = vpop.eup %4011 }
 0x4ec   : > { %4015 = vrcp.f32 %v1408_v28  ;;  %v4014_v41 = vpop.eup %4013 }
 0x4ed   : > { %4017 = vrcp.f32 %v1409_v11  ;;  %v1410_v3 = vadd.f32 1.0, %v4014_v41 }
 0x4ef   : > { %4019 = vrcp.f32 %v1410_v3 }
 0x4f6   : > { %v4016_v43 = vpop.eup %4015 }
 0x4f7   : > { %v1419_v60 = vmul.f32 %v4016_v43, %v4012_v12  ;;  %v4018_v2 = vpop.eup %4017 }
 0x4f8   : > { %v1418_v19 = vmul.f32 %v4018_v2, %v4928_v40 }
 0x4f9   : > { %v4020_v22 = vpop.eup %4019 }
 0x4fa   : > { %v1420_v56 = vadd.f32 %v1419_v60, %v1418_v19 }
 0x4fc   : > { %4021 = vtanh.f32 %v1420_v56  ;;  %v4977_v55 = vsel %vm1428_vm5, %v1420_v56, %v4928_v40 }
 0x506   : > { %v4022_v48 = vpop.eup %4021 }
 0x507   : > { %v1422_v51 = vmul.f32 %v4022_v48, %v4020_v22 }
 0x509   : > { %v4980_v52 = vsel %vm1428_vm5, %v1422_v51, %v4933_v47  ;;  %v1551_v51 = vpop.permute.xlu1 %1550 }
 0x50a   : > { %v1436_v53 = vpack.c.bf16 %v4980_v52, %v4980_v52  ;;  %vm1552_vm6 = vcmp.eq.s32.totalorder %v1551_v51, 1  ;;  %v5126_v51 = vld [vmem:[#allocation4 + $0x84] ss:$16 sps:$4 sm:$0xff]  }
 0x50c   : > { %1470 = vmatmul.mubr.bf16.vlgmr.msra.gmra.mrb[28].mxu1 %v1436_v53  ;;  %1511 = vmatmul.mubr.bf16.vlgmr.msra.gmra.mrb[36].mxu0 %v1436_v53 }
 0x50d   : > { %1562 = vmatpush1.bf16.msra.mxu1 %v4650_v63  ;;  %1603 = vmatpush1.bf16.msra.mxu0 %v4652_v1 }
 0x50e   : > { %1563 = vmatprep.subr.bf16.mxu1 %v4654_v4  ;;  %1604 = vmatprep.subr.bf16.mxu0 %v4656_v5 }
 0x50f   : > { %1593 = vmatprep.mubr.bf16.mxu1 %v5918_v42  ;;  %1634 = vmatprep.mubr.bf16.mxu0 %v5918_v42 }
 0x511   : > { %1564 = vmatpush1.bf16.msra.mxu1 %v4662_v6  ;;  %1605 = vmatpush1.bf16.msra.mxu0 %v4664_v7 }
 0x512   : > { %1565 = vmatprep.subr.bf16.mxu1 %v4668_v9  ;;  %1606 = vmatprep.subr.bf16.mxu0 %v4670_v10 }
 0x515   : > { %1566 = vmatpush1.bf16.msra.mxu1 %v4676_v14  ;;  %1607 = vmatpush1.bf16.msra.mxu0 %v4678_v15 }
 0x516   : > { %1567 = vmatprep.subr.bf16.mxu1 %v4682_v17  ;;  %1608 = vmatprep.subr.bf16.mxu0 %v4684_v18 }
 0x519   : > { %1568 = vmatpush1.bf16.msra.mxu1 %v4690_v20  ;;  %1609 = vmatpush1.bf16.msra.mxu0 %v4692_v21 }
 0x51a   : > { %1569 = vmatprep.subr.bf16.mxu1 %v4696_v23  ;;  %1610 = vmatprep.subr.bf16.mxu0 %v4698_v24 }
 0x51d   : > { %1570 = vmatpush1.bf16.msra.mxu1 %v4704_v25  ;;  %1611 = vmatpush1.bf16.msra.mxu0 %v4706_v26 }
 0x51e   : > { %1571 = vmatprep.subr.bf16.mxu1 %v4710_v27  ;;  %1612 = vmatprep.subr.bf16.mxu0 %v4712_v29 }
 0x521   : > { %1572 = vmatpush1.bf16.msra.mxu1 %v4718_v30  ;;  %1613 = vmatpush1.bf16.msra.mxu0 %v4720_v31 }
 0x522   : > { %1573 = vmatprep.subr.bf16.mxu1 %v4724_v32  ;;  %1614 = vmatprep.subr.bf16.mxu0 %v4726_v33 }
 0x525   : > { %1574 = vmatpush1.bf16.msra.mxu1 %v4732_v34  ;;  %1615 = vmatpush1.bf16.msra.mxu0 %v4734_v35 }
 0x526   : > { %1575 = vmatprep.subr.bf16.mxu1 %v4738_v36  ;;  %1616 = vmatprep.subr.bf16.mxu0 %v4740_v37 }
 0x529   : > { %1576 = vmatpush1.bf16.msra.mxu1 %v4746_v38  ;;  %1617 = vmatpush1.bf16.msra.mxu0 %v4748_v39 }
 0x52a   : > { %1685 = vmatprep.subr.bf16.mxu1 %v4644_v49  ;;  %1726 = vmatprep.subr.bf16.mxu0 %v4647_v50 }
 0x5df   : > { %v1471_v40 = vpop.f32.mrb[28].mxu1  ;;  %v1512_v47 = vpop.f32.mrb[36].mxu0 }
 0x5e0   : > { %v1519_v54 = vadd.f32 %v1471_v40, %v5921_v0  ;;  %v1521_v57 = vadd.f32 %v1512_v47, %v5922_v16  ;;  %v1473_v58 = vpop.f32.mrb[29].mxu1  ;;  %v1514_v61 = vpop.f32.mrb[37].mxu0 }
 0x5e1   : > { %v1520_v62 = vadd.f32 %v1473_v58, %v5923_v44  ;;  %v1522_v59 = vadd.f32 %v1514_v61, %v5924_v45  ;;  %v1475_v13 = vpop.f32.mrb[30].mxu1  ;;  %v1516_v28 = vpop.f32.mrb[38].mxu0 }
 0x5e2   : > { %v3561_v8 = vmul.f32 -1.442695, %v1519_v54  ;;  %v1476_v11 = vpop.f32.mrb[31].mxu1  ;;  %v1517_v12 = vpop.f32.mrb[39].mxu0  ;;  %v3563_v50 = vmul.f32 -1.442695, %v1521_v57 }
 0x5e3   : > { %v3562_v49 = vmul.f32 -1.442695, %v1520_v62  ;;  %v5082_v11 = vld [vmem:[#allocation4] ss:$16 sps:$4 sm:$0xff]   ;;  %v5085_v12 = vld [vmem:[#allocation4 + $0x8] ss:$16 sps:$4 sm:$0xff]  }
 0x5e4   : > { %4023 = vpow2.f32 %v3561_v8 }
 0x5e5   : > { %4025 = vpow2.f32 %v3562_v49  ;;  %v5088_v49 = vld [vmem:[#allocation4 + $0x24] ss:$16 sps:$4 sm:$0xff]  }
 0x5e6   : > { %4027 = vtanh.f32 %v1522_v59 }
 0x5e7   : > { %4029 = vpow2.f32 %v3563_v50  ;;  %v5091_v50 = vld [vmem:[#allocation4 + $0x2c] ss:$16 sps:$4 sm:$0xff]  }
 0x5ee   : > { %v4024_v41 = vpop.eup %4023 }
 0x5ef   : > { %v1532_v43 = vadd.f32 1.0, %v4024_v41  ;;  %v4026_v60 = vpop.eup %4025  ;;  %v5096_v41 = vld [vmem:[#allocation4 + $0x20] ss:$16 sps:$4 sm:$0xff]  }
 0x5f0   : > { %v1533_v2 = vadd.f32 1.0, %v4026_v60  ;;  %v4028_v3 = vpop.eup %4027  ;;  %v5102_v60 = vld [vmem:[#allocation4 + $0x44] ss:$16 sps:$4 sm:$0xff]  }
 0x5f1   : > { %4031 = vrcp.f32 %v1532_v43  ;;  %v4030_v46 = vpop.eup %4029  ;;  %v5099_v43 = vld [vmem:[#allocation4 + $0x28] ss:$16 sps:$4 sm:$0xff]  }
 0x5f2   : > { %4033 = vrcp.f32 %v1533_v2  ;;  %v1534_v48 = vadd.f32 1.0, %v4030_v46  ;;  %v5105_v2 = vld [vmem:[#allocation4 + $0x4c] ss:$16 sps:$4 sm:$0xff]   ;;  %v5111_v46 = vld [vmem:[#allocation4 + $0x48] ss:$16 sps:$4 sm:$0xff]  }
 0x5f4   : > { %4035 = vrcp.f32 %v1534_v48  ;;  %v5123_v48 = vld [vmem:[#allocation4 + $0x68] ss:$16 sps:$4 sm:$0xff]  }
 0x5fb   : > { %v4032_v19 = vpop.eup %4031 }
 0x5fc   : > { %v1543_v56 = vmul.f32 %v4032_v19, %v4028_v3  ;;  %v4034_v22 = vpop.eup %4033  ;;  %v5108_v3 = vld [vmem:[#allocation4 + $0x40] ss:$16 sps:$4 sm:$0xff]   ;;  %v5114_v19 = vld [vmem:[#allocation4 + $0x64] ss:$16 sps:$4 sm:$0xff]  }
 0x5fd   : > { %v1542_v53 = vmul.f32 %v4034_v22, %v4977_v55  ;;  %v5120_v22 = vld [vmem:[#allocation4 + $0x60] ss:$16 sps:$4 sm:$0xff]  }
 0x5fe   : > { %v4036_v0 = vpop.eup %4035 }
 0x5ff   : > { %v1544_v40 = vadd.f32 %v1543_v56, %v1542_v53  ;;  %v5117_v56 = vld [vmem:[#allocation4 + $0x6c] ss:$16 sps:$4 sm:$0xff]  }
 0x600   : > { %v5129_v53 = vld [vmem:[#allocation4 + $0x8c] ss:$16 sps:$4 sm:$0xff]  }
 0x601   : > { %4037 = vtanh.f32 %v1544_v40  ;;  %v5024_v47 = vsel %vm1552_vm6, %v1544_v40, %v4977_v55  ;;  %v5132_v40 = vld [vmem:[#allocation4 + $0x80] ss:$16 sps:$4 sm:$0xff]  }
 0x60b   : > { %v4038_v54 = vpop.eup %4037 }
 0x60c   : > { %v1546_v16 = vmul.f32 %v4038_v54, %v4036_v0  ;;  %v5138_v0 = vld [vmem:[#allocation4 + $0xa4] ss:$16 sps:$4 sm:$0xff]   ;;  %v5141_v54 = vld [vmem:[#allocation4 + $0xac] ss:$16 sps:$4 sm:$0xff]  }
 0x60e   : > { %v5027_v57 = vsel %vm1552_vm6, %v1546_v16, %v4980_v52  ;;  %v1675_v52 = vpop.permute.xlu0 %1674  ;;  %v5144_v16 = vld [vmem:[#allocation4 + $0xa0] ss:$16 sps:$4 sm:$0xff]  }
 0x60f   : > { %v1560_v58 = vpack.c.bf16 %v5027_v57, %v5027_v57  ;;  %vm1676_vm7 = vcmp.eq.s32.totalorder %v1675_v52, 1 }
 0x611   : > { %1594 = vmatmul.mubr.bf16.vlgmr.msra.gmra.mrb[32].mxu1 %v1560_v58  ;;  %1635 = vmatmul.mubr.bf16.vlgmr.msra.gmra.mrb[40].mxu0 %v1560_v58  ;;  %v5150_v58 = vld [vmem:[#allocation4 + $0xc4] ss:$16 sps:$4 sm:$0xff]  }
 0x612   : > { %1686 = vmatpush1.bf16.msra.mxu1 %v4650_v63  ;;  %1727 = vmatpush1.bf16.msra.mxu0 %v4652_v1  ;;  %v5063_v63 = vld [vmem:[#allocation4 + $0x4] ss:$16 sps:$4 sm:$0xff]   ;;  %v5066_v1 = vld [vmem:[#allocation4 + $0xc] ss:$16 sps:$4 sm:$0xff]  }
 0x613   : > { %1687 = vmatprep.subr.bf16.mxu1 %v4654_v4  ;;  %1728 = vmatprep.subr.bf16.mxu0 %v4656_v5 }
 0x614   : > { %1717 = vmatprep.mubr.bf16.mxu1 %v5918_v42  ;;  %1758 = vmatprep.mubr.bf16.mxu0 %v5918_v42 }
 0x616   : > { %1688 = vmatpush1.bf16.msra.mxu1 %v4662_v6  ;;  %1729 = vmatpush1.bf16.msra.mxu0 %v4664_v7  ;;  %v5925_v6 = vld [vmem:[#allocation27_spill] sm:$0xff] }
 0x617   : > { %1689 = vmatprep.subr.bf16.mxu1 %v4668_v9  ;;  %1730 = vmatprep.subr.bf16.mxu0 %v4670_v10  ;;  %v5926_v9 = vld [vmem:[#allocation28_spill] sm:$0xff] }
 0x61a   : > { %1690 = vmatpush1.bf16.msra.mxu1 %v4676_v14  ;;  %1731 = vmatpush1.bf16.msra.mxu0 %v4678_v15 }
 0x61b   : > { %1691 = vmatprep.subr.bf16.mxu1 %v4682_v17  ;;  %1732 = vmatprep.subr.bf16.mxu0 %v4684_v18  ;;  %v5927_v17 = vld [vmem:[#allocation29_spill] sm:$0xff] }
 0x61e   : > { %1692 = vmatpush1.bf16.msra.mxu1 %v4690_v20  ;;  %1733 = vmatpush1.bf16.msra.mxu0 %v4692_v21  ;;  %v5928_v20 = vld [vmem:[#allocation30_spill] sm:$0xff] }
 0x61f   : > { %1693 = vmatprep.subr.bf16.mxu1 %v4696_v23  ;;  %1734 = vmatprep.subr.bf16.mxu0 %v4698_v24 }
 0x622   : > { %1694 = vmatpush1.bf16.msra.mxu1 %v4704_v25  ;;  %1735 = vmatpush1.bf16.msra.mxu0 %v4706_v26 }
 0x623   : > { %1695 = vmatprep.subr.bf16.mxu1 %v4710_v27  ;;  %1736 = vmatprep.subr.bf16.mxu0 %v4712_v29 }
 0x626   : > { %1696 = vmatpush1.bf16.msra.mxu1 %v4718_v30  ;;  %1737 = vmatpush1.bf16.msra.mxu0 %v4720_v31 }
 0x627   : > { %1697 = vmatprep.subr.bf16.mxu1 %v4724_v32  ;;  %1738 = vmatprep.subr.bf16.mxu0 %v4726_v33 }
 0x62a   : > { %1698 = vmatpush1.bf16.msra.mxu1 %v4732_v34  ;;  %1739 = vmatpush1.bf16.msra.mxu0 %v4734_v35 }
 0x62b   : > { %1699 = vmatprep.subr.bf16.mxu1 %v4738_v36  ;;  %1740 = vmatprep.subr.bf16.mxu0 %v4740_v37 }
 0x62e   : > { %1700 = vmatpush1.bf16.msra.mxu1 %v4746_v38  ;;  %1741 = vmatpush1.bf16.msra.mxu0 %v4748_v39 }
 0x62f   : > { %1809 = vmatprep.subr.bf16.mxu1 %v5063_v63  ;;  %1850 = vmatprep.subr.bf16.mxu0 %v5066_v1 }
 0x6e4   : > { %v1595_v4 = vpop.f32.mrb[32].mxu1  ;;  %v1636_v5 = vpop.f32.mrb[40].mxu0 }
 0x6e5   : > { %v1643_v7 = vadd.f32 %v1595_v4, %v5925_v6  ;;  %v1645_v10 = vadd.f32 %v1636_v5, %v5926_v9  ;;  %v1597_v14 = vpop.f32.mrb[33].mxu1  ;;  %v1638_v15 = vpop.f32.mrb[41].mxu0  ;;  %v5153_v4 = vld [vmem:[#allocation4 + $0xcc] ss:$16 sps:$4 sm:$0xff]   ;;  %v5156_v5 = vld [vmem:[#allocation4 + $0xc0] ss:$16 sps:$4 sm:$0xff]  }
 0x6e6   : > { %v1644_v18 = vadd.f32 %v1597_v14, %v5927_v17  ;;  %v1646_v21 = vadd.f32 %v1638_v15, %v5928_v20  ;;  %v1599_v23 = vpop.f32.mrb[34].mxu1  ;;  %v1640_v24 = vpop.f32.mrb[42].mxu0  ;;  %v5159_v6 = vld [vmem:[#allocation4 + $0xc8] ss:$16 sps:$4 sm:$0xff]   ;;  %v5165_v9 = vld [vmem:[#allocation4 + $0xec] ss:$16 sps:$4 sm:$0xff]  }
 0x6e7   : > { %v3564_v25 = vmul.f32 -1.442695, %v1643_v7  ;;  %v1600_v26 = vpop.f32.mrb[35].mxu1  ;;  %v1641_v27 = vpop.f32.mrb[43].mxu0  ;;  %v3566_v30 = vmul.f32 -1.442695, %v1645_v10 }
 0x6e8   : > { %v3565_v29 = vmul.f32 -1.442695, %v1644_v18  ;;  %v5162_v7 = vld [vmem:[#allocation4 + $0xe4] ss:$16 sps:$4 sm:$0xff]   ;;  %v5168_v10 = vld [vmem:[#allocation4 + $0xe0] ss:$16 sps:$4 sm:$0xff]  }
 0x6e9   : > { %4039 = vpow2.f32 %v3564_v25  ;;  %v5171_v14 = vld [vmem:[#allocation4 + $0xe8] ss:$16 sps:$4 sm:$0xff]   ;;  %v5929_v18 = vld [vmem:[#allocation31_spill] sm:$0xff]  ;;  %v5931_v26 = vld [vmem:[#allocation33_spill] sm:$0xff] }
 0x6ea   : > { %4041 = vpow2.f32 %v3565_v29  ;;  %v5932_v29 = vld [vmem:[#allocation34_spill] sm:$0xff] }
 0x6eb   : > { %4043 = vtanh.f32 %v1646_v21  ;;  %v5930_v21 = vld [vmem:[#allocation32_spill] sm:$0xff] }
 0x6ec   : > { %4045 = vpow2.f32 %v3566_v30 }
 0x6f3   : > { %v4040_v31 = vpop.eup %4039 }
 0x6f4   : > { %v1656_v32 = vadd.f32 1.0, %v4040_v31  ;;  %v4042_v33 = vpop.eup %4041 }
 0x6f5   : > { %v1657_v34 = vadd.f32 1.0, %v4042_v33  ;;  %v4044_v35 = vpop.eup %4043 }
 0x6f6   : > { %4047 = vrcp.f32 %v1656_v32  ;;  %v4046_v36 = vpop.eup %4045 }
 0x6f7   : > { %4049 = vrcp.f32 %v1657_v34  ;;  %v1658_v55 = vadd.f32 1.0, %v4046_v36 }
 0x6f9   : > { %4051 = vrcp.f32 %v1658_v55 }
 0x700   : > { %v4048_v37 = vpop.eup %4047 }
 0x701   : > { %v1667_v38 = vmul.f32 %v4048_v37, %v4044_v35  ;;  %v4050_v39 = vpop.eup %4049 }
 0x702   : > { %v1666_v61 = vmul.f32 %v4050_v39, %v5024_v47 }
 0x703   : > { %v4052_v45 = vpop.eup %4051 }
 0x704   : > { %v1668_v44 = vadd.f32 %v1667_v38, %v1666_v61 }
 0x706   : > { %4053 = vtanh.f32 %v1668_v44  ;;  %v5075_v62 = vsel %vm1676_vm7, %v1668_v44, %v5024_v47  ;;  %v5135_v47 = vld [vmem:[#allocation4 + $0x88] ss:$16 sps:$4 sm:$0xff]  }
 0x710   : > { %v4054_v59 = vpop.eup %4053 }
 0x711   : > { %v1670_v13 = vmul.f32 %v4054_v59, %v4052_v45 }
 0x713   : > { %v5078_v28 = vsel %vm1676_vm7, %v1670_v13, %v5027_v57  ;;  %v5147_v57 = vld [vmem:[#allocation4 + $0xa8] ss:$16 sps:$4 sm:$0xff]   ;;  %v1799_v13 = vpop.permute.xlu1 %1798 }
 0x714   : > { %v1684_v8 = vpack.c.bf16 %v5078_v28, %v5078_v28  ;;  %vm1800_vm8 = vcmp.eq.s32.totalorder %v1799_v13, 1  ;;  %v5283_v13 = vld [vmem:[#allocation9 + $0x84] ss:$16 sps:$4 sm:$0xff]  }
 0x715   : > { %5944 = vst [vmem:[#allocation28_spill] sm:$0xff] %v5283_v13 }
 0x716   : > { %1718 = vmatmul.mubr.bf16.vlgmr.msra.gmra.mrb[36].mxu1 %v1684_v8  ;;  %1759 = vmatmul.mubr.bf16.vlgmr.msra.gmra.mrb[44].mxu0 %v1684_v8 }
 0x717   : > { %1810 = vmatpush1.bf16.msra.mxu1 %v5082_v11  ;;  %1851 = vmatpush1.bf16.msra.mxu0 %v5085_v12 }
 0x718   : > { %1811 = vmatprep.subr.bf16.mxu1 %v5088_v49  ;;  %1852 = vmatprep.subr.bf16.mxu0 %v5091_v50 }
 0x719   : > { %1841 = vmatprep.mubr.bf16.mxu1 %v5918_v42  ;;  %1882 = vmatprep.mubr.bf16.mxu0 %v5918_v42 }
 0x71b   : > { %1812 = vmatpush1.bf16.msra.mxu1 %v5096_v41  ;;  %1853 = vmatpush1.bf16.msra.mxu0 %v5099_v43 }
 0x71c   : > { %1813 = vmatprep.subr.bf16.mxu1 %v5102_v60  ;;  %1854 = vmatprep.subr.bf16.mxu0 %v5105_v2 }
 0x71f   : > { %1814 = vmatpush1.bf16.msra.mxu1 %v5108_v3  ;;  %1855 = vmatpush1.bf16.msra.mxu0 %v5111_v46 }
 0x720   : > { %1815 = vmatprep.subr.bf16.mxu1 %v5114_v19  ;;  %1856 = vmatprep.subr.bf16.mxu0 %v5117_v56 }
 0x723   : > { %1816 = vmatpush1.bf16.msra.mxu1 %v5120_v22  ;;  %1857 = vmatpush1.bf16.msra.mxu0 %v5123_v48 }
 0x724   : > { %1817 = vmatprep.subr.bf16.mxu1 %v5126_v51  ;;  %1858 = vmatprep.subr.bf16.mxu0 %v5129_v53 }
 0x727   : > { %1818 = vmatpush1.bf16.msra.mxu1 %v5132_v40  ;;  %1859 = vmatpush1.bf16.msra.mxu0 %v5135_v47 }
 0x728   : > { %1819 = vmatprep.subr.bf16.mxu1 %v5138_v0  ;;  %1860 = vmatprep.subr.bf16.mxu0 %v5141_v54 }
 0x72b   : > { %1820 = vmatpush1.bf16.msra.mxu1 %v5144_v16  ;;  %1861 = vmatpush1.bf16.msra.mxu0 %v5147_v57 }
 0x72c   : > { %1821 = vmatprep.subr.bf16.mxu1 %v5150_v58  ;;  %1862 = vmatprep.subr.bf16.mxu0 %v5153_v4 }
 0x72f   : > { %1822 = vmatpush1.bf16.msra.mxu1 %v5156_v5  ;;  %1863 = vmatpush1.bf16.msra.mxu0 %v5159_v6 }
 0x730   : > { %1823 = vmatprep.subr.bf16.mxu1 %v5162_v7  ;;  %1864 = vmatprep.subr.bf16.mxu0 %v5165_v9 }
 0x733   : > { %1824 = vmatpush1.bf16.msra.mxu1 %v5168_v10  ;;  %1865 = vmatpush1.bf16.msra.mxu0 %v5171_v14 }
 0x734   : > { %1933 = vmatprep.subr.bf16.mxu1 %v5063_v63  ;;  %1974 = vmatprep.subr.bf16.mxu0 %v5066_v1 }
 0x7e9   : > { %v1719_v15 = vpop.f32.mrb[36].mxu1  ;;  %v1760_v17 = vpop.f32.mrb[44].mxu0 }
 0x7ea   : > { %v1767_v20 = vadd.f32 %v1719_v15, %v5929_v18  ;;  %v1769_v23 = vadd.f32 %v1760_v17, %v5930_v21  ;;  %v1721_v24 = vpop.f32.mrb[37].mxu1  ;;  %v1762_v25 = vpop.f32.mrb[45].mxu0 }
 0x7eb   : > { %v1768_v27 = vadd.f32 %v1721_v24, %v5931_v26  ;;  %v1770_v30 = vadd.f32 %v1762_v25, %v5932_v29  ;;  %v1723_v31 = vpop.f32.mrb[38].mxu1  ;;  %v1764_v32 = vpop.f32.mrb[46].mxu0 }
 0x7ec   : > { %v3567_v33 = vmul.f32 -1.442695, %v1767_v20  ;;  %v1724_v34 = vpop.f32.mrb[39].mxu1  ;;  %v1765_v35 = vpop.f32.mrb[47].mxu0  ;;  %v3569_v1 = vmul.f32 -1.442695, %v1769_v23 }
 0x7ed   : > { %v3568_v63 = vmul.f32 -1.442695, %v1768_v27  ;;  %v5240_v34 = vld [vmem:[#allocation9 + $0x8] ss:$16 sps:$4 sm:$0xff]  }
 0x7ee   : > { %4055 = vpow2.f32 %v3567_v33  ;;  %v5238_v33 = vld [vmem:[#allocation9] ss:$16 sps:$4 sm:$0xff]  }
 0x7ef   : > { %4057 = vpow2.f32 %v3568_v63  ;;  %v5244_v63 = vld [vmem:[#allocation9 + $0x24] ss:$16 sps:$4 sm:$0xff]  }
 0x7f0   : > { %4059 = vtanh.f32 %v1770_v30 }
 0x7f1   : > { %4061 = vpow2.f32 %v3569_v1  ;;  %v5246_v1 = vld [vmem:[#allocation9 + $0x2c] ss:$16 sps:$4 sm:$0xff]  }
 0x7f8   : > { %v4056_v36 = vpop.eup %4055 }
 0x7f9   : > { %v1780_v37 = vadd.f32 1.0, %v4056_v36  ;;  %v4058_v38 = vpop.eup %4057  ;;  %v5250_v36 = vld [vmem:[#allocation9 + $0x20] ss:$16 sps:$4 sm:$0xff]  }
 0x7fa   : > { %v1781_v39 = vadd.f32 1.0, %v4058_v38  ;;  %v4060_v55 = vpop.eup %4059  ;;  %v5260_v38 = vld [vmem:[#allocation9 + $0x44] ss:$16 sps:$4 sm:$0xff]  }
 0x7fb   : > { %4063 = vrcp.f32 %v1780_v37  ;;  %v4062_v52 = vpop.eup %4061  ;;  %v5252_v37 = vld [vmem:[#allocation9 + $0x28] ss:$16 sps:$4 sm:$0xff]  }
 0x7fc   : > { %4065 = vrcp.f32 %v1781_v39  ;;  %v1782_v59 = vadd.f32 1.0, %v4062_v52  ;;  %v5262_v39 = vld [vmem:[#allocation9 + $0x40] ss:$16 sps:$4 sm:$0xff]   ;;  %v5268_v52 = vld [vmem:[#allocation9 + $0x48] ss:$16 sps:$4 sm:$0xff]  }
 0x7fd   : > { %5939 = vst [vmem:[#allocation23_spill] sm:$0xff] %v5268_v52 }
 0x7fe   : > { %4067 = vrcp.f32 %v1782_v59  ;;  %v5280_v59 = vld [vmem:[#allocation9 + $0x68] ss:$16 sps:$4 sm:$0xff]  }
 0x7ff   : > { %5943 = vst [vmem:[#allocation27_spill] sm:$0xff] %v5280_v59 }
 0x805   : > { %v4064_v61 = vpop.eup %4063 }
 0x806   : > { %v1791_v44 = vmul.f32 %v4064_v61, %v4060_v55  ;;  %v4066_v45 = vpop.eup %4065  ;;  %v5265_v55 = vld [vmem:[#allocation9 + $0x4c] ss:$16 sps:$4 sm:$0xff]   ;;  %v5271_v61 = vld [vmem:[#allocation9 + $0x64] ss:$16 sps:$4 sm:$0xff]  }
 0x807   : > { %v1790_v8 = vmul.f32 %v4066_v45, %v5075_v62  ;;  %5940 = vst [vmem:[#allocation24_spill] sm:$0xff] %v5271_v61  ;;  %v5277_v45 = vld [vmem:[#allocation9 + $0x6c] ss:$16 sps:$4 sm:$0xff]  }
 0x808   : > { %v4068_v18 = vpop.eup %4067  ;;  %5942 = vst [vmem:[#allocation26_spill] sm:$0xff] %v5277_v45 }
 0x809   : > { %v1792_v15 = vadd.f32 %v1791_v44, %v1790_v8  ;;  %v5274_v44 = vld [vmem:[#allocation9 + $0x60] ss:$16 sps:$4 sm:$0xff]  }
 0x80a   : > { %5941 = vst [vmem:[#allocation25_spill] sm:$0xff] %v5274_v44  ;;  %v5286_v8 = vld [vmem:[#allocation9 + $0x80] ss:$16 sps:$4 sm:$0xff]  }
 0x80b   : > { %4069 = vtanh.f32 %v1792_v15  ;;  %v5182_v17 = vsel %vm1800_vm8, %v1792_v15, %v5075_v62  ;;  %v5221_v62 = vld [vmem:[#allocation9 + $0x4] ss:$16 sps:$4 sm:$0xff]   ;;  %5945 = vst [vmem:[#allocation29_spill] sm:$0xff] %v5286_v8  ;;  %v5289_v15 = vld [vmem:[#allocation9 + $0x8c] ss:$16 sps:$4 sm:$0xff]  }
 0x80c   : > { %5933 = vst [vmem:[#allocation21_spill] sm:$0xff] %v5221_v62  ;;  %5946 = vst [vmem:[#allocation30_spill] sm:$0xff] %v5289_v15 }
 0x815   : > { %v4070_v20 = vpop.eup %4069 }
 0x816   : > { %v1794_v21 = vmul.f32 %v4070_v20, %v4068_v18  ;;  %v5295_v18 = vld [vmem:[#allocation9 + $0xa4] ss:$16 sps:$4 sm:$0xff]   ;;  %v5298_v20 = vld [vmem:[#allocation9 + $0xa0] ss:$16 sps:$4 sm:$0xff]  }
 0x817   : > { %5948 = vst [vmem:[#allocation32_spill] sm:$0xff] %v5295_v18  ;;  %5949 = vst [vmem:[#allocation33_spill] sm:$0xff] %v5298_v20 }
 0x818   : > { %v5185_v23 = vsel %vm1800_vm8, %v1794_v21, %v5078_v28  ;;  %v5223_v28 = vld [vmem:[#allocation9 + $0xc] ss:$16 sps:$4 sm:$0xff]  }
 0x819   : > { %v1808_v24 = vpack.c.bf16 %v5185_v23, %v5185_v23  ;;  %5934 = vst [vmem:[#allocation22_spill] sm:$0xff] %v5223_v28  ;;  %v5301_v21 = vld [vmem:[#allocation9 + $0xac] ss:$16 sps:$4 sm:$0xff]  }
 0x81a   : > { %5950 = vst [vmem:[#allocation34_spill] sm:$0xff] %v5301_v21 }
 0x81b   : > { %1842 = vmatmul.mubr.bf16.vlgmr.msra.gmra.mrb[40].mxu1 %v1808_v24  ;;  %1883 = vmatmul.mubr.bf16.vlgmr.msra.gmra.mrb[48].mxu0 %v1808_v24  ;;  %v5307_v24 = vld [vmem:[#allocation9 + $0xc4] ss:$16 sps:$4 sm:$0xff]  }
 0x81c   : > { %1934 = vmatpush1.bf16.msra.mxu1 %v5082_v11  ;;  %1975 = vmatpush1.bf16.msra.mxu0 %v5085_v12 }
 0x81d   : > { %1935 = vmatprep.subr.bf16.mxu1 %v5088_v49  ;;  %1976 = vmatprep.subr.bf16.mxu0 %v5091_v50  ;;  %v5935_v49 = vld [vmem:[#allocation35_spill] sm:$0xff] }
 0x81e   : > { %1965 = vmatprep.mubr.bf16.mxu1 %v5918_v42  ;;  %2006 = vmatprep.mubr.bf16.mxu0 %v5918_v42 }
 0x820   : > { %1936 = vmatpush1.bf16.msra.mxu1 %v5096_v41  ;;  %1977 = vmatpush1.bf16.msra.mxu0 %v5099_v43  ;;  %v5936_v41 = vld [vmem:[#allocation36_spill] sm:$0xff] }
 0x821   : > { %1937 = vmatprep.subr.bf16.mxu1 %v5102_v60  ;;  %1978 = vmatprep.subr.bf16.mxu0 %v5105_v2  ;;  %5952 = vst [vmem:[#allocation36_spill] sm:$0xff] %v5307_v24 }
 0x824   : > { %1938 = vmatpush1.bf16.msra.mxu1 %v5108_v3  ;;  %1979 = vmatpush1.bf16.msra.mxu0 %v5111_v46  ;;  %v5937_v3 = vld [vmem:[#allocation37_spill] sm:$0xff] }
 0x825   : > { %1939 = vmatprep.subr.bf16.mxu1 %v5114_v19  ;;  %1980 = vmatprep.subr.bf16.mxu0 %v5117_v56  ;;  %v5938_v19 = vld [vmem:[#allocation38_spill] sm:$0xff] }
 0x828   : > { %1940 = vmatpush1.bf16.msra.mxu1 %v5120_v22  ;;  %1981 = vmatpush1.bf16.msra.mxu0 %v5123_v48 }
 0x829   : > { %1941 = vmatprep.subr.bf16.mxu1 %v5126_v51  ;;  %1982 = vmatprep.subr.bf16.mxu0 %v5129_v53 }
 0x82c   : > { %1942 = vmatpush1.bf16.msra.mxu1 %v5132_v40  ;;  %1983 = vmatpush1.bf16.msra.mxu0 %v5135_v47 }
 0x82d   : > { %1943 = vmatprep.subr.bf16.mxu1 %v5138_v0  ;;  %1984 = vmatprep.subr.bf16.mxu0 %v5141_v54 }
 0x830   : > { %1944 = vmatpush1.bf16.msra.mxu1 %v5144_v16  ;;  %1985 = vmatpush1.bf16.msra.mxu0 %v5147_v57 }
 0x831   : > { %1945 = vmatprep.subr.bf16.mxu1 %v5150_v58  ;;  %1986 = vmatprep.subr.bf16.mxu0 %v5153_v4 }
 0x834   : > { %1946 = vmatpush1.bf16.msra.mxu1 %v5156_v5  ;;  %1987 = vmatpush1.bf16.msra.mxu0 %v5159_v6 }
 0x835   : > { %1947 = vmatprep.subr.bf16.mxu1 %v5162_v7  ;;  %1988 = vmatprep.subr.bf16.mxu0 %v5165_v9 }
 0x838   : > { %1948 = vmatpush1.bf16.msra.mxu1 %v5168_v10  ;;  %1989 = vmatpush1.bf16.msra.mxu0 %v5171_v14  ;;  %v1923_v14 = vpop.permute.xlu0 %1922 }
 0x839   : > { %2278 = vmatprep.subr.bf16.mxu1 %v5221_v62  ;;  %2319 = vmatprep.subr.bf16.mxu0 %v5223_v28  ;;  %vm1924_vm9 = vcmp.eq.s32.totalorder %v1923_v14, 1  ;;  %v5400_v14 = vld [vmem:[#allocation7 + $0xa0] ss:$16 sps:$4 sm:$0xff]  }
 0x83a   : > { %5974 = vst [vmem:[#allocation62_spill] sm:$0xff] %v5400_v14 }
 0x8ee   : > { %v1843_v11 = vpop.f32.mrb[40].mxu1  ;;  %v1884_v12 = vpop.f32.mrb[48].mxu0 }
 0x8ef   : > { %v1891_v50 = vadd.f32 %v1843_v11, %v5935_v49  ;;  %v1893_v43 = vadd.f32 %v1884_v12, %v5936_v41  ;;  %v1845_v60 = vpop.f32.mrb[41].mxu1  ;;  %v1886_v2 = vpop.f32.mrb[49].mxu0  ;;  %v5310_v11 = vld [vmem:[#allocation9 + $0xc0] ss:$16 sps:$4 sm:$0xff]   ;;  %v5313_v12 = vld [vmem:[#allocation9 + $0xcc] ss:$16 sps:$4 sm:$0xff]  }
 0x8f0   : > { %v1892_v46 = vadd.f32 %v1845_v60, %v5937_v3  ;;  %v1894_v56 = vadd.f32 %v1886_v2, %v5938_v19  ;;  %v1847_v22 = vpop.f32.mrb[42].mxu1  ;;  %v1888_v48 = vpop.f32.mrb[50].mxu0  ;;  %5953 = vst [vmem:[#allocation37_spill] sm:$0xff] %v5310_v11  ;;  %5954 = vst [vmem:[#allocation38_spill] sm:$0xff] %v5313_v12  ;;  %v5316_v49 = vld [vmem:[#allocation9 + $0xc8] ss:$16 sps:$4 sm:$0xff]  }
 0x8f1   : > { %v3570_v51 = vmul.f32 -1.442695, %v1891_v50  ;;  %v1848_v53 = vpop.f32.mrb[43].mxu1  ;;  %v1889_v40 = vpop.f32.mrb[51].mxu0  ;;  %v3572_v0 = vmul.f32 -1.442695, %v1893_v43 }
 0x8f2   : > { %v3571_v47 = vmul.f32 -1.442695, %v1892_v46  ;;  %5955 = vst [vmem:[#allocation43_spill] sm:$0xff] %v5316_v49  ;;  %v5319_v50 = vld [vmem:[#allocation9 + $0xe4] ss:$16 sps:$4 sm:$0xff]  }
 0x8f3   : > { %4071 = vpow2.f32 %v3570_v51  ;;  %5956 = vst [vmem:[#allocation44_spill] sm:$0xff] %v5319_v50  ;;  %v5322_v41 = vld [vmem:[#allocation9 + $0xe0] ss:$16 sps:$4 sm:$0xff]   ;;  %v5325_v43 = vld [vmem:[#allocation9 + $0xec] ss:$16 sps:$4 sm:$0xff]  }
 0x8f4   : > { %4073 = vpow2.f32 %v3571_v47  ;;  %5957 = vst [vmem:[#allocation45_spill] sm:$0xff] %v5322_v41  ;;  %5958 = vst [vmem:[#allocation46_spill] sm:$0xff] %v5325_v43  ;;  %v5328_v60 = vld [vmem:[#allocation9 + $0xe8] ss:$16 sps:$4 sm:$0xff]   ;;  %v5333_v2 = vld [vmem:[#allocation7 + $0x4] ss:$16 sps:$4 sm:$0xff]  }
 0x8f5   : > { %4075 = vtanh.f32 %v1894_v56  ;;  %5959 = vst [vmem:[#allocation47_spill] sm:$0xff] %v5328_v60  ;;  %5960 = vst [vmem:[#allocation48_spill] sm:$0xff] %v5333_v2  ;;  %v5335_v3 = vld [vmem:[#allocation7 + $0xc] ss:$16 sps:$4 sm:$0xff]   ;;  %v5337_v46 = vld [vmem:[#allocation7] ss:$16 sps:$4 sm:$0xff]  }
 0x8f6   : > { %4077 = vpow2.f32 %v3572_v0  ;;  %5961 = vst [vmem:[#allocation49_spill] sm:$0xff] %v5335_v3  ;;  %v5339_v19 = vld [vmem:[#allocation7 + $0x8] ss:$16 sps:$4 sm:$0xff]   ;;  %v5347_v56 = vld [vmem:[#allocation7 + $0x24] ss:$16 sps:$4 sm:$0xff]  }
 0x8f7   : > { %v5349_v22 = vld [vmem:[#allocation7 + $0x2c] ss:$16 sps:$4 sm:$0xff]   ;;  %v5352_v48 = vld [vmem:[#allocation7 + $0x20] ss:$16 sps:$4 sm:$0xff]   ;;  %v5354_v51 = vld [vmem:[#allocation7 + $0x28] ss:$16 sps:$4 sm:$0xff]  }
 0x8f8   : > { %v5360_v53 = vld [vmem:[#allocation7 + $0x44] ss:$16 sps:$4 sm:$0xff]   ;;  %v5362_v40 = vld [vmem:[#allocation7 + $0x4c] ss:$16 sps:$4 sm:$0xff]   ;;  %v5364_v47 = vld [vmem:[#allocation7 + $0x40] ss:$16 sps:$4 sm:$0xff]  }
 0x8f9   : > { %5962 = vst [vmem:[#allocation50_spill] sm:$0xff] %v5364_v47  ;;  %v5366_v0 = vld [vmem:[#allocation7 + $0x48] ss:$16 sps:$4 sm:$0xff]  }
 0x8fa   : > { %5963 = vst [vmem:[#allocation51_spill] sm:$0xff] %v5366_v0 }
 0x8fd   : > { %v4072_v54 = vpop.eup %4071 }
 0x8fe   : > { %v1904_v16 = vadd.f32 1.0, %v4072_v54  ;;  %v4074_v57 = vpop.eup %4073  ;;  %v5372_v54 = vld [vmem:[#allocation7 + $0x64] ss:$16 sps:$4 sm:$0xff]  }
 0x8ff   : > { %v1905_v58 = vadd.f32 1.0, %v4074_v57  ;;  %v4076_v4 = vpop.eup %4075  ;;  %5964 = vst [vmem:[#allocation52_spill] sm:$0xff] %v5372_v54  ;;  %v5376_v57 = vld [vmem:[#allocation7 + $0x60] ss:$16 sps:$4 sm:$0xff]  }
 0x900   : > { %4079 = vrcp.f32 %v1904_v16  ;;  %v4078_v5 = vpop.eup %4077  ;;  %v5374_v16 = vld [vmem:[#allocation7 + $0x6c] ss:$16 sps:$4 sm:$0xff]   ;;  %5966 = vst [vmem:[#allocation54_spill] sm:$0xff] %v5376_v57 }
 0x901   : > { %4081 = vrcp.f32 %v1905_v58  ;;  %v1906_v10 = vadd.f32 1.0, %v4078_v5  ;;  %5965 = vst [vmem:[#allocation53_spill] sm:$0xff] %v5374_v16  ;;  %v5378_v58 = vld [vmem:[#allocation7 + $0x68] ss:$16 sps:$4 sm:$0xff]   ;;  %v5386_v5 = vld [vmem:[#allocation7 + $0x8c] ss:$16 sps:$4 sm:$0xff]  }
 0x902   : > { %5967 = vst [vmem:[#allocation55_spill] sm:$0xff] %v5378_v58  ;;  %5969 = vst [vmem:[#allocation57_spill] sm:$0xff] %v5386_v5 }
 0x903   : > { %4083 = vrcp.f32 %v1906_v10  ;;  %v5398_v10 = vld [vmem:[#allocation7 + $0xac] ss:$16 sps:$4 sm:$0xff]  }
 0x904   : > { %5973 = vst [vmem:[#allocation61_spill] sm:$0xff] %v5398_v10 }
 0x90a   : > { %v4080_v6 = vpop.eup %4079 }
 0x90b   : > { %v1915_v7 = vmul.f32 %v4080_v6, %v4076_v4  ;;  %v4082_v9 = vpop.eup %4081  ;;  %v5384_v4 = vld [vmem:[#allocation7 + $0x84] ss:$16 sps:$4 sm:$0xff]   ;;  %v5388_v6 = vld [vmem:[#allocation7 + $0x80] ss:$16 sps:$4 sm:$0xff]  }
 0x90c   : > { %v1914_v25 = vmul.f32 %v4082_v9, %v5182_v17  ;;  %5968 = vst [vmem:[#allocation56_spill] sm:$0xff] %v5384_v4  ;;  %5970 = vst [vmem:[#allocation58_spill] sm:$0xff] %v5388_v6  ;;  %v5396_v9 = vld [vmem:[#allocation7 + $0xa4] ss:$16 sps:$4 sm:$0xff]  }
 0x90d   : > { %v4084_v29 = vpop.eup %4083  ;;  %5972 = vst [vmem:[#allocation60_spill] sm:$0xff] %v5396_v9 }
 0x90e   : > { %v1916_v26 = vadd.f32 %v1915_v7, %v1914_v25  ;;  %v5390_v7 = vld [vmem:[#allocation7 + $0x88] ss:$16 sps:$4 sm:$0xff]  }
 0x90f   : > { %5971 = vst [vmem:[#allocation59_spill] sm:$0xff] %v5390_v7  ;;  %v5402_v25 = vld [vmem:[#allocation7 + $0xa8] ss:$16 sps:$4 sm:$0xff]  }
 0x910   : > { %4085 = vtanh.f32 %v1916_v26  ;;  %v5233_v27 = vsel %vm1924_vm9, %v1916_v26, %v5182_v17  ;;  %v5292_v17 = vld [vmem:[#allocation9 + $0x88] ss:$16 sps:$4 sm:$0xff]   ;;  %5975 = vst [vmem:[#allocation63_spill] sm:$0xff] %v5402_v25  ;;  %v5408_v26 = vld [vmem:[#allocation7 + $0xc4] ss:$16 sps:$4 sm:$0xff]  }
 0x911   : > { %5947 = vst [vmem:[#allocation31_spill] sm:$0xff] %v5292_v17  ;;  %5976 = vst [vmem:[#allocation64_spill] sm:$0xff] %v5408_v26 }
 0x91a   : > { %v4086_v30 = vpop.eup %4085 }
 0x91b   : > { %v1918_v31 = vmul.f32 %v4086_v30, %v4084_v29  ;;  %v5410_v29 = vld [vmem:[#allocation7 + $0xcc] ss:$16 sps:$4 sm:$0xff]   ;;  %v5412_v30 = vld [vmem:[#allocation7 + $0xc0] ss:$16 sps:$4 sm:$0xff]  }
 0x91c   : > { %5977 = vst [vmem:[#allocation65_spill] sm:$0xff] %v5410_v29  ;;  %5978 = vst [vmem:[#allocation66_spill] sm:$0xff] %v5412_v30 }
 0x91d   : > { %v5236_v32 = vsel %vm1924_vm9, %v1918_v31, %v5185_v23  ;;  %v5304_v23 = vld [vmem:[#allocation9 + $0xa8] ss:$16 sps:$4 sm:$0xff]  }
 0x91e   : > { %v1932_v35 = vpack.c.bf16 %v5236_v32, %v5236_v32  ;;  %5951 = vst [vmem:[#allocation35_spill] sm:$0xff] %v5304_v23  ;;  %v5414_v31 = vld [vmem:[#allocation7 + $0xc8] ss:$16 sps:$4 sm:$0xff]  }
 0x91f   : > { %5979 = vst [vmem:[#allocation67_spill] sm:$0xff] %v5414_v31 }
 0x920   : > { %1966 = vmatmul.mubr.bf16.vlgmr.msra.gmra.mrb[44].mxu1 %v1932_v35  ;;  %2007 = vmatmul.mubr.bf16.vlgmr.msra.gmra.mrb[52].mxu0 %v1932_v35  ;;  %v5416_v35 = vld [vmem:[#allocation7 + $0xe4] ss:$16 sps:$4 sm:$0xff]  }
 0x921   : > { %2279 = vmatpush1.bf16.msra.mxu1 %v5238_v33  ;;  %2320 = vmatpush1.bf16.msra.mxu0 %v5240_v34  ;;  %5980 = vst [vmem:[#allocation68_spill] sm:$0xff] %v5416_v35 }
 0x922   : > { %2280 = vmatprep.subr.bf16.mxu1 %v5244_v63  ;;  %2321 = vmatprep.subr.bf16.mxu0 %v5246_v1 }
 0x923   : > { %2310 = vmatprep.mubr.bf16.mxu1 %v5918_v42  ;;  %2351 = vmatprep.mubr.bf16.mxu0 %v5918_v42 }
 0x925   : > { %2281 = vmatpush1.bf16.msra.mxu1 %v5250_v36  ;;  %2322 = vmatpush1.bf16.msra.mxu0 %v5252_v37 }
 0x926   : > { %2282 = vmatprep.subr.bf16.mxu1 %v5260_v38  ;;  %2323 = vmatprep.subr.bf16.mxu0 %v5265_v55 }
 0x929   : > { %2283 = vmatpush1.bf16.msra.mxu1 %v5262_v39  ;;  %2324 = vmatpush1.bf16.msra.mxu0 %v5268_v52 }
 0x92a   : > { %2284 = vmatprep.subr.bf16.mxu1 %v5271_v61  ;;  %2325 = vmatprep.subr.bf16.mxu0 %v5277_v45 }
 0x92d   : > { %2285 = vmatpush1.bf16.msra.mxu1 %v5274_v44  ;;  %2326 = vmatpush1.bf16.msra.mxu0 %v5280_v59 }
 0x92e   : > { %2286 = vmatprep.subr.bf16.mxu1 %v5283_v13  ;;  %2327 = vmatprep.subr.bf16.mxu0 %v5289_v15 }
 0x931   : > { %2287 = vmatpush1.bf16.msra.mxu1 %v5286_v8  ;;  %2328 = vmatpush1.bf16.msra.mxu0 %v5292_v17 }
 0x932   : > { %2288 = vmatprep.subr.bf16.mxu1 %v5295_v18  ;;  %2329 = vmatprep.subr.bf16.mxu0 %v5301_v21 }
 0x935   : > { %2289 = vmatpush1.bf16.msra.mxu1 %v5298_v20  ;;  %2330 = vmatpush1.bf16.msra.mxu0 %v5304_v23 }
 0x936   : > { %2290 = vmatprep.subr.bf16.mxu1 %v5307_v24  ;;  %2331 = vmatprep.subr.bf16.mxu0 %v5313_v12 }
 0x939   : > { %2291 = vmatpush1.bf16.msra.mxu1 %v5310_v11  ;;  %2332 = vmatpush1.bf16.msra.mxu0 %v5316_v49 }
 0x93a   : > { %2292 = vmatprep.subr.bf16.mxu1 %v5319_v50  ;;  %2333 = vmatprep.subr.bf16.mxu0 %v5325_v43 }
 0x93d   : > { %2293 = vmatpush1.bf16.msra.mxu1 %v5322_v41  ;;  %2334 = vmatpush1.bf16.msra.mxu0 %v5328_v60 }
 0x93e   : > { %2520 = vmatprep.subr.bf16.mxu1 %v5333_v2  ;;  %2561 = vmatprep.subr.bf16.mxu0 %v5335_v3 }
 0x940   : > { %2311 = vmatmul.mubr.bf16.vlgmr.msra.gmra.mrb[48].mxu1 %v5918_v42  ;;  %2352 = vmatmul.mubr.bf16.vlgmr.msra.gmra.mrb[56].mxu0 %v5918_v42 }
 0x941   : > { %2552 = vmatprep.mubr.bf16.mxu1 %v5918_v42  ;;  %2521 = vmatpush1.bf16.msra.mxu1 %v5337_v46 }
 0x942   : > { %2562 = vmatpush1.bf16.msra.mxu0 %v5339_v19  ;;  %2593 = vmatprep.mubr.bf16.mxu0 %v5918_v42 }
 0x943   : > { %2522 = vmatprep.subr.bf16.mxu1 %v5347_v56  ;;  %2563 = vmatprep.subr.bf16.mxu0 %v5349_v22 }
 0x945   : > { %2523 = vmatpush1.bf16.msra.mxu1 %v5352_v48 }
 0x946   : > { %2564 = vmatpush1.bf16.msra.mxu0 %v5354_v51  ;;  %2524 = vmatprep.subr.bf16.mxu1 %v5360_v53 }
 0x947   : > { %2565 = vmatprep.subr.bf16.mxu0 %v5362_v40 }
 0x949   : > { %2525 = vmatpush1.bf16.msra.mxu1 %v5364_v47 }
 0x94a   : > { %2566 = vmatpush1.bf16.msra.mxu0 %v5366_v0  ;;  %2526 = vmatprep.subr.bf16.mxu1 %v5372_v54 }
 0x94b   : > { %2567 = vmatprep.subr.bf16.mxu0 %v5374_v16 }
 0x94d   : > { %2527 = vmatpush1.bf16.msra.mxu1 %v5376_v57 }
 0x94e   : > { %2568 = vmatpush1.bf16.msra.mxu0 %v5378_v58  ;;  %2528 = vmatprep.subr.bf16.mxu1 %v5384_v4  ;;  %v5987_v58 = vld [vmem:[#allocation42_spill] sm:$0xff] }
 0x94f   : > { %2569 = vmatprep.subr.bf16.mxu0 %v5386_v5  ;;  %v5986_v5 = vld [vmem:[#allocation41_spill] sm:$0xff] }
 0x951   : > { %2529 = vmatpush1.bf16.msra.mxu1 %v5388_v6 }
 0x952   : > { %2570 = vmatpush1.bf16.msra.mxu0 %v5390_v7  ;;  %2530 = vmatprep.subr.bf16.mxu1 %v5396_v9  ;;  %v5418_v7 = vld [vmem:[#allocation7 + $0xec] ss:$16 sps:$4 sm:$0xff]   ;;  %v5985_v9 = vld [vmem:[#allocation40_spill] sm:$0xff] }
 0x953   : > { %2571 = vmatprep.subr.bf16.mxu0 %v5398_v10  ;;  %5981 = vst [vmem:[#allocation69_spill] sm:$0xff] %v5418_v7 }
 0x955   : > { %2531 = vmatpush1.bf16.msra.mxu1 %v5400_v14  ;;  %v5423_v14 = vld [vmem:[#allocation7 + $0xe0] ss:$16 sps:$4 sm:$0xff]  }
 0x956   : > { %2572 = vmatpush1.bf16.msra.mxu0 %v5402_v25  ;;  %2532 = vmatprep.subr.bf16.mxu1 %v5408_v26  ;;  %5982 = vst [vmem:[#allocation70_spill] sm:$0xff] %v5423_v14  ;;  %v5427_v25 = vld [vmem:[#allocation7 + $0xe8] ss:$16 sps:$4 sm:$0xff]   ;;  %v5984_v26 = vld [vmem:[#allocation39_spill] sm:$0xff] }
 0x957   : > { %2573 = vmatprep.subr.bf16.mxu0 %v5410_v29  ;;  %5983 = vst [vmem:[#allocation71_spill] sm:$0xff] %v5427_v25 }
 0x959   : > { %2533 = vmatpush1.bf16.msra.mxu1 %v5412_v30 }
 0x95a   : > { %2574 = vmatpush1.bf16.msra.mxu0 %v5414_v31  ;;  %2534 = vmatprep.subr.bf16.mxu1 %v5416_v35 }
 0x95b   : > { %2575 = vmatprep.subr.bf16.mxu0 %v5418_v7 }
 0x95d   : > { %2535 = vmatpush1.bf16.msra.mxu1 %v5423_v14 }
 0x95e   : > { %2576 = vmatpush1.bf16.msra.mxu0 %v5427_v25  ;;  %2654 = vmatprep.subr.bf16.mxu1 %v5221_v62 }
 0x95f   : > { %2695 = vmatprep.subr.bf16.mxu0 %v5223_v28 }
 0x9f3   : > { %v1967_v29 = vpop.f32.mrb[44].mxu1  ;;  %v2008_v30 = vpop.f32.mrb[52].mxu0 }
 0x9f4   : > { %v2015_v10 = vadd.f32 %v1967_v29, %v5984_v26  ;;  %v2017_v31 = vadd.f32 %v2008_v30, %v5985_v9  ;;  %v1969_v6 = vpop.f32.mrb[45].mxu1  ;;  %v2010_v35 = vpop.f32.mrb[53].mxu0 }
 0x9f5   : > { %v2016_v4 = vadd.f32 %v1969_v6, %v5986_v5  ;;  %v2018_v7 = vadd.f32 %v2010_v35, %v5987_v58  ;;  %v1971_v57 = vpop.f32.mrb[46].mxu1  ;;  %v2012_v14 = vpop.f32.mrb[54].mxu0 }
 0x9f6   : > { %v3573_v16 = vmul.f32 -1.442695, %v2015_v10  ;;  %v1972_v25 = vpop.f32.mrb[47].mxu1  ;;  %v2013_v54 = vpop.f32.mrb[55].mxu0  ;;  %v3575_v28 = vmul.f32 -1.442695, %v2017_v31 }
 0x9f7   : > { %v3574_v62 = vmul.f32 -1.442695, %v2016_v4 }
 0x9f8   : > { %4087 = vpow2.f32 %v3573_v16  ;;  %v2047_v16 = vpop.permute.xlu1 %2046 }
 0x9f9   : > { %4089 = vpow2.f32 %v3574_v62  ;;  %vm2048_vm10 = vcmp.eq.s32.totalorder %v2047_v16, 1 }
 0x9fa   : > { %4091 = vtanh.f32 %v2018_v7 }
 0x9fb   : > { %4093 = vpow2.f32 %v3575_v28 }
 0xa02   : > { %v4088_v0 = vpop.eup %4087 }
 0xa03   : > { %v2028_v47 = vadd.f32 1.0, %v4088_v0  ;;  %v4090_v26 = vpop.eup %4089 }
 0xa04   : > { %v2029_v9 = vadd.f32 1.0, %v4090_v26  ;;  %v4092_v5 = vpop.eup %4091 }
 0xa05   : > { %4095 = vrcp.f32 %v2028_v47  ;;  %v4094_v6 = vpop.eup %4093 }
 0xa06   : > { %4097 = vrcp.f32 %v2029_v9  ;;  %v2030_v10 = vadd.f32 1.0, %v4094_v6  ;;  %v5988_v6 = vld [vmem:[#allocation20_spill] sm:$0xff] }
 0xa08   : > { %4099 = vrcp.f32 %v2030_v10 }
 0xa0f   : > { %v4096_v58 = vpop.eup %4095 }
 0xa10   : > { %v2039_v57 = vmul.f32 %v4096_v58, %v4092_v5  ;;  %v4098_v14 = vpop.eup %4097  ;;  %v2115_v5 = vld [vmem:[%s5780_s8] sm:$0xf]  ;;  %v5989_v58 = vsub.s32 0, %v5988_v6 }
 0xa11   : > { %v2038_v54 = vmul.f32 %v4098_v14, %v5233_v27 }
 0xa12   : > { %v4100_v62 = vpop.eup %4099 }
 0xa13   : > { %v2040_v4 = vadd.f32 %v2039_v57, %v2038_v54  ;;  %v2312_v27 = vpop.f32.mrb[48].mxu1  ;;  %v2353_v31 = vpop.f32.mrb[56].mxu0  ;;  %v5479_v57 = vrot.slane %v2115_v5, %v5989_v58  ;;  %v5990_v54 = vsub.s32 1, %v5988_v6 }
 0xa14   : > { %v2355_v35 = vpop.f32.mrb[57].mxu0 }
 0xa15   : > { %4101 = vtanh.f32 %v2040_v4  ;;  %v2357_v26 = vpop.f32.mrb[58].mxu0  ;;  %v5483_v4 = vrot.slane %v2115_v5, %v5990_v54  ;;  %v5991_v54 = vsub.s32 2, %v5988_v6 }
 0xa16   : > { %v2358_v9 = vpop.f32.mrb[59].mxu0 }
 0xa1f   : > { %v4102_v0 = vpop.eup %4101 }
 0xa20   : > { %v2042_v7 = vmul.f32 %v4102_v0, %v4100_v62 }
 0xa22   : > { %v2049_v28 = vsel %vm2048_vm10, %v2042_v7, %v5236_v32  ;;  %v2314_v32 = vpop.f32.mrb[49].mxu1 }
 0xa23   : > { %2050 = vst [vmem:[#allocation3] sm:$0xff] %v2049_v28  ;;  %v2316_v29 = vpop.f32.mrb[50].mxu1 }
 0xa24   : > { %v2317_v30 = vpop.f32.mrb[51].mxu1 }
 0xa2a   : > { %v2116_v47 = vld [vmem:[#allocation3] sm:$0x3] }
 0xa2b   : > { %v2117_v25 = vpack.c.bf16 %v2116_v47, %v2116_v47 }
 0xa2d   : > { %2553 = vmatmul.mubr.bf16.vlgmr.msra.gmra.mrb[52].mxu1 %v2117_v25  ;;  %2594 = vmatmul.mubr.bf16.vlgmr.msra.gmra.mrb[60].mxu0 %v2117_v25 }
 0xa2e   : > { %2655 = vmatpush1.bf16.msra.mxu1 %v5238_v33  ;;  %2696 = vmatpush1.bf16.msra.mxu0 %v5240_v34 }
 0xa2f   : > { %2656 = vmatprep.subr.bf16.mxu1 %v5244_v63  ;;  %2697 = vmatprep.subr.bf16.mxu0 %v5246_v1 }
 0xa30   : > { %2686 = vmatprep.mubr.bf16.mxu1 %v5918_v42  ;;  %2727 = vmatprep.mubr.bf16.mxu0 %v5918_v42 }
 0xa32   : > { %2657 = vmatpush1.bf16.msra.mxu1 %v5250_v36  ;;  %2698 = vmatpush1.bf16.msra.mxu0 %v5252_v37 }
 0xa33   : > { %2658 = vmatprep.subr.bf16.mxu1 %v5260_v38  ;;  %2699 = vmatprep.subr.bf16.mxu0 %v5265_v55 }
 0xa36   : > { %2659 = vmatpush1.bf16.msra.mxu1 %v5262_v39  ;;  %2700 = vmatpush1.bf16.msra.mxu0 %v5268_v52 }
 0xa37   : > { %2660 = vmatprep.subr.bf16.mxu1 %v5271_v61  ;;  %2701 = vmatprep.subr.bf16.mxu0 %v5277_v45 }
 0xa3a   : > { %2661 = vmatpush1.bf16.msra.mxu1 %v5274_v44  ;;  %2702 = vmatpush1.bf16.msra.mxu0 %v5280_v59 }
 0xa3b   : > { %2662 = vmatprep.subr.bf16.mxu1 %v5283_v13  ;;  %2703 = vmatprep.subr.bf16.mxu0 %v5289_v15 }
 0xa3e   : > { %2663 = vmatpush1.bf16.msra.mxu1 %v5286_v8  ;;  %2704 = vmatpush1.bf16.msra.mxu0 %v5292_v17 }
 0xa3f   : > { %2664 = vmatprep.subr.bf16.mxu1 %v5295_v18  ;;  %2705 = vmatprep.subr.bf16.mxu0 %v5301_v21 }
 0xa42   : > { %2665 = vmatpush1.bf16.msra.mxu1 %v5298_v20  ;;  %2706 = vmatpush1.bf16.msra.mxu0 %v5304_v23 }
 0xa43   : > { %2666 = vmatprep.subr.bf16.mxu1 %v5307_v24  ;;  %2707 = vmatprep.subr.bf16.mxu0 %v5313_v12 }
 0xa46   : > { %2667 = vmatpush1.bf16.msra.mxu1 %v5310_v11  ;;  %2708 = vmatpush1.bf16.msra.mxu0 %v5316_v49 }
 0xa47   : > { %2668 = vmatprep.subr.bf16.mxu1 %v5319_v50  ;;  %2709 = vmatprep.subr.bf16.mxu0 %v5325_v43 }
 0xa4a   : > { %2669 = vmatpush1.bf16.msra.mxu1 %v5322_v41  ;;  %2710 = vmatpush1.bf16.msra.mxu0 %v5328_v60  ;;  %v5489_v60 = vrot.slane %v2115_v5, %v5991_v54  ;;  %v5994_v54 = vld [vmem:[#allocation51_spill] sm:$0xff] }
 0xa4b   : > { %2736 = vmatprep.subr.bf16.mxu1 %v5333_v2  ;;  %2777 = vmatprep.subr.bf16.mxu0 %v5335_v3 }
 0xb00   : > { %v2554_v14 = vpop.f32.mrb[52].mxu1  ;;  %v2595_v10 = vpop.f32.mrb[60].mxu0 }
 0xb01   : > { %v2555_v62 = vadd.f32 %v2554_v14, %v2312_v27  ;;  %v2596_v16 = vadd.f32 %v2595_v10, %v2353_v31  ;;  %v2556_v0 = vpop.f32.mrb[53].mxu1  ;;  %v2597_v7 = vpop.f32.mrb[61].mxu0  ;;  %v5992_v27 = vsub.s32 3, %v5988_v6 }
 0xb02   : > { %v2557_v28 = vadd.f32 %v2556_v0, %v2314_v32  ;;  %v2598_v47 = vadd.f32 %v2597_v7, %v2355_v35  ;;  %v2558_v25 = vpop.f32.mrb[54].mxu1  ;;  %v2599_v29 = vpop.f32.mrb[62].mxu0 }
 0xb03   : > { %v2623_v30 = vadd.f32 %v5479_v57, %v2555_v62  ;;  %v2559_v26 = vpop.f32.mrb[55].mxu1  ;;  %v2600_v9 = vpop.f32.mrb[63].mxu0  ;;  %v5493_v32 = vrot.slane %v2115_v5, %v5992_v27  ;;  %v2625_v31 = vadd.f32 %v5489_v60, %v2596_v16  ;;  %v5995_v27 = vld [vmem:[#allocation52_spill] sm:$0xff] }
 0xb04   : > { %v2624_v58 = vadd.f32 %v5483_v4, %v2557_v28 }
 0xb05   : > { %v3640_v3 = vmul.f32 -1.442695, %v2623_v30  ;;  %v2626_v35 = vadd.f32 %v5493_v32, %v2598_v47  ;;  %v3642_v14 = vmul.f32 -1.442695, %v2625_v31  ;;  %v5996_v31 = vld [vmem:[#allocation53_spill] sm:$0xff] }
 0xb06   : > { %v3641_v2 = vmul.f32 -1.442695, %v2624_v58  ;;  %v5993_v58 = vld [vmem:[#allocation50_spill] sm:$0xff] }
 0xb07   : > { %4103 = vpow2.f32 %v3640_v3 }
 0xb08   : > { %4105 = vpow2.f32 %v3641_v2 }
 0xb09   : > { %4107 = vtanh.f32 %v2626_v35  ;;  %v5997_v35 = vld [vmem:[#allocation54_spill] sm:$0xff] }
 0xb0a   : > { %4109 = vpow2.f32 %v3642_v14  ;;  %v5998_v14 = vld [vmem:[#allocation55_spill] sm:$0xff] }
 0xb11   : > { %v4104_v10 = vpop.eup %4103 }
 0xb12   : > { %v2636_v62 = vadd.f32 1.0, %v4104_v10  ;;  %v4106_v0 = vpop.eup %4105  ;;  %v5999_v10 = vld [vmem:[#allocation56_spill] sm:$0xff] }
 0xb13   : > { %v2637_v3 = vadd.f32 1.0, %v4106_v0  ;;  %v4108_v7 = vpop.eup %4107  ;;  %v6001_v0 = vld [vmem:[#allocation58_spill] sm:$0xff] }
 0xb14   : > { %4111 = vrcp.f32 %v2636_v62  ;;  %v4110_v28 = vpop.eup %4109  ;;  %v6000_v62 = vld [vmem:[#allocation57_spill] sm:$0xff] }
 0xb15   : > { %4113 = vrcp.f32 %v2637_v3  ;;  %v2638_v5 = vadd.f32 1.0, %v4110_v28  ;;  %v6002_v3 = vld [vmem:[#allocation59_spill] sm:$0xff]  ;;  %v6004_v28 = vld [vmem:[#allocation61_spill] sm:$0xff] }
 0xb17   : > { %4115 = vrcp.f32 %v2638_v5  ;;  %v6008_v5 = vld [vmem:[#allocation65_spill] sm:$0xff] }
 0xb1e   : > { %v4112_v2 = vpop.eup %4111 }
 0xb1f   : > { %v2647_v25 = vmul.f32 %v4112_v2, %v4108_v7  ;;  %v4114_v6 = vpop.eup %4113  ;;  %v6003_v7 = vld [vmem:[#allocation60_spill] sm:$0xff]  ;;  %v6005_v2 = vld [vmem:[#allocation62_spill] sm:$0xff] }
 0xb20   : > { %v2646_v29 = vmul.f32 0.0, %v4114_v6  ;;  %v6007_v6 = vld [vmem:[#allocation64_spill] sm:$0xff] }
 0xb21   : > { %v4116_v16 = vpop.eup %4115 }
 0xb22   : > { %v5497_v30 = vadd.f32 %v2647_v25, %v2646_v29  ;;  %v6006_v25 = vld [vmem:[#allocation63_spill] sm:$0xff]  ;;  %v6009_v29 = vld [vmem:[#allocation66_spill] sm:$0xff] }
 0xb24   : > { %4117 = vtanh.f32 %v5497_v30 }
 0xb2e   : > { %v4118_v47 = vpop.eup %4117 }
 0xb2f   : > { %v2650_v26 = vmul.f32 %v4118_v47, %v4116_v16  ;;  %v6010_v16 = vld [vmem:[#allocation67_spill] sm:$0xff]  ;;  %v6011_v47 = vld [vmem:[#allocation68_spill] sm:$0xff] }
 0xb31   : > { %v2653_v9 = vpack.c.bf16 %v2650_v26, %v2650_v26  ;;  %v6012_v26 = vld [vmem:[#allocation69_spill] sm:$0xff] }
 0xb33   : > { %2687 = vmatmul.mubr.bf16.vlgmr.msra.gmra.mrb[56].mxu1 %v2653_v9  ;;  %2728 = vmatmul.mubr.bf16.vlgmr.msra.gmra.mrb[64].mxu0 %v2653_v9  ;;  %v2651_v9 = vld [vmem:[#allocation3 + $0x2] sm:$0x3] }
 0xb34   : > { %2737 = vmatpush1.bf16.msra.mxu1 %v5337_v46  ;;  %2778 = vmatpush1.bf16.msra.mxu0 %v5339_v19 }
 0xb35   : > { %2738 = vmatprep.subr.bf16.mxu1 %v5347_v56  ;;  %2779 = vmatprep.subr.bf16.mxu0 %v5349_v22 }
 0xb36   : > { %2768 = vmatprep.mubr.bf16.mxu1 %v5918_v42  ;;  %2809 = vmatprep.mubr.bf16.mxu0 %v5918_v42 }
 0xb38   : > { %2739 = vmatpush1.bf16.msra.mxu1 %v5352_v48  ;;  %2780 = vmatpush1.bf16.msra.mxu0 %v5354_v51 }
 0xb39   : > { %2740 = vmatprep.subr.bf16.mxu1 %v5360_v53  ;;  %2781 = vmatprep.subr.bf16.mxu0 %v5362_v40 }
 0xb3c   : > { %2741 = vmatpush1.bf16.msra.mxu1 %v5993_v58  ;;  %2782 = vmatpush1.bf16.msra.mxu0 %v5994_v54 }
 0xb3d   : > { %2742 = vmatprep.subr.bf16.mxu1 %v5995_v27  ;;  %2783 = vmatprep.subr.bf16.mxu0 %v5996_v31 }
 0xb40   : > { %2743 = vmatpush1.bf16.msra.mxu1 %v5997_v35  ;;  %2784 = vmatpush1.bf16.msra.mxu0 %v5998_v14 }
 0xb41   : > { %2744 = vmatprep.subr.bf16.mxu1 %v5999_v10  ;;  %2785 = vmatprep.subr.bf16.mxu0 %v6000_v62 }
 0xb44   : > { %2745 = vmatpush1.bf16.msra.mxu1 %v6001_v0  ;;  %2786 = vmatpush1.bf16.msra.mxu0 %v6002_v3  ;;  %v6015_v3 = vld [vmem:[#allocation21_spill] sm:$0xff] }
 0xb45   : > { %2746 = vmatprep.subr.bf16.mxu1 %v6003_v7  ;;  %2787 = vmatprep.subr.bf16.mxu0 %v6004_v28  ;;  %v6013_v7 = vld [vmem:[#allocation70_spill] sm:$0xff]  ;;  %v6014_v28 = vld [vmem:[#allocation71_spill] sm:$0xff] }
 0xb48   : > { %2747 = vmatpush1.bf16.msra.mxu1 %v6005_v2  ;;  %2788 = vmatpush1.bf16.msra.mxu0 %v6006_v25  ;;  %v2652_v2 = vpack.c.bf16 %v2651_v9, %v2651_v9  ;;  %v6016_v25 = vld [vmem:[#allocation22_spill] sm:$0xff]  ;;  %v6018_v9 = vld [vmem:[#allocation48_spill] sm:$0xff] }
 0xb49   : > { %2748 = vmatprep.subr.bf16.mxu1 %v6007_v6  ;;  %2789 = vmatprep.subr.bf16.mxu0 %v6008_v5 }
 0xb4c   : > { %2749 = vmatpush1.bf16.msra.mxu1 %v6009_v29  ;;  %2790 = vmatpush1.bf16.msra.mxu0 %v6010_v16 }
 0xb4d   : > { %2750 = vmatprep.subr.bf16.mxu1 %v6011_v47  ;;  %2791 = vmatprep.subr.bf16.mxu0 %v6012_v26 }
 0xb50   : > { %2751 = vmatpush1.bf16.msra.mxu1 %v6013_v7  ;;  %2792 = vmatpush1.bf16.msra.mxu0 %v6014_v28 }
 0xb51   : > { %2849 = vmatprep.subr.bf16.mxu1 %v6015_v3  ;;  %2890 = vmatprep.subr.bf16.mxu0 %v6016_v25 }
 0xb53   : > { %2769 = vmatmul.mubr.bf16.vlgmr.msra.gmra.mrb[60].mxu1 %v2652_v2  ;;  %2810 = vmatmul.mubr.bf16.vlgmr.msra.gmra.mrb[68].mxu0 %v2652_v2  ;;  %v6017_v2 = vld [vmem:[#allocation47_spill] sm:$0xff] }
 0xb54   : > { %2850 = vmatpush1.bf16.msra.mxu1 %v5238_v33  ;;  %2891 = vmatpush1.bf16.msra.mxu0 %v5240_v34 }
 0xb55   : > { %2851 = vmatprep.subr.bf16.mxu1 %v5244_v63  ;;  %2892 = vmatprep.subr.bf16.mxu0 %v5246_v1 }
 0xb56   : > { %2881 = vmatprep.mubr.bf16.mxu1 %v5918_v42  ;;  %2922 = vmatprep.mubr.bf16.mxu0 %v5918_v42 }
 0xb58   : > { %2852 = vmatpush1.bf16.msra.mxu1 %v5250_v36  ;;  %2893 = vmatpush1.bf16.msra.mxu0 %v5252_v37 }
 0xb59   : > { %2853 = vmatprep.subr.bf16.mxu1 %v5260_v38  ;;  %2894 = vmatprep.subr.bf16.mxu0 %v5265_v55 }
 0xb5c   : > { %2854 = vmatpush1.bf16.msra.mxu1 %v5262_v39  ;;  %2895 = vmatpush1.bf16.msra.mxu0 %v5268_v52 }
 0xb5d   : > { %2855 = vmatprep.subr.bf16.mxu1 %v5271_v61  ;;  %2896 = vmatprep.subr.bf16.mxu0 %v5277_v45 }
 0xb60   : > { %2856 = vmatpush1.bf16.msra.mxu1 %v5274_v44  ;;  %2897 = vmatpush1.bf16.msra.mxu0 %v5280_v59 }
 0xb61   : > { %2857 = vmatprep.subr.bf16.mxu1 %v5283_v13  ;;  %2898 = vmatprep.subr.bf16.mxu0 %v5289_v15 }
 0xb64   : > { %2858 = vmatpush1.bf16.msra.mxu1 %v5286_v8  ;;  %2899 = vmatpush1.bf16.msra.mxu0 %v5292_v17 }
 0xb65   : > { %2859 = vmatprep.subr.bf16.mxu1 %v5295_v18  ;;  %2900 = vmatprep.subr.bf16.mxu0 %v5301_v21 }
 0xb68   : > { %2860 = vmatpush1.bf16.msra.mxu1 %v5298_v20  ;;  %2901 = vmatpush1.bf16.msra.mxu0 %v5304_v23  ;;  %v6019_v20 = vld [vmem:[#allocation49_spill] sm:$0xff] }
 0xb69   : > { %2861 = vmatprep.subr.bf16.mxu1 %v5307_v24  ;;  %2902 = vmatprep.subr.bf16.mxu0 %v5313_v12 }
 0xb6c   : > { %2862 = vmatpush1.bf16.msra.mxu1 %v5310_v11  ;;  %2903 = vmatpush1.bf16.msra.mxu0 %v5316_v49 }
 0xb6d   : > { %2863 = vmatprep.subr.bf16.mxu1 %v5319_v50  ;;  %2904 = vmatprep.subr.bf16.mxu0 %v5325_v43 }
 0xb70   : > { %2864 = vmatpush1.bf16.msra.mxu1 %v5322_v41  ;;  %2905 = vmatpush1.bf16.msra.mxu0 %v6017_v2 }
 0xb71   : > { %2931 = vmatprep.subr.bf16.mxu1 %v6018_v9  ;;  %2972 = vmatprep.subr.bf16.mxu0 %v6019_v20 }
 0xc06   : > { %v2688_v23 = vpop.f32.mrb[56].mxu1  ;;  %v2729_v24 = vpop.f32.mrb[64].mxu0 }
 0xc07   : > { %v2690_v21 = vpop.f32.mrb[57].mxu1  ;;  %v2731_v12 = vpop.f32.mrb[65].mxu0 }
 0xc08   : > { %v2692_v18 = vpop.f32.mrb[58].mxu1  ;;  %v2733_v11 = vpop.f32.mrb[66].mxu0 }
 0xc09   : > { %v2693_v17 = vpop.f32.mrb[59].mxu1  ;;  %v2734_v49 = vpop.f32.mrb[67].mxu0 }
 0xc26   : > { %v2770_v8 = vpop.f32.mrb[60].mxu1  ;;  %v2811_v50 = vpop.f32.mrb[68].mxu0 }
 0xc27   : > { %v2771_v15 = vadd.f32 %v2770_v8, %v2688_v23  ;;  %v2812_v43 = vadd.f32 %v2811_v50, %v2729_v24  ;;  %v2772_v13 = vpop.f32.mrb[61].mxu1  ;;  %v2813_v41 = vpop.f32.mrb[69].mxu0 }
 0xc28   : > { %v2773_v59 = vadd.f32 %v2772_v13, %v2690_v21  ;;  %v2814_v2 = vadd.f32 %v2813_v41, %v2731_v12  ;;  %v2774_v44 = vpop.f32.mrb[62].mxu1  ;;  %v2815_v9 = vpop.f32.mrb[70].mxu0 }
 0xc29   : > { %v2818_v20 = vadd.f32 %v2771_v15, %v5479_v57  ;;  %v2775_v45 = vpop.f32.mrb[63].mxu1  ;;  %v2816_v61 = vpop.f32.mrb[71].mxu0  ;;  %v2820_v17 = vadd.f32 %v2812_v43, %v5489_v60  ;;  %v6021_v9 = vld [vmem:[#allocation60_spill] sm:$0xff] }
 0xc2a   : > { %v2819_v52 = vadd.f32 %v2773_v59, %v5483_v4  ;;  %v2821_v8 = vadd.f32 %v2814_v2, %v5493_v32 }
 0xc2b   : > { %v3643_v18 = vmul.f32 -1.442695, %v2818_v20  ;;  %v3645_v23 = vmul.f32 -1.442695, %v2820_v17  ;;  %v6024_v17 = vld [vmem:[#allocation63_spill] sm:$0xff] }
 0xc2c   : > { %v3644_v11 = vmul.f32 -1.442695, %v2819_v52 }
 0xc2d   : > { %4119 = vpow2.f32 %v3643_v18  ;;  %v6022_v18 = vld [vmem:[#allocation61_spill] sm:$0xff] }
 0xc2e   : > { %4121 = vpow2.f32 %v3644_v11  ;;  %v6023_v11 = vld [vmem:[#allocation62_spill] sm:$0xff] }
 0xc2f   : > { %4123 = vtanh.f32 %v2821_v8  ;;  %v2846_v8 = vld [vmem:[#allocation3 + $0x4] sm:$0x3] }
 0xc30   : > { %4125 = vpow2.f32 %v3645_v23  ;;  %v2847_v23 = vpack.c.bf16 %v2846_v8, %v2846_v8 }
 0xc37   : > { %v4120_v24 = vpop.eup %4119 }
 0xc38   : > { %v2831_v13 = vadd.f32 1.0, %v4120_v24  ;;  %v4122_v44 = vpop.eup %4121  ;;  %v6036_v24 = vld [vmem:[#allocation33_spill] sm:$0xff] }
 0xc39   : > { %v2832_v15 = vadd.f32 1.0, %v4122_v44  ;;  %v4124_v61 = vpop.eup %4123  ;;  %v6038_v44 = vld [vmem:[#allocation36_spill] sm:$0xff] }
 0xc3a   : > { %4127 = vrcp.f32 %v2831_v13  ;;  %v4126_v45 = vpop.eup %4125  ;;  %v6037_v13 = vld [vmem:[#allocation35_spill] sm:$0xff] }
 0xc3b   : > { %4129 = vrcp.f32 %v2832_v15  ;;  %v2833_v21 = vadd.f32 1.0, %v4126_v45  ;;  %v6039_v15 = vld [vmem:[#allocation38_spill] sm:$0xff]  ;;  %v6041_v45 = vld [vmem:[#allocation43_spill] sm:$0xff] }
 0xc3d   : > { %4131 = vrcp.f32 %v2833_v21  ;;  %v6045_v21 = vld [vmem:[#allocation47_spill] sm:$0xff] }
 0xc44   : > { %v4128_v59 = vpop.eup %4127 }
 0xc45   : > { %v2842_v20 = vmul.f32 %v4128_v59, %v4124_v61  ;;  %v4130_v52 = vpop.eup %4129  ;;  %v6040_v61 = vld [vmem:[#allocation37_spill] sm:$0xff]  ;;  %v6042_v59 = vld [vmem:[#allocation44_spill] sm:$0xff] }
 0xc46   : > { %v2841_v12 = vmul.f32 %v4130_v52, %v5497_v30  ;;  %v6020_v30 = vld [vmem:[#allocation59_spill] sm:$0xff]  ;;  %v6044_v52 = vld [vmem:[#allocation45_spill] sm:$0xff] }
 0xc47   : > { %v4132_v50 = vpop.eup %4131 }
 0xc48   : > { %v5573_v49 = vadd.f32 %v2842_v20, %v2841_v12  ;;  %v6043_v20 = vld [vmem:[#allocation46_spill] sm:$0xff]  ;;  %v6046_v12 = vld [vmem:[#allocation48_spill] sm:$0xff] }
 0xc4a   : > { %4133 = vtanh.f32 %v5573_v49 }
 0xc54   : > { %v4134_v41 = vpop.eup %4133 }
 0xc55   : > { %v2845_v43 = vmul.f32 %v4134_v41, %v4132_v50  ;;  %v6047_v50 = vld [vmem:[#allocation49_spill] sm:$0xff] }
 0xc57   : > { %v2848_v2 = vpack.c.bf16 %v2845_v43, %v2845_v43 }
 0xc59   : > { %2882 = vmatmul.mubr.bf16.vlgmr.msra.gmra.mrb[64].mxu1 %v2848_v2  ;;  %2923 = vmatmul.mubr.bf16.vlgmr.msra.gmra.mrb[72].mxu0 %v2848_v2 }
 0xc5a   : > { %2932 = vmatpush1.bf16.msra.mxu1 %v5337_v46  ;;  %2973 = vmatpush1.bf16.msra.mxu0 %v5339_v19 }
 0xc5b   : > { %2933 = vmatprep.subr.bf16.mxu1 %v5347_v56  ;;  %2974 = vmatprep.subr.bf16.mxu0 %v5349_v22 }
 0xc5c   : > { %2963 = vmatprep.mubr.bf16.mxu1 %v5918_v42  ;;  %3004 = vmatprep.mubr.bf16.mxu0 %v5918_v42 }
 0xc5e   : > { %2934 = vmatpush1.bf16.msra.mxu1 %v5352_v48  ;;  %2975 = vmatpush1.bf16.msra.mxu0 %v5354_v51 }
 0xc5f   : > { %2935 = vmatprep.subr.bf16.mxu1 %v5360_v53  ;;  %2976 = vmatprep.subr.bf16.mxu0 %v5362_v40 }
 0xc62   : > { %2936 = vmatpush1.bf16.msra.mxu1 %v5993_v58  ;;  %2977 = vmatpush1.bf16.msra.mxu0 %v5994_v54 }
 0xc63   : > { %2937 = vmatprep.subr.bf16.mxu1 %v5995_v27  ;;  %2978 = vmatprep.subr.bf16.mxu0 %v5996_v31 }
 0xc66   : > { %2938 = vmatpush1.bf16.msra.mxu1 %v5997_v35  ;;  %2979 = vmatpush1.bf16.msra.mxu0 %v5998_v14 }
 0xc67   : > { %2939 = vmatprep.subr.bf16.mxu1 %v5999_v10  ;;  %2980 = vmatprep.subr.bf16.mxu0 %v6000_v62 }
 0xc6a   : > { %2940 = vmatpush1.bf16.msra.mxu1 %v6001_v0  ;;  %2981 = vmatpush1.bf16.msra.mxu0 %v6020_v30 }
 0xc6b   : > { %2941 = vmatprep.subr.bf16.mxu1 %v6021_v9  ;;  %2982 = vmatprep.subr.bf16.mxu0 %v6022_v18 }
 0xc6e   : > { %2942 = vmatpush1.bf16.msra.mxu1 %v6023_v11  ;;  %2983 = vmatpush1.bf16.msra.mxu0 %v6024_v17 }
 0xc6f   : > { %2943 = vmatprep.subr.bf16.mxu1 %v6007_v6  ;;  %2984 = vmatprep.subr.bf16.mxu0 %v6008_v5 }
 0xc72   : > { %2944 = vmatpush1.bf16.msra.mxu1 %v6009_v29  ;;  %2985 = vmatpush1.bf16.msra.mxu0 %v6010_v16 }
 0xc73   : > { %2945 = vmatprep.subr.bf16.mxu1 %v6011_v47  ;;  %2986 = vmatprep.subr.bf16.mxu0 %v6012_v26 }
 0xc76   : > { %2946 = vmatpush1.bf16.msra.mxu1 %v6013_v7  ;;  %2987 = vmatpush1.bf16.msra.mxu0 %v6014_v28 }
 0xc77   : > { %3044 = vmatprep.subr.bf16.mxu1 %v6015_v3  ;;  %3085 = vmatprep.subr.bf16.mxu0 %v6016_v25  ;;  %v6029_v3 = vld [vmem:[#allocation27_spill] sm:$0xff]  ;;  %v6030_v25 = vld [vmem:[#allocation28_spill] sm:$0xff] }
 0xc79   : > { %2964 = vmatmul.mubr.bf16.vlgmr.msra.gmra.mrb[68].mxu1 %v2847_v23  ;;  %3005 = vmatmul.mubr.bf16.vlgmr.msra.gmra.mrb[76].mxu0 %v2847_v23 }
 0xc7a   : > { %3045 = vmatpush1.bf16.msra.mxu1 %v5238_v33  ;;  %3086 = vmatpush1.bf16.msra.mxu0 %v5240_v34  ;;  %v6025_v33 = vld [vmem:[#allocation23_spill] sm:$0xff]  ;;  %v6026_v34 = vld [vmem:[#allocation24_spill] sm:$0xff] }
 0xc7b   : > { %3046 = vmatprep.subr.bf16.mxu1 %v5244_v63  ;;  %3087 = vmatprep.subr.bf16.mxu0 %v5246_v1  ;;  %v6027_v63 = vld [vmem:[#allocation26_spill] sm:$0xff]  ;;  %v6028_v1 = vld [vmem:[#allocation25_spill] sm:$0xff] }
 0xc7c   : > { %3076 = vmatprep.mubr.bf16.mxu1 %v5918_v42  ;;  %3117 = vmatprep.mubr.bf16.mxu0 %v5918_v42 }
 0xc7e   : > { %3047 = vmatpush1.bf16.msra.mxu1 %v5250_v36  ;;  %3088 = vmatpush1.bf16.msra.mxu0 %v5252_v37  ;;  %v6031_v36 = vld [vmem:[#allocation30_spill] sm:$0xff]  ;;  %v6032_v37 = vld [vmem:[#allocation29_spill] sm:$0xff] }
 0xc7f   : > { %3048 = vmatprep.subr.bf16.mxu1 %v5260_v38  ;;  %3089 = vmatprep.subr.bf16.mxu0 %v5265_v55  ;;  %v6033_v38 = vld [vmem:[#allocation31_spill] sm:$0xff]  ;;  %v6034_v55 = vld [vmem:[#allocation32_spill] sm:$0xff] }
 0xc82   : > { %3049 = vmatpush1.bf16.msra.mxu1 %v5262_v39  ;;  %3090 = vmatpush1.bf16.msra.mxu0 %v6025_v33  ;;  %v6035_v39 = vld [vmem:[#allocation34_spill] sm:$0xff] }
 0xc83   : > { %3050 = vmatprep.subr.bf16.mxu1 %v6026_v34  ;;  %3091 = vmatprep.subr.bf16.mxu0 %v6027_v63 }
 0xc86   : > { %3051 = vmatpush1.bf16.msra.mxu1 %v6028_v1  ;;  %3092 = vmatpush1.bf16.msra.mxu0 %v6029_v3 }
 0xc87   : > { %3052 = vmatprep.subr.bf16.mxu1 %v6030_v25  ;;  %3093 = vmatprep.subr.bf16.mxu0 %v6031_v36 }
 0xc8a   : > { %3053 = vmatpush1.bf16.msra.mxu1 %v6032_v37  ;;  %3094 = vmatpush1.bf16.msra.mxu0 %v6033_v38 }
 0xc8b   : > { %3054 = vmatprep.subr.bf16.mxu1 %v6034_v55  ;;  %3095 = vmatprep.subr.bf16.mxu0 %v6035_v39 }
 0xc8e   : > { %3055 = vmatpush1.bf16.msra.mxu1 %v6036_v24  ;;  %3096 = vmatpush1.bf16.msra.mxu0 %v6037_v13 }
 0xc8f   : > { %3056 = vmatprep.subr.bf16.mxu1 %v6038_v44  ;;  %3097 = vmatprep.subr.bf16.mxu0 %v6039_v15 }
 0xc92   : > { %3057 = vmatpush1.bf16.msra.mxu1 %v6040_v61  ;;  %3098 = vmatpush1.bf16.msra.mxu0 %v6041_v45 }
 0xc93   : > { %3058 = vmatprep.subr.bf16.mxu1 %v6042_v59  ;;  %3099 = vmatprep.subr.bf16.mxu0 %v6043_v20 }
 0xc96   : > { %3059 = vmatpush1.bf16.msra.mxu1 %v6044_v52  ;;  %3100 = vmatpush1.bf16.msra.mxu0 %v6045_v21 }
 0xc97   : > { %3126 = vmatprep.subr.bf16.mxu1 %v6046_v12  ;;  %3167 = vmatprep.subr.bf16.mxu0 %v6047_v50 }
 0xd2c   : > { %v2883_v41 = vpop.f32.mrb[64].mxu1  ;;  %v2924_v43 = vpop.f32.mrb[72].mxu0 }
 0xd2d   : > { %v2885_v2 = vpop.f32.mrb[65].mxu1  ;;  %v2926_v8 = vpop.f32.mrb[73].mxu0 }
 0xd2e   : > { %v2887_v23 = vpop.f32.mrb[66].mxu1  ;;  %v2928_v33 = vpop.f32.mrb[74].mxu0 }
 0xd2f   : > { %v2888_v34 = vpop.f32.mrb[67].mxu1  ;;  %v2929_v63 = vpop.f32.mrb[75].mxu0 }
 0xd4c   : > { %v2965_v1 = vpop.f32.mrb[68].mxu1  ;;  %v3006_v3 = vpop.f32.mrb[76].mxu0 }
 0xd4d   : > { %v2966_v25 = vadd.f32 %v2965_v1, %v2883_v41  ;;  %v3007_v36 = vadd.f32 %v3006_v3, %v2924_v43  ;;  %v2967_v37 = vpop.f32.mrb[69].mxu1  ;;  %v3008_v38 = vpop.f32.mrb[77].mxu0 }
 0xd4e   : > { %v2968_v55 = vadd.f32 %v2967_v37, %v2885_v2  ;;  %v3009_v39 = vadd.f32 %v3008_v38, %v2926_v8  ;;  %v2969_v24 = vpop.f32.mrb[70].mxu1  ;;  %v3010_v13 = vpop.f32.mrb[78].mxu0 }
 0xd4f   : > { %v3013_v44 = vadd.f32 %v2966_v25, %v5479_v57  ;;  %v2970_v15 = vpop.f32.mrb[71].mxu1  ;;  %v3011_v61 = vpop.f32.mrb[79].mxu0  ;;  %v3015_v52 = vadd.f32 %v3007_v36, %v5489_v60 }
 0xd50   : > { %v3014_v45 = vadd.f32 %v2968_v55, %v5483_v4  ;;  %v3016_v21 = vadd.f32 %v3009_v39, %v5493_v32 }
 0xd51   : > { %v3646_v59 = vmul.f32 -1.442695, %v3013_v44  ;;  %v3648_v12 = vmul.f32 -1.442695, %v3015_v52 }
 0xd52   : > { %v3647_v20 = vmul.f32 -1.442695, %v3014_v45 }
 0xd53   : > { %4135 = vpow2.f32 %v3646_v59 }
 0xd54   : > { %4137 = vpow2.f32 %v3647_v20 }
 0xd55   : > { %4139 = vtanh.f32 %v3016_v21 }
 0xd56   : > { %4141 = vpow2.f32 %v3648_v12 }
 0xd5d   : > { %v4136_v50 = vpop.eup %4135 }
 0xd5e   : > { %v3026_v41 = vadd.f32 1.0, %v4136_v50  ;;  %v4138_v43 = vpop.eup %4137 }
 0xd5f   : > { %v3027_v2 = vadd.f32 1.0, %v4138_v43  ;;  %v4140_v8 = vpop.eup %4139 }
 0xd60   : > { %4143 = vrcp.f32 %v3026_v41  ;;  %v4142_v23 = vpop.eup %4141 }
 0xd61   : > { %4145 = vrcp.f32 %v3027_v2  ;;  %v3028_v1 = vadd.f32 1.0, %v4142_v23 }
 0xd63   : > { %4147 = vrcp.f32 %v3028_v1 }
 0xd6a   : > { %v4144_v33 = vpop.eup %4143 }
 0xd6b   : > { %v3037_v34 = vmul.f32 %v4144_v33, %v4140_v8  ;;  %v4146_v63 = vpop.eup %4145 }
 0xd6c   : > { %v3036_v3 = vmul.f32 %v4146_v63, %v5573_v49 }
 0xd6d   : > { %v4148_v36 = vpop.eup %4147 }
 0xd6e   : > { %v5649_v25 = vadd.f32 %v3037_v34, %v3036_v3  ;;  %v3652_v34 = vld [vmem:[%s5782_s10] ss:$0 sm:$0xff] }
 0xd70   : > { %4149 = vtanh.f32 %v5649_v25 }
 0xd7a   : > { %v4150_v37 = vpop.eup %4149 }
 0xd7b   : > { %v3040_v38 = vmul.f32 %v4150_v37, %v4148_v36 }
 0xd7d   : > { %v3043_v55 = vpack.c.bf16 %v3040_v38, %v3040_v38 }
 0xd7f   : > { %3077 = vmatmul.mubr.bf16.vlgmr.msra.gmra.mrb[72].mxu1 %v3043_v55  ;;  %3118 = vmatmul.mubr.bf16.vlgmr.msra.gmra.mrb[80].mxu0 %v3043_v55 }
 0xd80   : > { %3127 = vmatpush1.bf16.msra.mxu1 %v5337_v46  ;;  %3168 = vmatpush1.bf16.msra.mxu0 %v5339_v19  ;;  %v6048_v19 = vmov 0.0  }
 0xd81   : > { %3128 = vmatprep.subr.bf16.mxu1 %v5347_v56  ;;  %3169 = vmatprep.subr.bf16.mxu0 %v5349_v22  ;;  %v3951_v56 = vld [vmem:[%s5781_s9] sm:$0xff]   ;;  %v3952_v22 = vld [vmem:[%s5781_s9 + $0x8] sm:$0xff]  }
 0xd82   : > { %3158 = vmatprep.mubr.bf16.mxu1 %v5918_v42  ;;  %3199 = vmatprep.mubr.bf16.mxu0 %v5918_v42  ;;  %v3041_v42 = vld [vmem:[#allocation3 + $0x6] sm:$0x3] }
 0xd83   : > { %v3042_v46 = vpack.c.bf16 %v3041_v42, %v3041_v42 }
 0xd84   : > { %3129 = vmatpush1.bf16.msra.mxu1 %v5352_v48  ;;  %3170 = vmatpush1.bf16.msra.mxu0 %v5354_v51  ;;  %v3953_v48 = vld [vmem:[%s5781_s9 + $0x10] sm:$0xff]   ;;  %v3954_v51 = vld [vmem:[%s5781_s9 + $0x18] sm:$0xff]  }
 0xd85   : > { %3130 = vmatprep.subr.bf16.mxu1 %v5360_v53  ;;  %3171 = vmatprep.subr.bf16.mxu0 %v5362_v40  ;;  %v3955_v53 = vld [vmem:[%s5781_s9 + $0x20] sm:$0xff]   ;;  %v3956_v40 = vld [vmem:[%s5781_s9 + $0x28] sm:$0xff]  }
 0xd88   : > { %3131 = vmatpush1.bf16.msra.mxu1 %v5993_v58  ;;  %3172 = vmatpush1.bf16.msra.mxu0 %v5994_v54  ;;  %v3957_v58 = vld [vmem:[%s5781_s9 + $0x30] sm:$0xff]   ;;  %v3958_v54 = vld [vmem:[%s5781_s9 + $0x38] sm:$0xff]  }
 0xd89   : > { %3132 = vmatprep.subr.bf16.mxu1 %v5995_v27  ;;  %3173 = vmatprep.subr.bf16.mxu0 %v5996_v31 }
 0xd8c   : > { %3133 = vmatpush1.bf16.msra.mxu1 %v5997_v35  ;;  %3174 = vmatpush1.bf16.msra.mxu0 %v5998_v14 }
 0xd8d   : > { %3134 = vmatprep.subr.bf16.mxu1 %v5999_v10  ;;  %3175 = vmatprep.subr.bf16.mxu0 %v6000_v62 }
 0xd90   : > { %3135 = vmatpush1.bf16.msra.mxu1 %v6001_v0  ;;  %3176 = vmatpush1.bf16.msra.mxu0 %v6020_v30 }
 0xd91   : > { %3136 = vmatprep.subr.bf16.mxu1 %v6021_v9  ;;  %3177 = vmatprep.subr.bf16.mxu0 %v6022_v18 }
 0xd94   : > { %3137 = vmatpush1.bf16.msra.mxu1 %v6023_v11  ;;  %3178 = vmatpush1.bf16.msra.mxu0 %v6024_v17 }
 0xd95   : > { %3138 = vmatprep.subr.bf16.mxu1 %v6007_v6  ;;  %3179 = vmatprep.subr.bf16.mxu0 %v6008_v5 }
 0xd98   : > { %3139 = vmatpush1.bf16.msra.mxu1 %v6009_v29  ;;  %3180 = vmatpush1.bf16.msra.mxu0 %v6010_v16 }
 0xd99   : > { %3140 = vmatprep.subr.bf16.mxu1 %v6011_v47  ;;  %3181 = vmatprep.subr.bf16.mxu0 %v6012_v26 }
 0xd9c   : > { %3141 = vmatpush1.bf16.msra.mxu1 %v6013_v7  ;;  %3182 = vmatpush1.bf16.msra.mxu0 %v6014_v28 }
 0xd9d   : > { %3700 = vmatprep.subr.bf16.mxu1 %v6048_v19 }
 0xd9f   : > { %3159 = vmatmul.mubr.bf16.vlgmr.msra.gmra.mrb[76].mxu1 %v3042_v46  ;;  %3200 = vmatmul.mubr.bf16.vlgmr.msra.gmra.mrb[84].mxu0 %v3042_v46 }
 0xda0   : > { %3701 = vmatpush3.bf16.msra.mxu1 %v3951_v56  ;;  %3716 = vmatprep.mubr.msk.bf16.mxu1 %vm4368_vm11, %v6048_v19 }
 0xda1   : > { %3702 = vmatprep.subr.bf16.mxu1 %v6048_v19 }
 0xda4   : > { %3703 = vmatpush3.bf16.msra.mxu1 %v3952_v22 }
 0xda5   : > { %3704 = vmatprep.subr.bf16.mxu1 %v6048_v19 }
 0xda8   : > { %3705 = vmatpush3.bf16.msra.mxu1 %v3953_v48 }
 0xda9   : > { %3706 = vmatprep.subr.bf16.mxu1 %v6048_v19 }
 0xdac   : > { %3707 = vmatpush3.bf16.msra.mxu1 %v3954_v51 }
 0xdad   : > { %3708 = vmatprep.subr.bf16.mxu1 %v6048_v19 }
 0xdb0   : > { %3709 = vmatpush3.bf16.msra.mxu1 %v3955_v53 }
 0xdb1   : > { %3710 = vmatprep.subr.bf16.mxu1 %v6048_v19 }
 0xdb4   : > { %3711 = vmatpush3.bf16.msra.mxu1 %v3956_v40 }
 0xdb5   : > { %3712 = vmatprep.subr.bf16.mxu1 %v6048_v19 }
 0xdb8   : > { %3713 = vmatpush3.bf16.msra.mxu1 %v3957_v58 }
 0xdb9   : > { %3714 = vmatprep.subr.bf16.mxu1 %v6048_v19 }
 0xdbc   : > { %3715 = vmatpush3.bf16.msra.mxu1 %v3958_v54 }
 0xe52   : > { %v3078_v27 = vpop.f32.mrb[72].mxu1  ;;  %v3119_v31 = vpop.f32.mrb[80].mxu0 }
 0xe53   : > { %v3080_v35 = vpop.f32.mrb[73].mxu1  ;;  %v3121_v14 = vpop.f32.mrb[81].mxu0 }
 0xe54   : > { %v3082_v10 = vpop.f32.mrb[74].mxu1  ;;  %v3123_v62 = vpop.f32.mrb[82].mxu0 }
 0xe55   : > { %v3083_v0 = vpop.f32.mrb[75].mxu1  ;;  %v3124_v7 = vpop.f32.mrb[83].mxu0 }
 0xe72   : > { %v3160_v28 = vpop.f32.mrb[76].mxu1  ;;  %v3201_v6 = vpop.f32.mrb[84].mxu0 }
 0xe73   : > { %v3161_v5 = vadd.f32 %v3160_v28, %v3078_v27  ;;  %v3202_v29 = vadd.f32 %v3201_v6, %v3119_v31  ;;  %v3162_v16 = vpop.f32.mrb[77].mxu1  ;;  %v3203_v47 = vpop.f32.mrb[85].mxu0 }
 0xe74   : > { %v3163_v26 = vadd.f32 %v3162_v16, %v3080_v35  ;;  %v3204_v49 = vadd.f32 %v3203_v47, %v3121_v14  ;;  %v3164_v30 = vpop.f32.mrb[78].mxu1  ;;  %v3205_v9 = vpop.f32.mrb[86].mxu0 }
 0xe75   : > { %v3208_v18 = vadd.f32 %v3161_v5, %v5479_v57  ;;  %v3165_v11 = vpop.f32.mrb[79].mxu1  ;;  %v3206_v17 = vpop.f32.mrb[87].mxu0  ;;  %v3210_v44 = vadd.f32 %v3202_v29, %v5489_v60 }
 0xe76   : > { %v3209_v39 = vadd.f32 %v3163_v26, %v5483_v4  ;;  %v3211_v15 = vadd.f32 %v3204_v49, %v5493_v32 }
 0xe77   : > { %v3649_v24 = vmul.f32 -1.442695, %v3208_v18  ;;  %v3651_v61 = vmul.f32 -1.442695, %v3210_v44 }
 0xe78   : > { %v3650_v13 = vmul.f32 -1.442695, %v3209_v39 }
 0xe79   : > { %4151 = vpow2.f32 %v3649_v24 }
 0xe7a   : > { %4153 = vpow2.f32 %v3650_v13 }
 0xe7b   : > { %4155 = vtanh.f32 %v3211_v15 }
 0xe7c   : > { %4157 = vpow2.f32 %v3651_v61 }
 0xe83   : > { %v4152_v45 = vpop.eup %4151 }
 0xe84   : > { %v3221_v59 = vadd.f32 1.0, %v4152_v45  ;;  %v4154_v20 = vpop.eup %4153 }
 0xe85   : > { %v3222_v57 = vadd.f32 1.0, %v4154_v20  ;;  %v4156_v52 = vpop.eup %4155 }
 0xe86   : > { %4159 = vrcp.f32 %v3221_v59  ;;  %v4158_v21 = vpop.eup %4157 }
 0xe87   : > { %4161 = vrcp.f32 %v3222_v57  ;;  %v3223_v41 = vadd.f32 1.0, %v4158_v21 }
 0xe89   : > { %4163 = vrcp.f32 %v3223_v41 }
 0xe90   : > { %v4160_v4 = vpop.eup %4159 }
 0xe91   : > { %v3232_v12 = vmul.f32 %v4160_v4, %v4156_v52  ;;  %v4162_v50 = vpop.eup %4161 }
 0xe92   : > { %v3231_v43 = vmul.f32 %v4162_v50, %v5649_v25 }
 0xe93   : > { %v4164_v32 = vpop.eup %4163 }
 0xe94   : > { %v3233_v60 = vadd.f32 %v3232_v12, %v3231_v43 }
 0xe96   : > { %4165 = vtanh.f32 %v3233_v60 }
 0xea0   : > { %v4166_v2 = vpop.eup %4165 }
 0xea1   : > { %v3235_v8 = vmul.f32 %v4166_v2, %v4164_v32 }
 0xea3   : > { %4167 = vtanh.f32 %v3235_v8 }
 0xead   : > { %v4168_v23 = vpop.eup %4167 }
 0xeae   : > { %v3237_v33 = vpack.c.bf16 %v4168_v23, %v4168_v23 }
 0xeb0   : > { %3717 = vmatmul.mubr.bf16.vlgmr.msra.gmra.mrb[80].mxu1 %v3237_v33 }
 0xf83   : > { %v3343_v63 = vpop.f32.mrb[80].mxu1 }
 0xf84   : > { %v3344_v1 = vadd.f32 %v3652_v34, %v3343_v63  ;;  %v3718_v3 = vpop.f32.mrb[81].mxu1 }
 0xf85   : > { %v3346_v25 = vpop.f32.mrb[82].mxu1 }
 0xf86   : > { %v3661_v36 = vmul.f32 -1.442695, %v3344_v1  ;;  %v3719_v37 = vpop.f32.mrb[83].mxu1 }
 0xf88   : > { %4169 = vpow2.f32 %v3661_v36 }
 0xf92   : > { %v4170_v38 = vpop.eup %4169 }
 0xf93   : > { %v3352_v55 = vadd.f32 1.0, %v4170_v38 }
 0xf95   : > { %4171 = vrcp.f32 %v3352_v55 }
 0xf9f   : > { %v4172_v42 = vpop.eup %4171 }
 0xfa0   : > { %3355 = vst [vmem:[%s436_s11] sm:$0x3] %v4172_v42 }
 0xfa1   : > { %4302 = shalt.err (!%p4299_p9)
}
 0xfa2   : > { %s4303_s25 = scalar_lea.hbm %s5730_s24, 32  ;;  %s4307_s16 = scalar_lea.hbm %s6049_s22, 64 }
 0xfa3   : > { %p4304_p2 = scmp.ne.s32.totalorder %s5730_s24, %s4303_s25  ;;  %p4308_p5 = scmp.lt.u32.totalorder %s5730_s24, %s6049_s22 }
 0xfa4   : > { %p4309_p10 = scmp.lt.u32.totalorder %s4307_s16, %s4303_s25  ;;  %p4311_p12 = scmp.lt.u32.totalorder %s4303_s25, %s5730_s24 }
 0xfa5   : > { %p4305_p0 = pnand %p4304_p2, %p6050_p7 }
 0xfa6   : > { %p4310_p4 = por %p4309_p10, %p4308_p5 }
 0xfa7   : > { %p4306_p3 = pneg %p4305_p0 }
 0xfa8   : > { %p4312_p8 = por %p4311_p12, %p4310_p4 }
 0xfaa   : > { %p4313_p11 = pnand %p4312_p8, %p4306_p3 }
 0xfac   : > { %4316 = shalt.err (!%p4313_p11)
}
 0xfad   : > { %3732 = dma.vmem_to_hbm [thread:$0]  (%p6050_p7), %s5732_s23, 32, %s5730_s24, %s3357_s26  }
 0xfae PF: > { %s6051_s15 = sld [smem:[#allocation16_spill]]  ;;  %s6052_s11 = sld [smem:[#allocation14_spill]] }
 0xfaf   : > { %s6053_s29 = sld [smem:[#allocation19_spill]] }
 0xfb4   : > { %p3754_p13 = scmp.ge.s32.totalorder %s6051_s15, 2  ;;  %s3382_s13 = sand.u32 1, %s6052_s11  }
 0xfb5   : > { %p6054_p1 = scmp.ne.s32.totalorder %s6053_s29, 0  ;;  %s3383_s17 = scalar_lea.sflag [#allocation6], %s3382_s13 }
 0xfb7   : > { %p3745_p6 = pnand %p3754_p13, %p6054_p1 }
 0xfb9   : > { %4342 = dma.done.wait (!%p3745_p6), %s3383_s17, 32  }
 0xfba   : > { %4344 = vsyncadd (!%p3745_p6), %s3383_s17, 4294967264  ;;  %s6055_s20 = sld [smem:[#allocation17_spill]]  ;;  %s6056_s21 = sld [smem:[#allocation15_spill]] }
 0xfbb   : > { %s6057_s19 = sld [smem:[#allocation18_spill]]  ;;  %s6058_s17 = smov %s4351_s18 }
 0xfc0   : > { %p23_p9 = scmp.ge.s32.totalorder %s6055_s20, 4   ;;  %s6059_s18 = smov %s6056_s21 }
 0xfc2   :  { %25 = sbr.rel (!%p23_p9) target bundleno = 7 (0x7), region = 122 }
 0xfc9   :  { %3388 = vsyncpa [#allocation5], 1 }
 0xfca   :  { %3390 = vsyncpa [#allocation5 + $0x1], 1 }
 0xfcb   :  { %3391 = vsyncpa [#allocation8], 1 }
 0xfcc   :  { %3392 = vsyncpa [#allocation6], 1 }
 0xfcd   :  { %3394 = vsyncpa [#allocation6 + $0x1], 1 }

// kernel: tpu_custom_call.1
= control target key start
LH: loop header
LB: loop body
LE: loop exit
PB: predicated region body
PF: predicated region fallthrough
CT: control target
= control target key end

     0   :  { %s5772_s0 = inlined_call_operand.vmem [shape: s32[2,64,1], index: 0, kind: input, shape index: {}]   ;;  %s5773_s1 = inlined_call_operand.vmem [shape: s32[2,8,1], index: 1, kind: input, shape index: {}]   ;;  %s5774_s2 = inlined_call_operand.vmem [shape: bf16[64,16], index: 2, kind: input, shape index: {}]   ;;  %s5775_s3 = inlined_call_operand.vmem [shape: bf16[16,512], index: 3, kind: input, shape index: {}]   ;;  %s5776_s4 = inlined_call_operand.hbm [shape: bf16[128,512], index: 4, kind: input, shape index: {}]   ;;  %s5777_s5 = inlined_call_operand.vmem [shape: f32[1,512], index: 5, kind: input, shape index: {}]   ;;  %s5778_s6 = inlined_call_operand.hbm [shape: bf16[128,512], index: 6, kind: input, shape index: {}]   ;;  %s5779_s7 = inlined_call_operand.hbm [shape: bf16[128,512], index: 7, kind: input, shape index: {}]   ;;  %s5780_s8 = inlined_call_operand.vmem [shape: f32[1,512], index: 8, kind: input, shape index: {}]   ;;  %s5781_s9 = inlined_call_operand.vmem [shape: bf16[128,128], index: 9, kind: input, shape index: {}]   ;;  %s5782_s10 = inlined_call_operand.vmem [shape: f32[1,128], index: 10, kind: input, shape index: {}]   ;;  %s5783_s11 = inlined_call_operand.hbm [shape: f32[2,2,128], index: 11, kind: output, shape index: {}]  }
   0x1   :  { %5878 = sst [smem:[#allocation72_spill]] %s5783_s11 }
   0x2   :  { %16 = vsyncpa [#allocation5], 0 }
   0x3   :  { %17 = vsyncpa [#allocation8], 0 }
   0x4   :  { %18 = vsyncpa [#allocation6], 0 }
   0x5   :  { %20 = vsyncpa [#allocation6 + $0x1], 0  ;;  %s4430_s17 = smov 0   ;;  %s4432_s18 = smov 0  }
   0x6   :  { %s4434_s19 = smov 0   ;;  %s4436_s20 = smov 0  }
   0x7 LB: > { %5879 = sst [smem:[#allocation14_spill]] %s4347_s17  ;;  %s4451_s21 = sadd.s32 4294967295, %s4359_s20   ;;  %s4359_s20 = sphi %s4436_s20, %s6055_s20   ;;  %s4355_s19 = sphi %s4434_s19, %s6057_s19   ;;  %s4351_s18 = sphi %s4432_s18, %s6059_s18   ;;  %s4347_s17 = sphi %s4430_s17, %s6058_s17  }
   0x8   : > { %5880 = sst [smem:[#allocation15_spill]] %s4355_s19  ;;  %s3472_s22 = sadd.s32 4294967294, %s4359_s20  }
   0x9   : > { %5881 = sst [smem:[#allocation16_spill]] %s4359_s20  ;;  %s4455_s23 = sadd.s32 1, %s4359_s20  }
   0xa   : > { %5882 = sst [smem:[#allocation17_spill]] %s4455_s23  ;;  %s274_s24 = sadd.s32 1, %s4355_s19 }
   0xb   : > { %s271_s25 = ssub.s32 %s4359_s20, %s4455_s23  ;;  %p284_p0 = scmp.ne.s32.totalorder %s4355_s19, %s4351_s18 }
   0xc   : > { %p272_p1 = scmp.eq.s32.totalorder %s271_s25, 0  ;;  %p285_p2 = scmp.eq.s32.totalorder %s4451_s21, 1 }
   0xd   : > { %p290_p3 = scmp.ne.s32.totalorder %s4351_s18, %s4347_s17  ;;  %p291_p4 = scmp.eq.s32.totalorder %s3472_s22, 1 }
   0xe   : > { %s4466_s26 = scalar_select %p272_p1, %s4355_s19, %s274_s24  }
   0xf   : > { %p4468_p5 = por %p285_p2, %p284_p0  ;;  %p4472_p6 = por %p291_p4, %p290_p3 }
  0x10   : > { %5883 = sst [smem:[#allocation18_spill]] %s4466_s26  ;;  %p3473_p7 = scmp.ge.s32.totalorder %s4359_s20, 1 }
  0x11   : > { %s5884_s27 = scalar_select %p4468_p5, 1, 0 }
  0x12   : > { %s5885_s28 = scalar_select %p4472_p6, 1, 0 }
  0x13   : > { %p298_p8 = scmp.lt.s32.totalorder %s4359_s20, 3  ;;  %p5787_p9 = scmp.eq.s32.totalorder %s4451_s21, 0 }
  0x14   : > { %5886 = sst [smem:[#allocation19_spill]] %s5885_s28  ;;  %s4361_s30 = smov [#allocation7]  }
  0x15   : > { %p4479_p10 = pnand %p3473_p7, %p298_p8  ;;  %s332_s12 = sshll.u32 %s4361_s30, 4  ;;  %s4485_s12 = int_to_ptr.vmem [resolvable:$true] %s332_s12 }
  0x16   : > { %s4362_s14 = smov [#allocation4]   ;;  %s4363_s16 = smov [#allocation9]  }
  0x17   : > { %s5887_s29 = scalar_select %p4479_p10, 1, 0 }
  0x18   : > { %p3734_p11 = pneg %p4479_p10  ;;  %s316_s15 = sshll.u32 %s4362_s14, 4  ;;  %s4493_s15 = int_to_ptr.vmem [resolvable:$true] %s316_s15 }
  0x19   : > { %s4495_s22 = sshll.u32 %s4363_s16, 4  ;;  %s4205_s26 = scalar_lea.hbm %s5778_s6, 4096  ;;  %s346_s22 = int_to_ptr.vmem [resolvable:$true] %s4495_s22 }
  0x1a   : > { %p4489_p12 = pnand %p5787_p9, %p3734_p11  ;;  %p4206_p13 = scmp.ne.s32.totalorder %s5778_s6, %s4205_s26 }
  0x1b   : > { %p4212_p3 = scmp.lt.u32.totalorder %s4205_s26, %s5778_s6 }
  0x1c   : > { %p4505_p0 = pneg %p4489_p12 }
  0x1e   : > { %p4208_p1 = pnand %p4505_p0, %p4206_p13 }
  0x20   : > { %p4209_p2 = pneg %p4208_p1 }
  0x22   : > { %p4214_p4 = pnand %p4212_p3, %p4209_p2 }
  0x24   : > { %4217 = shalt.err (!%p4214_p4)
}
  0x25   : > { %s4218_s19 = scalar_lea.vmem %s4485_s12, 4096  ;;  %p4226_p9 = scmp.lt.s32.totalorder %s4485_s12, %s4485_s12 }
  0x26   : > { %p4219_p7 = scmp.ne.s32.totalorder %s4485_s12, %s4218_s19  ;;  %p4227_p6 = scmp.lt.s32.totalorder %s4218_s19, %s4218_s19 }
  0x28   : > { %p4221_p8 = pnand %p4219_p7, %p4505_p0  ;;  %p4228_p13 = por %p4227_p6, %p4226_p9 }
  0x2a   : > { %p4222_p11 = pneg %p4221_p8 }
  0x2c   : > { %p4229_p1 = pnand %p4228_p13, %p4222_p11 }
  0x2e   : > { %4232 = shalt.err (!%p4229_p1)
}
  0x2f   : > { %s4364_s24 = smov 256   ;;  %s4365_s26 = smov 16  }
  0x30   : > { %3740 = dma.hbm_to_vmem [thread:$0]  (!%p4489_p12), %s5778_s6, 4096, %s4485_s12, [#allocation8], %s4364_s24, %s4364_s24, %s4365_s26  }
  0x31   : > { %s4233_s19 = scalar_lea.hbm %s5776_s4, 4096 }
  0x32   : > { %p4234_p6 = scmp.ne.s32.totalorder %s5776_s4, %s4233_s19  ;;  %p4240_p3 = scmp.lt.u32.totalorder %s4233_s19, %s5776_s4 }
  0x34   : > { %p4236_p9 = pnand %p4234_p6, %p4505_p0 }
  0x36   : > { %p4237_p2 = pneg %p4236_p9 }
  0x38   : > { %p4242_p4 = pnand %p4240_p3, %p4237_p2 }
  0x3a   : > { %4245 = shalt.err (!%p4242_p4)
}
  0x3b   : > { %s4246_s12 = scalar_lea.vmem %s4493_s15, 4096  ;;  %p4254_p13 = scmp.lt.s32.totalorder %s4493_s15, %s4493_s15 }
  0x3c   : > { %p4247_p7 = scmp.ne.s32.totalorder %s4493_s15, %s4246_s12  ;;  %p4255_p1 = scmp.lt.s32.totalorder %s4246_s12, %s4246_s12 }
  0x3e   : > { %p4249_p8 = pnand %p4247_p7, %p4505_p0  ;;  %p4256_p6 = por %p4255_p1, %p4254_p13 }
  0x40   : > { %p4250_p11 = pneg %p4249_p8 }
  0x42   : > { %p4257_p9 = pnand %p4256_p6, %p4250_p11 }
  0x44   : > { %4260 = shalt.err (!%p4257_p9)
}
  0x45   : > { %3737 = dma.hbm_to_vmem [thread:$0]  (!%p4489_p12), %s5776_s4, 4096, %s4493_s15, [#allocation5], %s4364_s24, %s4364_s24, %s4365_s26  }
  0x46   : > { %s4261_s25 = scalar_lea.hbm %s5779_s7, 4096 }
  0x47   : > { %p4262_p2 = scmp.ne.s32.totalorder %s5779_s7, %s4261_s25  ;;  %p4268_p7 = scmp.lt.u32.totalorder %s4261_s25, %s5779_s7 }
  0x49   : > { %p4264_p3 = pnand %p4262_p2, %p4505_p0 }
  0x4b   : > { %p4265_p4 = pneg %p4264_p3 }
  0x4d   : > { %p4270_p8 = pnand %p4268_p7, %p4265_p4 }
  0x4f   : > { %4273 = shalt.err (!%p4270_p8)
}
  0x50   : > { %s4274_s12 = scalar_lea.vmem %s346_s22, 4096  ;;  %p4282_p6 = scmp.lt.s32.totalorder %s346_s22, %s346_s22 }
  0x51   : > { %p4275_p11 = scmp.ne.s32.totalorder %s346_s22, %s4274_s12  ;;  %p4283_p9 = scmp.lt.s32.totalorder %s4274_s12, %s4274_s12 }
  0x53   : > { %p4277_p13 = pnand %p4275_p11, %p4505_p0  ;;  %p4284_p5 = por %p4283_p9, %p4282_p6 }
  0x55   : > { %p4278_p1 = pneg %p4277_p13 }
  0x57   : > { %p4285_p10 = pnand %p4284_p5, %p4278_p1 }
  0x59   : > { %4288 = shalt.err (!%p4285_p10)
}
  0x5a   : > { %3743 = dma.hbm_to_vmem [thread:$0]  (!%p4489_p12), %s5779_s7, 4096, %s346_s22, [#allocation8], %s4364_s24, %s4364_s24, %s4365_s26  }
  0x5b   : > { %p5890_p2 = scmp.ne.s32.totalorder %s5887_s29, 0 }
  0x5d   : > { %385 = sbr.rel (%p5890_p2) target bundleno = 4014 (0xfae), region = 64 }
  0x64   : > { %p5891_p0 = scmp.eq.s32.totalorder %s4451_s21, 0 }
  0x66   : > { %4334 = dma.done.wait (%p5891_p0), [#allocation5], 4096   ;;  %p5892_p3 = pmov %p5891_p0 }
  0x67   : > { %p5893_p5 = pmov %p5891_p0 }
  0x68   : > { %4336 = vsyncadd (%p5892_p3), [#allocation5], 4294963200 }
  0x69   : > { %4338 = dma.done.wait (%p5893_p5), [#allocation8], 8192   ;;  %p5894_p10 = pmov %p5891_p0 }
  0x6a   : > { %p437_p4 = scmp.lt.s32.totalorder %s4451_s21, 1  ;;  %v5800_v0 = vmov 0   ;;  %v3797_v6 = vld [vmem:[%s5774_s2] sm:$0xff]   ;;  %v3798_v8 = vld [vmem:[%s5774_s2 + $0x8] sm:$0xff]   ;;  %v3799_v12 = vld [vmem:[%s5774_s2 + $0x10] sm:$0xff]   ;;  %v456_v22 = vlaneseq  ;;  %vm542_vm12 = vcmask 523264  }
  0x6b   : > { %4340 = vsyncadd (%p5894_p10), [#allocation8], 4294959104  ;;  %3796 = vset.pattern.permute.xlu1 %v5800_v0  ;;  %3795 = vset.pattern.permute.xlu0 %v5800_v0  ;;  %v3800_v13 = vld [vmem:[%s5774_s2 + $0x18] sm:$0xff]   ;;  %v5794_v28 = vmov 0.0   ;;  %v3801_v45 = vld [vmem:[%s5775_s3 + $0x4] ss:$16 sps:$4 sm:$0xff]  }
  0x6c   : > { %s438_s23 = scalar_select %p437_p4, %s4451_s21, 1  ;;  %723 = vmatprep.mubr.bf16.mxu1 %v5800_v0  ;;  %3684 = vmatprep.subr.bf16.mxu0 %v3797_v6  ;;  %v457_v23 = vand.u32 127, %v456_v22  ;;  %v3806_v46 = vld [vmem:[%s5775_s3 + $0xc] ss:$16 sps:$4 sm:$0xff]   ;;  %v3803_v47 = vld [vmem:[%s5775_s3] ss:$16 sps:$4 sm:$0xff]  }
  0x6d   : > { %3685 = vmatpush3.bf16.msra.mxu0 %v3797_v6  ;;  %v3804_v48 = vld [vmem:[%s5775_s3 + $0x8] ss:$16 sps:$4 sm:$0xff]   ;;  %v4644_v49 = vld [vmem:[#allocation4 + $0x4] ss:$16 sps:$4 sm:$0xff]   ;;  %691 = vmatprep.subr.bf16.mxu1 %v3801_v45  ;;  %v4647_v50 = vld [vmem:[#allocation4 + $0xc] ss:$16 sps:$4 sm:$0xff]  }
  0x6e   : > { %s3666_s29 = sshll.u32 %s438_s23, 6  ;;  %s3485_s26 = sshll.u32 %s438_s23, 3  ;;  %3686 = vmatprep.subr.bf16.mxu0 %v3798_v8  ;;  %692 = vmatpush1.bf16.msra.mxu1 %v3803_v47  ;;  %v4650_v63 = vld [vmem:[#allocation4] ss:$16 sps:$4 sm:$0xff]  }
  0x6f   : > { %s441_s24 = scalar_lea.vmem %s5772_s0, %s3666_s29  ;;  %s445_s28 = scalar_lea.vmem %s5773_s1, %s3485_s26  ;;  %1065 = vmatprep.subr.bf16.mxu1 %v4644_v49  ;;  %v4662_v6 = vld [vmem:[#allocation4 + $0x20] ss:$16 sps:$4 sm:$0xff]  }
  0x70   : > { %v449_v1 = vld [vmem:[%s441_s24 + $0x10] sm:$0xff]  ;;  %v447_v2 = vld [vmem:[%s441_s24] sm:$0xff]  ;;  %v450_v3 = vld [vmem:[%s441_s24 + $0x18] sm:$0xff]  ;;  %s434_s19 = sand.u32 1, %s4351_s18   ;;  %s3663_s15 = sshll.u32 %s4451_s21, 5 }
  0x71   : > { %465 = vperm.xlu1 %3796, %v449_v1   ;;  %459 = vperm.xlu0 %3795, %v447_v2   ;;  %v448_v4 = vld [vmem:[%s441_s24 + $0x8] sm:$0xff]  ;;  %v451_v7 = vld [vmem:[%s441_s24 + $0x20] sm:$0xff]  ;;  %v454_v9 = vld [vmem:[%s441_s24 + $0x38] sm:$0xff]  ;;  %s3482_s12 = sshll.u32 %s434_s19, 1  ;;  %s6049_s22 = sld [smem:[#allocation72_spill]] }
  0x72   : > { %v452_v5 = vld [vmem:[%s441_s24 + $0x28] sm:$0xff]  ;;  %v453_v10 = vld [vmem:[%s441_s24 + $0x30] sm:$0xff]  ;;  %v455_v11 = vld [vmem:[%s445_s28] sm:$0xff]  ;;  %3687 = vmatpush3.bf16.msra.mxu0 %v3798_v8  ;;  %s436_s11 = scalar_lea.vmem [#allocation10], %s3482_s12  ;;  %s3357_s26 = scalar_lea.sflag [#allocation6], %s434_s19 }
  0x73   : > { %vm1299_vm0 = vcmp.gt.s32.totalorder %v455_v11, 1  ;;  %vm1175_vm1 = vcmp.gt.s32.totalorder %v455_v11, 0  ;;  %3688 = vmatprep.subr.bf16.mxu0 %v3799_v12  ;;  %vm1547_vm2 = vcmp.gt.s32.totalorder %v455_v11, 3  ;;  %vm1423_vm3 = vcmp.gt.s32.totalorder %v455_v11, 2  ;;  %v4652_v1 = vld [vmem:[#allocation4 + $0x8] ss:$16 sps:$4 sm:$0xff]  }
  0x74   : > { %v1300_v14 = vsel %vm1299_vm0, 1, %v5800_v0  ;;  %v1176_v15 = vsel %vm1175_vm1, 1, %v5800_v0  ;;  %v1548_v16 = vsel %vm1547_vm2, 1, %v5800_v0  ;;  %v1424_v17 = vsel %vm1423_vm3, 1, %v5800_v0  ;;  %s3370_s23 = sshll.u32 %s436_s11, 4  ;;  %p6050_p7 = scmp.ne.s32.totalorder %s5884_s27, 0  ;;  %s5732_s23 = int_to_ptr.vmem [resolvable:$true] %s3370_s23 }
  0x75   : > { %468 = vperm.xlu1 %3796, %v450_v3   ;;  %462 = vperm.xlu0 %3795, %v448_v4   ;;  %vm1795_vm4 = vcmp.gt.s32.totalorder %v455_v11, 5  ;;  %vm1671_vm5 = vcmp.gt.s32.totalorder %v455_v11, 4  ;;  %vm2043_vm6 = vcmp.gt.s32.totalorder %v455_v11, 7  ;;  %vm1919_vm7 = vcmp.gt.s32.totalorder %v455_v11, 6  ;;  %v4654_v4 = vld [vmem:[#allocation4 + $0x24] ss:$16 sps:$4 sm:$0xff]  }
  0x76   : > { %3689 = vmatpush3.bf16.msra.mxu0 %v3799_v12  ;;  %v1796_v18 = vsel %vm1795_vm4, 1, %v5800_v0  ;;  %v1672_v19 = vsel %vm1671_vm5, 1, %v5800_v0  ;;  %v2044_v20 = vsel %vm2043_vm6, 1, %v5800_v0  ;;  %v1920_v21 = vsel %vm1919_vm7, 1, %v5800_v0  ;;  %s4289_s17 = scalar_lea.vmem %s5732_s23, 32  ;;  %s4369_s21 = smov [#allocation10]  }
  0x77   : > { %3690 = vmatprep.subr.bf16.mxu0 %v3800_v13  ;;  %vm678_vm1 = vcmask 130048   ;;  %s5730_s24 = scalar_lea.hbm %s6049_s22, %s3663_s15  ;;  %p4290_p12 = scmp.ne.s32.totalorder %s5732_s23, %s4289_s17 }
  0x78   : > { %s4293_s20 = sshll.u32 %s4369_s21, 4  ;;  %s4294_s20 = int_to_ptr.vmem [resolvable:$false] %s4293_s20 }
  0x79   : > { %474 = vperm.xlu1 %3796, %v452_v5   ;;  %471 = vperm.xlu0 %3795, %v451_v7   ;;  %v4656_v5 = vld [vmem:[#allocation4 + $0x2c] ss:$16 sps:$4 sm:$0xff]   ;;  %v4664_v7 = vld [vmem:[#allocation4 + $0x28] ss:$16 sps:$4 sm:$0xff]   ;;  %p4291_p8 = pnand %p4290_p12, %p6050_p7  ;;  %s4295_s28 = scalar_lea.vmem %s4294_s20, 64 }
  0x7a   : > { %3691 = vmatpush3.bf16.msra.mxu0 %v3800_v13  ;;  %p4296_p13 = scmp.lt.s32.totalorder %s5732_s23, %s4294_s20  ;;  %p4297_p1 = scmp.lt.s32.totalorder %s4295_s28, %s4289_s17 }
  0x7b   : > { %764 = vmatprep.subr.bf16.mxu0 %v3806_v46  ;;  %p4292_p11 = pneg %p4291_p8 }
  0x7c   : > { %p4298_p6 = por %p4297_p1, %p4296_p13 }
  0x7d   : > { %480 = vperm.xlu1 %3796, %v454_v9   ;;  %477 = vperm.xlu0 %3795, %v453_v10   ;;  %v4668_v9 = vld [vmem:[#allocation4 + $0x44] ss:$16 sps:$4 sm:$0xff]   ;;  %v4670_v10 = vld [vmem:[#allocation4 + $0x4c] ss:$16 sps:$4 sm:$0xff]  }
  0x7e   : > { %p4299_p9 = pnand %p4298_p6, %p4292_p11 }
  0x81   : > { %1302 = vperm.xlu1 %3796, %v1300_v14   ;;  %1178 = vperm.xlu0 %3795, %v1176_v15   ;;  %v4676_v14 = vld [vmem:[#allocation4 + $0x40] ss:$16 sps:$4 sm:$0xff]   ;;  %v4678_v15 = vld [vmem:[#allocation4 + $0x48] ss:$16 sps:$4 sm:$0xff]  }
  0x85   : > { %1550 = vperm.xlu1 %3796, %v1548_v16   ;;  %1426 = vperm.xlu0 %3795, %v1424_v17   ;;  %v4682_v17 = vld [vmem:[#allocation4 + $0x64] ss:$16 sps:$4 sm:$0xff]  }
  0x89   : > { %1798 = vperm.xlu1 %3796, %v1796_v18   ;;  %1674 = vperm.xlu0 %3795, %v1672_v19   ;;  %v4684_v18 = vld [vmem:[#allocation4 + $0x6c] ss:$16 sps:$4 sm:$0xff]  }
  0x8d   : > { %2046 = vperm.xlu1 %3796, %v2044_v20   ;;  %1922 = vperm.xlu0 %3795, %v1920_v21   ;;  %v4690_v20 = vld [vmem:[#allocation4 + $0x60] ss:$16 sps:$4 sm:$0xff]   ;;  %v4692_v21 = vld [vmem:[#allocation4 + $0x68] ss:$16 sps:$4 sm:$0xff]  }
  0xf0   : > { %v466_v24 = vpop.permute.xlu1 %465  ;;  %v460_v25 = vpop.permute.xlu0 %459 }
  0xf1   : > { %vm484_vm8 = vcmp.eq.s32.totalorder %v466_v24, %v457_v23  ;;  %vm482_vm9 = vcmp.eq.s32.totalorder %v460_v25, %v457_v23  ;;  %v4698_v24 = vld [vmem:[#allocation4 + $0x8c] ss:$16 sps:$4 sm:$0xff]   ;;  %v4704_v25 = vld [vmem:[#allocation4 + $0x80] ss:$16 sps:$4 sm:$0xff]  }
  0xf2   : > { %v3488_v29 = vsel %vm484_vm8, 1.0, %v5794_v28  ;;  %v3486_v30 = vsel %vm482_vm9, 1.0, %v5794_v28 }
  0xf4   : > { %v469_v26 = vpop.permute.xlu1 %468  ;;  %v463_v27 = vpop.permute.xlu0 %462 }
  0xf5   : > { %vm485_vm10 = vcmp.eq.s32.totalorder %v469_v26, %v457_v23  ;;  %vm483_vm11 = vcmp.eq.s32.totalorder %v463_v27, %v457_v23  ;;  %v4706_v26 = vld [vmem:[#allocation4 + $0x88] ss:$16 sps:$4 sm:$0xff]   ;;  %v4710_v27 = vld [vmem:[#allocation4 + $0xa4] ss:$16 sps:$4 sm:$0xff]  }
  0xf6   : > { %v3489_v31 = vsel %vm485_vm10, 1.0, %v5794_v28  ;;  %v3487_v32 = vsel %vm483_vm11, 1.0, %v5794_v28  ;;  %vm4368_vm11 = vmmov 0  }
  0xf7   : > { %v507_v33 = vpack.c.bf16 %v3489_v31, %v3488_v29  ;;  %v506_v34 = vpack.c.bf16 %v3487_v32, %v3486_v30  ;;  %v4712_v29 = vld [vmem:[#allocation4 + $0xac] ss:$16 sps:$4 sm:$0xff]   ;;  %v4718_v30 = vld [vmem:[#allocation4 + $0xa0] ss:$16 sps:$4 sm:$0xff]   ;;  %v4720_v31 = vld [vmem:[#allocation4 + $0xa8] ss:$16 sps:$4 sm:$0xff]  }
  0xf8   : > { %v475_v35 = vpop.permute.xlu1 %474  ;;  %v472_v36 = vpop.permute.xlu0 %471  ;;  %v4724_v32 = vld [vmem:[#allocation4 + $0xc4] ss:$16 sps:$4 sm:$0xff]  }
  0xf9   : > { %vm487_vm13 = vcmp.eq.s32.totalorder %v475_v35, %v457_v23  ;;  %vm486_vm14 = vcmp.eq.s32.totalorder %v472_v36, %v457_v23  ;;  %3692 = vmatprep.mubr.msk.bf16.mxu0 %vm542_vm12, %v506_v34  ;;  %v4732_v34 = vld [vmem:[#allocation4 + $0xc0] ss:$16 sps:$4 sm:$0xff]   ;;  %v4734_v35 = vld [vmem:[#allocation4 + $0xc8] ss:$16 sps:$4 sm:$0xff]   ;;  %v4738_v36 = vld [vmem:[#allocation4 + $0xe4] ss:$16 sps:$4 sm:$0xff]  }
  0xfa   : > { %v3491_v37 = vsel %vm487_vm13, 1.0, %v5794_v28  ;;  %v3490_v38 = vsel %vm486_vm14, 1.0, %v5794_v28  ;;  %3693 = vmatmul.mubr.msk.bf16.vlgmr.msra.gmra.mrb[0].mxu0 %vm542_vm12, %v507_v33  ;;  %v4726_v33 = vld [vmem:[#allocation4 + $0xcc] ss:$16 sps:$4 sm:$0xff]  }
  0xfb   : > { %v508_v39 = vpack.c.bf16 %v3491_v37, %v3490_v38  ;;  %765 = vmatpush1.bf16.msra.mxu0 %v3804_v48  ;;  %v4740_v37 = vld [vmem:[#allocation4 + $0xec] ss:$16 sps:$4 sm:$0xff]   ;;  %v4746_v38 = vld [vmem:[#allocation4 + $0xe0] ss:$16 sps:$4 sm:$0xff]  }
  0xfc   : > { %v481_v40 = vpop.permute.xlu1 %480  ;;  %v478_v41 = vpop.permute.xlu0 %477  ;;  %1106 = vmatprep.subr.bf16.mxu0 %v4647_v50 }
  0xfd   : > { %vm489_vm15 = vcmp.eq.s32.totalorder %v481_v40, %v457_v23  ;;  %vm488_vm0 = vcmp.eq.s32.totalorder %v478_v41, %v457_v23  ;;  %3696 = vmatprep.mubr.msk.bf16.mxu0 %vm542_vm12, %v508_v39  ;;  %v4696_v23 = vld [vmem:[#allocation4 + $0x84] ss:$16 sps:$4 sm:$0xff]   ;;  %v4748_v39 = vld [vmem:[#allocation4 + $0xe8] ss:$16 sps:$4 sm:$0xff]   ;;  %v4795_v40 = vshrl.u32 %v456_v22, 7 }
  0xfe   : > { %v3493_v42 = vsel %vm489_vm15, 1.0, %v5794_v28  ;;  %v3492_v43 = vsel %vm488_vm0, 1.0, %v5794_v28 }
  0xff   : > { %v509_v44 = vpack.c.bf16 %v3493_v42, %v3492_v43  ;;  %5895 = vst [vmem:[#allocation20_spill] sm:$0xff] %v4795_v40  ;;  %v5799_v41 = vsub.s32 0, %v4795_v40  ;;  %v5797_v42 = vsub.s32 2, %v4795_v40  ;;  %v636_v43 = vld [vmem:[%s5777_s5] sm:$0xf]  ;;  %v5796_v45 = vsub.s32 3, %v4795_v40 }
 0x101   : > { %v641_v22 = vrot.slane %v636_v43, %v5799_v41  ;;  %v649_v48 = vrot.slane %v636_v43, %v5797_v42 }
 0x102   : > { %3697 = vmatmul.mubr.msk.bf16.gmra.mrb[4].mxu0 %vm542_vm12, %v509_v44  ;;  %v5798_v44 = vsub.s32 1, %v4795_v40 }
 0x103   : > { %796 = vmatprep.mubr.bf16.mxu0 %v5800_v0 }
 0x1cd   : > { %v3694_v51 = vpop.f32.mrb[0].mxu0 }
 0x1ce   : > { %3959 = vtanh.f32 %v3694_v51  ;;  %v589_v52 = vpop.f32.mrb[1].mxu0 }
 0x1cf   : > { %3961 = vtanh.f32 %v589_v52  ;;  %v3695_v53 = vpop.f32.mrb[2].mxu0 }
 0x1d0   : > { %3963 = vtanh.f32 %v3695_v53  ;;  %v592_v54 = vpop.f32.mrb[3].mxu0  ;;  %v645_v53 = vrot.slane %v636_v43, %v5798_v44 }
 0x1d1   : > { %3965 = vtanh.f32 %v592_v54  ;;  %v653_v54 = vrot.slane %v636_v43, %v5796_v45 }
 0x1d5   : > { %v3698_v55 = vpop.f32.mrb[4].mxu0 }
 0x1d6   : > { %3967 = vtanh.f32 %v3698_v55  ;;  %v605_v56 = vpop.f32.mrb[5].mxu0 }
 0x1d7   : > { %3969 = vtanh.f32 %v605_v56  ;;  %v3699_v57 = vpop.f32.mrb[6].mxu0 }
 0x1d8   : > { %v3960_v58 = vpop.eup %3959  ;;  %3971 = vtanh.f32 %v3699_v57  ;;  %v608_v59 = vpop.f32.mrb[7].mxu0 }
 0x1d9   : > { %v3962_v60 = vpop.eup %3961  ;;  %3973 = vtanh.f32 %v608_v59 }
 0x1da   : > { %v3964_v61 = vpop.eup %3963 }
 0x1db   : > { %v3966_v62 = vpop.eup %3965  ;;  %v629_v2 = vpack.c.bf16 %v3964_v61, %v3960_v58 }
 0x1dc   : > { %v628_v3 = vpack.c.bf16 %v3966_v62, %v3962_v60 }
 0x1de   : > { %3506 = vmatmul.mubr.msk.bf16.vlgmr.msra.gmra.mrb[0].mxu1 %vm678_vm1, %v628_v3  ;;  %3510 = vmatmul.mubr.msk.bf16.vlgmr.msra.gmra.mrb[8].mxu0 %vm678_vm1, %v628_v3 }
 0x1df   : > { %1066 = vmatpush1.bf16.msra.mxu1 %v4650_v63  ;;  %1107 = vmatpush1.bf16.msra.mxu0 %v4652_v1 }
 0x1e0   : > { %v3968_v8 = vpop.eup %3967  ;;  %1067 = vmatprep.subr.bf16.mxu1 %v4654_v4  ;;  %1108 = vmatprep.subr.bf16.mxu0 %v4656_v5 }
 0x1e1   : > { %v3970_v11 = vpop.eup %3969  ;;  %733 = vmatprep.mubr.bf16.mxu1 %v5800_v0  ;;  %806 = vmatprep.mubr.bf16.mxu0 %v5800_v0 }
 0x1e2   : > { %v3972_v12 = vpop.eup %3971 }
 0x1e3   : > { %v3974_v13 = vpop.eup %3973  ;;  %1068 = vmatpush1.bf16.msra.mxu1 %v4662_v6  ;;  %1109 = vmatpush1.bf16.msra.mxu0 %v4664_v7  ;;  %v631_v16 = vpack.c.bf16 %v3972_v12, %v3968_v8 }
 0x1e4   : > { %1069 = vmatprep.subr.bf16.mxu1 %v4668_v9  ;;  %1110 = vmatprep.subr.bf16.mxu0 %v4670_v10  ;;  %v630_v19 = vpack.c.bf16 %v3974_v13, %v3970_v11 }
 0x1e6   : > { %3507 = vmatmul.mubr.msk.bf16.gmra.mrb[4].mxu1 %vm678_vm1, %v629_v2  ;;  %3511 = vmatmul.mubr.msk.bf16.gmra.mrb[12].mxu0 %vm678_vm1, %v629_v2 }
 0x1e7   : > { %1070 = vmatpush1.bf16.msra.mxu1 %v4676_v14  ;;  %1111 = vmatpush1.bf16.msra.mxu0 %v4678_v15 }
 0x1e8   : > { %1071 = vmatprep.subr.bf16.mxu1 %v4682_v17  ;;  %1112 = vmatprep.subr.bf16.mxu0 %v4684_v18 }
 0x1e9   : > { %743 = vmatprep.mubr.bf16.mxu1 %v5800_v0  ;;  %816 = vmatprep.mubr.bf16.mxu0 %v5800_v0 }
 0x1eb   : > { %1072 = vmatpush1.bf16.msra.mxu1 %v4690_v20  ;;  %1113 = vmatpush1.bf16.msra.mxu0 %v4692_v21 }
 0x1ec   : > { %1073 = vmatprep.subr.bf16.mxu1 %v4696_v23  ;;  %1114 = vmatprep.subr.bf16.mxu0 %v4698_v24 }
 0x1ee   : > { %3508 = vmatmul.mubr.msk.bf16.gmra.mrb[8].mxu1 %vm678_vm1, %v630_v19  ;;  %3512 = vmatmul.mubr.msk.bf16.gmra.mrb[16].mxu0 %vm678_vm1, %v630_v19 }
 0x1ef   : > { %1074 = vmatpush1.bf16.msra.mxu1 %v4704_v25  ;;  %1115 = vmatpush1.bf16.msra.mxu0 %v4706_v26 }
 0x1f0   : > { %1075 = vmatprep.subr.bf16.mxu1 %v4710_v27  ;;  %1116 = vmatprep.subr.bf16.mxu0 %v4712_v29 }
 0x1f1   : > { %753 = vmatprep.mubr.bf16.mxu1 %v5800_v0  ;;  %826 = vmatprep.mubr.bf16.mxu0 %v5800_v0 }
 0x1f3   : > { %1076 = vmatpush1.bf16.msra.mxu1 %v4718_v30  ;;  %1117 = vmatpush1.bf16.msra.mxu0 %v4720_v31 }
 0x1f4   : > { %1077 = vmatprep.subr.bf16.mxu1 %v4724_v32  ;;  %1118 = vmatprep.subr.bf16.mxu0 %v4726_v33 }
 0x1f6   : > { %3509 = vmatmul.mubr.msk.bf16.gmra.mrb[12].mxu1 %vm678_vm1, %v631_v16  ;;  %3513 = vmatmul.mubr.msk.bf16.gmra.mrb[20].mxu0 %vm678_vm1, %v631_v16 }
 0x1f7   : > { %1078 = vmatpush1.bf16.msra.mxu1 %v4732_v34  ;;  %1119 = vmatpush1.bf16.msra.mxu0 %v4734_v35 }
 0x1f8   : > { %1079 = vmatprep.subr.bf16.mxu1 %v4738_v36  ;;  %1120 = vmatprep.subr.bf16.mxu0 %v4740_v37 }
 0x1f9   : > { %1097 = vmatprep.mubr.bf16.mxu1 %v5800_v0  ;;  %1138 = vmatprep.mubr.bf16.mxu0 %v5800_v0 }
 0x1fb   : > { %1080 = vmatpush1.bf16.msra.mxu1 %v4746_v38  ;;  %1121 = vmatpush1.bf16.msra.mxu0 %v4748_v39 }
 0x1fc   : > { %1189 = vmatprep.subr.bf16.mxu1 %v4644_v49  ;;  %1230 = vmatprep.subr.bf16.mxu0 %v4647_v50 }
 0x1fe   : > { %1098 = vmatmul.mubr.bf16.vlgmr.msra.gmra.mrb[16].mxu1 %v5800_v0  ;;  %1139 = vmatmul.mubr.bf16.vlgmr.msra.gmra.mrb[24].mxu0 %v5800_v0 }
 0x1ff   : > { %1190 = vmatpush1.bf16.msra.mxu1 %v4650_v63  ;;  %1231 = vmatpush1.bf16.msra.mxu0 %v4652_v1 }
 0x200   : > { %1191 = vmatprep.subr.bf16.mxu1 %v4654_v4  ;;  %1232 = vmatprep.subr.bf16.mxu0 %v4656_v5 }
 0x201   : > { %1221 = vmatprep.mubr.bf16.mxu1 %v5800_v0  ;;  %1262 = vmatprep.mubr.bf16.mxu0 %v5800_v0 }
 0x203   : > { %1192 = vmatpush1.bf16.msra.mxu1 %v4662_v6  ;;  %1233 = vmatpush1.bf16.msra.mxu0 %v4664_v7 }
 0x204   : > { %1193 = vmatprep.subr.bf16.mxu1 %v4668_v9  ;;  %1234 = vmatprep.subr.bf16.mxu0 %v4670_v10 }
 0x207   : > { %1194 = vmatpush1.bf16.msra.mxu1 %v4676_v14  ;;  %1235 = vmatpush1.bf16.msra.mxu0 %v4678_v15 }
 0x208   : > { %1195 = vmatprep.subr.bf16.mxu1 %v4682_v17  ;;  %1236 = vmatprep.subr.bf16.mxu0 %v4684_v18 }
 0x20b   : > { %1196 = vmatpush1.bf16.msra.mxu1 %v4690_v20  ;;  %1237 = vmatpush1.bf16.msra.mxu0 %v4692_v21 }
 0x20c   : > { %1197 = vmatprep.subr.bf16.mxu1 %v4696_v23  ;;  %1238 = vmatprep.subr.bf16.mxu0 %v4698_v24 }
 0x20f   : > { %1198 = vmatpush1.bf16.msra.mxu1 %v4704_v25  ;;  %1239 = vmatpush1.bf16.msra.mxu0 %v4706_v26 }
 0x210   : > { %1199 = vmatprep.subr.bf16.mxu1 %v4710_v27  ;;  %1240 = vmatprep.subr.bf16.mxu0 %v4712_v29 }
 0x213   : > { %1200 = vmatpush1.bf16.msra.mxu1 %v4718_v30  ;;  %1241 = vmatpush1.bf16.msra.mxu0 %v4720_v31 }
 0x214   : > { %1201 = vmatprep.subr.bf16.mxu1 %v4724_v32  ;;  %1242 = vmatprep.subr.bf16.mxu0 %v4726_v33 }
 0x217   : > { %1202 = vmatpush1.bf16.msra.mxu1 %v4732_v34  ;;  %1243 = vmatpush1.bf16.msra.mxu0 %v4734_v35 }
 0x218   : > { %1203 = vmatprep.subr.bf16.mxu1 %v4738_v36  ;;  %1244 = vmatprep.subr.bf16.mxu0 %v4740_v37 }
 0x21b   : > { %1204 = vmatpush1.bf16.msra.mxu1 %v4746_v38  ;;  %1245 = vmatpush1.bf16.msra.mxu0 %v4748_v39 }
 0x21c   : > { %1313 = vmatprep.subr.bf16.mxu1 %v4644_v49  ;;  %1354 = vmatprep.subr.bf16.mxu0 %v4647_v50 }
 0x2b1   : > { %v4804_v46 = vpop.f32.mrb[0].mxu1  ;;  %v4806_v47 = vpop.f32.mrb[8].mxu0 }
 0x2b2   : > { %v727_v51 = vpop.f32.mrb[1].mxu1  ;;  %v800_v52 = vpop.f32.mrb[9].mxu0 }
 0x2b3   : > { %v729_v55 = vpop.f32.mrb[2].mxu1  ;;  %v802_v56 = vpop.f32.mrb[10].mxu0 }
 0x2b4   : > { %v4816_v57 = vadd.f32 %v729_v55, %v641_v22  ;;  %v4818_v58 = vadd.f32 %v802_v56, %v649_v48  ;;  %v731_v59 = vpop.f32.mrb[3].mxu1  ;;  %v804_v60 = vpop.f32.mrb[11].mxu0 }
 0x2b5   : > { %v4820_v61 = vadd.f32 %v731_v59, %v645_v53  ;;  %v4822_v62 = vadd.f32 %v804_v60, %v653_v54 }
 0x2b9   : > { %v735_v2 = vpop.f32.mrb[4].mxu1  ;;  %v808_v3 = vpop.f32.mrb[12].mxu0 }
 0x2ba   : > { %v4824_v8 = vadd.f32 %v735_v2, %v641_v22  ;;  %v4826_v11 = vadd.f32 %v808_v3, %v649_v48  ;;  %v737_v12 = vpop.f32.mrb[5].mxu1  ;;  %v810_v13 = vpop.f32.mrb[13].mxu0 }
 0x2bb   : > { %v4828_v16 = vadd.f32 %v737_v12, %v645_v53  ;;  %v4830_v19 = vadd.f32 %v810_v13, %v653_v54  ;;  %v739_v43 = vpop.f32.mrb[6].mxu1  ;;  %v812_v55 = vpop.f32.mrb[14].mxu0 }
 0x2bc   : > { %v4832_v56 = vadd.f32 %v739_v43, %v641_v22  ;;  %v4834_v59 = vadd.f32 %v812_v55, %v649_v48  ;;  %v741_v60 = vpop.f32.mrb[7].mxu1  ;;  %v814_v28 = vpop.f32.mrb[15].mxu0 }
 0x2bd   : > { %5896 = vst [vmem:[#allocation21_spill] sm:$0xff] %v4828_v16  ;;  %5897 = vst [vmem:[#allocation22_spill] sm:$0xff] %v4830_v19  ;;  %v4836_v45 = vadd.f32 %v741_v60, %v645_v53  ;;  %v4838_v2 = vadd.f32 %v814_v28, %v653_v54 }
 0x2be   : > { %5898 = vst [vmem:[#allocation23_spill] sm:$0xff] %v4832_v56  ;;  %5899 = vst [vmem:[#allocation24_spill] sm:$0xff] %v4834_v59 }
 0x2bf   : > { %5900 = vst [vmem:[#allocation25_spill] sm:$0xff] %v4836_v45  ;;  %5901 = vst [vmem:[#allocation26_spill] sm:$0xff] %v4838_v2 }
 0x2c1   : > { %v745_v3 = vpop.f32.mrb[8].mxu1  ;;  %v818_v42 = vpop.f32.mrb[16].mxu0 }
 0x2c2   : > { %v4840_v44 = vadd.f32 %v745_v3, %v641_v22  ;;  %v4842_v12 = vadd.f32 %v818_v42, %v649_v48  ;;  %v747_v13 = vpop.f32.mrb[9].mxu1  ;;  %v820_v41 = vpop.f32.mrb[17].mxu0 }
 0x2c3   : > { %v4844_v0 = vadd.f32 %v747_v13, %v645_v53  ;;  %v4846_v43 = vadd.f32 %v820_v41, %v653_v54  ;;  %v749_v55 = vpop.f32.mrb[10].mxu1  ;;  %v822_v40 = vpop.f32.mrb[18].mxu0 }
 0x2c4   : > { %5902 = vst [vmem:[#allocation27_spill] sm:$0xff] %v4840_v44  ;;  %5903 = vst [vmem:[#allocation28_spill] sm:$0xff] %v4842_v12  ;;  %v4848_v59 = vadd.f32 %v749_v55, %v641_v22  ;;  %v4850_v60 = vadd.f32 %v822_v40, %v649_v48  ;;  %v751_v28 = vpop.f32.mrb[11].mxu1  ;;  %v824_v2 = vpop.f32.mrb[19].mxu0 }
 0x2c5   : > { %5904 = vst [vmem:[#allocation29_spill] sm:$0xff] %v4844_v0  ;;  %5905 = vst [vmem:[#allocation30_spill] sm:$0xff] %v4846_v43  ;;  %v4852_v45 = vadd.f32 %v751_v28, %v645_v53  ;;  %v4854_v3 = vadd.f32 %v824_v2, %v653_v54 }
 0x2c6   : > { %5906 = vst [vmem:[#allocation31_spill] sm:$0xff] %v4848_v59  ;;  %5907 = vst [vmem:[#allocation32_spill] sm:$0xff] %v4850_v60 }
 0x2c7   : > { %5908 = vst [vmem:[#allocation33_spill] sm:$0xff] %v4852_v45  ;;  %5909 = vst [vmem:[#allocation34_spill] sm:$0xff] %v4854_v3 }
 0x2c9   : > { %v755_v42 = vpop.f32.mrb[12].mxu1  ;;  %v828_v12 = vpop.f32.mrb[20].mxu0 }
 0x2ca   : > { %v4856_v44 = vadd.f32 %v755_v42, %v641_v22  ;;  %v4858_v13 = vadd.f32 %v828_v12, %v649_v48  ;;  %v757_v41 = vpop.f32.mrb[13].mxu1  ;;  %v830_v43 = vpop.f32.mrb[21].mxu0  ;;  %v726_v12 = vadd.f32 %v4804_v46, %v641_v22 }
 0x2cb   : > { %v4860_v0 = vadd.f32 %v757_v41, %v645_v53  ;;  %v4862_v55 = vadd.f32 %v830_v43, %v653_v54  ;;  %v759_v40 = vpop.f32.mrb[14].mxu1  ;;  %v832_v60 = vpop.f32.mrb[22].mxu0  ;;  %v728_v41 = vadd.f32 %v727_v51, %v645_v53 }
 0x2cc   : > { %5910 = vst [vmem:[#allocation35_spill] sm:$0xff] %v4856_v44  ;;  %5911 = vst [vmem:[#allocation36_spill] sm:$0xff] %v4858_v13  ;;  %v4864_v59 = vadd.f32 %v759_v40, %v641_v22  ;;  %v4866_v28 = vadd.f32 %v832_v60, %v649_v48  ;;  %v761_v2 = vpop.f32.mrb[15].mxu1  ;;  %v834_v3 = vpop.f32.mrb[23].mxu0  ;;  %v799_v13 = vadd.f32 %v4806_v47, %v649_v48 }
 0x2cd   : > { %5912 = vst [vmem:[#allocation37_spill] sm:$0xff] %v4860_v0  ;;  %5913 = vst [vmem:[#allocation38_spill] sm:$0xff] %v4862_v55  ;;  %v4868_v45 = vadd.f32 %v761_v2, %v645_v53  ;;  %v4870_v42 = vadd.f32 %v834_v3, %v653_v54  ;;  %v801_v0 = vadd.f32 %v800_v52, %v653_v54 }
 0x2ce   : > { %5914 = vst [vmem:[#allocation39_spill] sm:$0xff] %v4864_v59  ;;  %5915 = vst [vmem:[#allocation40_spill] sm:$0xff] %v4866_v28 }
 0x2cf   : > { %5916 = vst [vmem:[#allocation41_spill] sm:$0xff] %v4868_v45  ;;  %5917 = vst [vmem:[#allocation42_spill] sm:$0xff] %v4870_v42 }
 0x2d1   : > { %v1099_v43 = vpop.f32.mrb[16].mxu1  ;;  %v1140_v55 = vpop.f32.mrb[24].mxu0 }
 0x2d2   : > { %v1147_v44 = vadd.f32 %v1099_v43, %v726_v12  ;;  %v1149_v56 = vadd.f32 %v1140_v55, %v799_v13  ;;  %v1101_v40 = vpop.f32.mrb[17].mxu1  ;;  %v1142_v59 = vpop.f32.mrb[25].mxu0 }
 0x2d3   : > { %v1148_v60 = vadd.f32 %v1101_v40, %v728_v41  ;;  %v1150_v28 = vadd.f32 %v1142_v59, %v801_v0  ;;  %v1103_v19 = vpop.f32.mrb[18].mxu1  ;;  %v1144_v16 = vpop.f32.mrb[26].mxu0 }
 0x2d4   : > { %v3546_v2 = vmul.f32 -1.442695, %v1147_v44  ;;  %v1104_v45 = vpop.f32.mrb[19].mxu1  ;;  %v1145_v3 = vpop.f32.mrb[27].mxu0  ;;  %v3548_v46 = vmul.f32 -1.442695, %v1149_v56 }
 0x2d5   : > { %v3547_v42 = vmul.f32 -1.442695, %v1148_v60  ;;  %v4877_v56 = vpop.permute.xlu0 %1178 }
 0x2d6   : > { %3975 = vpow2.f32 %v3546_v2  ;;  %vm1180_vm2 = vcmp.eq.s32.totalorder %v4877_v56, 1 }
 0x2d7   : > { %3977 = vpow2.f32 %v3547_v42  ;;  %vm3549_vm3 = vmpackc.low %vm1180_vm2, %vm1180_vm2  ;;  %v5918_v42 = vmov 0  }
 0x2d8   : > { %3979 = vtanh.f32 %v1150_v28 }
 0x2d9   : > { %3981 = vpow2.f32 %v3548_v46 }
 0x2e0   : > { %v3976_v47 = vpop.eup %3975 }
 0x2e1   : > { %v1160_v22 = vadd.f32 1.0, %v3976_v47  ;;  %v3978_v48 = vpop.eup %3977 }
 0x2e2   : > { %v1161_v51 = vadd.f32 1.0, %v3978_v48  ;;  %v3980_v52 = vpop.eup %3979 }
 0x2e3   : > { %3983 = vrcp.f32 %v1160_v22  ;;  %v3982_v53 = vpop.eup %3981 }
 0x2e4   : > { %3985 = vrcp.f32 %v1161_v51  ;;  %v1162_v44 = vadd.f32 1.0, %v3982_v53 }
 0x2e6   : > { %3987 = vrcp.f32 %v1162_v44 }
 0x2ed   : > { %v3984_v0 = vpop.eup %3983 }
 0x2ee   : > { %v1171_v54 = vmul.f32 %v3984_v0, %v3980_v52  ;;  %v3986_v16 = vpop.eup %3985 }
 0x2ef   : > { %v1170_v45 = vmul.f32 0.0, %v3986_v16 }
 0x2f0   : > { %v3988_v59 = vpop.eup %3987 }
 0x2f1   : > { %v4874_v19 = vadd.f32 %v1171_v54, %v1170_v45 }
 0x2f3   : > { %3989 = vtanh.f32 %v4874_v19 }
 0x2fd   : > { %v3990_v13 = vpop.eup %3989 }
 0x2fe   : > { %v4880_v55 = vmul.f32 %v3990_v13, %v3988_v59  ;;  %v1182_v13 = vsel %vm1180_vm2, %v4874_v19, 0.0 }
 0x300   : > { %v3550_v28 = vpack.c.bf16 %v4880_v55, %v4880_v55 }
 0x302   : > { %3551 = vmatmul.mubr.msk.bf16.vlgmr.msra.gmra.mrb[20].mxu1 %vm3549_vm3, %v3550_v28  ;;  %3554 = vmatmul.mubr.msk.bf16.vlgmr.msra.gmra.mrb[28].mxu0 %vm3549_vm3, %v3550_v28 }
 0x303   : > { %1314 = vmatpush1.bf16.msra.mxu1 %v4650_v63  ;;  %1355 = vmatpush1.bf16.msra.mxu0 %v4652_v1 }
 0x304   : > { %1315 = vmatprep.subr.bf16.mxu1 %v4654_v4  ;;  %1356 = vmatprep.subr.bf16.mxu0 %v4656_v5 }
 0x305   : > { %1345 = vmatprep.mubr.bf16.mxu1 %v5918_v42  ;;  %1386 = vmatprep.mubr.bf16.mxu0 %v5918_v42 }
 0x307   : > { %1316 = vmatpush1.bf16.msra.mxu1 %v4662_v6  ;;  %1357 = vmatpush1.bf16.msra.mxu0 %v4664_v7 }
 0x308   : > { %1317 = vmatprep.subr.bf16.mxu1 %v4668_v9  ;;  %1358 = vmatprep.subr.bf16.mxu0 %v4670_v10 }
 0x30b   : > { %1318 = vmatpush1.bf16.msra.mxu1 %v4676_v14  ;;  %1359 = vmatpush1.bf16.msra.mxu0 %v4678_v15 }
 0x30c   : > { %1319 = vmatprep.subr.bf16.mxu1 %v4682_v17  ;;  %1360 = vmatprep.subr.bf16.mxu0 %v4684_v18 }
 0x30f   : > { %1320 = vmatpush1.bf16.msra.mxu1 %v4690_v20  ;;  %1361 = vmatpush1.bf16.msra.mxu0 %v4692_v21 }
 0x310   : > { %1321 = vmatprep.subr.bf16.mxu1 %v4696_v23  ;;  %1362 = vmatprep.subr.bf16.mxu0 %v4698_v24 }
 0x313   : > { %1322 = vmatpush1.bf16.msra.mxu1 %v4704_v25  ;;  %1363 = vmatpush1.bf16.msra.mxu0 %v4706_v26 }
 0x314   : > { %1323 = vmatprep.subr.bf16.mxu1 %v4710_v27  ;;  %1364 = vmatprep.subr.bf16.mxu0 %v4712_v29 }
 0x317   : > { %1324 = vmatpush1.bf16.msra.mxu1 %v4718_v30  ;;  %1365 = vmatpush1.bf16.msra.mxu0 %v4720_v31 }
 0x318   : > { %1325 = vmatprep.subr.bf16.mxu1 %v4724_v32  ;;  %1366 = vmatprep.subr.bf16.mxu0 %v4726_v33 }
 0x31b   : > { %1326 = vmatpush1.bf16.msra.mxu1 %v4732_v34  ;;  %1367 = vmatpush1.bf16.msra.mxu0 %v4734_v35 }
 0x31c   : > { %1327 = vmatprep.subr.bf16.mxu1 %v4738_v36  ;;  %1368 = vmatprep.subr.bf16.mxu0 %v4740_v37 }
 0x31f   : > { %1328 = vmatpush1.bf16.msra.mxu1 %v4746_v38  ;;  %1369 = vmatpush1.bf16.msra.mxu0 %v4748_v39 }
 0x320   : > { %1437 = vmatprep.subr.bf16.mxu1 %v4644_v49  ;;  %1478 = vmatprep.subr.bf16.mxu0 %v4647_v50 }
 0x3d5   : > { %v1223_v12 = vpop.f32.mrb[20].mxu1  ;;  %v1264_v41 = vpop.f32.mrb[28].mxu0 }
 0x3d6   : > { %v1271_v43 = vadd.f32 %v1223_v12, %v4816_v57  ;;  %v1273_v40 = vadd.f32 %v1264_v41, %v4818_v58  ;;  %v1225_v60 = vpop.f32.mrb[21].mxu1  ;;  %v1266_v2 = vpop.f32.mrb[29].mxu0 }
 0x3d7   : > { %v1272_v3 = vadd.f32 %v1225_v60, %v4820_v61  ;;  %v1274_v46 = vadd.f32 %v1266_v2, %v4822_v62  ;;  %v1227_v47 = vpop.f32.mrb[22].mxu1  ;;  %v1268_v22 = vpop.f32.mrb[30].mxu0 }
 0x3d8   : > { %v3555_v48 = vmul.f32 -1.442695, %v1271_v43  ;;  %v1228_v51 = vpop.f32.mrb[23].mxu1  ;;  %v1269_v52 = vpop.f32.mrb[31].mxu0  ;;  %v3557_v0 = vmul.f32 -1.442695, %v1273_v40 }
 0x3d9   : > { %v3556_v53 = vmul.f32 -1.442695, %v1272_v3  ;;  %v1303_v12 = vpop.permute.xlu1 %1302 }
 0x3da   : > { %3991 = vpow2.f32 %v3555_v48  ;;  %vm1304_vm4 = vcmp.eq.s32.totalorder %v1303_v12, 1 }
 0x3db   : > { %3993 = vpow2.f32 %v3556_v53  ;;  %v5919_v53 = vld [vmem:[#allocation21_spill] sm:$0xff] }
 0x3dc   : > { %3995 = vtanh.f32 %v1274_v46  ;;  %v1181_v46 = vsel %vm1180_vm2, %v4880_v55, 0.0 }
 0x3dd   : > { %3997 = vpow2.f32 %v3557_v0 }
 0x3e4   : > { %v3992_v54 = vpop.eup %3991 }
 0x3e5   : > { %v1284_v16 = vadd.f32 1.0, %v3992_v54  ;;  %v3994_v57 = vpop.eup %3993  ;;  %v5920_v54 = vld [vmem:[#allocation22_spill] sm:$0xff] }
 0x3e6   : > { %v1285_v58 = vadd.f32 1.0, %v3994_v57  ;;  %v3996_v61 = vpop.eup %3995 }
 0x3e7   : > { %3999 = vrcp.f32 %v1284_v16  ;;  %v3998_v44 = vpop.eup %3997 }
 0x3e8   : > { %4001 = vrcp.f32 %v1285_v58  ;;  %v1286_v28 = vadd.f32 1.0, %v3998_v44 }
 0x3ea   : > { %4003 = vrcp.f32 %v1286_v28 }
 0x3f1   : > { %v4000_v62 = vpop.eup %3999 }
 0x3f2   : > { %v1295_v45 = vmul.f32 %v4000_v62, %v3996_v61  ;;  %v4002_v59 = vpop.eup %4001 }
 0x3f3   : > { %v1294_v41 = vmul.f32 %v4002_v59, %v1182_v13 }
 0x3f4   : > { %v4004_v60 = vpop.eup %4003 }
 0x3f5   : > { %v1296_v43 = vadd.f32 %v1295_v45, %v1294_v41 }
 0x3f7   : > { %4005 = vtanh.f32 %v1296_v43  ;;  %v4928_v40 = vsel %vm1304_vm4, %v1296_v43, %v1182_v13 }
 0x401   : > { %v4006_v2 = vpop.eup %4005 }
 0x402   : > { %v1298_v3 = vmul.f32 %v4006_v2, %v4004_v60 }
 0x404   : > { %v4933_v47 = vsel %vm1304_vm4, %v1298_v3, %v1181_v46  ;;  %v1427_v46 = vpop.permute.xlu0 %1426 }
 0x405   : > { %v1312_v19 = vpack.c.bf16 %v4933_v47, %v4933_v47  ;;  %vm1428_vm5 = vcmp.eq.s32.totalorder %v1427_v46, 1 }
 0x407   : > { %1346 = vmatmul.mubr.bf16.vlgmr.msra.gmra.mrb[24].mxu1 %v1312_v19  ;;  %1387 = vmatmul.mubr.bf16.vlgmr.msra.gmra.mrb[32].mxu0 %v1312_v19 }
 0x408   : > { %1438 = vmatpush1.bf16.msra.mxu1 %v4650_v63  ;;  %1479 = vmatpush1.bf16.msra.mxu0 %v4652_v1 }
 0x409   : > { %1439 = vmatprep.subr.bf16.mxu1 %v4654_v4  ;;  %1480 = vmatprep.subr.bf16.mxu0 %v4656_v5 }
 0x40a   : > { %1469 = vmatprep.mubr.bf16.mxu1 %v5918_v42  ;;  %1510 = vmatprep.mubr.bf16.mxu0 %v5918_v42 }
 0x40c   : > { %1440 = vmatpush1.bf16.msra.mxu1 %v4662_v6  ;;  %1481 = vmatpush1.bf16.msra.mxu0 %v4664_v7 }
 0x40d   : > { %1441 = vmatprep.subr.bf16.mxu1 %v4668_v9  ;;  %1482 = vmatprep.subr.bf16.mxu0 %v4670_v10 }
 0x410   : > { %1442 = vmatpush1.bf16.msra.mxu1 %v4676_v14  ;;  %1483 = vmatpush1.bf16.msra.mxu0 %v4678_v15 }
 0x411   : > { %1443 = vmatprep.subr.bf16.mxu1 %v4682_v17  ;;  %1484 = vmatprep.subr.bf16.mxu0 %v4684_v18 }
 0x414   : > { %1444 = vmatpush1.bf16.msra.mxu1 %v4690_v20  ;;  %1485 = vmatpush1.bf16.msra.mxu0 %v4692_v21 }
 0x415   : > { %1445 = vmatprep.subr.bf16.mxu1 %v4696_v23  ;;  %1486 = vmatprep.subr.bf16.mxu0 %v4698_v24 }
 0x418   : > { %1446 = vmatpush1.bf16.msra.mxu1 %v4704_v25  ;;  %1487 = vmatpush1.bf16.msra.mxu0 %v4706_v26 }
 0x419   : > { %1447 = vmatprep.subr.bf16.mxu1 %v4710_v27  ;;  %1488 = vmatprep.subr.bf16.mxu0 %v4712_v29 }
 0x41c   : > { %1448 = vmatpush1.bf16.msra.mxu1 %v4718_v30  ;;  %1489 = vmatpush1.bf16.msra.mxu0 %v4720_v31 }
 0x41d   : > { %1449 = vmatprep.subr.bf16.mxu1 %v4724_v32  ;;  %1490 = vmatprep.subr.bf16.mxu0 %v4726_v33 }
 0x420   : > { %1450 = vmatpush1.bf16.msra.mxu1 %v4732_v34  ;;  %1491 = vmatpush1.bf16.msra.mxu0 %v4734_v35 }
 0x421   : > { %1451 = vmatprep.subr.bf16.mxu1 %v4738_v36  ;;  %1492 = vmatprep.subr.bf16.mxu0 %v4740_v37 }
 0x424   : > { %1452 = vmatpush1.bf16.msra.mxu1 %v4746_v38  ;;  %1493 = vmatpush1.bf16.msra.mxu0 %v4748_v39 }
 0x425   : > { %1561 = vmatprep.subr.bf16.mxu1 %v4644_v49  ;;  %1602 = vmatprep.subr.bf16.mxu0 %v4647_v50 }
 0x4da   : > { %v1347_v56 = vpop.f32.mrb[24].mxu1  ;;  %v1388_v55 = vpop.f32.mrb[32].mxu0 }
 0x4db   : > { %v1395_v22 = vadd.f32 %v1347_v56, %v4824_v8  ;;  %v1397_v48 = vadd.f32 %v1388_v55, %v4826_v11  ;;  %v1349_v51 = vpop.f32.mrb[25].mxu1  ;;  %v1390_v52 = vpop.f32.mrb[33].mxu0 }
 0x4dc   : > { %v1396_v0 = vadd.f32 %v1349_v51, %v5919_v53  ;;  %v1398_v16 = vadd.f32 %v1390_v52, %v5920_v54  ;;  %v1351_v57 = vpop.f32.mrb[26].mxu1  ;;  %v1392_v58 = vpop.f32.mrb[34].mxu0 }
 0x4dd   : > { %v3558_v61 = vmul.f32 -1.442695, %v1395_v22  ;;  %v1352_v44 = vpop.f32.mrb[27].mxu1  ;;  %v1393_v62 = vpop.f32.mrb[35].mxu0  ;;  %v3560_v59 = vmul.f32 -1.442695, %v1397_v48 }
 0x4de   : > { %v3559_v45 = vmul.f32 -1.442695, %v1396_v0  ;;  %v5921_v0 = vld [vmem:[#allocation23_spill] sm:$0xff]  ;;  %v5923_v44 = vld [vmem:[#allocation25_spill] sm:$0xff] }
 0x4df   : > { %4007 = vpow2.f32 %v3558_v61 }
 0x4e0   : > { %4009 = vpow2.f32 %v3559_v45  ;;  %v5924_v45 = vld [vmem:[#allocation26_spill] sm:$0xff] }
 0x4e1   : > { %4011 = vtanh.f32 %v1398_v16  ;;  %v5922_v16 = vld [vmem:[#allocation24_spill] sm:$0xff] }
 0x4e2   : > { %4013 = vpow2.f32 %v3560_v59 }
 0x4e9   : > { %v4008_v13 = vpop.eup %4007 }
 0x4ea   : > { %v1408_v28 = vadd.f32 1.0, %v4008_v13  ;;  %v4010_v8 = vpop.eup %4009 }
 0x4eb   : > { %v1409_v11 = vadd.f32 1.0, %v4010_v8  ;;  %v4012_v12 = vpop.eup %4011 }
 0x4ec   : > { %4015 = vrcp.f32 %v1408_v28  ;;  %v4014_v41 = vpop.eup %4013 }
 0x4ed   : > { %4017 = vrcp.f32 %v1409_v11  ;;  %v1410_v3 = vadd.f32 1.0, %v4014_v41 }
 0x4ef   : > { %4019 = vrcp.f32 %v1410_v3 }
 0x4f6   : > { %v4016_v43 = vpop.eup %4015 }
 0x4f7   : > { %v1419_v60 = vmul.f32 %v4016_v43, %v4012_v12  ;;  %v4018_v2 = vpop.eup %4017 }
 0x4f8   : > { %v1418_v19 = vmul.f32 %v4018_v2, %v4928_v40 }
 0x4f9   : > { %v4020_v22 = vpop.eup %4019 }
 0x4fa   : > { %v1420_v56 = vadd.f32 %v1419_v60, %v1418_v19 }
 0x4fc   : > { %4021 = vtanh.f32 %v1420_v56  ;;  %v4977_v55 = vsel %vm1428_vm5, %v1420_v56, %v4928_v40 }
 0x506   : > { %v4022_v48 = vpop.eup %4021 }
 0x507   : > { %v1422_v51 = vmul.f32 %v4022_v48, %v4020_v22 }
 0x509   : > { %v4980_v52 = vsel %vm1428_vm5, %v1422_v51, %v4933_v47  ;;  %v1551_v51 = vpop.permute.xlu1 %1550 }
 0x50a   : > { %v1436_v53 = vpack.c.bf16 %v4980_v52, %v4980_v52  ;;  %vm1552_vm6 = vcmp.eq.s32.totalorder %v1551_v51, 1  ;;  %v5126_v51 = vld [vmem:[#allocation4 + $0x84] ss:$16 sps:$4 sm:$0xff]  }
 0x50c   : > { %1470 = vmatmul.mubr.bf16.vlgmr.msra.gmra.mrb[28].mxu1 %v1436_v53  ;;  %1511 = vmatmul.mubr.bf16.vlgmr.msra.gmra.mrb[36].mxu0 %v1436_v53 }
 0x50d   : > { %1562 = vmatpush1.bf16.msra.mxu1 %v4650_v63  ;;  %1603 = vmatpush1.bf16.msra.mxu0 %v4652_v1 }
 0x50e   : > { %1563 = vmatprep.subr.bf16.mxu1 %v4654_v4  ;;  %1604 = vmatprep.subr.bf16.mxu0 %v4656_v5 }
 0x50f   : > { %1593 = vmatprep.mubr.bf16.mxu1 %v5918_v42  ;;  %1634 = vmatprep.mubr.bf16.mxu0 %v5918_v42 }
 0x511   : > { %1564 = vmatpush1.bf16.msra.mxu1 %v4662_v6  ;;  %1605 = vmatpush1.bf16.msra.mxu0 %v4664_v7 }
 0x512   : > { %1565 = vmatprep.subr.bf16.mxu1 %v4668_v9  ;;  %1606 = vmatprep.subr.bf16.mxu0 %v4670_v10 }
 0x515   : > { %1566 = vmatpush1.bf16.msra.mxu1 %v4676_v14  ;;  %1607 = vmatpush1.bf16.msra.mxu0 %v4678_v15 }
 0x516   : > { %1567 = vmatprep.subr.bf16.mxu1 %v4682_v17  ;;  %1608 = vmatprep.subr.bf16.mxu0 %v4684_v18 }
 0x519   : > { %1568 = vmatpush1.bf16.msra.mxu1 %v4690_v20  ;;  %1609 = vmatpush1.bf16.msra.mxu0 %v4692_v21 }
 0x51a   : > { %1569 = vmatprep.subr.bf16.mxu1 %v4696_v23  ;;  %1610 = vmatprep.subr.bf16.mxu0 %v4698_v24 }
 0x51d   : > { %1570 = vmatpush1.bf16.msra.mxu1 %v4704_v25  ;;  %1611 = vmatpush1.bf16.msra.mxu0 %v4706_v26 }
 0x51e   : > { %1571 = vmatprep.subr.bf16.mxu1 %v4710_v27  ;;  %1612 = vmatprep.subr.bf16.mxu0 %v4712_v29 }
 0x521   : > { %1572 = vmatpush1.bf16.msra.mxu1 %v4718_v30  ;;  %1613 = vmatpush1.bf16.msra.mxu0 %v4720_v31 }
 0x522   : > { %1573 = vmatprep.subr.bf16.mxu1 %v4724_v32  ;;  %1614 = vmatprep.subr.bf16.mxu0 %v4726_v33 }
 0x525   : > { %1574 = vmatpush1.bf16.msra.mxu1 %v4732_v34  ;;  %1615 = vmatpush1.bf16.msra.mxu0 %v4734_v35 }
 0x526   : > { %1575 = vmatprep.subr.bf16.mxu1 %v4738_v36  ;;  %1616 = vmatprep.subr.bf16.mxu0 %v4740_v37 }
 0x529   : > { %1576 = vmatpush1.bf16.msra.mxu1 %v4746_v38  ;;  %1617 = vmatpush1.bf16.msra.mxu0 %v4748_v39 }
 0x52a   : > { %1685 = vmatprep.subr.bf16.mxu1 %v4644_v49  ;;  %1726 = vmatprep.subr.bf16.mxu0 %v4647_v50 }
 0x5df   : > { %v1471_v40 = vpop.f32.mrb[28].mxu1  ;;  %v1512_v47 = vpop.f32.mrb[36].mxu0 }
 0x5e0   : > { %v1519_v54 = vadd.f32 %v1471_v40, %v5921_v0  ;;  %v1521_v57 = vadd.f32 %v1512_v47, %v5922_v16  ;;  %v1473_v58 = vpop.f32.mrb[29].mxu1  ;;  %v1514_v61 = vpop.f32.mrb[37].mxu0 }
 0x5e1   : > { %v1520_v62 = vadd.f32 %v1473_v58, %v5923_v44  ;;  %v1522_v59 = vadd.f32 %v1514_v61, %v5924_v45  ;;  %v1475_v13 = vpop.f32.mrb[30].mxu1  ;;  %v1516_v28 = vpop.f32.mrb[38].mxu0 }
 0x5e2   : > { %v3561_v8 = vmul.f32 -1.442695, %v1519_v54  ;;  %v1476_v11 = vpop.f32.mrb[31].mxu1  ;;  %v1517_v12 = vpop.f32.mrb[39].mxu0  ;;  %v3563_v50 = vmul.f32 -1.442695, %v1521_v57 }
 0x5e3   : > { %v3562_v49 = vmul.f32 -1.442695, %v1520_v62  ;;  %v5082_v11 = vld [vmem:[#allocation4] ss:$16 sps:$4 sm:$0xff]   ;;  %v5085_v12 = vld [vmem:[#allocation4 + $0x8] ss:$16 sps:$4 sm:$0xff]  }
 0x5e4   : > { %4023 = vpow2.f32 %v3561_v8 }
 0x5e5   : > { %4025 = vpow2.f32 %v3562_v49  ;;  %v5088_v49 = vld [vmem:[#allocation4 + $0x24] ss:$16 sps:$4 sm:$0xff]  }
 0x5e6   : > { %4027 = vtanh.f32 %v1522_v59 }
 0x5e7   : > { %4029 = vpow2.f32 %v3563_v50  ;;  %v5091_v50 = vld [vmem:[#allocation4 + $0x2c] ss:$16 sps:$4 sm:$0xff]  }
 0x5ee   : > { %v4024_v41 = vpop.eup %4023 }
 0x5ef   : > { %v1532_v43 = vadd.f32 1.0, %v4024_v41  ;;  %v4026_v60 = vpop.eup %4025  ;;  %v5096_v41 = vld [vmem:[#allocation4 + $0x20] ss:$16 sps:$4 sm:$0xff]  }
 0x5f0   : > { %v1533_v2 = vadd.f32 1.0, %v4026_v60  ;;  %v4028_v3 = vpop.eup %4027  ;;  %v5102_v60 = vld [vmem:[#allocation4 + $0x44] ss:$16 sps:$4 sm:$0xff]  }
 0x5f1   : > { %4031 = vrcp.f32 %v1532_v43  ;;  %v4030_v46 = vpop.eup %4029  ;;  %v5099_v43 = vld [vmem:[#allocation4 + $0x28] ss:$16 sps:$4 sm:$0xff]  }
 0x5f2   : > { %4033 = vrcp.f32 %v1533_v2  ;;  %v1534_v48 = vadd.f32 1.0, %v4030_v46  ;;  %v5105_v2 = vld [vmem:[#allocation4 + $0x4c] ss:$16 sps:$4 sm:$0xff]   ;;  %v5111_v46 = vld [vmem:[#allocation4 + $0x48] ss:$16 sps:$4 sm:$0xff]  }
 0x5f4   : > { %4035 = vrcp.f32 %v1534_v48  ;;  %v5123_v48 = vld [vmem:[#allocation4 + $0x68] ss:$16 sps:$4 sm:$0xff]  }
 0x5fb   : > { %v4032_v19 = vpop.eup %4031 }
 0x5fc   : > { %v1543_v56 = vmul.f32 %v4032_v19, %v4028_v3  ;;  %v4034_v22 = vpop.eup %4033  ;;  %v5108_v3 = vld [vmem:[#allocation4 + $0x40] ss:$16 sps:$4 sm:$0xff]   ;;  %v5114_v19 = vld [vmem:[#allocation4 + $0x64] ss:$16 sps:$4 sm:$0xff]  }
 0x5fd   : > { %v1542_v53 = vmul.f32 %v4034_v22, %v4977_v55  ;;  %v5120_v22 = vld [vmem:[#allocation4 + $0x60] ss:$16 sps:$4 sm:$0xff]  }
 0x5fe   : > { %v4036_v0 = vpop.eup %4035 }
 0x5ff   : > { %v1544_v40 = vadd.f32 %v1543_v56, %v1542_v53  ;;  %v5117_v56 = vld [vmem:[#allocation4 + $0x6c] ss:$16 sps:$4 sm:$0xff]  }
 0x600   : > { %v5129_v53 = vld [vmem:[#allocation4 + $0x8c] ss:$16 sps:$4 sm:$0xff]  }
 0x601   : > { %4037 = vtanh.f32 %v1544_v40  ;;  %v5024_v47 = vsel %vm1552_vm6, %v1544_v40, %v4977_v55  ;;  %v5132_v40 = vld [vmem:[#allocation4 + $0x80] ss:$16 sps:$4 sm:$0xff]  }
 0x60b   : > { %v4038_v54 = vpop.eup %4037 }
 0x60c   : > { %v1546_v16 = vmul.f32 %v4038_v54, %v4036_v0  ;;  %v5138_v0 = vld [vmem:[#allocation4 + $0xa4] ss:$16 sps:$4 sm:$0xff]   ;;  %v5141_v54 = vld [vmem:[#allocation4 + $0xac] ss:$16 sps:$4 sm:$0xff]  }
 0x60e   : > { %v5027_v57 = vsel %vm1552_vm6, %v1546_v16, %v4980_v52  ;;  %v1675_v52 = vpop.permute.xlu0 %1674  ;;  %v5144_v16 = vld [vmem:[#allocation4 + $0xa0] ss:$16 sps:$4 sm:$0xff]  }
 0x60f   : > { %v1560_v58 = vpack.c.bf16 %v5027_v57, %v5027_v57  ;;  %vm1676_vm7 = vcmp.eq.s32.totalorder %v1675_v52, 1 }
 0x611   : > { %1594 = vmatmul.mubr.bf16.vlgmr.msra.gmra.mrb[32].mxu1 %v1560_v58  ;;  %1635 = vmatmul.mubr.bf16.vlgmr.msra.gmra.mrb[40].mxu0 %v1560_v58  ;;  %v5150_v58 = vld [vmem:[#allocation4 + $0xc4] ss:$16 sps:$4 sm:$0xff]  }
 0x612   : > { %1686 = vmatpush1.bf16.msra.mxu1 %v4650_v63  ;;  %1727 = vmatpush1.bf16.msra.mxu0 %v4652_v1  ;;  %v5063_v63 = vld [vmem:[#allocation4 + $0x4] ss:$16 sps:$4 sm:$0xff]   ;;  %v5066_v1 = vld [vmem:[#allocation4 + $0xc] ss:$16 sps:$4 sm:$0xff]  }
 0x613   : > { %1687 = vmatprep.subr.bf16.mxu1 %v4654_v4  ;;  %1728 = vmatprep.subr.bf16.mxu0 %v4656_v5 }
 0x614   : > { %1717 = vmatprep.mubr.bf16.mxu1 %v5918_v42  ;;  %1758 = vmatprep.mubr.bf16.mxu0 %v5918_v42 }
 0x616   : > { %1688 = vmatpush1.bf16.msra.mxu1 %v4662_v6  ;;  %1729 = vmatpush1.bf16.msra.mxu0 %v4664_v7  ;;  %v5925_v6 = vld [vmem:[#allocation27_spill] sm:$0xff] }
 0x617   : > { %1689 = vmatprep.subr.bf16.mxu1 %v4668_v9  ;;  %1730 = vmatprep.subr.bf16.mxu0 %v4670_v10  ;;  %v5926_v9 = vld [vmem:[#allocation28_spill] sm:$0xff] }
 0x61a   : > { %1690 = vmatpush1.bf16.msra.mxu1 %v4676_v14  ;;  %1731 = vmatpush1.bf16.msra.mxu0 %v4678_v15 }
 0x61b   : > { %1691 = vmatprep.subr.bf16.mxu1 %v4682_v17  ;;  %1732 = vmatprep.subr.bf16.mxu0 %v4684_v18  ;;  %v5927_v17 = vld [vmem:[#allocation29_spill] sm:$0xff] }
 0x61e   : > { %1692 = vmatpush1.bf16.msra.mxu1 %v4690_v20  ;;  %1733 = vmatpush1.bf16.msra.mxu0 %v4692_v21  ;;  %v5928_v20 = vld [vmem:[#allocation30_spill] sm:$0xff] }
 0x61f   : > { %1693 = vmatprep.subr.bf16.mxu1 %v4696_v23  ;;  %1734 = vmatprep.subr.bf16.mxu0 %v4698_v24 }
 0x622   : > { %1694 = vmatpush1.bf16.msra.mxu1 %v4704_v25  ;;  %1735 = vmatpush1.bf16.msra.mxu0 %v4706_v26 }
 0x623   : > { %1695 = vmatprep.subr.bf16.mxu1 %v4710_v27  ;;  %1736 = vmatprep.subr.bf16.mxu0 %v4712_v29 }
 0x626   : > { %1696 = vmatpush1.bf16.msra.mxu1 %v4718_v30  ;;  %1737 = vmatpush1.bf16.msra.mxu0 %v4720_v31 }
 0x627   : > { %1697 = vmatprep.subr.bf16.mxu1 %v4724_v32  ;;  %1738 = vmatprep.subr.bf16.mxu0 %v4726_v33 }
 0x62a   : > { %1698 = vmatpush1.bf16.msra.mxu1 %v4732_v34  ;;  %1739 = vmatpush1.bf16.msra.mxu0 %v4734_v35 }
 0x62b   : > { %1699 = vmatprep.subr.bf16.mxu1 %v4738_v36  ;;  %1740 = vmatprep.subr.bf16.mxu0 %v4740_v37 }
 0x62e   : > { %1700 = vmatpush1.bf16.msra.mxu1 %v4746_v38  ;;  %1741 = vmatpush1.bf16.msra.mxu0 %v4748_v39 }
 0x62f   : > { %1809 = vmatprep.subr.bf16.mxu1 %v5063_v63  ;;  %1850 = vmatprep.subr.bf16.mxu0 %v5066_v1 }
 0x6e4   : > { %v1595_v4 = vpop.f32.mrb[32].mxu1  ;;  %v1636_v5 = vpop.f32.mrb[40].mxu0 }
 0x6e5   : > { %v1643_v7 = vadd.f32 %v1595_v4, %v5925_v6  ;;  %v1645_v10 = vadd.f32 %v1636_v5, %v5926_v9  ;;  %v1597_v14 = vpop.f32.mrb[33].mxu1  ;;  %v1638_v15 = vpop.f32.mrb[41].mxu0  ;;  %v5153_v4 = vld [vmem:[#allocation4 + $0xcc] ss:$16 sps:$4 sm:$0xff]   ;;  %v5156_v5 = vld [vmem:[#allocation4 + $0xc0] ss:$16 sps:$4 sm:$0xff]  }
 0x6e6   : > { %v1644_v18 = vadd.f32 %v1597_v14, %v5927_v17  ;;  %v1646_v21 = vadd.f32 %v1638_v15, %v5928_v20  ;;  %v1599_v23 = vpop.f32.mrb[34].mxu1  ;;  %v1640_v24 = vpop.f32.mrb[42].mxu0  ;;  %v5159_v6 = vld [vmem:[#allocation4 + $0xc8] ss:$16 sps:$4 sm:$0xff]   ;;  %v5165_v9 = vld [vmem:[#allocation4 + $0xec] ss:$16 sps:$4 sm:$0xff]  }
 0x6e7   : > { %v3564_v25 = vmul.f32 -1.442695, %v1643_v7  ;;  %v1600_v26 = vpop.f32.mrb[35].mxu1  ;;  %v1641_v27 = vpop.f32.mrb[43].mxu0  ;;  %v3566_v30 = vmul.f32 -1.442695, %v1645_v10 }
 0x6e8   : > { %v3565_v29 = vmul.f32 -1.442695, %v1644_v18  ;;  %v5162_v7 = vld [vmem:[#allocation4 + $0xe4] ss:$16 sps:$4 sm:$0xff]   ;;  %v5168_v10 = vld [vmem:[#allocation4 + $0xe0] ss:$16 sps:$4 sm:$0xff]  }
 0x6e9   : > { %4039 = vpow2.f32 %v3564_v25  ;;  %v5171_v14 = vld [vmem:[#allocation4 + $0xe8] ss:$16 sps:$4 sm:$0xff]   ;;  %v5929_v18 = vld [vmem:[#allocation31_spill] sm:$0xff]  ;;  %v5931_v26 = vld [vmem:[#allocation33_spill] sm:$0xff] }
 0x6ea   : > { %4041 = vpow2.f32 %v3565_v29  ;;  %v5932_v29 = vld [vmem:[#allocation34_spill] sm:$0xff] }
 0x6eb   : > { %4043 = vtanh.f32 %v1646_v21  ;;  %v5930_v21 = vld [vmem:[#allocation32_spill] sm:$0xff] }
 0x6ec   : > { %4045 = vpow2.f32 %v3566_v30 }
 0x6f3   : > { %v4040_v31 = vpop.eup %4039 }
 0x6f4   : > { %v1656_v32 = vadd.f32 1.0, %v4040_v31  ;;  %v4042_v33 = vpop.eup %4041 }
 0x6f5   : > { %v1657_v34 = vadd.f32 1.0, %v4042_v33  ;;  %v4044_v35 = vpop.eup %4043 }
 0x6f6   : > { %4047 = vrcp.f32 %v1656_v32  ;;  %v4046_v36 = vpop.eup %4045 }
 0x6f7   : > { %4049 = vrcp.f32 %v1657_v34  ;;  %v1658_v55 = vadd.f32 1.0, %v4046_v36 }
 0x6f9   : > { %4051 = vrcp.f32 %v1658_v55 }
 0x700   : > { %v4048_v37 = vpop.eup %4047 }
 0x701   : > { %v1667_v38 = vmul.f32 %v4048_v37, %v4044_v35  ;;  %v4050_v39 = vpop.eup %4049 }
 0x702   : > { %v1666_v61 = vmul.f32 %v4050_v39, %v5024_v47 }
 0x703   : > { %v4052_v45 = vpop.eup %4051 }
 0x704   : > { %v1668_v44 = vadd.f32 %v1667_v38, %v1666_v61 }
 0x706   : > { %4053 = vtanh.f32 %v1668_v44  ;;  %v5075_v62 = vsel %vm1676_vm7, %v1668_v44, %v5024_v47  ;;  %v5135_v47 = vld [vmem:[#allocation4 + $0x88] ss:$16 sps:$4 sm:$0xff]  }
 0x710   : > { %v4054_v59 = vpop.eup %4053 }
 0x711   : > { %v1670_v13 = vmul.f32 %v4054_v59, %v4052_v45 }
 0x713   : > { %v5078_v28 = vsel %vm1676_vm7, %v1670_v13, %v5027_v57  ;;  %v5147_v57 = vld [vmem:[#allocation4 + $0xa8] ss:$16 sps:$4 sm:$0xff]   ;;  %v1799_v13 = vpop.permute.xlu1 %1798 }
 0x714   : > { %v1684_v8 = vpack.c.bf16 %v5078_v28, %v5078_v28  ;;  %vm1800_vm8 = vcmp.eq.s32.totalorder %v1799_v13, 1  ;;  %v5283_v13 = vld [vmem:[#allocation9 + $0x84] ss:$16 sps:$4 sm:$0xff]  }
 0x715   : > { %5944 = vst [vmem:[#allocation28_spill] sm:$0xff] %v5283_v13 }
 0x716   : > { %1718 = vmatmul.mubr.bf16.vlgmr.msra.gmra.mrb[36].mxu1 %v1684_v8  ;;  %1759 = vmatmul.mubr.bf16.vlgmr.msra.gmra.mrb[44].mxu0 %v1684_v8 }
 0x717   : > { %1810 = vmatpush1.bf16.msra.mxu1 %v5082_v11  ;;  %1851 = vmatpush1.bf16.msra.mxu0 %v5085_v12 }
 0x718   : > { %1811 = vmatprep.subr.bf16.mxu1 %v5088_v49  ;;  %1852 = vmatprep.subr.bf16.mxu0 %v5091_v50 }
 0x719   : > { %1841 = vmatprep.mubr.bf16.mxu1 %v5918_v42  ;;  %1882 = vmatprep.mubr.bf16.mxu0 %v5918_v42 }
 0x71b   : > { %1812 = vmatpush1.bf16.msra.mxu1 %v5096_v41  ;;  %1853 = vmatpush1.bf16.msra.mxu0 %v5099_v43 }
 0x71c   : > { %1813 = vmatprep.subr.bf16.mxu1 %v5102_v60  ;;  %1854 = vmatprep.subr.bf16.mxu0 %v5105_v2 }
 0x71f   : > { %1814 = vmatpush1.bf16.msra.mxu1 %v5108_v3  ;;  %1855 = vmatpush1.bf16.msra.mxu0 %v5111_v46 }
 0x720   : > { %1815 = vmatprep.subr.bf16.mxu1 %v5114_v19  ;;  %1856 = vmatprep.subr.bf16.mxu0 %v5117_v56 }
 0x723   : > { %1816 = vmatpush1.bf16.msra.mxu1 %v5120_v22  ;;  %1857 = vmatpush1.bf16.msra.mxu0 %v5123_v48 }
 0x724   : > { %1817 = vmatprep.subr.bf16.mxu1 %v5126_v51  ;;  %1858 = vmatprep.subr.bf16.mxu0 %v5129_v53 }
 0x727   : > { %1818 = vmatpush1.bf16.msra.mxu1 %v5132_v40  ;;  %1859 = vmatpush1.bf16.msra.mxu0 %v5135_v47 }
 0x728   : > { %1819 = vmatprep.subr.bf16.mxu1 %v5138_v0  ;;  %1860 = vmatprep.subr.bf16.mxu0 %v5141_v54 }
 0x72b   : > { %1820 = vmatpush1.bf16.msra.mxu1 %v5144_v16  ;;  %1861 = vmatpush1.bf16.msra.mxu0 %v5147_v57 }
 0x72c   : > { %1821 = vmatprep.subr.bf16.mxu1 %v5150_v58  ;;  %1862 = vmatprep.subr.bf16.mxu0 %v5153_v4 }
 0x72f   : > { %1822 = vmatpush1.bf16.msra.mxu1 %v5156_v5  ;;  %1863 = vmatpush1.bf16.msra.mxu0 %v5159_v6 }
 0x730   : > { %1823 = vmatprep.subr.bf16.mxu1 %v5162_v7  ;;  %1864 = vmatprep.subr.bf16.mxu0 %v5165_v9 }
 0x733   : > { %1824 = vmatpush1.bf16.msra.mxu1 %v5168_v10  ;;  %1865 = vmatpush1.bf16.msra.mxu0 %v5171_v14 }
 0x734   : > { %1933 = vmatprep.subr.bf16.mxu1 %v5063_v63  ;;  %1974 = vmatprep.subr.bf16.mxu0 %v5066_v1 }
 0x7e9   : > { %v1719_v15 = vpop.f32.mrb[36].mxu1  ;;  %v1760_v17 = vpop.f32.mrb[44].mxu0 }
 0x7ea   : > { %v1767_v20 = vadd.f32 %v1719_v15, %v5929_v18  ;;  %v1769_v23 = vadd.f32 %v1760_v17, %v5930_v21  ;;  %v1721_v24 = vpop.f32.mrb[37].mxu1  ;;  %v1762_v25 = vpop.f32.mrb[45].mxu0 }
 0x7eb   : > { %v1768_v27 = vadd.f32 %v1721_v24, %v5931_v26  ;;  %v1770_v30 = vadd.f32 %v1762_v25, %v5932_v29  ;;  %v1723_v31 = vpop.f32.mrb[38].mxu1  ;;  %v1764_v32 = vpop.f32.mrb[46].mxu0 }
 0x7ec   : > { %v3567_v33 = vmul.f32 -1.442695, %v1767_v20  ;;  %v1724_v34 = vpop.f32.mrb[39].mxu1  ;;  %v1765_v35 = vpop.f32.mrb[47].mxu0  ;;  %v3569_v1 = vmul.f32 -1.442695, %v1769_v23 }
 0x7ed   : > { %v3568_v63 = vmul.f32 -1.442695, %v1768_v27  ;;  %v5240_v34 = vld [vmem:[#allocation9 + $0x8] ss:$16 sps:$4 sm:$0xff]  }
 0x7ee   : > { %4055 = vpow2.f32 %v3567_v33  ;;  %v5238_v33 = vld [vmem:[#allocation9] ss:$16 sps:$4 sm:$0xff]  }
 0x7ef   : > { %4057 = vpow2.f32 %v3568_v63  ;;  %v5244_v63 = vld [vmem:[#allocation9 + $0x24] ss:$16 sps:$4 sm:$0xff]  }
 0x7f0   : > { %4059 = vtanh.f32 %v1770_v30 }
 0x7f1   : > { %4061 = vpow2.f32 %v3569_v1  ;;  %v5246_v1 = vld [vmem:[#allocation9 + $0x2c] ss:$16 sps:$4 sm:$0xff]  }
 0x7f8   : > { %v4056_v36 = vpop.eup %4055 }
 0x7f9   : > { %v1780_v37 = vadd.f32 1.0, %v4056_v36  ;;  %v4058_v38 = vpop.eup %4057  ;;  %v5250_v36 = vld [vmem:[#allocation9 + $0x20] ss:$16 sps:$4 sm:$0xff]  }
 0x7fa   : > { %v1781_v39 = vadd.f32 1.0, %v4058_v38  ;;  %v4060_v55 = vpop.eup %4059  ;;  %v5260_v38 = vld [vmem:[#allocation9 + $0x44] ss:$16 sps:$4 sm:$0xff]  }
 0x7fb   : > { %4063 = vrcp.f32 %v1780_v37  ;;  %v4062_v52 = vpop.eup %4061  ;;  %v5252_v37 = vld [vmem:[#allocation9 + $0x28] ss:$16 sps:$4 sm:$0xff]  }
 0x7fc   : > { %4065 = vrcp.f32 %v1781_v39  ;;  %v1782_v59 = vadd.f32 1.0, %v4062_v52  ;;  %v5262_v39 = vld [vmem:[#allocation9 + $0x40] ss:$16 sps:$4 sm:$0xff]   ;;  %v5268_v52 = vld [vmem:[#allocation9 + $0x48] ss:$16 sps:$4 sm:$0xff]  }
 0x7fd   : > { %5939 = vst [vmem:[#allocation23_spill] sm:$0xff] %v5268_v52 }
 0x7fe   : > { %4067 = vrcp.f32 %v1782_v59  ;;  %v5280_v59 = vld [vmem:[#allocation9 + $0x68] ss:$16 sps:$4 sm:$0xff]  }
 0x7ff   : > { %5943 = vst [vmem:[#allocation27_spill] sm:$0xff] %v5280_v59 }
 0x805   : > { %v4064_v61 = vpop.eup %4063 }
 0x806   : > { %v1791_v44 = vmul.f32 %v4064_v61, %v4060_v55  ;;  %v4066_v45 = vpop.eup %4065  ;;  %v5265_v55 = vld [vmem:[#allocation9 + $0x4c] ss:$16 sps:$4 sm:$0xff]   ;;  %v5271_v61 = vld [vmem:[#allocation9 + $0x64] ss:$16 sps:$4 sm:$0xff]  }
 0x807   : > { %v1790_v8 = vmul.f32 %v4066_v45, %v5075_v62  ;;  %5940 = vst [vmem:[#allocation24_spill] sm:$0xff] %v5271_v61  ;;  %v5277_v45 = vld [vmem:[#allocation9 + $0x6c] ss:$16 sps:$4 sm:$0xff]  }
 0x808   : > { %v4068_v18 = vpop.eup %4067  ;;  %5942 = vst [vmem:[#allocation26_spill] sm:$0xff] %v5277_v45 }
 0x809   : > { %v1792_v15 = vadd.f32 %v1791_v44, %v1790_v8  ;;  %v5274_v44 = vld [vmem:[#allocation9 + $0x60] ss:$16 sps:$4 sm:$0xff]  }
 0x80a   : > { %5941 = vst [vmem:[#allocation25_spill] sm:$0xff] %v5274_v44  ;;  %v5286_v8 = vld [vmem:[#allocation9 + $0x80] ss:$16 sps:$4 sm:$0xff]  }
 0x80b   : > { %4069 = vtanh.f32 %v1792_v15  ;;  %v5182_v17 = vsel %vm1800_vm8, %v1792_v15, %v5075_v62  ;;  %v5221_v62 = vld [vmem:[#allocation9 + $0x4] ss:$16 sps:$4 sm:$0xff]   ;;  %5945 = vst [vmem:[#allocation29_spill] sm:$0xff] %v5286_v8  ;;  %v5289_v15 = vld [vmem:[#allocation9 + $0x8c] ss:$16 sps:$4 sm:$0xff]  }
 0x80c   : > { %5933 = vst [vmem:[#allocation21_spill] sm:$0xff] %v5221_v62  ;;  %5946 = vst [vmem:[#allocation30_spill] sm:$0xff] %v5289_v15 }
 0x815   : > { %v4070_v20 = vpop.eup %4069 }
 0x816   : > { %v1794_v21 = vmul.f32 %v4070_v20, %v4068_v18  ;;  %v5295_v18 = vld [vmem:[#allocation9 + $0xa4] ss:$16 sps:$4 sm:$0xff]   ;;  %v5298_v20 = vld [vmem:[#allocation9 + $0xa0] ss:$16 sps:$4 sm:$0xff]  }
 0x817   : > { %5948 = vst [vmem:[#allocation32_spill] sm:$0xff] %v5295_v18  ;;  %5949 = vst [vmem:[#allocation33_spill] sm:$0xff] %v5298_v20 }
 0x818   : > { %v5185_v23 = vsel %vm1800_vm8, %v1794_v21, %v5078_v28  ;;  %v5223_v28 = vld [vmem:[#allocation9 + $0xc] ss:$16 sps:$4 sm:$0xff]  }
 0x819   : > { %v1808_v24 = vpack.c.bf16 %v5185_v23, %v5185_v23  ;;  %5934 = vst [vmem:[#allocation22_spill] sm:$0xff] %v5223_v28  ;;  %v5301_v21 = vld [vmem:[#allocation9 + $0xac] ss:$16 sps:$4 sm:$0xff]  }
 0x81a   : > { %5950 = vst [vmem:[#allocation34_spill] sm:$0xff] %v5301_v21 }
 0x81b   : > { %1842 = vmatmul.mubr.bf16.vlgmr.msra.gmra.mrb[40].mxu1 %v1808_v24  ;;  %1883 = vmatmul.mubr.bf16.vlgmr.msra.gmra.mrb[48].mxu0 %v1808_v24  ;;  %v5307_v24 = vld [vmem:[#allocation9 + $0xc4] ss:$16 sps:$4 sm:$0xff]  }
 0x81c   : > { %1934 = vmatpush1.bf16.msra.mxu1 %v5082_v11  ;;  %1975 = vmatpush1.bf16.msra.mxu0 %v5085_v12 }
 0x81d   : > { %1935 = vmatprep.subr.bf16.mxu1 %v5088_v49  ;;  %1976 = vmatprep.subr.bf16.mxu0 %v5091_v50  ;;  %v5935_v49 = vld [vmem:[#allocation35_spill] sm:$0xff] }
 0x81e   : > { %1965 = vmatprep.mubr.bf16.mxu1 %v5918_v42  ;;  %2006 = vmatprep.mubr.bf16.mxu0 %v5918_v42 }
 0x820   : > { %1936 = vmatpush1.bf16.msra.mxu1 %v5096_v41  ;;  %1977 = vmatpush1.bf16.msra.mxu0 %v5099_v43  ;;  %v5936_v41 = vld [vmem:[#allocation36_spill] sm:$0xff] }
 0x821   : > { %1937 = vmatprep.subr.bf16.mxu1 %v5102_v60  ;;  %1978 = vmatprep.subr.bf16.mxu0 %v5105_v2  ;;  %5952 = vst [vmem:[#allocation36_spill] sm:$0xff] %v5307_v24 }
 0x824   : > { %1938 = vmatpush1.bf16.msra.mxu1 %v5108_v3  ;;  %1979 = vmatpush1.bf16.msra.mxu0 %v5111_v46  ;;  %v5937_v3 = vld [vmem:[#allocation37_spill] sm:$0xff] }
 0x825   : > { %1939 = vmatprep.subr.bf16.mxu1 %v5114_v19  ;;  %1980 = vmatprep.subr.bf16.mxu0 %v5117_v56  ;;  %v5938_v19 = vld [vmem:[#allocation38_spill] sm:$0xff] }
 0x828   : > { %1940 = vmatpush1.bf16.msra.mxu1 %v5120_v22  ;;  %1981 = vmatpush1.bf16.msra.mxu0 %v5123_v48 }
 0x829   : > { %1941 = vmatprep.subr.bf16.mxu1 %v5126_v51  ;;  %1982 = vmatprep.subr.bf16.mxu0 %v5129_v53 }
 0x82c   : > { %1942 = vmatpush1.bf16.msra.mxu1 %v5132_v40  ;;  %1983 = vmatpush1.bf16.msra.mxu0 %v5135_v47 }
 0x82d   : > { %1943 = vmatprep.subr.bf16.mxu1 %v5138_v0  ;;  %1984 = vmatprep.subr.bf16.mxu0 %v5141_v54 }
 0x830   : > { %1944 = vmatpush1.bf16.msra.mxu1 %v5144_v16  ;;  %1985 = vmatpush1.bf16.msra.mxu0 %v5147_v57 }
 0x831   : > { %1945 = vmatprep.subr.bf16.mxu1 %v5150_v58  ;;  %1986 = vmatprep.subr.bf16.mxu0 %v5153_v4 }
 0x834   : > { %1946 = vmatpush1.bf16.msra.mxu1 %v5156_v5  ;;  %1987 = vmatpush1.bf16.msra.mxu0 %v5159_v6 }
 0x835   : > { %1947 = vmatprep.subr.bf16.mxu1 %v5162_v7  ;;  %1988 = vmatprep.subr.bf16.mxu0 %v5165_v9 }
 0x838   : > { %1948 = vmatpush1.bf16.msra.mxu1 %v5168_v10  ;;  %1989 = vmatpush1.bf16.msra.mxu0 %v5171_v14  ;;  %v1923_v14 = vpop.permute.xlu0 %1922 }
 0x839   : > { %2278 = vmatprep.subr.bf16.mxu1 %v5221_v62  ;;  %2319 = vmatprep.subr.bf16.mxu0 %v5223_v28  ;;  %vm1924_vm9 = vcmp.eq.s32.totalorder %v1923_v14, 1  ;;  %v5400_v14 = vld [vmem:[#allocation7 + $0xa0] ss:$16 sps:$4 sm:$0xff]  }
 0x83a   : > { %5974 = vst [vmem:[#allocation62_spill] sm:$0xff] %v5400_v14 }
 0x8ee   : > { %v1843_v11 = vpop.f32.mrb[40].mxu1  ;;  %v1884_v12 = vpop.f32.mrb[48].mxu0 }
 0x8ef   : > { %v1891_v50 = vadd.f32 %v1843_v11, %v5935_v49  ;;  %v1893_v43 = vadd.f32 %v1884_v12, %v5936_v41  ;;  %v1845_v60 = vpop.f32.mrb[41].mxu1  ;;  %v1886_v2 = vpop.f32.mrb[49].mxu0  ;;  %v5310_v11 = vld [vmem:[#allocation9 + $0xc0] ss:$16 sps:$4 sm:$0xff]   ;;  %v5313_v12 = vld [vmem:[#allocation9 + $0xcc] ss:$16 sps:$4 sm:$0xff]  }
 0x8f0   : > { %v1892_v46 = vadd.f32 %v1845_v60, %v5937_v3  ;;  %v1894_v56 = vadd.f32 %v1886_v2, %v5938_v19  ;;  %v1847_v22 = vpop.f32.mrb[42].mxu1  ;;  %v1888_v48 = vpop.f32.mrb[50].mxu0  ;;  %5953 = vst [vmem:[#allocation37_spill] sm:$0xff] %v5310_v11  ;;  %5954 = vst [vmem:[#allocation38_spill] sm:$0xff] %v5313_v12  ;;  %v5316_v49 = vld [vmem:[#allocation9 + $0xc8] ss:$16 sps:$4 sm:$0xff]  }
 0x8f1   : > { %v3570_v51 = vmul.f32 -1.442695, %v1891_v50  ;;  %v1848_v53 = vpop.f32.mrb[43].mxu1  ;;  %v1889_v40 = vpop.f32.mrb[51].mxu0  ;;  %v3572_v0 = vmul.f32 -1.442695, %v1893_v43 }
 0x8f2   : > { %v3571_v47 = vmul.f32 -1.442695, %v1892_v46  ;;  %5955 = vst [vmem:[#allocation43_spill] sm:$0xff] %v5316_v49  ;;  %v5319_v50 = vld [vmem:[#allocation9 + $0xe4] ss:$16 sps:$4 sm:$0xff]  }
 0x8f3   : > { %4071 = vpow2.f32 %v3570_v51  ;;  %5956 = vst [vmem:[#allocation44_spill] sm:$0xff] %v5319_v50  ;;  %v5322_v41 = vld [vmem:[#allocation9 + $0xe0] ss:$16 sps:$4 sm:$0xff]   ;;  %v5325_v43 = vld [vmem:[#allocation9 + $0xec] ss:$16 sps:$4 sm:$0xff]  }
 0x8f4   : > { %4073 = vpow2.f32 %v3571_v47  ;;  %5957 = vst [vmem:[#allocation45_spill] sm:$0xff] %v5322_v41  ;;  %5958 = vst [vmem:[#allocation46_spill] sm:$0xff] %v5325_v43  ;;  %v5328_v60 = vld [vmem:[#allocation9 + $0xe8] ss:$16 sps:$4 sm:$0xff]   ;;  %v5333_v2 = vld [vmem:[#allocation7 + $0x4] ss:$16 sps:$4 sm:$0xff]  }
 0x8f5   : > { %4075 = vtanh.f32 %v1894_v56  ;;  %5959 = vst [vmem:[#allocation47_spill] sm:$0xff] %v5328_v60  ;;  %5960 = vst [vmem:[#allocation48_spill] sm:$0xff] %v5333_v2  ;;  %v5335_v3 = vld [vmem:[#allocation7 + $0xc] ss:$16 sps:$4 sm:$0xff]   ;;  %v5337_v46 = vld [vmem:[#allocation7] ss:$16 sps:$4 sm:$0xff]  }
 0x8f6   : > { %4077 = vpow2.f32 %v3572_v0  ;;  %5961 = vst [vmem:[#allocation49_spill] sm:$0xff] %v5335_v3  ;;  %v5339_v19 = vld [vmem:[#allocation7 + $0x8] ss:$16 sps:$4 sm:$0xff]   ;;  %v5347_v56 = vld [vmem:[#allocation7 + $0x24] ss:$16 sps:$4 sm:$0xff]  }
 0x8f7   : > { %v5349_v22 = vld [vmem:[#allocation7 + $0x2c] ss:$16 sps:$4 sm:$0xff]   ;;  %v5352_v48 = vld [vmem:[#allocation7 + $0x20] ss:$16 sps:$4 sm:$0xff]   ;;  %v5354_v51 = vld [vmem:[#allocation7 + $0x28] ss:$16 sps:$4 sm:$0xff]  }
 0x8f8   : > { %v5360_v53 = vld [vmem:[#allocation7 + $0x44] ss:$16 sps:$4 sm:$0xff]   ;;  %v5362_v40 = vld [vmem:[#allocation7 + $0x4c] ss:$16 sps:$4 sm:$0xff]   ;;  %v5364_v47 = vld [vmem:[#allocation7 + $0x40] ss:$16 sps:$4 sm:$0xff]  }
 0x8f9   : > { %5962 = vst [vmem:[#allocation50_spill] sm:$0xff] %v5364_v47  ;;  %v5366_v0 = vld [vmem:[#allocation7 + $0x48] ss:$16 sps:$4 sm:$0xff]  }
 0x8fa   : > { %5963 = vst [vmem:[#allocation51_spill] sm:$0xff] %v5366_v0 }
 0x8fd   : > { %v4072_v54 = vpop.eup %4071 }
 0x8fe   : > { %v1904_v16 = vadd.f32 1.0, %v4072_v54  ;;  %v4074_v57 = vpop.eup %4073  ;;  %v5372_v54 = vld [vmem:[#allocation7 + $0x64] ss:$16 sps:$4 sm:$0xff]  }
 0x8ff   : > { %v1905_v58 = vadd.f32 1.0, %v4074_v57  ;;  %v4076_v4 = vpop.eup %4075  ;;  %5964 = vst [vmem:[#allocation52_spill] sm:$0xff] %v5372_v54  ;;  %v5376_v57 = vld [vmem:[#allocation7 + $0x60] ss:$16 sps:$4 sm:$0xff]  }
 0x900   : > { %4079 = vrcp.f32 %v1904_v16  ;;  %v4078_v5 = vpop.eup %4077  ;;  %v5374_v16 = vld [vmem:[#allocation7 + $0x6c] ss:$16 sps:$4 sm:$0xff]   ;;  %5966 = vst [vmem:[#allocation54_spill] sm:$0xff] %v5376_v57 }
 0x901   : > { %4081 = vrcp.f32 %v1905_v58  ;;  %v1906_v10 = vadd.f32 1.0, %v4078_v5  ;;  %5965 = vst [vmem:[#allocation53_spill] sm:$0xff] %v5374_v16  ;;  %v5378_v58 = vld [vmem:[#allocation7 + $0x68] ss:$16 sps:$4 sm:$0xff]   ;;  %v5386_v5 = vld [vmem:[#allocation7 + $0x8c] ss:$16 sps:$4 sm:$0xff]  }
 0x902   : > { %5967 = vst [vmem:[#allocation55_spill] sm:$0xff] %v5378_v58  ;;  %5969 = vst [vmem:[#allocation57_spill] sm:$0xff] %v5386_v5 }
 0x903   : > { %4083 = vrcp.f32 %v1906_v10  ;;  %v5398_v10 = vld [vmem:[#allocation7 + $0xac] ss:$16 sps:$4 sm:$0xff]  }
 0x904   : > { %5973 = vst [vmem:[#allocation61_spill] sm:$0xff] %v5398_v10 }
 0x90a   : > { %v4080_v6 = vpop.eup %4079 }
 0x90b   : > { %v1915_v7 = vmul.f32 %v4080_v6, %v4076_v4  ;;  %v4082_v9 = vpop.eup %4081  ;;  %v5384_v4 = vld [vmem:[#allocation7 + $0x84] ss:$16 sps:$4 sm:$0xff]   ;;  %v5388_v6 = vld [vmem:[#allocation7 + $0x80] ss:$16 sps:$4 sm:$0xff]  }
 0x90c   : > { %v1914_v25 = vmul.f32 %v4082_v9, %v5182_v17  ;;  %5968 = vst [vmem:[#allocation56_spill] sm:$0xff] %v5384_v4  ;;  %5970 = vst [vmem:[#allocation58_spill] sm:$0xff] %v5388_v6  ;;  %v5396_v9 = vld [vmem:[#allocation7 + $0xa4] ss:$16 sps:$4 sm:$0xff]  }
 0x90d   : > { %v4084_v29 = vpop.eup %4083  ;;  %5972 = vst [vmem:[#allocation60_spill] sm:$0xff] %v5396_v9 }
 0x90e   : > { %v1916_v26 = vadd.f32 %v1915_v7, %v1914_v25  ;;  %v5390_v7 = vld [vmem:[#allocation7 + $0x88] ss:$16 sps:$4 sm:$0xff]  }
 0x90f   : > { %5971 = vst [vmem:[#allocation59_spill] sm:$0xff] %v5390_v7  ;;  %v5402_v25 = vld [vmem:[#allocation7 + $0xa8] ss:$16 sps:$4 sm:$0xff]  }
 0x910   : > { %4085 = vtanh.f32 %v1916_v26  ;;  %v5233_v27 = vsel %vm1924_vm9, %v1916_v26, %v5182_v17  ;;  %v5292_v17 = vld [vmem:[#allocation9 + $0x88] ss:$16 sps:$4 sm:$0xff]   ;;  %5975 = vst [vmem:[#allocation63_spill] sm:$0xff] %v5402_v25  ;;  %v5408_v26 = vld [vmem:[#allocation7 + $0xc4] ss:$16 sps:$4 sm:$0xff]  }
 0x911   : > { %5947 = vst [vmem:[#allocation31_spill] sm:$0xff] %v5292_v17  ;;  %5976 = vst [vmem:[#allocation64_spill] sm:$0xff] %v5408_v26 }
 0x91a   : > { %v4086_v30 = vpop.eup %4085 }
 0x91b   : > { %v1918_v31 = vmul.f32 %v4086_v30, %v4084_v29  ;;  %v5410_v29 = vld [vmem:[#allocation7 + $0xcc] ss:$16 sps:$4 sm:$0xff]   ;;  %v5412_v30 = vld [vmem:[#allocation7 + $0xc0] ss:$16 sps:$4 sm:$0xff]  }
 0x91c   : > { %5977 = vst [vmem:[#allocation65_spill] sm:$0xff] %v5410_v29  ;;  %5978 = vst [vmem:[#allocation66_spill] sm:$0xff] %v5412_v30 }
 0x91d   : > { %v5236_v32 = vsel %vm1924_vm9, %v1918_v31, %v5185_v23  ;;  %v5304_v23 = vld [vmem:[#allocation9 + $0xa8] ss:$16 sps:$4 sm:$0xff]  }
 0x91e   : > { %v1932_v35 = vpack.c.bf16 %v5236_v32, %v5236_v32  ;;  %5951 = vst [vmem:[#allocation35_spill] sm:$0xff] %v5304_v23  ;;  %v5414_v31 = vld [vmem:[#allocation7 + $0xc8] ss:$16 sps:$4 sm:$0xff]  }
 0x91f   : > { %5979 = vst [vmem:[#allocation67_spill] sm:$0xff] %v5414_v31 }
 0x920   : > { %1966 = vmatmul.mubr.bf16.vlgmr.msra.gmra.mrb[44].mxu1 %v1932_v35  ;;  %2007 = vmatmul.mubr.bf16.vlgmr.msra.gmra.mrb[52].mxu0 %v1932_v35  ;;  %v5416_v35 = vld [vmem:[#allocation7 + $0xe4] ss:$16 sps:$4 sm:$0xff]  }
 0x921   : > { %2279 = vmatpush1.bf16.msra.mxu1 %v5238_v33  ;;  %2320 = vmatpush1.bf16.msra.mxu0 %v5240_v34  ;;  %5980 = vst [vmem:[#allocation68_spill] sm:$0xff] %v5416_v35 }
 0x922   : > { %2280 = vmatprep.subr.bf16.mxu1 %v5244_v63  ;;  %2321 = vmatprep.subr.bf16.mxu0 %v5246_v1 }
 0x923   : > { %2310 = vmatprep.mubr.bf16.mxu1 %v5918_v42  ;;  %2351 = vmatprep.mubr.bf16.mxu0 %v5918_v42 }
 0x925   : > { %2281 = vmatpush1.bf16.msra.mxu1 %v5250_v36  ;;  %2322 = vmatpush1.bf16.msra.mxu0 %v5252_v37 }
 0x926   : > { %2282 = vmatprep.subr.bf16.mxu1 %v5260_v38  ;;  %2323 = vmatprep.subr.bf16.mxu0 %v5265_v55 }
 0x929   : > { %2283 = vmatpush1.bf16.msra.mxu1 %v5262_v39  ;;  %2324 = vmatpush1.bf16.msra.mxu0 %v5268_v52 }
 0x92a   : > { %2284 = vmatprep.subr.bf16.mxu1 %v5271_v61  ;;  %2325 = vmatprep.subr.bf16.mxu0 %v5277_v45 }
 0x92d   : > { %2285 = vmatpush1.bf16.msra.mxu1 %v5274_v44  ;;  %2326 = vmatpush1.bf16.msra.mxu0 %v5280_v59 }
 0x92e   : > { %2286 = vmatprep.subr.bf16.mxu1 %v5283_v13  ;;  %2327 = vmatprep.subr.bf16.mxu0 %v5289_v15 }
 0x931   : > { %2287 = vmatpush1.bf16.msra.mxu1 %v5286_v8  ;;  %2328 = vmatpush1.bf16.msra.mxu0 %v5292_v17 }
 0x932   : > { %2288 = vmatprep.subr.bf16.mxu1 %v5295_v18  ;;  %2329 = vmatprep.subr.bf16.mxu0 %v5301_v21 }
 0x935   : > { %2289 = vmatpush1.bf16.msra.mxu1 %v5298_v20  ;;  %2330 = vmatpush1.bf16.msra.mxu0 %v5304_v23 }
 0x936   : > { %2290 = vmatprep.subr.bf16.mxu1 %v5307_v24  ;;  %2331 = vmatprep.subr.bf16.mxu0 %v5313_v12 }
 0x939   : > { %2291 = vmatpush1.bf16.msra.mxu1 %v5310_v11  ;;  %2332 = vmatpush1.bf16.msra.mxu0 %v5316_v49 }
 0x93a   : > { %2292 = vmatprep.subr.bf16.mxu1 %v5319_v50  ;;  %2333 = vmatprep.subr.bf16.mxu0 %v5325_v43 }
 0x93d   : > { %2293 = vmatpush1.bf16.msra.mxu1 %v5322_v41  ;;  %2334 = vmatpush1.bf16.msra.mxu0 %v5328_v60 }
 0x93e   : > { %2520 = vmatprep.subr.bf16.mxu1 %v5333_v2  ;;  %2561 = vmatprep.subr.bf16.mxu0 %v5335_v3 }
 0x940   : > { %2311 = vmatmul.mubr.bf16.vlgmr.msra.gmra.mrb[48].mxu1 %v5918_v42  ;;  %2352 = vmatmul.mubr.bf16.vlgmr.msra.gmra.mrb[56].mxu0 %v5918_v42 }
 0x941   : > { %2552 = vmatprep.mubr.bf16.mxu1 %v5918_v42  ;;  %2521 = vmatpush1.bf16.msra.mxu1 %v5337_v46 }
 0x942   : > { %2562 = vmatpush1.bf16.msra.mxu0 %v5339_v19  ;;  %2593 = vmatprep.mubr.bf16.mxu0 %v5918_v42 }
 0x943   : > { %2522 = vmatprep.subr.bf16.mxu1 %v5347_v56  ;;  %2563 = vmatprep.subr.bf16.mxu0 %v5349_v22 }
 0x945   : > { %2523 = vmatpush1.bf16.msra.mxu1 %v5352_v48 }
 0x946   : > { %2564 = vmatpush1.bf16.msra.mxu0 %v5354_v51  ;;  %2524 = vmatprep.subr.bf16.mxu1 %v5360_v53 }
 0x947   : > { %2565 = vmatprep.subr.bf16.mxu0 %v5362_v40 }
 0x949   : > { %2525 = vmatpush1.bf16.msra.mxu1 %v5364_v47 }
 0x94a   : > { %2566 = vmatpush1.bf16.msra.mxu0 %v5366_v0  ;;  %2526 = vmatprep.subr.bf16.mxu1 %v5372_v54 }
 0x94b   : > { %2567 = vmatprep.subr.bf16.mxu0 %v5374_v16 }
 0x94d   : > { %2527 = vmatpush1.bf16.msra.mxu1 %v5376_v57 }
 0x94e   : > { %2568 = vmatpush1.bf16.msra.mxu0 %v5378_v58  ;;  %2528 = vmatprep.subr.bf16.mxu1 %v5384_v4  ;;  %v5987_v58 = vld [vmem:[#allocation42_spill] sm:$0xff] }
 0x94f   : > { %2569 = vmatprep.subr.bf16.mxu0 %v5386_v5  ;;  %v5986_v5 = vld [vmem:[#allocation41_spill] sm:$0xff] }
 0x951   : > { %2529 = vmatpush1.bf16.msra.mxu1 %v5388_v6 }
 0x952   : > { %2570 = vmatpush1.bf16.msra.mxu0 %v5390_v7  ;;  %2530 = vmatprep.subr.bf16.mxu1 %v5396_v9  ;;  %v5418_v7 = vld [vmem:[#allocation7 + $0xec] ss:$16 sps:$4 sm:$0xff]   ;;  %v5985_v9 = vld [vmem:[#allocation40_spill] sm:$0xff] }
 0x953   : > { %2571 = vmatprep.subr.bf16.mxu0 %v5398_v10  ;;  %5981 = vst [vmem:[#allocation69_spill] sm:$0xff] %v5418_v7 }
 0x955   : > { %2531 = vmatpush1.bf16.msra.mxu1 %v5400_v14  ;;  %v5423_v14 = vld [vmem:[#allocation7 + $0xe0] ss:$16 sps:$4 sm:$0xff]  }
 0x956   : > { %2572 = vmatpush1.bf16.msra.mxu0 %v5402_v25  ;;  %2532 = vmatprep.subr.bf16.mxu1 %v5408_v26  ;;  %5982 = vst [vmem:[#allocation70_spill] sm:$0xff] %v5423_v14  ;;  %v5427_v25 = vld [vmem:[#allocation7 + $0xe8] ss:$16 sps:$4 sm:$0xff]   ;;  %v5984_v26 = vld [vmem:[#allocation39_spill] sm:$0xff] }
 0x957   : > { %2573 = vmatprep.subr.bf16.mxu0 %v5410_v29  ;;  %5983 = vst [vmem:[#allocation71_spill] sm:$0xff] %v5427_v25 }
 0x959   : > { %2533 = vmatpush1.bf16.msra.mxu1 %v5412_v30 }
 0x95a   : > { %2574 = vmatpush1.bf16.msra.mxu0 %v5414_v31  ;;  %2534 = vmatprep.subr.bf16.mxu1 %v5416_v35 }
 0x95b   : > { %2575 = vmatprep.subr.bf16.mxu0 %v5418_v7 }
 0x95d   : > { %2535 = vmatpush1.bf16.msra.mxu1 %v5423_v14 }
 0x95e   : > { %2576 = vmatpush1.bf16.msra.mxu0 %v5427_v25  ;;  %2654 = vmatprep.subr.bf16.mxu1 %v5221_v62 }
 0x95f   : > { %2695 = vmatprep.subr.bf16.mxu0 %v5223_v28 }
 0x9f3   : > { %v1967_v29 = vpop.f32.mrb[44].mxu1  ;;  %v2008_v30 = vpop.f32.mrb[52].mxu0 }
 0x9f4   : > { %v2015_v10 = vadd.f32 %v1967_v29, %v5984_v26  ;;  %v2017_v31 = vadd.f32 %v2008_v30, %v5985_v9  ;;  %v1969_v6 = vpop.f32.mrb[45].mxu1  ;;  %v2010_v35 = vpop.f32.mrb[53].mxu0 }
 0x9f5   : > { %v2016_v4 = vadd.f32 %v1969_v6, %v5986_v5  ;;  %v2018_v7 = vadd.f32 %v2010_v35, %v5987_v58  ;;  %v1971_v57 = vpop.f32.mrb[46].mxu1  ;;  %v2012_v14 = vpop.f32.mrb[54].mxu0 }
 0x9f6   : > { %v3573_v16 = vmul.f32 -1.442695, %v2015_v10  ;;  %v1972_v25 = vpop.f32.mrb[47].mxu1  ;;  %v2013_v54 = vpop.f32.mrb[55].mxu0  ;;  %v3575_v28 = vmul.f32 -1.442695, %v2017_v31 }
 0x9f7   : > { %v3574_v62 = vmul.f32 -1.442695, %v2016_v4 }
 0x9f8   : > { %4087 = vpow2.f32 %v3573_v16  ;;  %v2047_v16 = vpop.permute.xlu1 %2046 }
 0x9f9   : > { %4089 = vpow2.f32 %v3574_v62  ;;  %vm2048_vm10 = vcmp.eq.s32.totalorder %v2047_v16, 1 }
 0x9fa   : > { %4091 = vtanh.f32 %v2018_v7 }
 0x9fb   : > { %4093 = vpow2.f32 %v3575_v28 }
 0xa02   : > { %v4088_v0 = vpop.eup %4087 }
 0xa03   : > { %v2028_v47 = vadd.f32 1.0, %v4088_v0  ;;  %v4090_v26 = vpop.eup %4089 }
 0xa04   : > { %v2029_v9 = vadd.f32 1.0, %v4090_v26  ;;  %v4092_v5 = vpop.eup %4091 }
 0xa05   : > { %4095 = vrcp.f32 %v2028_v47  ;;  %v4094_v6 = vpop.eup %4093 }
 0xa06   : > { %4097 = vrcp.f32 %v2029_v9  ;;  %v2030_v10 = vadd.f32 1.0, %v4094_v6  ;;  %v5988_v6 = vld [vmem:[#allocation20_spill] sm:$0xff] }
 0xa08   : > { %4099 = vrcp.f32 %v2030_v10 }
 0xa0f   : > { %v4096_v58 = vpop.eup %4095 }
 0xa10   : > { %v2039_v57 = vmul.f32 %v4096_v58, %v4092_v5  ;;  %v4098_v14 = vpop.eup %4097  ;;  %v2115_v5 = vld [vmem:[%s5780_s8] sm:$0xf]  ;;  %v5989_v58 = vsub.s32 0, %v5988_v6 }
 0xa11   : > { %v2038_v54 = vmul.f32 %v4098_v14, %v5233_v27 }
 0xa12   : > { %v4100_v62 = vpop.eup %4099 }
 0xa13   : > { %v2040_v4 = vadd.f32 %v2039_v57, %v2038_v54  ;;  %v2312_v27 = vpop.f32.mrb[48].mxu1  ;;  %v2353_v31 = vpop.f32.mrb[56].mxu0  ;;  %v5479_v57 = vrot.slane %v2115_v5, %v5989_v58  ;;  %v5990_v54 = vsub.s32 1, %v5988_v6 }
 0xa14   : > { %v2355_v35 = vpop.f32.mrb[57].mxu0 }
 0xa15   : > { %4101 = vtanh.f32 %v2040_v4  ;;  %v2357_v26 = vpop.f32.mrb[58].mxu0  ;;  %v5483_v4 = vrot.slane %v2115_v5, %v5990_v54  ;;  %v5991_v54 = vsub.s32 2, %v5988_v6 }
 0xa16   : > { %v2358_v9 = vpop.f32.mrb[59].mxu0 }
 0xa1f   : > { %v4102_v0 = vpop.eup %4101 }
 0xa20   : > { %v2042_v7 = vmul.f32 %v4102_v0, %v4100_v62 }
 0xa22   : > { %v2049_v28 = vsel %vm2048_vm10, %v2042_v7, %v5236_v32  ;;  %v2314_v32 = vpop.f32.mrb[49].mxu1 }
 0xa23   : > { %2050 = vst [vmem:[#allocation3] sm:$0xff] %v2049_v28  ;;  %v2316_v29 = vpop.f32.mrb[50].mxu1 }
 0xa24   : > { %v2317_v30 = vpop.f32.mrb[51].mxu1 }
 0xa2a   : > { %v2116_v47 = vld [vmem:[#allocation3] sm:$0x3] }
 0xa2b   : > { %v2117_v25 = vpack.c.bf16 %v2116_v47, %v2116_v47 }
 0xa2d   : > { %2553 = vmatmul.mubr.bf16.vlgmr.msra.gmra.mrb[52].mxu1 %v2117_v25  ;;  %2594 = vmatmul.mubr.bf16.vlgmr.msra.gmra.mrb[60].mxu0 %v2117_v25 }
 0xa2e   : > { %2655 = vmatpush1.bf16.msra.mxu1 %v5238_v33  ;;  %2696 = vmatpush1.bf16.msra.mxu0 %v5240_v34 }
 0xa2f   : > { %2656 = vmatprep.subr.bf16.mxu1 %v5244_v63  ;;  %2697 = vmatprep.subr.bf16.mxu0 %v5246_v1 }
 0xa30   : > { %2686 = vmatprep.mubr.bf16.mxu1 %v5918_v42  ;;  %2727 = vmatprep.mubr.bf16.mxu0 %v5918_v42 }
 0xa32   : > { %2657 = vmatpush1.bf16.msra.mxu1 %v5250_v36  ;;  %2698 = vmatpush1.bf16.msra.mxu0 %v5252_v37 }
 0xa33   : > { %2658 = vmatprep.subr.bf16.mxu1 %v5260_v38  ;;  %2699 = vmatprep.subr.bf16.mxu0 %v5265_v55 }
 0xa36   : > { %2659 = vmatpush1.bf16.msra.mxu1 %v5262_v39  ;;  %2700 = vmatpush1.bf16.msra.mxu0 %v5268_v52 }
 0xa37   : > { %2660 = vmatprep.subr.bf16.mxu1 %v5271_v61  ;;  %2701 = vmatprep.subr.bf16.mxu0 %v5277_v45 }
 0xa3a   : > { %2661 = vmatpush1.bf16.msra.mxu1 %v5274_v44  ;;  %2702 = vmatpush1.bf16.msra.mxu0 %v5280_v59 }
 0xa3b   : > { %2662 = vmatprep.subr.bf16.mxu1 %v5283_v13  ;;  %2703 = vmatprep.subr.bf16.mxu0 %v5289_v15 }
 0xa3e   : > { %2663 = vmatpush1.bf16.msra.mxu1 %v5286_v8  ;;  %2704 = vmatpush1.bf16.msra.mxu0 %v5292_v17 }
 0xa3f   : > { %2664 = vmatprep.subr.bf16.mxu1 %v5295_v18  ;;  %2705 = vmatprep.subr.bf16.mxu0 %v5301_v21 }
 0xa42   : > { %2665 = vmatpush1.bf16.msra.mxu1 %v5298_v20  ;;  %2706 = vmatpush1.bf16.msra.mxu0 %v5304_v23 }
 0xa43   : > { %2666 = vmatprep.subr.bf16.mxu1 %v5307_v24  ;;  %2707 = vmatprep.subr.bf16.mxu0 %v5313_v12 }
 0xa46   : > { %2667 = vmatpush1.bf16.msra.mxu1 %v5310_v11  ;;  %2708 = vmatpush1.bf16.msra.mxu0 %v5316_v49 }
 0xa47   : > { %2668 = vmatprep.subr.bf16.mxu1 %v5319_v50  ;;  %2709 = vmatprep.subr.bf16.mxu0 %v5325_v43 }
 0xa4a   : > { %2669 = vmatpush1.bf16.msra.mxu1 %v5322_v41  ;;  %2710 = vmatpush1.bf16.msra.mxu0 %v5328_v60  ;;  %v5489_v60 = vrot.slane %v2115_v5, %v5991_v54  ;;  %v5994_v54 = vld [vmem:[#allocation51_spill] sm:$0xff] }
 0xa4b   : > { %2736 = vmatprep.subr.bf16.mxu1 %v5333_v2  ;;  %2777 = vmatprep.subr.bf16.mxu0 %v5335_v3 }
 0xb00   : > { %v2554_v14 = vpop.f32.mrb[52].mxu1  ;;  %v2595_v10 = vpop.f32.mrb[60].mxu0 }
 0xb01   : > { %v2555_v62 = vadd.f32 %v2554_v14, %v2312_v27  ;;  %v2596_v16 = vadd.f32 %v2595_v10, %v2353_v31  ;;  %v2556_v0 = vpop.f32.mrb[53].mxu1  ;;  %v2597_v7 = vpop.f32.mrb[61].mxu0  ;;  %v5992_v27 = vsub.s32 3, %v5988_v6 }
 0xb02   : > { %v2557_v28 = vadd.f32 %v2556_v0, %v2314_v32  ;;  %v2598_v47 = vadd.f32 %v2597_v7, %v2355_v35  ;;  %v2558_v25 = vpop.f32.mrb[54].mxu1  ;;  %v2599_v29 = vpop.f32.mrb[62].mxu0 }
 0xb03   : > { %v2623_v30 = vadd.f32 %v5479_v57, %v2555_v62  ;;  %v2559_v26 = vpop.f32.mrb[55].mxu1  ;;  %v2600_v9 = vpop.f32.mrb[63].mxu0  ;;  %v5493_v32 = vrot.slane %v2115_v5, %v5992_v27  ;;  %v2625_v31 = vadd.f32 %v5489_v60, %v2596_v16  ;;  %v5995_v27 = vld [vmem:[#allocation52_spill] sm:$0xff] }
 0xb04   : > { %v2624_v58 = vadd.f32 %v5483_v4, %v2557_v28 }
 0xb05   : > { %v3640_v3 = vmul.f32 -1.442695, %v2623_v30  ;;  %v2626_v35 = vadd.f32 %v5493_v32, %v2598_v47  ;;  %v3642_v14 = vmul.f32 -1.442695, %v2625_v31  ;;  %v5996_v31 = vld [vmem:[#allocation53_spill] sm:$0xff] }
 0xb06   : > { %v3641_v2 = vmul.f32 -1.442695, %v2624_v58  ;;  %v5993_v58 = vld [vmem:[#allocation50_spill] sm:$0xff] }
 0xb07   : > { %4103 = vpow2.f32 %v3640_v3 }
 0xb08   : > { %4105 = vpow2.f32 %v3641_v2 }
 0xb09   : > { %4107 = vtanh.f32 %v2626_v35  ;;  %v5997_v35 = vld [vmem:[#allocation54_spill] sm:$0xff] }
 0xb0a   : > { %4109 = vpow2.f32 %v3642_v14  ;;  %v5998_v14 = vld [vmem:[#allocation55_spill] sm:$0xff] }
 0xb11   : > { %v4104_v10 = vpop.eup %4103 }
 0xb12   : > { %v2636_v62 = vadd.f32 1.0, %v4104_v10  ;;  %v4106_v0 = vpop.eup %4105  ;;  %v5999_v10 = vld [vmem:[#allocation56_spill] sm:$0xff] }
 0xb13   : > { %v2637_v3 = vadd.f32 1.0, %v4106_v0  ;;  %v4108_v7 = vpop.eup %4107  ;;  %v6001_v0 = vld [vmem:[#allocation58_spill] sm:$0xff] }
 0xb14   : > { %4111 = vrcp.f32 %v2636_v62  ;;  %v4110_v28 = vpop.eup %4109  ;;  %v6000_v62 = vld [vmem:[#allocation57_spill] sm:$0xff] }
 0xb15   : > { %4113 = vrcp.f32 %v2637_v3  ;;  %v2638_v5 = vadd.f32 1.0, %v4110_v28  ;;  %v6002_v3 = vld [vmem:[#allocation59_spill] sm:$0xff]  ;;  %v6004_v28 = vld [vmem:[#allocation61_spill] sm:$0xff] }
 0xb17   : > { %4115 = vrcp.f32 %v2638_v5  ;;  %v6008_v5 = vld [vmem:[#allocation65_spill] sm:$0xff] }
 0xb1e   : > { %v4112_v2 = vpop.eup %4111 }
 0xb1f   : > { %v2647_v25 = vmul.f32 %v4112_v2, %v4108_v7  ;;  %v4114_v6 = vpop.eup %4113  ;;  %v6003_v7 = vld [vmem:[#allocation60_spill] sm:$0xff]  ;;  %v6005_v2 = vld [vmem:[#allocation62_spill] sm:$0xff] }
 0xb20   : > { %v2646_v29 = vmul.f32 0.0, %v4114_v6  ;;  %v6007_v6 = vld [vmem:[#allocation64_spill] sm:$0xff] }
 0xb21   : > { %v4116_v16 = vpop.eup %4115 }
 0xb22   : > { %v5497_v30 = vadd.f32 %v2647_v25, %v2646_v29  ;;  %v6006_v25 = vld [vmem:[#allocation63_spill] sm:$0xff]  ;;  %v6009_v29 = vld [vmem:[#allocation66_spill] sm:$0xff] }
 0xb24   : > { %4117 = vtanh.f32 %v5497_v30 }
 0xb2e   : > { %v4118_v47 = vpop.eup %4117 }
 0xb2f   : > { %v2650_v26 = vmul.f32 %v4118_v47, %v4116_v16  ;;  %v6010_v16 = vld [vmem:[#allocation67_spill] sm:$0xff]  ;;  %v6011_v47 = vld [vmem:[#allocation68_spill] sm:$0xff] }
 0xb31   : > { %v2653_v9 = vpack.c.bf16 %v2650_v26, %v2650_v26  ;;  %v6012_v26 = vld [vmem:[#allocation69_spill] sm:$0xff] }
 0xb33   : > { %2687 = vmatmul.mubr.bf16.vlgmr.msra.gmra.mrb[56].mxu1 %v2653_v9  ;;  %2728 = vmatmul.mubr.bf16.vlgmr.msra.gmra.mrb[64].mxu0 %v2653_v9  ;;  %v2651_v9 = vld [vmem:[#allocation3 + $0x2] sm:$0x3] }
 0xb34   : > { %2737 = vmatpush1.bf16.msra.mxu1 %v5337_v46  ;;  %2778 = vmatpush1.bf16.msra.mxu0 %v5339_v19 }
 0xb35   : > { %2738 = vmatprep.subr.bf16.mxu1 %v5347_v56  ;;  %2779 = vmatprep.subr.bf16.mxu0 %v5349_v22 }
 0xb36   : > { %2768 = vmatprep.mubr.bf16.mxu1 %v5918_v42  ;;  %2809 = vmatprep.mubr.bf16.mxu0 %v5918_v42 }
 0xb38   : > { %2739 = vmatpush1.bf16.msra.mxu1 %v5352_v48  ;;  %2780 = vmatpush1.bf16.msra.mxu0 %v5354_v51 }
 0xb39   : > { %2740 = vmatprep.subr.bf16.mxu1 %v5360_v53  ;;  %2781 = vmatprep.subr.bf16.mxu0 %v5362_v40 }
 0xb3c   : > { %2741 = vmatpush1.bf16.msra.mxu1 %v5993_v58  ;;  %2782 = vmatpush1.bf16.msra.mxu0 %v5994_v54 }
 0xb3d   : > { %2742 = vmatprep.subr.bf16.mxu1 %v5995_v27  ;;  %2783 = vmatprep.subr.bf16.mxu0 %v5996_v31 }
 0xb40   : > { %2743 = vmatpush1.bf16.msra.mxu1 %v5997_v35  ;;  %2784 = vmatpush1.bf16.msra.mxu0 %v5998_v14 }
 0xb41   : > { %2744 = vmatprep.subr.bf16.mxu1 %v5999_v10  ;;  %2785 = vmatprep.subr.bf16.mxu0 %v6000_v62 }
 0xb44   : > { %2745 = vmatpush1.bf16.msra.mxu1 %v6001_v0  ;;  %2786 = vmatpush1.bf16.msra.mxu0 %v6002_v3  ;;  %v6015_v3 = vld [vmem:[#allocation21_spill] sm:$0xff] }
 0xb45   : > { %2746 = vmatprep.subr.bf16.mxu1 %v6003_v7  ;;  %2787 = vmatprep.subr.bf16.mxu0 %v6004_v28  ;;  %v6013_v7 = vld [vmem:[#allocation70_spill] sm:$0xff]  ;;  %v6014_v28 = vld [vmem:[#allocation71_spill] sm:$0xff] }
 0xb48   : > { %2747 = vmatpush1.bf16.msra.mxu1 %v6005_v2  ;;  %2788 = vmatpush1.bf16.msra.mxu0 %v6006_v25  ;;  %v2652_v2 = vpack.c.bf16 %v2651_v9, %v2651_v9  ;;  %v6016_v25 = vld [vmem:[#allocation22_spill] sm:$0xff]  ;;  %v6018_v9 = vld [vmem:[#allocation48_spill] sm:$0xff] }
 0xb49   : > { %2748 = vmatprep.subr.bf16.mxu1 %v6007_v6  ;;  %2789 = vmatprep.subr.bf16.mxu0 %v6008_v5 }
 0xb4c   : > { %2749 = vmatpush1.bf16.msra.mxu1 %v6009_v29  ;;  %2790 = vmatpush1.bf16.msra.mxu0 %v6010_v16 }
 0xb4d   : > { %2750 = vmatprep.subr.bf16.mxu1 %v6011_v47  ;;  %2791 = vmatprep.subr.bf16.mxu0 %v6012_v26 }
 0xb50   : > { %2751 = vmatpush1.bf16.msra.mxu1 %v6013_v7  ;;  %2792 = vmatpush1.bf16.msra.mxu0 %v6014_v28 }
 0xb51   : > { %2849 = vmatprep.subr.bf16.mxu1 %v6015_v3  ;;  %2890 = vmatprep.subr.bf16.mxu0 %v6016_v25 }
 0xb53   : > { %2769 = vmatmul.mubr.bf16.vlgmr.msra.gmra.mrb[60].mxu1 %v2652_v2  ;;  %2810 = vmatmul.mubr.bf16.vlgmr.msra.gmra.mrb[68].mxu0 %v2652_v2  ;;  %v6017_v2 = vld [vmem:[#allocation47_spill] sm:$0xff] }
 0xb54   : > { %2850 = vmatpush1.bf16.msra.mxu1 %v5238_v33  ;;  %2891 = vmatpush1.bf16.msra.mxu0 %v5240_v34 }
 0xb55   : > { %2851 = vmatprep.subr.bf16.mxu1 %v5244_v63  ;;  %2892 = vmatprep.subr.bf16.mxu0 %v5246_v1 }
 0xb56   : > { %2881 = vmatprep.mubr.bf16.mxu1 %v5918_v42  ;;  %2922 = vmatprep.mubr.bf16.mxu0 %v5918_v42 }
 0xb58   : > { %2852 = vmatpush1.bf16.msra.mxu1 %v5250_v36  ;;  %2893 = vmatpush1.bf16.msra.mxu0 %v5252_v37 }
 0xb59   : > { %2853 = vmatprep.subr.bf16.mxu1 %v5260_v38  ;;  %2894 = vmatprep.subr.bf16.mxu0 %v5265_v55 }
 0xb5c   : > { %2854 = vmatpush1.bf16.msra.mxu1 %v5262_v39  ;;  %2895 = vmatpush1.bf16.msra.mxu0 %v5268_v52 }
 0xb5d   : > { %2855 = vmatprep.subr.bf16.mxu1 %v5271_v61  ;;  %2896 = vmatprep.subr.bf16.mxu0 %v5277_v45 }
 0xb60   : > { %2856 = vmatpush1.bf16.msra.mxu1 %v5274_v44  ;;  %2897 = vmatpush1.bf16.msra.mxu0 %v5280_v59 }
 0xb61   : > { %2857 = vmatprep.subr.bf16.mxu1 %v5283_v13  ;;  %2898 = vmatprep.subr.bf16.mxu0 %v5289_v15 }
 0xb64   : > { %2858 = vmatpush1.bf16.msra.mxu1 %v5286_v8  ;;  %2899 = vmatpush1.bf16.msra.mxu0 %v5292_v17 }
 0xb65   : > { %2859 = vmatprep.subr.bf16.mxu1 %v5295_v18  ;;  %2900 = vmatprep.subr.bf16.mxu0 %v5301_v21 }
 0xb68   : > { %2860 = vmatpush1.bf16.msra.mxu1 %v5298_v20  ;;  %2901 = vmatpush1.bf16.msra.mxu0 %v5304_v23  ;;  %v6019_v20 = vld [vmem:[#allocation49_spill] sm:$0xff] }
 0xb69   : > { %2861 = vmatprep.subr.bf16.mxu1 %v5307_v24  ;;  %2902 = vmatprep.subr.bf16.mxu0 %v5313_v12 }
 0xb6c   : > { %2862 = vmatpush1.bf16.msra.mxu1 %v5310_v11  ;;  %2903 = vmatpush1.bf16.msra.mxu0 %v5316_v49 }
 0xb6d   : > { %2863 = vmatprep.subr.bf16.mxu1 %v5319_v50  ;;  %2904 = vmatprep.subr.bf16.mxu0 %v5325_v43 }
 0xb70   : > { %2864 = vmatpush1.bf16.msra.mxu1 %v5322_v41  ;;  %2905 = vmatpush1.bf16.msra.mxu0 %v6017_v2 }
 0xb71   : > { %2931 = vmatprep.subr.bf16.mxu1 %v6018_v9  ;;  %2972 = vmatprep.subr.bf16.mxu0 %v6019_v20 }
 0xc06   : > { %v2688_v23 = vpop.f32.mrb[56].mxu1  ;;  %v2729_v24 = vpop.f32.mrb[64].mxu0 }
 0xc07   : > { %v2690_v21 = vpop.f32.mrb[57].mxu1  ;;  %v2731_v12 = vpop.f32.mrb[65].mxu0 }
 0xc08   : > { %v2692_v18 = vpop.f32.mrb[58].mxu1  ;;  %v2733_v11 = vpop.f32.mrb[66].mxu0 }
 0xc09   : > { %v2693_v17 = vpop.f32.mrb[59].mxu1  ;;  %v2734_v49 = vpop.f32.mrb[67].mxu0 }
 0xc26   : > { %v2770_v8 = vpop.f32.mrb[60].mxu1  ;;  %v2811_v50 = vpop.f32.mrb[68].mxu0 }
 0xc27   : > { %v2771_v15 = vadd.f32 %v2770_v8, %v2688_v23  ;;  %v2812_v43 = vadd.f32 %v2811_v50, %v2729_v24  ;;  %v2772_v13 = vpop.f32.mrb[61].mxu1  ;;  %v2813_v41 = vpop.f32.mrb[69].mxu0 }
 0xc28   : > { %v2773_v59 = vadd.f32 %v2772_v13, %v2690_v21  ;;  %v2814_v2 = vadd.f32 %v2813_v41, %v2731_v12  ;;  %v2774_v44 = vpop.f32.mrb[62].mxu1  ;;  %v2815_v9 = vpop.f32.mrb[70].mxu0 }
 0xc29   : > { %v2818_v20 = vadd.f32 %v2771_v15, %v5479_v57  ;;  %v2775_v45 = vpop.f32.mrb[63].mxu1  ;;  %v2816_v61 = vpop.f32.mrb[71].mxu0  ;;  %v2820_v17 = vadd.f32 %v2812_v43, %v5489_v60  ;;  %v6021_v9 = vld [vmem:[#allocation60_spill] sm:$0xff] }
 0xc2a   : > { %v2819_v52 = vadd.f32 %v2773_v59, %v5483_v4  ;;  %v2821_v8 = vadd.f32 %v2814_v2, %v5493_v32 }
 0xc2b   : > { %v3643_v18 = vmul.f32 -1.442695, %v2818_v20  ;;  %v3645_v23 = vmul.f32 -1.442695, %v2820_v17  ;;  %v6024_v17 = vld [vmem:[#allocation63_spill] sm:$0xff] }
 0xc2c   : > { %v3644_v11 = vmul.f32 -1.442695, %v2819_v52 }
 0xc2d   : > { %4119 = vpow2.f32 %v3643_v18  ;;  %v6022_v18 = vld [vmem:[#allocation61_spill] sm:$0xff] }
 0xc2e   : > { %4121 = vpow2.f32 %v3644_v11  ;;  %v6023_v11 = vld [vmem:[#allocation62_spill] sm:$0xff] }
 0xc2f   : > { %4123 = vtanh.f32 %v2821_v8  ;;  %v2846_v8 = vld [vmem:[#allocation3 + $0x4] sm:$0x3] }
 0xc30   : > { %4125 = vpow2.f32 %v3645_v23  ;;  %v2847_v23 = vpack.c.bf16 %v2846_v8, %v2846_v8 }
 0xc37   : > { %v4120_v24 = vpop.eup %4119 }
 0xc38   : > { %v2831_v13 = vadd.f32 1.0, %v4120_v24  ;;  %v4122_v44 = vpop.eup %4121  ;;  %v6036_v24 = vld [vmem:[#allocation33_spill] sm:$0xff] }
 0xc39   : > { %v2832_v15 = vadd.f32 1.0, %v4122_v44  ;;  %v4124_v61 = vpop.eup %4123  ;;  %v6038_v44 = vld [vmem:[#allocation36_spill] sm:$0xff] }
 0xc3a   : > { %4127 = vrcp.f32 %v2831_v13  ;;  %v4126_v45 = vpop.eup %4125  ;;  %v6037_v13 = vld [vmem:[#allocation35_spill] sm:$0xff] }
 0xc3b   : > { %4129 = vrcp.f32 %v2832_v15  ;;  %v2833_v21 = vadd.f32 1.0, %v4126_v45  ;;  %v6039_v15 = vld [vmem:[#allocation38_spill] sm:$0xff]  ;;  %v6041_v45 = vld [vmem:[#allocation43_spill] sm:$0xff] }
 0xc3d   : > { %4131 = vrcp.f32 %v2833_v21  ;;  %v6045_v21 = vld [vmem:[#allocation47_spill] sm:$0xff] }
 0xc44   : > { %v4128_v59 = vpop.eup %4127 }
 0xc45   : > { %v2842_v20 = vmul.f32 %v4128_v59, %v4124_v61  ;;  %v4130_v52 = vpop.eup %4129  ;;  %v6040_v61 = vld [vmem:[#allocation37_spill] sm:$0xff]  ;;  %v6042_v59 = vld [vmem:[#allocation44_spill] sm:$0xff] }
 0xc46   : > { %v2841_v12 = vmul.f32 %v4130_v52, %v5497_v30  ;;  %v6020_v30 = vld [vmem:[#allocation59_spill] sm:$0xff]  ;;  %v6044_v52 = vld [vmem:[#allocation45_spill] sm:$0xff] }
 0xc47   : > { %v4132_v50 = vpop.eup %4131 }
 0xc48   : > { %v5573_v49 = vadd.f32 %v2842_v20, %v2841_v12  ;;  %v6043_v20 = vld [vmem:[#allocation46_spill] sm:$0xff]  ;;  %v6046_v12 = vld [vmem:[#allocation48_spill] sm:$0xff] }
 0xc4a   : > { %4133 = vtanh.f32 %v5573_v49 }
 0xc54   : > { %v4134_v41 = vpop.eup %4133 }
 0xc55   : > { %v2845_v43 = vmul.f32 %v4134_v41, %v4132_v50  ;;  %v6047_v50 = vld [vmem:[#allocation49_spill] sm:$0xff] }
 0xc57   : > { %v2848_v2 = vpack.c.bf16 %v2845_v43, %v2845_v43 }
 0xc59   : > { %2882 = vmatmul.mubr.bf16.vlgmr.msra.gmra.mrb[64].mxu1 %v2848_v2  ;;  %2923 = vmatmul.mubr.bf16.vlgmr.msra.gmra.mrb[72].mxu0 %v2848_v2 }
 0xc5a   : > { %2932 = vmatpush1.bf16.msra.mxu1 %v5337_v46  ;;  %2973 = vmatpush1.bf16.msra.mxu0 %v5339_v19 }
 0xc5b   : > { %2933 = vmatprep.subr.bf16.mxu1 %v5347_v56  ;;  %2974 = vmatprep.subr.bf16.mxu0 %v5349_v22 }
 0xc5c   : > { %2963 = vmatprep.mubr.bf16.mxu1 %v5918_v42  ;;  %3004 = vmatprep.mubr.bf16.mxu0 %v5918_v42 }
 0xc5e   : > { %2934 = vmatpush1.bf16.msra.mxu1 %v5352_v48  ;;  %2975 = vmatpush1.bf16.msra.mxu0 %v5354_v51 }
 0xc5f   : > { %2935 = vmatprep.subr.bf16.mxu1 %v5360_v53  ;;  %2976 = vmatprep.subr.bf16.mxu0 %v5362_v40 }
 0xc62   : > { %2936 = vmatpush1.bf16.msra.mxu1 %v5993_v58  ;;  %2977 = vmatpush1.bf16.msra.mxu0 %v5994_v54 }
 0xc63   : > { %2937 = vmatprep.subr.bf16.mxu1 %v5995_v27  ;;  %2978 = vmatprep.subr.bf16.mxu0 %v5996_v31 }
 0xc66   : > { %2938 = vmatpush1.bf16.msra.mxu1 %v5997_v35  ;;  %2979 = vmatpush1.bf16.msra.mxu0 %v5998_v14 }
 0xc67   : > { %2939 = vmatprep.subr.bf16.mxu1 %v5999_v10  ;;  %2980 = vmatprep.subr.bf16.mxu0 %v6000_v62 }
 0xc6a   : > { %2940 = vmatpush1.bf16.msra.mxu1 %v6001_v0  ;;  %2981 = vmatpush1.bf16.msra.mxu0 %v6020_v30 }
 0xc6b   : > { %2941 = vmatprep.subr.bf16.mxu1 %v6021_v9  ;;  %2982 = vmatprep.subr.bf16.mxu0 %v6022_v18 }
 0xc6e   : > { %2942 = vmatpush1.bf16.msra.mxu1 %v6023_v11  ;;  %2983 = vmatpush1.bf16.msra.mxu0 %v6024_v17 }
 0xc6f   : > { %2943 = vmatprep.subr.bf16.mxu1 %v6007_v6  ;;  %2984 = vmatprep.subr.bf16.mxu0 %v6008_v5 }
 0xc72   : > { %2944 = vmatpush1.bf16.msra.mxu1 %v6009_v29  ;;  %2985 = vmatpush1.bf16.msra.mxu0 %v6010_v16 }
 0xc73   : > { %2945 = vmatprep.subr.bf16.mxu1 %v6011_v47  ;;  %2986 = vmatprep.subr.bf16.mxu0 %v6012_v26 }
 0xc76   : > { %2946 = vmatpush1.bf16.msra.mxu1 %v6013_v7  ;;  %2987 = vmatpush1.bf16.msra.mxu0 %v6014_v28 }
 0xc77   : > { %3044 = vmatprep.subr.bf16.mxu1 %v6015_v3  ;;  %3085 = vmatprep.subr.bf16.mxu0 %v6016_v25  ;;  %v6029_v3 = vld [vmem:[#allocation27_spill] sm:$0xff]  ;;  %v6030_v25 = vld [vmem:[#allocation28_spill] sm:$0xff] }
 0xc79   : > { %2964 = vmatmul.mubr.bf16.vlgmr.msra.gmra.mrb[68].mxu1 %v2847_v23  ;;  %3005 = vmatmul.mubr.bf16.vlgmr.msra.gmra.mrb[76].mxu0 %v2847_v23 }
 0xc7a   : > { %3045 = vmatpush1.bf16.msra.mxu1 %v5238_v33  ;;  %3086 = vmatpush1.bf16.msra.mxu0 %v5240_v34  ;;  %v6025_v33 = vld [vmem:[#allocation23_spill] sm:$0xff]  ;;  %v6026_v34 = vld [vmem:[#allocation24_spill] sm:$0xff] }
 0xc7b   : > { %3046 = vmatprep.subr.bf16.mxu1 %v5244_v63  ;;  %3087 = vmatprep.subr.bf16.mxu0 %v5246_v1  ;;  %v6027_v63 = vld [vmem:[#allocation26_spill] sm:$0xff]  ;;  %v6028_v1 = vld [vmem:[#allocation25_spill] sm:$0xff] }
 0xc7c   : > { %3076 = vmatprep.mubr.bf16.mxu1 %v5918_v42  ;;  %3117 = vmatprep.mubr.bf16.mxu0 %v5918_v42 }
 0xc7e   : > { %3047 = vmatpush1.bf16.msra.mxu1 %v5250_v36  ;;  %3088 = vmatpush1.bf16.msra.mxu0 %v5252_v37  ;;  %v6031_v36 = vld [vmem:[#allocation30_spill] sm:$0xff]  ;;  %v6032_v37 = vld [vmem:[#allocation29_spill] sm:$0xff] }
 0xc7f   : > { %3048 = vmatprep.subr.bf16.mxu1 %v5260_v38  ;;  %3089 = vmatprep.subr.bf16.mxu0 %v5265_v55  ;;  %v6033_v38 = vld [vmem:[#allocation31_spill] sm:$0xff]  ;;  %v6034_v55 = vld [vmem:[#allocation32_spill] sm:$0xff] }
 0xc82   : > { %3049 = vmatpush1.bf16.msra.mxu1 %v5262_v39  ;;  %3090 = vmatpush1.bf16.msra.mxu0 %v6025_v33  ;;  %v6035_v39 = vld [vmem:[#allocation34_spill] sm:$0xff] }
 0xc83   : > { %3050 = vmatprep.subr.bf16.mxu1 %v6026_v34  ;;  %3091 = vmatprep.subr.bf16.mxu0 %v6027_v63 }
 0xc86   : > { %3051 = vmatpush1.bf16.msra.mxu1 %v6028_v1  ;;  %3092 = vmatpush1.bf16.msra.mxu0 %v6029_v3 }
 0xc87   : > { %3052 = vmatprep.subr.bf16.mxu1 %v6030_v25  ;;  %3093 = vmatprep.subr.bf16.mxu0 %v6031_v36 }
 0xc8a   : > { %3053 = vmatpush1.bf16.msra.mxu1 %v6032_v37  ;;  %3094 = vmatpush1.bf16.msra.mxu0 %v6033_v38 }
 0xc8b   : > { %3054 = vmatprep.subr.bf16.mxu1 %v6034_v55  ;;  %3095 = vmatprep.subr.bf16.mxu0 %v6035_v39 }
 0xc8e   : > { %3055 = vmatpush1.bf16.msra.mxu1 %v6036_v24  ;;  %3096 = vmatpush1.bf16.msra.mxu0 %v6037_v13 }
 0xc8f   : > { %3056 = vmatprep.subr.bf16.mxu1 %v6038_v44  ;;  %3097 = vmatprep.subr.bf16.mxu0 %v6039_v15 }
 0xc92   : > { %3057 = vmatpush1.bf16.msra.mxu1 %v6040_v61  ;;  %3098 = vmatpush1.bf16.msra.mxu0 %v6041_v45 }
 0xc93   : > { %3058 = vmatprep.subr.bf16.mxu1 %v6042_v59  ;;  %3099 = vmatprep.subr.bf16.mxu0 %v6043_v20 }
 0xc96   : > { %3059 = vmatpush1.bf16.msra.mxu1 %v6044_v52  ;;  %3100 = vmatpush1.bf16.msra.mxu0 %v6045_v21 }
 0xc97   : > { %3126 = vmatprep.subr.bf16.mxu1 %v6046_v12  ;;  %3167 = vmatprep.subr.bf16.mxu0 %v6047_v50 }
 0xd2c   : > { %v2883_v41 = vpop.f32.mrb[64].mxu1  ;;  %v2924_v43 = vpop.f32.mrb[72].mxu0 }
 0xd2d   : > { %v2885_v2 = vpop.f32.mrb[65].mxu1  ;;  %v2926_v8 = vpop.f32.mrb[73].mxu0 }
 0xd2e   : > { %v2887_v23 = vpop.f32.mrb[66].mxu1  ;;  %v2928_v33 = vpop.f32.mrb[74].mxu0 }
 0xd2f   : > { %v2888_v34 = vpop.f32.mrb[67].mxu1  ;;  %v2929_v63 = vpop.f32.mrb[75].mxu0 }
 0xd4c   : > { %v2965_v1 = vpop.f32.mrb[68].mxu1  ;;  %v3006_v3 = vpop.f32.mrb[76].mxu0 }
 0xd4d   : > { %v2966_v25 = vadd.f32 %v2965_v1, %v2883_v41  ;;  %v3007_v36 = vadd.f32 %v3006_v3, %v2924_v43  ;;  %v2967_v37 = vpop.f32.mrb[69].mxu1  ;;  %v3008_v38 = vpop.f32.mrb[77].mxu0 }
 0xd4e   : > { %v2968_v55 = vadd.f32 %v2967_v37, %v2885_v2  ;;  %v3009_v39 = vadd.f32 %v3008_v38, %v2926_v8  ;;  %v2969_v24 = vpop.f32.mrb[70].mxu1  ;;  %v3010_v13 = vpop.f32.mrb[78].mxu0 }
 0xd4f   : > { %v3013_v44 = vadd.f32 %v2966_v25, %v5479_v57  ;;  %v2970_v15 = vpop.f32.mrb[71].mxu1  ;;  %v3011_v61 = vpop.f32.mrb[79].mxu0  ;;  %v3015_v52 = vadd.f32 %v3007_v36, %v5489_v60 }
 0xd50   : > { %v3014_v45 = vadd.f32 %v2968_v55, %v5483_v4  ;;  %v3016_v21 = vadd.f32 %v3009_v39, %v5493_v32 }
 0xd51   : > { %v3646_v59 = vmul.f32 -1.442695, %v3013_v44  ;;  %v3648_v12 = vmul.f32 -1.442695, %v3015_v52 }
 0xd52   : > { %v3647_v20 = vmul.f32 -1.442695, %v3014_v45 }
 0xd53   : > { %4135 = vpow2.f32 %v3646_v59 }
 0xd54   : > { %4137 = vpow2.f32 %v3647_v20 }
 0xd55   : > { %4139 = vtanh.f32 %v3016_v21 }
 0xd56   : > { %4141 = vpow2.f32 %v3648_v12 }
 0xd5d   : > { %v4136_v50 = vpop.eup %4135 }
 0xd5e   : > { %v3026_v41 = vadd.f32 1.0, %v4136_v50  ;;  %v4138_v43 = vpop.eup %4137 }
 0xd5f   : > { %v3027_v2 = vadd.f32 1.0, %v4138_v43  ;;  %v4140_v8 = vpop.eup %4139 }
 0xd60   : > { %4143 = vrcp.f32 %v3026_v41  ;;  %v4142_v23 = vpop.eup %4141 }
 0xd61   : > { %4145 = vrcp.f32 %v3027_v2  ;;  %v3028_v1 = vadd.f32 1.0, %v4142_v23 }
 0xd63   : > { %4147 = vrcp.f32 %v3028_v1 }
 0xd6a   : > { %v4144_v33 = vpop.eup %4143 }
 0xd6b   : > { %v3037_v34 = vmul.f32 %v4144_v33, %v4140_v8  ;;  %v4146_v63 = vpop.eup %4145 }
 0xd6c   : > { %v3036_v3 = vmul.f32 %v4146_v63, %v5573_v49 }
 0xd6d   : > { %v4148_v36 = vpop.eup %4147 }
 0xd6e   : > { %v5649_v25 = vadd.f32 %v3037_v34, %v3036_v3  ;;  %v3652_v34 = vld [vmem:[%s5782_s10] ss:$0 sm:$0xff] }
 0xd70   : > { %4149 = vtanh.f32 %v5649_v25 }
 0xd7a   : > { %v4150_v37 = vpop.eup %4149 }
 0xd7b   : > { %v3040_v38 = vmul.f32 %v4150_v37, %v4148_v36 }
 0xd7d   : > { %v3043_v55 = vpack.c.bf16 %v3040_v38, %v3040_v38 }
 0xd7f   : > { %3077 = vmatmul.mubr.bf16.vlgmr.msra.gmra.mrb[72].mxu1 %v3043_v55  ;;  %3118 = vmatmul.mubr.bf16.vlgmr.msra.gmra.mrb[80].mxu0 %v3043_v55 }
 0xd80   : > { %3127 = vmatpush1.bf16.msra.mxu1 %v5337_v46  ;;  %3168 = vmatpush1.bf16.msra.mxu0 %v5339_v19  ;;  %v6048_v19 = vmov 0.0  }
 0xd81   : > { %3128 = vmatprep.subr.bf16.mxu1 %v5347_v56  ;;  %3169 = vmatprep.subr.bf16.mxu0 %v5349_v22  ;;  %v3951_v56 = vld [vmem:[%s5781_s9] sm:$0xff]   ;;  %v3952_v22 = vld [vmem:[%s5781_s9 + $0x8] sm:$0xff]  }
 0xd82   : > { %3158 = vmatprep.mubr.bf16.mxu1 %v5918_v42  ;;  %3199 = vmatprep.mubr.bf16.mxu0 %v5918_v42  ;;  %v3041_v42 = vld [vmem:[#allocation3 + $0x6] sm:$0x3] }
 0xd83   : > { %v3042_v46 = vpack.c.bf16 %v3041_v42, %v3041_v42 }
 0xd84   : > { %3129 = vmatpush1.bf16.msra.mxu1 %v5352_v48  ;;  %3170 = vmatpush1.bf16.msra.mxu0 %v5354_v51  ;;  %v3953_v48 = vld [vmem:[%s5781_s9 + $0x10] sm:$0xff]   ;;  %v3954_v51 = vld [vmem:[%s5781_s9 + $0x18] sm:$0xff]  }
 0xd85   : > { %3130 = vmatprep.subr.bf16.mxu1 %v5360_v53  ;;  %3171 = vmatprep.subr.bf16.mxu0 %v5362_v40  ;;  %v3955_v53 = vld [vmem:[%s5781_s9 + $0x20] sm:$0xff]   ;;  %v3956_v40 = vld [vmem:[%s5781_s9 + $0x28] sm:$0xff]  }
 0xd88   : > { %3131 = vmatpush1.bf16.msra.mxu1 %v5993_v58  ;;  %3172 = vmatpush1.bf16.msra.mxu0 %v5994_v54  ;;  %v3957_v58 = vld [vmem:[%s5781_s9 + $0x30] sm:$0xff]   ;;  %v3958_v54 = vld [vmem:[%s5781_s9 + $0x38] sm:$0xff]  }
 0xd89   : > { %3132 = vmatprep.subr.bf16.mxu1 %v5995_v27  ;;  %3173 = vmatprep.subr.bf16.mxu0 %v5996_v31 }
 0xd8c   : > { %3133 = vmatpush1.bf16.msra.mxu1 %v5997_v35  ;;  %3174 = vmatpush1.bf16.msra.mxu0 %v5998_v14 }
 0xd8d   : > { %3134 = vmatprep.subr.bf16.mxu1 %v5999_v10  ;;  %3175 = vmatprep.subr.bf16.mxu0 %v6000_v62 }
 0xd90   : > { %3135 = vmatpush1.bf16.msra.mxu1 %v6001_v0  ;;  %3176 = vmatpush1.bf16.msra.mxu0 %v6020_v30 }
 0xd91   : > { %3136 = vmatprep.subr.bf16.mxu1 %v6021_v9  ;;  %3177 = vmatprep.subr.bf16.mxu0 %v6022_v18 }
 0xd94   : > { %3137 = vmatpush1.bf16.msra.mxu1 %v6023_v11  ;;  %3178 = vmatpush1.bf16.msra.mxu0 %v6024_v17 }
 0xd95   : > { %3138 = vmatprep.subr.bf16.mxu1 %v6007_v6  ;;  %3179 = vmatprep.subr.bf16.mxu0 %v6008_v5 }
 0xd98   : > { %3139 = vmatpush1.bf16.msra.mxu1 %v6009_v29  ;;  %3180 = vmatpush1.bf16.msra.mxu0 %v6010_v16 }
 0xd99   : > { %3140 = vmatprep.subr.bf16.mxu1 %v6011_v47  ;;  %3181 = vmatprep.subr.bf16.mxu0 %v6012_v26 }
 0xd9c   : > { %3141 = vmatpush1.bf16.msra.mxu1 %v6013_v7  ;;  %3182 = vmatpush1.bf16.msra.mxu0 %v6014_v28 }
 0xd9d   : > { %3700 = vmatprep.subr.bf16.mxu1 %v6048_v19 }
 0xd9f   : > { %3159 = vmatmul.mubr.bf16.vlgmr.msra.gmra.mrb[76].mxu1 %v3042_v46  ;;  %3200 = vmatmul.mubr.bf16.vlgmr.msra.gmra.mrb[84].mxu0 %v3042_v46 }
 0xda0   : > { %3701 = vmatpush3.bf16.msra.mxu1 %v3951_v56  ;;  %3716 = vmatprep.mubr.msk.bf16.mxu1 %vm4368_vm11, %v6048_v19 }
 0xda1   : > { %3702 = vmatprep.subr.bf16.mxu1 %v6048_v19 }
 0xda4   : > { %3703 = vmatpush3.bf16.msra.mxu1 %v3952_v22 }
 0xda5   : > { %3704 = vmatprep.subr.bf16.mxu1 %v6048_v19 }
 0xda8   : > { %3705 = vmatpush3.bf16.msra.mxu1 %v3953_v48 }
 0xda9   : > { %3706 = vmatprep.subr.bf16.mxu1 %v6048_v19 }
 0xdac   : > { %3707 = vmatpush3.bf16.msra.mxu1 %v3954_v51 }
 0xdad   : > { %3708 = vmatprep.subr.bf16.mxu1 %v6048_v19 }
 0xdb0   : > { %3709 = vmatpush3.bf16.msra.mxu1 %v3955_v53 }
 0xdb1   : > { %3710 = vmatprep.subr.bf16.mxu1 %v6048_v19 }
 0xdb4   : > { %3711 = vmatpush3.bf16.msra.mxu1 %v3956_v40 }
 0xdb5   : > { %3712 = vmatprep.subr.bf16.mxu1 %v6048_v19 }
 0xdb8   : > { %3713 = vmatpush3.bf16.msra.mxu1 %v3957_v58 }
 0xdb9   : > { %3714 = vmatprep.subr.bf16.mxu1 %v6048_v19 }
 0xdbc   : > { %3715 = vmatpush3.bf16.msra.mxu1 %v3958_v54 }
 0xe52   : > { %v3078_v27 = vpop.f32.mrb[72].mxu1  ;;  %v3119_v31 = vpop.f32.mrb[80].mxu0 }
 0xe53   : > { %v3080_v35 = vpop.f32.mrb[73].mxu1  ;;  %v3121_v14 = vpop.f32.mrb[81].mxu0 }
 0xe54   : > { %v3082_v10 = vpop.f32.mrb[74].mxu1  ;;  %v3123_v62 = vpop.f32.mrb[82].mxu0 }
 0xe55   : > { %v3083_v0 = vpop.f32.mrb[75].mxu1  ;;  %v3124_v7 = vpop.f32.mrb[83].mxu0 }
 0xe72   : > { %v3160_v28 = vpop.f32.mrb[76].mxu1  ;;  %v3201_v6 = vpop.f32.mrb[84].mxu0 }
 0xe73   : > { %v3161_v5 = vadd.f32 %v3160_v28, %v3078_v27  ;;  %v3202_v29 = vadd.f32 %v3201_v6, %v3119_v31  ;;  %v3162_v16 = vpop.f32.mrb[77].mxu1  ;;  %v3203_v47 = vpop.f32.mrb[85].mxu0 }
 0xe74   : > { %v3163_v26 = vadd.f32 %v3162_v16, %v3080_v35  ;;  %v3204_v49 = vadd.f32 %v3203_v47, %v3121_v14  ;;  %v3164_v30 = vpop.f32.mrb[78].mxu1  ;;  %v3205_v9 = vpop.f32.mrb[86].mxu0 }
 0xe75   : > { %v3208_v18 = vadd.f32 %v3161_v5, %v5479_v57  ;;  %v3165_v11 = vpop.f32.mrb[79].mxu1  ;;  %v3206_v17 = vpop.f32.mrb[87].mxu0  ;;  %v3210_v44 = vadd.f32 %v3202_v29, %v5489_v60 }
 0xe76   : > { %v3209_v39 = vadd.f32 %v3163_v26, %v5483_v4  ;;  %v3211_v15 = vadd.f32 %v3204_v49, %v5493_v32 }
 0xe77   : > { %v3649_v24 = vmul.f32 -1.442695, %v3208_v18  ;;  %v3651_v61 = vmul.f32 -1.442695, %v3210_v44 }
 0xe78   : > { %v3650_v13 = vmul.f32 -1.442695, %v3209_v39 }
 0xe79   : > { %4151 = vpow2.f32 %v3649_v24 }
 0xe7a   : > { %4153 = vpow2.f32 %v3650_v13 }
 0xe7b   : > { %4155 = vtanh.f32 %v3211_v15 }
 0xe7c   : > { %4157 = vpow2.f32 %v3651_v61 }
 0xe83   : > { %v4152_v45 = vpop.eup %4151 }
 0xe84   : > { %v3221_v59 = vadd.f32 1.0, %v4152_v45  ;;  %v4154_v20 = vpop.eup %4153 }
 0xe85   : > { %v3222_v57 = vadd.f32 1.0, %v4154_v20  ;;  %v4156_v52 = vpop.eup %4155 }
 0xe86   : > { %4159 = vrcp.f32 %v3221_v59  ;;  %v4158_v21 = vpop.eup %4157 }
 0xe87   : > { %4161 = vrcp.f32 %v3222_v57  ;;  %v3223_v41 = vadd.f32 1.0, %v4158_v21 }
 0xe89   : > { %4163 = vrcp.f32 %v3223_v41 }
 0xe90   : > { %v4160_v4 = vpop.eup %4159 }
 0xe91   : > { %v3232_v12 = vmul.f32 %v4160_v4, %v4156_v52  ;;  %v4162_v50 = vpop.eup %4161 }
 0xe92   : > { %v3231_v43 = vmul.f32 %v4162_v50, %v5649_v25 }
 0xe93   : > { %v4164_v32 = vpop.eup %4163 }
 0xe94   : > { %v3233_v60 = vadd.f32 %v3232_v12, %v3231_v43 }
 0xe96   : > { %4165 = vtanh.f32 %v3233_v60 }
 0xea0   : > { %v4166_v2 = vpop.eup %4165 }
 0xea1   : > { %v3235_v8 = vmul.f32 %v4166_v2, %v4164_v32 }
 0xea3   : > { %4167 = vtanh.f32 %v3235_v8 }
 0xead   : > { %v4168_v23 = vpop.eup %4167 }
 0xeae   : > { %v3237_v33 = vpack.c.bf16 %v4168_v23, %v4168_v23 }
 0xeb0   : > { %3717 = vmatmul.mubr.bf16.vlgmr.msra.gmra.mrb[80].mxu1 %v3237_v33 }
 0xf83   : > { %v3343_v63 = vpop.f32.mrb[80].mxu1 }
 0xf84   : > { %v3344_v1 = vadd.f32 %v3652_v34, %v3343_v63  ;;  %v3718_v3 = vpop.f32.mrb[81].mxu1 }
 0xf85   : > { %v3346_v25 = vpop.f32.mrb[82].mxu1 }
 0xf86   : > { %v3661_v36 = vmul.f32 -1.442695, %v3344_v1  ;;  %v3719_v37 = vpop.f32.mrb[83].mxu1 }
 0xf88   : > { %4169 = vpow2.f32 %v3661_v36 }
 0xf92   : > { %v4170_v38 = vpop.eup %4169 }
 0xf93   : > { %v3352_v55 = vadd.f32 1.0, %v4170_v38 }
 0xf95   : > { %4171 = vrcp.f32 %v3352_v55 }
 0xf9f   : > { %v4172_v42 = vpop.eup %4171 }
 0xfa0   : > { %3355 = vst [vmem:[%s436_s11] sm:$0x3] %v4172_v42 }
 0xfa1   : > { %4302 = shalt.err (!%p4299_p9)
}
 0xfa2   : > { %s4303_s25 = scalar_lea.hbm %s5730_s24, 32  ;;  %s4307_s16 = scalar_lea.hbm %s6049_s22, 64 }
 0xfa3   : > { %p4304_p2 = scmp.ne.s32.totalorder %s5730_s24, %s4303_s25  ;;  %p4308_p5 = scmp.lt.u32.totalorder %s5730_s24, %s6049_s22 }
 0xfa4   : > { %p4309_p10 = scmp.lt.u32.totalorder %s4307_s16, %s4303_s25  ;;  %p4311_p12 = scmp.lt.u32.totalorder %s4303_s25, %s5730_s24 }
 0xfa5   : > { %p4305_p0 = pnand %p4304_p2, %p6050_p7 }
 0xfa6   : > { %p4310_p4 = por %p4309_p10, %p4308_p5 }
 0xfa7   : > { %p4306_p3 = pneg %p4305_p0 }
 0xfa8   : > { %p4312_p8 = por %p4311_p12, %p4310_p4 }
 0xfaa   : > { %p4313_p11 = pnand %p4312_p8, %p4306_p3 }
 0xfac   : > { %4316 = shalt.err (!%p4313_p11)
}
 0xfad   : > { %3732 = dma.vmem_to_hbm [thread:$0]  (%p6050_p7), %s5732_s23, 32, %s5730_s24, %s3357_s26  }
 0xfae PF: > { %s6051_s15 = sld [smem:[#allocation16_spill]]  ;;  %s6052_s11 = sld [smem:[#allocation14_spill]] }
 0xfaf   : > { %s6053_s29 = sld [smem:[#allocation19_spill]] }
 0xfb4   : > { %p3754_p13 = scmp.ge.s32.totalorder %s6051_s15, 2  ;;  %s3382_s13 = sand.u32 1, %s6052_s11  }
 0xfb5   : > { %p6054_p1 = scmp.ne.s32.totalorder %s6053_s29, 0  ;;  %s3383_s17 = scalar_lea.sflag [#allocation6], %s3382_s13 }
 0xfb7   : > { %p3745_p6 = pnand %p3754_p13, %p6054_p1 }
 0xfb9   : > { %4342 = dma.done.wait (!%p3745_p6), %s3383_s17, 32  }
 0xfba   : > { %4344 = vsyncadd (!%p3745_p6), %s3383_s17, 4294967264  ;;  %s6055_s20 = sld [smem:[#allocation17_spill]]  ;;  %s6056_s21 = sld [smem:[#allocation15_spill]] }
 0xfbb   : > { %s6057_s19 = sld [smem:[#allocation18_spill]]  ;;  %s6058_s17 = smov %s4351_s18 }
 0xfc0   : > { %p23_p9 = scmp.ge.s32.totalorder %s6055_s20, 4   ;;  %s6059_s18 = smov %s6056_s21 }
 0xfc2   :  { %25 = sbr.rel (!%p23_p9) target bundleno = 7 (0x7), region = 122 }
 0xfc9   :  { %3388 = vsyncpa [#allocation5], 1 }
 0xfca   :  { %3390 = vsyncpa [#allocation5 + $0x1], 1 }
 0xfcb   :  { %3391 = vsyncpa [#allocation8], 1 }
 0xfcc   :  { %3392 = vsyncpa [#allocation6], 1 }
 0xfcd   :  { %3394 = vsyncpa [#allocation6 + $0x1], 1 }

</bundles_post_ra>
